<compile_context>
chip_gen: v7x
topology: tpu7x:2x2x1
jax: 0.10.0
libtpu: 0.0.40
codegen_flags: <defaults>
</compile_context>

<pallas_src>
import jax
import jax.numpy as jnp
from jax import lax
from jax.experimental import pallas as pl
from jax.experimental.pallas import tpu as pltpu


def _make_cat_bn_kernel(channel_sizes, n_reduce, eps):
    n_in = len(channel_sizes)
    inv_n = 1.0 / float(n_reduce)

    def _reduce_bs(v):
        # reduce over batch (axis 0) and spatial/lane (axis 2) -> (1, c, 1)
        return jnp.sum(jnp.sum(v, axis=2, keepdims=True), axis=0, keepdims=True)

    def kernel(*refs):
        x_refs = refs[:n_in]
        w_ref = refs[n_in]        # (C_total, 1) f32
        b_ref = refs[n_in + 1]    # (C_total, 1) f32
        o_ref = refs[n_in + 2]    # (N, C_total, H*W)

        off = 0
        for x_ref, c in zip(x_refs, channel_sizes):
            x = x_ref[...].astype(jnp.float32)            # (N, c, HW)
            # One pass over the data: sum and sum-of-squares per channel.
            s = _reduce_bs(x)                             # (1, c, 1)
            ss = _reduce_bs(x * x)                        # (1, c, 1)
            mean = s * inv_n
            var = jnp.maximum(ss * inv_n - mean * mean, 0.0)
            inv = lax.rsqrt(var + eps)
            # Static, sublane-aligned slices of the affine params.
            w = w_ref[off:off + c, :]                     # (c, 1)
            b = b_ref[off:off + c, :]                     # (c, 1)
            scale = inv * w                               # (1, c, 1)
            shift = b - mean * scale                      # (1, c, 1)
            o_ref[:, off:off + c, :] = (x * scale + shift).astype(o_ref.dtype)
            off += c

    return kernel


def cat_batchnorm(xs_nchw, weight, bias, eps=1e-5):
    """torch.cat(dim=1) followed by training-mode BatchNorm2d (batch stats)."""
    N, _, H, W = xs_nchw[0].shape
    HW = H * W
    channel_sizes = [int(x.shape[1]) for x in xs_nchw]
    C = sum(channel_sizes)

    # NCHW -> (N, C_i, H*W): pure reshape, keeps native channel-major layout.
    xs = [x.reshape(N, x.shape[1], HW) for x in xs_nchw]
    w2 = weight.reshape(C, 1).astype(jnp.float32)
    b2 = bias.reshape(C, 1).astype(jnp.float32)

    kernel = _make_cat_bn_kernel(channel_sizes, N * HW, eps)

    in_specs = [pl.BlockSpec((N, c, HW), lambda i: (0, 0, 0))
                for c in channel_sizes]
    in_specs += [pl.BlockSpec((C, 1), lambda i: (0, 0)),
                 pl.BlockSpec((C, 1), lambda i: (0, 0))]

    out = pl.pallas_call(
        kernel,
        grid=(1,),
        in_specs=in_specs,
        out_specs=pl.BlockSpec((N, C, HW), lambda i: (0, 0, 0)),
        out_shape=jax.ShapeDtypeStruct((N, C, HW), xs_nchw[0].dtype),
        compiler_params=pltpu.CompilerParams(
            dimension_semantics=("arbitrary",)),
    )(*xs, w2, b2)

    # (N, C, H*W) -> NCHW: again a pure reshape, no transpose.
    return out.reshape(N, C, H, W)


if __name__ == "__main__":
    key = jax.random.PRNGKey(0)
    k1, k2, k3, k4, kw, kb = jax.random.split(key, 6)

    # Shapes taken directly from the module (1 x 1200 x 7 x 7 total).
    x397 = jax.random.normal(k1, (1, 1056, 7, 7), jnp.float32)
    x404 = jax.random.normal(k2, (1, 48, 7, 7), jnp.float32)
    x411 = jax.random.normal(k3, (1, 48, 7, 7), jnp.float32)
    x418 = jax.random.normal(k4, (1, 48, 7, 7), jnp.float32)

    # BatchNorm2d(1200) affine parameters, deterministic and non-trivial.
    weight = 1.0 + 0.1 * jax.random.normal(kw, (1200,), jnp.float32)
    bias = 0.1 * jax.random.normal(kb, (1200,), jnp.float32)

    fn = jax.jit(cat_batchnorm)
    out = fn([x397, x404, x411, x418], weight, bias)
    out = jax.block_until_ready(out)

    # Pure-JAX reference (concat + training-mode batchnorm, two-pass stats).
    xcat = jnp.concatenate([x397, x404, x411, x418], axis=1)
    mean = jnp.mean(xcat, axis=(0, 2, 3), keepdims=True)
    var = jnp.mean((xcat - mean) ** 2, axis=(0, 2, 3), keepdims=True)
    ref = ((xcat - mean) * jax.lax.rsqrt(var + 1e-5)
           * weight.reshape(1, -1, 1, 1) + bias.reshape(1, -1, 1, 1))

    assert out.shape == (1, 1200, 7, 7), out.shape
    assert jnp.allclose(out, ref, atol=1e-4, rtol=1e-4)
    print("KERNEL_OK")
</pallas_src>

<mosaic_0001>
module attributes {stable_mosaic.version = 11 : i64} {
  func.func @kernel(%arg0: i32, %arg1: memref<1x1056x49xf32, #tpu.memory_space<vmem>>, %arg2: memref<1x48x49xf32, #tpu.memory_space<vmem>>, %arg3: memref<1x48x49xf32, #tpu.memory_space<vmem>>, %arg4: memref<1x48x49xf32, #tpu.memory_space<vmem>>, %arg5: memref<1200x1xf32, #tpu.memory_space<vmem>>, %arg6: memref<1200x1xf32, #tpu.memory_space<vmem>>, %arg7: memref<1x1200x49xf32, #tpu.memory_space<vmem>>) attributes {dimension_semantics = [#tpu.dimension_semantics<arbitrary>], iteration_bounds = array<i64: 1>, scalar_prefetch = 0 : i64, scratch_operands = 0 : i64, tpu.core_type = #tpu.core_type<tc>, window_params = [{pipeline_mode = #tpu.pipeline_mode<synchronous>, transform_indices = @transform_0, window_bounds = array<i64: 1, 1056, 49>}, {pipeline_mode = #tpu.pipeline_mode<synchronous>, transform_indices = @transform_1, window_bounds = array<i64: 1, 48, 49>}, {pipeline_mode = #tpu.pipeline_mode<synchronous>, transform_indices = @transform_2, window_bounds = array<i64: 1, 48, 49>}, {pipeline_mode = #tpu.pipeline_mode<synchronous>, transform_indices = @transform_3, window_bounds = array<i64: 1, 48, 49>}, {pipeline_mode = #tpu.pipeline_mode<synchronous>, transform_indices = @transform_4, window_bounds = array<i64: 1200, 1>}, {pipeline_mode = #tpu.pipeline_mode<synchronous>, transform_indices = @transform_5, window_bounds = array<i64: 1200, 1>}, {pipeline_mode = #tpu.pipeline_mode<synchronous>, transform_indices = @transform_6, window_bounds = array<i64: 1, 1200, 49>}]} {
    %c0 = arith.constant 0 : index
    %c0_0 = arith.constant 0 : index
    %c0_1 = arith.constant 0 : index
    %0 = vector.load %arg1[%c0, %c0_0, %c0_1] : memref<1x1056x49xf32, #tpu.memory_space<vmem>>, vector<1x1056x49xf32>
    %cst = arith.constant dense<0.000000e+00> : vector<1x1056xf32>
    %1 = vector.multi_reduction <add>, %0, %cst [2] : vector<1x1056x49xf32> to vector<1x1056xf32>
    %2 = vector.shape_cast %1 : vector<1x1056xf32> to vector<1x1056x1xf32>
    %cst_2 = arith.constant dense<0.000000e+00> : vector<1056x1xf32>
    %3 = vector.multi_reduction <add>, %2, %cst_2 [0] : vector<1x1056x1xf32> to vector<1056x1xf32>
    %4 = vector.shape_cast %3 : vector<1056x1xf32> to vector<1x1056x1xf32>
    %5 = arith.mulf %0, %0 : vector<1x1056x49xf32>
    %cst_3 = arith.constant dense<0.000000e+00> : vector<1x1056xf32>
    %6 = vector.multi_reduction <add>, %5, %cst_3 [2] : vector<1x1056x49xf32> to vector<1x1056xf32>
    %7 = vector.shape_cast %6 : vector<1x1056xf32> to vector<1x1056x1xf32>
    %cst_4 = arith.constant dense<0.000000e+00> : vector<1056x1xf32>
    %8 = vector.multi_reduction <add>, %7, %cst_4 [0] : vector<1x1056x1xf32> to vector<1056x1xf32>
    %9 = vector.shape_cast %8 : vector<1056x1xf32> to vector<1x1056x1xf32>
    %cst_5 = arith.constant 0.0204081628 : f32
    %10 = vector.broadcast %cst_5 : f32 to vector<1x1056x1xf32>
    %11 = arith.mulf %4, %10 : vector<1x1056x1xf32>
    %cst_6 = arith.constant 0.0204081628 : f32
    %12 = vector.broadcast %cst_6 : f32 to vector<1x1056x1xf32>
    %13 = arith.mulf %9, %12 : vector<1x1056x1xf32>
    %14 = arith.mulf %11, %11 : vector<1x1056x1xf32>
    %15 = arith.subf %13, %14 : vector<1x1056x1xf32>
    %cst_7 = arith.constant 0.000000e+00 : f32
    %16 = vector.broadcast %cst_7 : f32 to vector<1x1056x1xf32>
    %17 = arith.maximumf %15, %16 : vector<1x1056x1xf32>
    %cst_8 = arith.constant 9.99999974E-6 : f32
    %18 = vector.broadcast %cst_8 : f32 to vector<1x1056x1xf32>
    %19 = arith.addf %17, %18 : vector<1x1056x1xf32>
    %20 = math.rsqrt %19 : vector<1x1056x1xf32>
    %c0_9 = arith.constant 0 : index
    %c0_10 = arith.constant 0 : index
    %21 = vector.load %arg5[%c0_9, %c0_10] : memref<1200x1xf32, #tpu.memory_space<vmem>>, vector<1056x1xf32>
    %c0_11 = arith.constant 0 : index
    %c0_12 = arith.constant 0 : index
    %22 = vector.load %arg6[%c0_11, %c0_12] : memref<1200x1xf32, #tpu.memory_space<vmem>>, vector<1056x1xf32>
    %23 = vector.shape_cast %21 : vector<1056x1xf32> to vector<1x1056x1xf32>
    %24 = arith.mulf %20, %23 : vector<1x1056x1xf32>
    %25 = arith.mulf %11, %24 : vector<1x1056x1xf32>
    %26 = vector.shape_cast %22 : vector<1056x1xf32> to vector<1x1056x1xf32>
    %27 = arith.subf %26, %25 : vector<1x1056x1xf32>
    %28 = vector.broadcast %24 : vector<1x1056x1xf32> to vector<1x1056x49xf32>
    %29 = arith.mulf %0, %28 : vector<1x1056x49xf32>
    %30 = vector.broadcast %27 : vector<1x1056x1xf32> to vector<1x1056x49xf32>
    %31 = arith.addf %29, %30 : vector<1x1056x49xf32>
    %c0_13 = arith.constant 0 : index
    %c0_14 = arith.constant 0 : index
    %c0_15 = arith.constant 0 : index
    %32 = vector.load %arg7[%c0_13, %c0_14, %c0_15] : memref<1x1200x49xf32, #tpu.memory_space<vmem>>, vector<1x1056x49xf32>
    tpu.vector_store %arg7[%c0_13, %c0_14, %c0_15], %31 {strides = array<i32>} : memref<1x1200x49xf32, #tpu.memory_space<vmem>>, vector<1x1056x49xf32>,
    %c0_16 = arith.constant 0 : index
    %c0_17 = arith.constant 0 : index
    %c0_18 = arith.constant 0 : index
    %33 = vector.load %arg2[%c0_16, %c0_17, %c0_18] : memref<1x48x49xf32, #tpu.memory_space<vmem>>, vector<1x48x49xf32>
    %cst_19 = arith.constant dense<0.000000e+00> : vector<1x48xf32>
    %34 = vector.multi_reduction <add>, %33, %cst_19 [2] : vector<1x48x49xf32> to vector<1x48xf32>
    %35 = vector.shape_cast %34 : vector<1x48xf32> to vector<1x48x1xf32>
    %cst_20 = arith.constant dense<0.000000e+00> : vector<48x1xf32>
    %36 = vector.multi_reduction <add>, %35, %cst_20 [0] : vector<1x48x1xf32> to vector<48x1xf32>
    %37 = vector.shape_cast %36 : vector<48x1xf32> to vector<1x48x1xf32>
    %38 = arith.mulf %33, %33 : vector<1x48x49xf32>
    %cst_21 = arith.constant dense<0.000000e+00> : vector<1x48xf32>
    %39 = vector.multi_reduction <add>, %38, %cst_21 [2] : vector<1x48x49xf32> to vector<1x48xf32>
    %40 = vector.shape_cast %39 : vector<1x48xf32> to vector<1x48x1xf32>
    %cst_22 = arith.constant dense<0.000000e+00> : vector<48x1xf32>
    %41 = vector.multi_reduction <add>, %40, %cst_22 [0] : vector<1x48x1xf32> to vector<48x1xf32>
    %42 = vector.shape_cast %41 : vector<48x1xf32> to vector<1x48x1xf32>
    %cst_23 = arith.constant 0.0204081628 : f32
    %43 = vector.broadcast %cst_23 : f32 to vector<1x48x1xf32>
    %44 = arith.mulf %37, %43 : vector<1x48x1xf32>
    %cst_24 = arith.constant 0.0204081628 : f32
    %45 = vector.broadcast %cst_24 : f32 to vector<1x48x1xf32>
    %46 = arith.mulf %42, %45 : vector<1x48x1xf32>
    %47 = arith.mulf %44, %44 : vector<1x48x1xf32>
    %48 = arith.subf %46, %47 : vector<1x48x1xf32>
    %cst_25 = arith.constant 0.000000e+00 : f32
    %49 = vector.broadcast %cst_25 : f32 to vector<1x48x1xf32>
    %50 = arith.maximumf %48, %49 : vector<1x48x1xf32>
    %cst_26 = arith.constant 9.99999974E-6 : f32
    %51 = vector.broadcast %cst_26 : f32 to vector<1x48x1xf32>
    %52 = arith.addf %50, %51 : vector<1x48x1xf32>
    %53 = math.rsqrt %52 : vector<1x48x1xf32>
    %c1056 = arith.constant 1056 : index
    %c0_27 = arith.constant 0 : index
    %54 = vector.load %arg5[%c1056, %c0_27] : memref<1200x1xf32, #tpu.memory_space<vmem>>, vector<48x1xf32>
    %c1056_28 = arith.constant 1056 : index
    %c0_29 = arith.constant 0 : index
    %55 = vector.load %arg6[%c1056_28, %c0_29] : memref<1200x1xf32, #tpu.memory_space<vmem>>, vector<48x1xf32>
    %56 = vector.shape_cast %54 : vector<48x1xf32> to vector<1x48x1xf32>
    %57 = arith.mulf %53, %56 : vector<1x48x1xf32>
    %58 = arith.mulf %44, %57 : vector<1x48x1xf32>
    %59 = vector.shape_cast %55 : vector<48x1xf32> to vector<1x48x1xf32>
    %60 = arith.subf %59, %58 : vector<1x48x1xf32>
    %61 = vector.broadcast %57 : vector<1x48x1xf32> to vector<1x48x49xf32>
    %62 = arith.mulf %33, %61 : vector<1x48x49xf32>
    %63 = vector.broadcast %60 : vector<1x48x1xf32> to vector<1x48x49xf32>
    %64 = arith.addf %62, %63 : vector<1x48x49xf32>
    %c0_30 = arith.constant 0 : index
    %c1056_31 = arith.constant 1056 : index
    %c0_32 = arith.constant 0 : index
    %65 = vector.load %arg7[%c0_30, %c1056_31, %c0_32] : memref<1x1200x49xf32, #tpu.memory_space<vmem>>, vector<1x48x49xf32>
    tpu.vector_store %arg7[%c0_30, %c1056_31, %c0_32], %64 {strides = array<i32>} : memref<1x1200x49xf32, #tpu.memory_space<vmem>>, vector<1x48x49xf32>,
    %c0_33 = arith.constant 0 : index
    %c0_34 = arith.constant 0 : index
    %c0_35 = arith.constant 0 : index
    %66 = vector.load %arg3[%c0_33, %c0_34, %c0_35] : memref<1x48x49xf32, #tpu.memory_space<vmem>>, vector<1x48x49xf32>
    %cst_36 = arith.constant dense<0.000000e+00> : vector<1x48xf32>
    %67 = vector.multi_reduction <add>, %66, %cst_36 [2] : vector<1x48x49xf32> to vector<1x48xf32>
    %68 = vector.shape_cast %67 : vector<1x48xf32> to vector<1x48x1xf32>
    %cst_37 = arith.constant dense<0.000000e+00> : vector<48x1xf32>
    %69 = vector.multi_reduction <add>, %68, %cst_37 [0] : vector<1x48x1xf32> to vector<48x1xf32>
    %70 = vector.shape_cast %69 : vector<48x1xf32> to vector<1x48x1xf32>
    %71 = arith.mulf %66, %66 : vector<1x48x49xf32>
    %cst_38 = arith.constant dense<0.000000e+00> : vector<1x48xf32>
    %72 = vector.multi_reduction <add>, %71, %cst_38 [2] : vector<1x48x49xf32> to vector<1x48xf32>
    %73 = vector.shape_cast %72 : vector<1x48xf32> to vector<1x48x1xf32>
    %cst_39 = arith.constant dense<0.000000e+00> : vector<48x1xf32>
    %74 = vector.multi_reduction <add>, %73, %cst_39 [0] : vector<1x48x1xf32> to vector<48x1xf32>
    %75 = vector.shape_cast %74 : vector<48x1xf32> to vector<1x48x1xf32>
    %cst_40 = arith.constant 0.0204081628 : f32
    %76 = vector.broadcast %cst_40 : f32 to vector<1x48x1xf32>
    %77 = arith.mulf %70, %76 : vector<1x48x1xf32>
    %cst_41 = arith.constant 0.0204081628 : f32
    %78 = vector.broadcast %cst_41 : f32 to vector<1x48x1xf32>
    %79 = arith.mulf %75, %78 : vector<1x48x1xf32>
    %80 = arith.mulf %77, %77 : vector<1x48x1xf32>
    %81 = arith.subf %79, %80 : vector<1x48x1xf32>
    %cst_42 = arith.constant 0.000000e+00 : f32
    %82 = vector.broadcast %cst_42 : f32 to vector<1x48x1xf32>
    %83 = arith.maximumf %81, %82 : vector<1x48x1xf32>
    %cst_43 = arith.constant 9.99999974E-6 : f32
    %84 = vector.broadcast %cst_43 : f32 to vector<1x48x1xf32>
    %85 = arith.addf %83, %84 : vector<1x48x1xf32>
    %86 = math.rsqrt %85 : vector<1x48x1xf32>
    %c1104 = arith.constant 1104 : index
    %c0_44 = arith.constant 0 : index
    %87 = vector.load %arg5[%c1104, %c0_44] : memref<1200x1xf32, #tpu.memory_space<vmem>>, vector<48x1xf32>
    %c1104_45 = arith.constant 1104 : index
    %c0_46 = arith.constant 0 : index
    %88 = vector.load %arg6[%c1104_45, %c0_46] : memref<1200x1xf32, #tpu.memory_space<vmem>>, vector<48x1xf32>
    %89 = vector.shape_cast %87 : vector<48x1xf32> to vector<1x48x1xf32>
    %90 = arith.mulf %86, %89 : vector<1x48x1xf32>
    %91 = arith.mulf %77, %90 : vector<1x48x1xf32>
    %92 = vector.shape_cast %88 : vector<48x1xf32> to vector<1x48x1xf32>
    %93 = arith.subf %92, %91 : vector<1x48x1xf32>
    %94 = vector.broadcast %90 : vector<1x48x1xf32> to vector<1x48x49xf32>
    %95 = arith.mulf %66, %94 : vector<1x48x49xf32>
    %96 = vector.broadcast %93 : vector<1x48x1xf32> to vector<1x48x49xf32>
    %97 = arith.addf %95, %96 : vector<1x48x49xf32>
    %c0_47 = arith.constant 0 : index
    %c1104_48 = arith.constant 1104 : index
    %c0_49 = arith.constant 0 : index
    %98 = vector.load %arg7[%c0_47, %c1104_48, %c0_49] : memref<1x1200x49xf32, #tpu.memory_space<vmem>>, vector<1x48x49xf32>
    tpu.vector_store %arg7[%c0_47, %c1104_48, %c0_49], %97 {strides = array<i32>} : memref<1x1200x49xf32, #tpu.memory_space<vmem>>, vector<1x48x49xf32>,
    %c0_50 = arith.constant 0 : index
    %c0_51 = arith.constant 0 : index
    %c0_52 = arith.constant 0 : index
    %99 = vector.load %arg4[%c0_50, %c0_51, %c0_52] : memref<1x48x49xf32, #tpu.memory_space<vmem>>, vector<1x48x49xf32>
    %cst_53 = arith.constant dense<0.000000e+00> : vector<1x48xf32>
    %100 = vector.multi_reduction <add>, %99, %cst_53 [2] : vector<1x48x49xf32> to vector<1x48xf32>
    %101 = vector.shape_cast %100 : vector<1x48xf32> to vector<1x48x1xf32>
    %cst_54 = arith.constant dense<0.000000e+00> : vector<48x1xf32>
    %102 = vector.multi_reduction <add>, %101, %cst_54 [0] : vector<1x48x1xf32> to vector<48x1xf32>
    %103 = vector.shape_cast %102 : vector<48x1xf32> to vector<1x48x1xf32>
    %104 = arith.mulf %99, %99 : vector<1x48x49xf32>
    %cst_55 = arith.constant dense<0.000000e+00> : vector<1x48xf32>
    %105 = vector.multi_reduction <add>, %104, %cst_55 [2] : vector<1x48x49xf32> to vector<1x48xf32>
    %106 = vector.shape_cast %105 : vector<1x48xf32> to vector<1x48x1xf32>
    %cst_56 = arith.constant dense<0.000000e+00> : vector<48x1xf32>
    %107 = vector.multi_reduction <add>, %106, %cst_56 [0] : vector<1x48x1xf32> to vector<48x1xf32>
    %108 = vector.shape_cast %107 : vector<48x1xf32> to vector<1x48x1xf32>
    %cst_57 = arith.constant 0.0204081628 : f32
    %109 = vector.broadcast %cst_57 : f32 to vector<1x48x1xf32>
    %110 = arith.mulf %103, %109 : vector<1x48x1xf32>
    %cst_58 = arith.constant 0.0204081628 : f32
    %111 = vector.broadcast %cst_58 : f32 to vector<1x48x1xf32>
    %112 = arith.mulf %108, %111 : vector<1x48x1xf32>
    %113 = arith.mulf %110, %110 : vector<1x48x1xf32>
    %114 = arith.subf %112, %113 : vector<1x48x1xf32>
    %cst_59 = arith.constant 0.000000e+00 : f32
    %115 = vector.broadcast %cst_59 : f32 to vector<1x48x1xf32>
    %116 = arith.maximumf %114, %115 : vector<1x48x1xf32>
    %cst_60 = arith.constant 9.99999974E-6 : f32
    %117 = vector.broadcast %cst_60 : f32 to vector<1x48x1xf32>
    %118 = arith.addf %116, %117 : vector<1x48x1xf32>
    %119 = math.rsqrt %118 : vector<1x48x1xf32>
    %c1152 = arith.constant 1152 : index
    %c0_61 = arith.constant 0 : index
    %120 = vector.load %arg5[%c1152, %c0_61] : memref<1200x1xf32, #tpu.memory_space<vmem>>, vector<48x1xf32>
    %c1152_62 = arith.constant 1152 : index
    %c0_63 = arith.constant 0 : index
    %121 = vector.load %arg6[%c1152_62, %c0_63] : memref<1200x1xf32, #tpu.memory_space<vmem>>, vector<48x1xf32>
    %122 = vector.shape_cast %120 : vector<48x1xf32> to vector<1x48x1xf32>
    %123 = arith.mulf %119, %122 : vector<1x48x1xf32>
    %124 = arith.mulf %110, %123 : vector<1x48x1xf32>
    %125 = vector.shape_cast %121 : vector<48x1xf32> to vector<1x48x1xf32>
    %126 = arith.subf %125, %124 : vector<1x48x1xf32>
    %127 = vector.broadcast %123 : vector<1x48x1xf32> to vector<1x48x49xf32>
    %128 = arith.mulf %99, %127 : vector<1x48x49xf32>
    %129 = vector.broadcast %126 : vector<1x48x1xf32> to vector<1x48x49xf32>
    %130 = arith.addf %128, %129 : vector<1x48x49xf32>
    %c0_64 = arith.constant 0 : index
    %c1152_65 = arith.constant 1152 : index
    %c0_66 = arith.constant 0 : index
    %131 = vector.load %arg7[%c0_64, %c1152_65, %c0_66] : memref<1x1200x49xf32, #tpu.memory_space<vmem>>, vector<1x48x49xf32>
    tpu.vector_store %arg7[%c0_64, %c1152_65, %c0_66], %130 {strides = array<i32>} : memref<1x1200x49xf32, #tpu.memory_space<vmem>>, vector<1x48x49xf32>,
    return
  }
  func.func @transform_0(%arg0: i32) -> (i32, i32, i32) {
    %c0_i32 = arith.constant 0 : i32
    %c0_i32_0 = arith.constant 0 : i32
    %c0_i32_1 = arith.constant 0 : i32
    %c0_i32_2 = arith.constant 0 : i32
    return %c0_i32, %c0_i32_0, %c0_i32_1 : i32, i32, i32
  }
  func.func @transform_1(%arg0: i32) -> (i32, i32, i32) {
    %c0_i32 = arith.constant 0 : i32
    %c0_i32_0 = arith.constant 0 : i32
    %c0_i32_1 = arith.constant 0 : i32
    %c0_i32_2 = arith.constant 0 : i32
    return %c0_i32, %c0_i32_0, %c0_i32_1 : i32, i32, i32
  }
  func.func @transform_2(%arg0: i32) -> (i32, i32, i32) {
    %c0_i32 = arith.constant 0 : i32
    %c0_i32_0 = arith.constant 0 : i32
    %c0_i32_1 = arith.constant 0 : i32
    %c0_i32_2 = arith.constant 0 : i32
    return %c0_i32, %c0_i32_0, %c0_i32_1 : i32, i32, i32
  }
  func.func @transform_3(%arg0: i32) -> (i32, i32, i32) {
    %c0_i32 = arith.constant 0 : i32
    %c0_i32_0 = arith.constant 0 : i32
    %c0_i32_1 = arith.constant 0 : i32
    %c0_i32_2 = arith.constant 0 : i32
    return %c0_i32, %c0_i32_0, %c0_i32_1 : i32, i32, i32
  }
  func.func @transform_4(%arg0: i32) -> (i32, i32) {
    %c0_i32 = arith.constant 0 : i32
    %c0_i32_0 = arith.constant 0 : i32
    %c0_i32_1 = arith.constant 0 : i32
    return %c0_i32, %c0_i32_0 : i32, i32
  }
  func.func @transform_5(%arg0: i32) -> (i32, i32) {
    %c0_i32 = arith.constant 0 : i32
    %c0_i32_0 = arith.constant 0 : i32
    %c0_i32_1 = arith.constant 0 : i32
    return %c0_i32, %c0_i32_0 : i32, i32
  }
  func.func @transform_6(%arg0: i32) -> (i32, i32, i32) {
    %c0_i32 = arith.constant 0 : i32
    %c0_i32_0 = arith.constant 0 : i32
    %c0_i32_1 = arith.constant 0 : i32
    %c0_i32_2 = arith.constant 0 : i32
    return %c0_i32, %c0_i32_0, %c0_i32_1 : i32, i32, i32
  }
}

</mosaic_0001>

<bundles_post_ra>
// kernel: cat_batchnorm.1
= control target key start
LH: loop header
LB: loop body
LE: loop exit
PB: predicated region body
PF: predicated region fallthrough
CT: control target
= control target key end

     0   :  { %vm155_vm0 = vcmask 400384   ;;  %s11708_s0 = inlined_call_operand.vmem [shape: f32[1,1056,49], index: 0, kind: input, shape index: {}]   ;;  %s11709_s1 = inlined_call_operand.vmem [shape: f32[1,48,49], index: 1, kind: input, shape index: {}]   ;;  %s11710_s2 = inlined_call_operand.vmem [shape: f32[1,48,49], index: 2, kind: input, shape index: {}]   ;;  %s11711_s3 = inlined_call_operand.vmem [shape: f32[1,48,49], index: 3, kind: input, shape index: {}]   ;;  %s11712_s4 = inlined_call_operand.vmem [shape: f32[1200,1], index: 4, kind: input, shape index: {}]   ;;  %s11713_s5 = inlined_call_operand.vmem [shape: f32[1200,1], index: 5, kind: input, shape index: {}]   ;;  %s11714_s6 = inlined_call_operand.vmem [shape: f32[1,1200,49], index: 6, kind: output, shape index: {}]  }
   0x1   :  { %v5846_v0 = vld [vmem:[%s11708_s0 + $0x10] sm:$0xff]  ;;  %v5851_v1 = vld [vmem:[%s11708_s0] sm:$0xff]  ;;  %v5856_v2 = vld [vmem:[%s11708_s0 + $0x18] sm:$0xff] }
   0x2   :  { %v162_v3 = vsel %vm155_vm0, %v5846_v0, 0.0  ;;  %v156_v4 = vsel %vm155_vm0, %v5851_v1, 0.0  ;;  %v5865_v5 = vld [vmem:[%s11708_s0 + $0x8] sm:$0xff]  ;;  %v165_v6 = vsel %vm155_vm0, %v5856_v2, 0.0  ;;  %v5879_v9 = vld [vmem:[%s11708_s0 + $0x20] sm:$0xff]  ;;  %v5888_v12 = vld [vmem:[%s11708_s0 + $0x38] sm:$0xff] }
   0x3   :  { %163 = vadd.xlane.f32.xlu1 %v162_v3  ;;  %157 = vadd.xlane.f32.xlu0 %v156_v4  ;;  %v159_v7 = vsel %vm155_vm0, %v5865_v5, 0.0  ;;  %v5874_v8 = vld [vmem:[%s11708_s0 + $0x28] sm:$0xff]  ;;  %v168_v11 = vsel %vm155_vm0, %v5879_v9, 0.0  ;;  %v5893_v13 = vld [vmem:[%s11708_s0 + $0x30] sm:$0xff]  ;;  %v177_v14 = vsel %vm155_vm0, %v5888_v12, 0.0  ;;  %v5907_v17 = vld [vmem:[%s11708_s0 + $0x40] sm:$0xff] }
   0x4   :  { %v171_v10 = vsel %vm155_vm0, %v5874_v8, 0.0  ;;  %v174_v15 = vsel %vm155_vm0, %v5893_v13, 0.0  ;;  %v5902_v16 = vld [vmem:[%s11708_s0 + $0x48] sm:$0xff]  ;;  %v180_v19 = vsel %vm155_vm0, %v5907_v17, 0.0  ;;  %v5916_v20 = vld [vmem:[%s11708_s0 + $0x58] sm:$0xff]  ;;  %v5921_v21 = vld [vmem:[%s11708_s0 + $0x50] sm:$0xff] }
   0x5   :  { %v183_v18 = vsel %vm155_vm0, %v5902_v16, 0.0  ;;  %v189_v22 = vsel %vm155_vm0, %v5916_v20, 0.0  ;;  %v186_v23 = vsel %vm155_vm0, %v5921_v21, 0.0  ;;  %v5930_v24 = vld [vmem:[%s11708_s0 + $0x68] sm:$0xff]  ;;  %v5935_v25 = vld [vmem:[%s11708_s0 + $0x60] sm:$0xff]  ;;  %v5944_v28 = vld [vmem:[%s11708_s0 + $0x78] sm:$0xff] }
   0x6   :  { %v195_v26 = vsel %vm155_vm0, %v5930_v24, 0.0  ;;  %v192_v27 = vsel %vm155_vm0, %v5935_v25, 0.0  ;;  %v5949_v29 = vld [vmem:[%s11708_s0 + $0x70] sm:$0xff]  ;;  %v201_v30 = vsel %vm155_vm0, %v5944_v28, 0.0  ;;  %v5958_v32 = vld [vmem:[%s11708_s0 + $0x88] sm:$0xff]  ;;  %v5963_v33 = vld [vmem:[%s11708_s0 + $0x80] sm:$0xff] }
   0x7   :  { %166 = vadd.xlane.f32.xlu1 %v165_v6  ;;  %160 = vadd.xlane.f32.xlu0 %v159_v7  ;;  %v198_v31 = vsel %vm155_vm0, %v5949_v29, 0.0  ;;  %v207_v34 = vsel %vm155_vm0, %v5958_v32, 0.0  ;;  %v204_v35 = vsel %vm155_vm0, %v5963_v33, 0.0  ;;  %v5972_v36 = vld [vmem:[%s11708_s0 + $0x98] sm:$0xff]  ;;  %v5977_v37 = vld [vmem:[%s11708_s0 + $0x90] sm:$0xff]  ;;  %v5986_v40 = vld [vmem:[%s11708_s0 + $0xa8] sm:$0xff] }
   0x8   :  { %v213_v38 = vsel %vm155_vm0, %v5972_v36, 0.0  ;;  %v210_v39 = vsel %vm155_vm0, %v5977_v37, 0.0  ;;  %v5991_v41 = vld [vmem:[%s11708_s0 + $0xa0] sm:$0xff]  ;;  %v219_v42 = vsel %vm155_vm0, %v5986_v40, 0.0  ;;  %v6000_v44 = vld [vmem:[%s11708_s0 + $0xb8] sm:$0xff]  ;;  %v6005_v45 = vld [vmem:[%s11708_s0 + $0xb0] sm:$0xff] }
   0x9   :  { %v216_v43 = vsel %vm155_vm0, %v5991_v41, 0.0  ;;  %v225_v46 = vsel %vm155_vm0, %v6000_v44, 0.0  ;;  %v222_v47 = vsel %vm155_vm0, %v6005_v45, 0.0  ;;  %v6014_v48 = vld [vmem:[%s11708_s0 + $0xc8] sm:$0xff]  ;;  %v6019_v49 = vld [vmem:[%s11708_s0 + $0xc0] sm:$0xff]  ;;  %v6028_v52 = vld [vmem:[%s11708_s0 + $0xd8] sm:$0xff] }
   0xa   :  { %v231_v50 = vsel %vm155_vm0, %v6014_v48, 0.0  ;;  %v228_v51 = vsel %vm155_vm0, %v6019_v49, 0.0  ;;  %v6033_v53 = vld [vmem:[%s11708_s0 + $0xd0] sm:$0xff]  ;;  %v237_v54 = vsel %vm155_vm0, %v6028_v52, 0.0  ;;  %v6042_v56 = vld [vmem:[%s11708_s0 + $0xe8] sm:$0xff]  ;;  %v6047_v57 = vld [vmem:[%s11708_s0 + $0xe0] sm:$0xff] }
   0xb   :  { %172 = vadd.xlane.f32.xlu1 %v171_v10  ;;  %169 = vadd.xlane.f32.xlu0 %v168_v11  ;;  %v234_v55 = vsel %vm155_vm0, %v6033_v53, 0.0  ;;  %v243_v58 = vsel %vm155_vm0, %v6042_v56, 0.0  ;;  %v240_v59 = vsel %vm155_vm0, %v6047_v57, 0.0  ;;  %v6056_v60 = vld [vmem:[%s11708_s0 + $0xf8] sm:$0xff]  ;;  %v6061_v61 = vld [vmem:[%s11708_s0 + $0xf0] sm:$0xff]  ;;  %v6070_v3 = vld [vmem:[%s11708_s0 + $0x108] sm:$0xff] }
   0xc   :  { %v249_v62 = vsel %vm155_vm0, %v6056_v60, 0.0  ;;  %v246_v63 = vsel %vm155_vm0, %v6061_v61, 0.0  ;;  %v6075_v4 = vld [vmem:[%s11708_s0 + $0x100] sm:$0xff]  ;;  %v255_v6 = vsel %vm155_vm0, %v6070_v3, 0.0  ;;  %v6084_v10 = vld [vmem:[%s11708_s0 + $0x118] sm:$0xff]  ;;  %v6089_v11 = vld [vmem:[%s11708_s0 + $0x110] sm:$0xff] }
   0xd   :  { %v252_v7 = vsel %vm155_vm0, %v6075_v4, 0.0 }
   0xf   :  { %178 = vadd.xlane.f32.xlu1 %v177_v14  ;;  %175 = vadd.xlane.f32.xlu0 %v174_v15  ;;  %v261_v14 = vsel %vm155_vm0, %v6084_v10, 0.0  ;;  %v258_v15 = vsel %vm155_vm0, %v6089_v11, 0.0 }
  0x13   :  { %184 = vadd.xlane.f32.xlu1 %v183_v18  ;;  %181 = vadd.xlane.f32.xlu0 %v180_v19  ;;  %v6098_v18 = vld [vmem:[%s11708_s0 + $0x128] sm:$0xff]  ;;  %v6103_v19 = vld [vmem:[%s11708_s0 + $0x120] sm:$0xff] }
  0x17   :  { %190 = vadd.xlane.f32.xlu1 %v189_v22  ;;  %187 = vadd.xlane.f32.xlu0 %v186_v23  ;;  %v267_v22 = vsel %vm155_vm0, %v6098_v18, 0.0  ;;  %v264_v23 = vsel %vm155_vm0, %v6103_v19, 0.0 }
  0x1b   :  { %196 = vadd.xlane.f32.xlu1 %v195_v26  ;;  %193 = vadd.xlane.f32.xlu0 %v192_v27  ;;  %v6112_v26 = vld [vmem:[%s11708_s0 + $0x138] sm:$0xff]  ;;  %v6117_v27 = vld [vmem:[%s11708_s0 + $0x130] sm:$0xff] }
  0x1f   :  { %202 = vadd.xlane.f32.xlu1 %v201_v30  ;;  %199 = vadd.xlane.f32.xlu0 %v198_v31  ;;  %v273_v30 = vsel %vm155_vm0, %v6112_v26, 0.0  ;;  %v270_v31 = vsel %vm155_vm0, %v6117_v27, 0.0 }
  0x23   :  { %208 = vadd.xlane.f32.xlu1 %v207_v34  ;;  %205 = vadd.xlane.f32.xlu0 %v204_v35  ;;  %v6126_v34 = vld [vmem:[%s11708_s0 + $0x148] sm:$0xff]  ;;  %v6131_v35 = vld [vmem:[%s11708_s0 + $0x140] sm:$0xff] }
  0x27   :  { %214 = vadd.xlane.f32.xlu1 %v213_v38  ;;  %211 = vadd.xlane.f32.xlu0 %v210_v39  ;;  %v279_v38 = vsel %vm155_vm0, %v6126_v34, 0.0  ;;  %v276_v39 = vsel %vm155_vm0, %v6131_v35, 0.0 }
  0x2b   :  { %220 = vadd.xlane.f32.xlu1 %v219_v42  ;;  %217 = vadd.xlane.f32.xlu0 %v216_v43  ;;  %v6140_v42 = vld [vmem:[%s11708_s0 + $0x158] sm:$0xff]  ;;  %v6145_v43 = vld [vmem:[%s11708_s0 + $0x150] sm:$0xff] }
  0x2f   :  { %226 = vadd.xlane.f32.xlu1 %v225_v46  ;;  %223 = vadd.xlane.f32.xlu0 %v222_v47  ;;  %v285_v46 = vsel %vm155_vm0, %v6140_v42, 0.0  ;;  %v282_v47 = vsel %vm155_vm0, %v6145_v43, 0.0 }
  0x33   :  { %232 = vadd.xlane.f32.xlu1 %v231_v50  ;;  %229 = vadd.xlane.f32.xlu0 %v228_v51  ;;  %v6154_v50 = vld [vmem:[%s11708_s0 + $0x168] sm:$0xff]  ;;  %v6159_v51 = vld [vmem:[%s11708_s0 + $0x160] sm:$0xff] }
  0x37   :  { %238 = vadd.xlane.f32.xlu1 %v237_v54  ;;  %235 = vadd.xlane.f32.xlu0 %v234_v55  ;;  %v291_v54 = vsel %vm155_vm0, %v6154_v50, 0.0  ;;  %v288_v55 = vsel %vm155_vm0, %v6159_v51, 0.0 }
  0x3b   :  { %244 = vadd.xlane.f32.xlu1 %v243_v58  ;;  %241 = vadd.xlane.f32.xlu0 %v240_v59  ;;  %v6168_v58 = vld [vmem:[%s11708_s0 + $0x178] sm:$0xff]  ;;  %v6173_v59 = vld [vmem:[%s11708_s0 + $0x170] sm:$0xff] }
  0x3f   :  { %250 = vadd.xlane.f32.xlu1 %v249_v62  ;;  %247 = vadd.xlane.f32.xlu0 %v246_v63  ;;  %v297_v62 = vsel %vm155_vm0, %v6168_v58, 0.0  ;;  %v294_v63 = vsel %vm155_vm0, %v6173_v59, 0.0 }
  0x43   :  { %256 = vadd.xlane.f32.xlu1 %v255_v6  ;;  %253 = vadd.xlane.f32.xlu0 %v252_v7  ;;  %v6182_v6 = vld [vmem:[%s11708_s0 + $0x188] sm:$0xff]  ;;  %v6187_v7 = vld [vmem:[%s11708_s0 + $0x180] sm:$0xff] }
  0x47   :  { %262 = vadd.xlane.f32.xlu1 %v261_v14  ;;  %259 = vadd.xlane.f32.xlu0 %v258_v15  ;;  %v303_v14 = vsel %vm155_vm0, %v6182_v6, 0.0  ;;  %v300_v15 = vsel %vm155_vm0, %v6187_v7, 0.0 }
  0x4b   :  { %268 = vadd.xlane.f32.xlu1 %v267_v22  ;;  %265 = vadd.xlane.f32.xlu0 %v264_v23  ;;  %v6196_v22 = vld [vmem:[%s11708_s0 + $0x198] sm:$0xff]  ;;  %v6201_v23 = vld [vmem:[%s11708_s0 + $0x190] sm:$0xff] }
  0x4f   :  { %274 = vadd.xlane.f32.xlu1 %v273_v30  ;;  %271 = vadd.xlane.f32.xlu0 %v270_v31  ;;  %v309_v30 = vsel %vm155_vm0, %v6196_v22, 0.0  ;;  %v306_v31 = vsel %vm155_vm0, %v6201_v23, 0.0 }
  0x53   :  { %280 = vadd.xlane.f32.xlu1 %v279_v38  ;;  %277 = vadd.xlane.f32.xlu0 %v276_v39  ;;  %v6210_v38 = vld [vmem:[%s11708_s0 + $0x1a8] sm:$0xff]  ;;  %v6215_v39 = vld [vmem:[%s11708_s0 + $0x1a0] sm:$0xff] }
  0x54   :  { %11943 = vst [vmem:[#allocation2_spill] sm:$0xff] %v6215_v39 }
  0x57   :  { %286 = vadd.xlane.f32.xlu1 %v285_v46  ;;  %283 = vadd.xlane.f32.xlu0 %v282_v47  ;;  %v315_v46 = vsel %vm155_vm0, %v6210_v38, 0.0  ;;  %v312_v47 = vsel %vm155_vm0, %v6215_v39, 0.0 }
  0x5b   :  { %292 = vadd.xlane.f32.xlu1 %v291_v54  ;;  %289 = vadd.xlane.f32.xlu0 %v288_v55  ;;  %v6224_v54 = vld [vmem:[%s11708_s0 + $0x1b8] sm:$0xff]  ;;  %v6229_v55 = vld [vmem:[%s11708_s0 + $0x1b0] sm:$0xff] }
  0x5c   :  { %11944 = vst [vmem:[#allocation3_spill] sm:$0xff] %v6224_v54  ;;  %11945 = vst [vmem:[#allocation4_spill] sm:$0xff] %v6229_v55 }
  0x5f   :  { %298 = vadd.xlane.f32.xlu1 %v297_v62  ;;  %295 = vadd.xlane.f32.xlu0 %v294_v63  ;;  %v321_v62 = vsel %vm155_vm0, %v6224_v54, 0.0  ;;  %v318_v63 = vsel %vm155_vm0, %v6229_v55, 0.0 }
  0x63   :  { %304 = vadd.xlane.f32.xlu1 %v303_v14  ;;  %301 = vadd.xlane.f32.xlu0 %v300_v15  ;;  %v80_v14 = vld [vmem:[%s11708_s0 + $0x1c8] sm:$0xff]  ;;  %v79_v15 = vld [vmem:[%s11708_s0 + $0x1c0] sm:$0xff] }
  0x67   :  { %310 = vadd.xlane.f32.xlu1 %v309_v30  ;;  %307 = vadd.xlane.f32.xlu0 %v306_v31  ;;  %v327_v30 = vsel %vm155_vm0, %v80_v14, 0.0  ;;  %v324_v31 = vsel %vm155_vm0, %v79_v15, 0.0 }
  0x6b   :  { %316 = vadd.xlane.f32.xlu1 %v315_v46  ;;  %313 = vadd.xlane.f32.xlu0 %v312_v47  ;;  %v82_v46 = vld [vmem:[%s11708_s0 + $0x1d8] sm:$0xff]  ;;  %v81_v47 = vld [vmem:[%s11708_s0 + $0x1d0] sm:$0xff] }
  0x6c   :  { %v333_v55 = vsel %vm155_vm0, %v82_v46, 0.0  ;;  %v330_v54 = vsel %vm155_vm0, %v81_v47, 0.0 }
  0x6f   :  { %322 = vadd.xlane.f32.xlu1 %v321_v62  ;;  %319 = vadd.xlane.f32.xlu0 %v318_v63  ;;  %v84_v62 = vld [vmem:[%s11708_s0 + $0x1e8] sm:$0xff]  ;;  %v83_v63 = vld [vmem:[%s11708_s0 + $0x1e0] sm:$0xff] }
  0x70   :  { %v339_v14 = vsel %vm155_vm0, %v84_v62, 0.0  ;;  %v336_v15 = vsel %vm155_vm0, %v83_v63, 0.0 }
  0x73   :  { %328 = vadd.xlane.f32.xlu1 %v327_v30  ;;  %325 = vadd.xlane.f32.xlu0 %v324_v31  ;;  %v86_v30 = vld [vmem:[%s11708_s0 + $0x1f8] sm:$0xff]  ;;  %v85_v31 = vld [vmem:[%s11708_s0 + $0x1f0] sm:$0xff] }
  0x74   :  { %v345_v46 = vsel %vm155_vm0, %v86_v30, 0.0  ;;  %v342_v47 = vsel %vm155_vm0, %v85_v31, 0.0 }
  0x77   :  { %334 = vadd.xlane.f32.xlu1 %v333_v55  ;;  %331 = vadd.xlane.f32.xlu0 %v330_v54  ;;  %v88_v54 = vld [vmem:[%s11708_s0 + $0x208] sm:$0xff]  ;;  %v87_v55 = vld [vmem:[%s11708_s0 + $0x200] sm:$0xff] }
  0x78   :  { %v351_v62 = vsel %vm155_vm0, %v88_v54, 0.0  ;;  %v348_v63 = vsel %vm155_vm0, %v87_v55, 0.0 }
  0x7b   :  { %340 = vadd.xlane.f32.xlu1 %v339_v14  ;;  %337 = vadd.xlane.f32.xlu0 %v336_v15  ;;  %v90_v14 = vld [vmem:[%s11708_s0 + $0x218] sm:$0xff]  ;;  %v89_v15 = vld [vmem:[%s11708_s0 + $0x210] sm:$0xff] }
  0x7c   :  { %v357_v30 = vsel %vm155_vm0, %v90_v14, 0.0  ;;  %v354_v31 = vsel %vm155_vm0, %v89_v15, 0.0 }
  0x7f   :  { %346 = vadd.xlane.f32.xlu1 %v345_v46  ;;  %343 = vadd.xlane.f32.xlu0 %v342_v47  ;;  %v92_v46 = vld [vmem:[%s11708_s0 + $0x228] sm:$0xff]  ;;  %v91_v47 = vld [vmem:[%s11708_s0 + $0x220] sm:$0xff] }
  0x80   :  { %v363_v54 = vsel %vm155_vm0, %v92_v46, 0.0  ;;  %v360_v55 = vsel %vm155_vm0, %v91_v47, 0.0 }
  0x83   :  { %352 = vadd.xlane.f32.xlu1 %v351_v62  ;;  %349 = vadd.xlane.f32.xlu0 %v348_v63  ;;  %v94_v62 = vld [vmem:[%s11708_s0 + $0x238] sm:$0xff]  ;;  %v93_v63 = vld [vmem:[%s11708_s0 + $0x230] sm:$0xff] }
  0x84   :  { %v369_v14 = vsel %vm155_vm0, %v94_v62, 0.0  ;;  %v366_v15 = vsel %vm155_vm0, %v93_v63, 0.0  ;;  %v98_v62 = vld [vmem:[%s11708_s0 + $0x258] sm:$0xff]  ;;  %v97_v63 = vld [vmem:[%s11708_s0 + $0x250] sm:$0xff] }
  0x87   :  { %358 = vadd.xlane.f32.xlu1 %v357_v30  ;;  %355 = vadd.xlane.f32.xlu0 %v354_v31  ;;  %v96_v30 = vld [vmem:[%s11708_s0 + $0x248] sm:$0xff]  ;;  %v95_v31 = vld [vmem:[%s11708_s0 + $0x240] sm:$0xff] }
  0x8b   :  { %364 = vadd.xlane.f32.xlu1 %v363_v54  ;;  %361 = vadd.xlane.f32.xlu0 %v360_v55  ;;  %v375_v54 = vsel %vm155_vm0, %v96_v30, 0.0  ;;  %v372_v55 = vsel %vm155_vm0, %v95_v31, 0.0  ;;  %v378_v30 = vsel %vm155_vm0, %v97_v63, 0.0  ;;  %v100_v31 = vld [vmem:[%s11708_s0 + $0x268] sm:$0xff]  ;;  %v102_v63 = vld [vmem:[%s11708_s0 + $0x278] sm:$0xff] }
  0x8f   :  { %370 = vadd.xlane.f32.xlu1 %v369_v14  ;;  %367 = vadd.xlane.f32.xlu0 %v366_v15 }
  0x90   :  { %v6305_v46 = vpop.xlane.xlu1 %163  ;;  %v6307_v47 = vpop.xlane.xlu0 %157 }
  0x91   :  { %11946 = vst [vmem:[#allocation5_spill] sm:$0xff] %v6305_v46  ;;  %11947 = vst [vmem:[#allocation6_spill] sm:$0xff] %v6307_v47  ;;  %v381_v46 = vsel %vm155_vm0, %v98_v62, 0.0  ;;  %v99_v47 = vld [vmem:[%s11708_s0 + $0x260] sm:$0xff] }
  0x92   :  { %v384_v62 = vsel %vm155_vm0, %v99_v47, 0.0  ;;  %v104_v47 = vld [vmem:[%s11708_s0 + $0x288] sm:$0xff] }
  0x93   :  { %376 = vadd.xlane.f32.xlu1 %v375_v54  ;;  %373 = vadd.xlane.f32.xlu0 %v372_v55 }
  0x94   :  { %v6317_v14 = vpop.xlane.xlu1 %166  ;;  %v6319_v15 = vpop.xlane.xlu0 %160 }
  0x95   :  { %11948 = vst [vmem:[#allocation7_spill] sm:$0xff] %v6317_v14  ;;  %11949 = vst [vmem:[#allocation8_spill] sm:$0xff] %v6319_v15  ;;  %v387_v14 = vsel %vm155_vm0, %v100_v31, 0.0  ;;  %v101_v15 = vld [vmem:[%s11708_s0 + $0x270] sm:$0xff] }
  0x96   :  { %v390_v31 = vsel %vm155_vm0, %v101_v15, 0.0  ;;  %v106_v15 = vld [vmem:[%s11708_s0 + $0x298] sm:$0xff] }
  0x97   :  { %382 = vadd.xlane.f32.xlu1 %v381_v46  ;;  %379 = vadd.xlane.f32.xlu0 %v378_v30 }
  0x98   :  { %v6329_v54 = vpop.xlane.xlu1 %172  ;;  %v6331_v55 = vpop.xlane.xlu0 %169 }
  0x99   :  { %11950 = vst [vmem:[#allocation9_spill] sm:$0xff] %v6329_v54  ;;  %11951 = vst [vmem:[#allocation10_spill] sm:$0xff] %v6331_v55  ;;  %v393_v54 = vsel %vm155_vm0, %v102_v63, 0.0  ;;  %v103_v55 = vld [vmem:[%s11708_s0 + $0x280] sm:$0xff] }
  0x9a   :  { %v396_v63 = vsel %vm155_vm0, %v103_v55, 0.0  ;;  %v108_v55 = vld [vmem:[%s11708_s0 + $0x2a8] sm:$0xff] }
  0x9b   :  { %388 = vadd.xlane.f32.xlu1 %v387_v14  ;;  %385 = vadd.xlane.f32.xlu0 %v384_v62 }
  0x9c   :  { %v6341_v46 = vpop.xlane.xlu1 %178  ;;  %v6343_v30 = vpop.xlane.xlu0 %175 }
  0x9d   :  { %11952 = vst [vmem:[#allocation11_spill] sm:$0xff] %v6341_v46  ;;  %11953 = vst [vmem:[#allocation12_spill] sm:$0xff] %v6343_v30  ;;  %v399_v46 = vsel %vm155_vm0, %v104_v47, 0.0  ;;  %v105_v30 = vld [vmem:[%s11708_s0 + $0x290] sm:$0xff] }
  0x9e   :  { %v402_v47 = vsel %vm155_vm0, %v105_v30, 0.0  ;;  %v110_v30 = vld [vmem:[%s11708_s0 + $0x2b8] sm:$0xff] }
  0x9f   :  { %394 = vadd.xlane.f32.xlu1 %v393_v54  ;;  %391 = vadd.xlane.f32.xlu0 %v390_v31 }
  0xa0   :  { %v6353_v14 = vpop.xlane.xlu1 %184  ;;  %v6355_v62 = vpop.xlane.xlu0 %181 }
  0xa1   :  { %11954 = vst [vmem:[#allocation13_spill] sm:$0xff] %v6353_v14  ;;  %11955 = vst [vmem:[#allocation14_spill] sm:$0xff] %v6355_v62  ;;  %v405_v62 = vsel %vm155_vm0, %v106_v15, 0.0  ;;  %v107_v14 = vld [vmem:[%s11708_s0 + $0x2a0] sm:$0xff] }
  0xa2   :  { %v408_v15 = vsel %vm155_vm0, %v107_v14, 0.0  ;;  %v112_v14 = vld [vmem:[%s11708_s0 + $0x2c8] sm:$0xff] }
  0xa3   :  { %400 = vadd.xlane.f32.xlu1 %v399_v46  ;;  %397 = vadd.xlane.f32.xlu0 %v396_v63 }
  0xa4   :  { %v6365_v54 = vpop.xlane.xlu1 %190  ;;  %v6367_v31 = vpop.xlane.xlu0 %187 }
  0xa5   :  { %11956 = vst [vmem:[#allocation15_spill] sm:$0xff] %v6365_v54  ;;  %11957 = vst [vmem:[#allocation16_spill] sm:$0xff] %v6367_v31  ;;  %v411_v31 = vsel %vm155_vm0, %v108_v55, 0.0  ;;  %v109_v54 = vld [vmem:[%s11708_s0 + $0x2b0] sm:$0xff] }
  0xa6   :  { %v414_v55 = vsel %vm155_vm0, %v109_v54, 0.0  ;;  %v114_v54 = vld [vmem:[%s11708_s0 + $0x2d8] sm:$0xff] }
  0xa7   :  { %406 = vadd.xlane.f32.xlu1 %v405_v62  ;;  %403 = vadd.xlane.f32.xlu0 %v402_v47 }
  0xa8   :  { %v6377_v46 = vpop.xlane.xlu1 %196  ;;  %v6379_v63 = vpop.xlane.xlu0 %193 }
  0xa9   :  { %11958 = vst [vmem:[#allocation17_spill] sm:$0xff] %v6377_v46  ;;  %11959 = vst [vmem:[#allocation18_spill] sm:$0xff] %v6379_v63  ;;  %v417_v63 = vsel %vm155_vm0, %v110_v30, 0.0  ;;  %v111_v46 = vld [vmem:[%s11708_s0 + $0x2c0] sm:$0xff] }
  0xaa   :  { %v420_v30 = vsel %vm155_vm0, %v111_v46, 0.0  ;;  %v116_v46 = vld [vmem:[%s11708_s0 + $0x2e8] sm:$0xff] }
  0xab   :  { %412 = vadd.xlane.f32.xlu1 %v411_v31  ;;  %409 = vadd.xlane.f32.xlu0 %v408_v15 }
  0xac   :  { %v6389_v62 = vpop.xlane.xlu1 %202  ;;  %v6391_v47 = vpop.xlane.xlu0 %199 }
  0xad   :  { %11960 = vst [vmem:[#allocation19_spill] sm:$0xff] %v6389_v62  ;;  %11961 = vst [vmem:[#allocation20_spill] sm:$0xff] %v6391_v47  ;;  %v423_v47 = vsel %vm155_vm0, %v112_v14, 0.0  ;;  %v113_v62 = vld [vmem:[%s11708_s0 + $0x2d0] sm:$0xff] }
  0xae   :  { %v426_v14 = vsel %vm155_vm0, %v113_v62, 0.0  ;;  %v118_v62 = vld [vmem:[%s11708_s0 + $0x2f8] sm:$0xff] }
  0xaf   :  { %418 = vadd.xlane.f32.xlu1 %v417_v63  ;;  %415 = vadd.xlane.f32.xlu0 %v414_v55 }
  0xb0   :  { %v6401_v31 = vpop.xlane.xlu1 %208  ;;  %v6403_v15 = vpop.xlane.xlu0 %205 }
  0xb1   :  { %11962 = vst [vmem:[#allocation21_spill] sm:$0xff] %v6401_v31  ;;  %11963 = vst [vmem:[#allocation22_spill] sm:$0xff] %v6403_v15  ;;  %v429_v15 = vsel %vm155_vm0, %v114_v54, 0.0  ;;  %v115_v31 = vld [vmem:[%s11708_s0 + $0x2e0] sm:$0xff] }
  0xb2   :  { %v432_v54 = vsel %vm155_vm0, %v115_v31, 0.0  ;;  %v120_v31 = vld [vmem:[%s11708_s0 + $0x308] sm:$0xff] }
  0xb3   :  { %424 = vadd.xlane.f32.xlu1 %v423_v47  ;;  %421 = vadd.xlane.f32.xlu0 %v420_v30 }
  0xb4   :  { %v6413_v63 = vpop.xlane.xlu1 %214  ;;  %v6415_v55 = vpop.xlane.xlu0 %211 }
  0xb5   :  { %11964 = vst [vmem:[#allocation23_spill] sm:$0xff] %v6413_v63  ;;  %11965 = vst [vmem:[#allocation24_spill] sm:$0xff] %v6415_v55  ;;  %v435_v55 = vsel %vm155_vm0, %v116_v46, 0.0  ;;  %v117_v63 = vld [vmem:[%s11708_s0 + $0x2f0] sm:$0xff] }
  0xb6   :  { %v438_v46 = vsel %vm155_vm0, %v117_v63, 0.0  ;;  %v122_v63 = vld [vmem:[%s11708_s0 + $0x318] sm:$0xff] }
  0xb7   :  { %430 = vadd.xlane.f32.xlu1 %v429_v15  ;;  %427 = vadd.xlane.f32.xlu0 %v426_v14 }
  0xb8   :  { %v6425_v47 = vpop.xlane.xlu1 %220  ;;  %v6427_v30 = vpop.xlane.xlu0 %217 }
  0xb9   :  { %11966 = vst [vmem:[#allocation25_spill] sm:$0xff] %v6425_v47  ;;  %11967 = vst [vmem:[#allocation26_spill] sm:$0xff] %v6427_v30  ;;  %v441_v30 = vsel %vm155_vm0, %v118_v62, 0.0  ;;  %v119_v47 = vld [vmem:[%s11708_s0 + $0x300] sm:$0xff] }
  0xba   :  { %v444_v62 = vsel %vm155_vm0, %v119_v47, 0.0  ;;  %v124_v47 = vld [vmem:[%s11708_s0 + $0x328] sm:$0xff] }
  0xbb   :  { %436 = vadd.xlane.f32.xlu1 %v435_v55  ;;  %433 = vadd.xlane.f32.xlu0 %v432_v54 }
  0xbc   :  { %v6437_v15 = vpop.xlane.xlu1 %226  ;;  %v6439_v14 = vpop.xlane.xlu0 %223 }
  0xbd   :  { %11968 = vst [vmem:[#allocation27_spill] sm:$0xff] %v6437_v15  ;;  %11969 = vst [vmem:[#allocation28_spill] sm:$0xff] %v6439_v14  ;;  %v447_v14 = vsel %vm155_vm0, %v120_v31, 0.0  ;;  %v121_v15 = vld [vmem:[%s11708_s0 + $0x310] sm:$0xff] }
  0xbe   :  { %v450_v31 = vsel %vm155_vm0, %v121_v15, 0.0  ;;  %v126_v15 = vld [vmem:[%s11708_s0 + $0x338] sm:$0xff] }
  0xbf   :  { %442 = vadd.xlane.f32.xlu1 %v441_v30  ;;  %439 = vadd.xlane.f32.xlu0 %v438_v46 }
  0xc0   :  { %v6449_v55 = vpop.xlane.xlu1 %232  ;;  %v6451_v54 = vpop.xlane.xlu0 %229 }
  0xc1   :  { %11970 = vst [vmem:[#allocation29_spill] sm:$0xff] %v6449_v55  ;;  %11971 = vst [vmem:[#allocation30_spill] sm:$0xff] %v6451_v54  ;;  %v453_v54 = vsel %vm155_vm0, %v122_v63, 0.0  ;;  %v123_v55 = vld [vmem:[%s11708_s0 + $0x320] sm:$0xff] }
  0xc2   :  { %v456_v63 = vsel %vm155_vm0, %v123_v55, 0.0  ;;  %v128_v55 = vld [vmem:[%s11708_s0 + $0x348] sm:$0xff] }
  0xc3   :  { %448 = vadd.xlane.f32.xlu1 %v447_v14  ;;  %445 = vadd.xlane.f32.xlu0 %v444_v62 }
  0xc4   :  { %v6461_v30 = vpop.xlane.xlu1 %238  ;;  %v6463_v46 = vpop.xlane.xlu0 %235 }
  0xc5   :  { %11972 = vst [vmem:[#allocation31_spill] sm:$0xff] %v6461_v30  ;;  %11973 = vst [vmem:[#allocation32_spill] sm:$0xff] %v6463_v46  ;;  %v459_v46 = vsel %vm155_vm0, %v124_v47, 0.0  ;;  %v125_v30 = vld [vmem:[%s11708_s0 + $0x330] sm:$0xff] }
  0xc6   :  { %v462_v47 = vsel %vm155_vm0, %v125_v30, 0.0  ;;  %v130_v30 = vld [vmem:[%s11708_s0 + $0x358] sm:$0xff] }
  0xc7   :  { %454 = vadd.xlane.f32.xlu1 %v453_v54  ;;  %451 = vadd.xlane.f32.xlu0 %v450_v31 }
  0xc8   :  { %v6473_v14 = vpop.xlane.xlu1 %244  ;;  %v6475_v62 = vpop.xlane.xlu0 %241 }
  0xc9   :  { %11974 = vst [vmem:[#allocation33_spill] sm:$0xff] %v6473_v14  ;;  %11975 = vst [vmem:[#allocation34_spill] sm:$0xff] %v6475_v62  ;;  %v465_v62 = vsel %vm155_vm0, %v126_v15, 0.0  ;;  %v127_v14 = vld [vmem:[%s11708_s0 + $0x340] sm:$0xff] }
  0xca   :  { %v468_v15 = vsel %vm155_vm0, %v127_v14, 0.0  ;;  %v132_v14 = vld [vmem:[%s11708_s0 + $0x368] sm:$0xff] }
  0xcb   :  { %460 = vadd.xlane.f32.xlu1 %v459_v46  ;;  %457 = vadd.xlane.f32.xlu0 %v456_v63 }
  0xcc   :  { %v6485_v54 = vpop.xlane.xlu1 %250  ;;  %v6487_v31 = vpop.xlane.xlu0 %247 }
  0xcd   :  { %11976 = vst [vmem:[#allocation35_spill] sm:$0xff] %v6485_v54  ;;  %11977 = vst [vmem:[#allocation36_spill] sm:$0xff] %v6487_v31  ;;  %v471_v31 = vsel %vm155_vm0, %v128_v55, 0.0  ;;  %v129_v54 = vld [vmem:[%s11708_s0 + $0x350] sm:$0xff] }
  0xce   :  { %v474_v55 = vsel %vm155_vm0, %v129_v54, 0.0  ;;  %v134_v54 = vld [vmem:[%s11708_s0 + $0x378] sm:$0xff] }
  0xcf   :  { %466 = vadd.xlane.f32.xlu1 %v465_v62  ;;  %463 = vadd.xlane.f32.xlu0 %v462_v47 }
  0xd0   :  { %v6497_v46 = vpop.xlane.xlu1 %256  ;;  %v6499_v63 = vpop.xlane.xlu0 %253 }
  0xd1   :  { %11978 = vst [vmem:[#allocation37_spill] sm:$0xff] %v6497_v46  ;;  %11979 = vst [vmem:[#allocation38_spill] sm:$0xff] %v6499_v63  ;;  %v477_v63 = vsel %vm155_vm0, %v130_v30, 0.0  ;;  %v131_v46 = vld [vmem:[%s11708_s0 + $0x360] sm:$0xff] }
  0xd2   :  { %v480_v30 = vsel %vm155_vm0, %v131_v46, 0.0  ;;  %v136_v46 = vld [vmem:[%s11708_s0 + $0x388] sm:$0xff] }
  0xd3   :  { %472 = vadd.xlane.f32.xlu1 %v471_v31  ;;  %469 = vadd.xlane.f32.xlu0 %v468_v15 }
  0xd4   :  { %v6509_v62 = vpop.xlane.xlu1 %262  ;;  %v6511_v47 = vpop.xlane.xlu0 %259 }
  0xd5   :  { %11980 = vst [vmem:[#allocation39_spill] sm:$0xff] %v6509_v62  ;;  %11981 = vst [vmem:[#allocation40_spill] sm:$0xff] %v6511_v47  ;;  %v483_v47 = vsel %vm155_vm0, %v132_v14, 0.0  ;;  %v133_v62 = vld [vmem:[%s11708_s0 + $0x370] sm:$0xff] }
  0xd6   :  { %v486_v14 = vsel %vm155_vm0, %v133_v62, 0.0  ;;  %v138_v62 = vld [vmem:[%s11708_s0 + $0x398] sm:$0xff] }
  0xd7   :  { %478 = vadd.xlane.f32.xlu1 %v477_v63  ;;  %475 = vadd.xlane.f32.xlu0 %v474_v55 }
  0xd8   :  { %v6521_v31 = vpop.xlane.xlu1 %268  ;;  %v6523_v15 = vpop.xlane.xlu0 %265 }
  0xd9   :  { %11982 = vst [vmem:[#allocation41_spill] sm:$0xff] %v6521_v31  ;;  %11983 = vst [vmem:[#allocation42_spill] sm:$0xff] %v6523_v15  ;;  %v489_v15 = vsel %vm155_vm0, %v134_v54, 0.0  ;;  %v135_v31 = vld [vmem:[%s11708_s0 + $0x380] sm:$0xff] }
  0xda   :  { %v492_v54 = vsel %vm155_vm0, %v135_v31, 0.0  ;;  %v140_v31 = vld [vmem:[%s11708_s0 + $0x3a8] sm:$0xff] }
  0xdb   :  { %484 = vadd.xlane.f32.xlu1 %v483_v47  ;;  %481 = vadd.xlane.f32.xlu0 %v480_v30 }
  0xdc   :  { %v6533_v63 = vpop.xlane.xlu1 %274  ;;  %v6535_v55 = vpop.xlane.xlu0 %271 }
  0xdd   :  { %11984 = vst [vmem:[#allocation43_spill] sm:$0xff] %v6533_v63  ;;  %11985 = vst [vmem:[#allocation44_spill] sm:$0xff] %v6535_v55  ;;  %v495_v55 = vsel %vm155_vm0, %v136_v46, 0.0  ;;  %v137_v63 = vld [vmem:[%s11708_s0 + $0x390] sm:$0xff] }
  0xde   :  { %v498_v46 = vsel %vm155_vm0, %v137_v63, 0.0  ;;  %v142_v63 = vld [vmem:[%s11708_s0 + $0x3b8] sm:$0xff] }
  0xdf   :  { %490 = vadd.xlane.f32.xlu1 %v489_v15  ;;  %487 = vadd.xlane.f32.xlu0 %v486_v14 }
  0xe0   :  { %v6545_v47 = vpop.xlane.xlu1 %280  ;;  %v6547_v30 = vpop.xlane.xlu0 %277 }
  0xe1   :  { %11986 = vst [vmem:[#allocation45_spill] sm:$0xff] %v6545_v47  ;;  %11987 = vst [vmem:[#allocation46_spill] sm:$0xff] %v6547_v30  ;;  %v501_v30 = vsel %vm155_vm0, %v138_v62, 0.0  ;;  %v139_v47 = vld [vmem:[%s11708_s0 + $0x3a0] sm:$0xff] }
  0xe2   :  { %v504_v62 = vsel %vm155_vm0, %v139_v47, 0.0  ;;  %v144_v47 = vld [vmem:[%s11708_s0 + $0x3c8] sm:$0xff] }
  0xe3   :  { %496 = vadd.xlane.f32.xlu1 %v495_v55  ;;  %493 = vadd.xlane.f32.xlu0 %v492_v54 }
  0xe4   :  { %v6557_v15 = vpop.xlane.xlu1 %286  ;;  %v6559_v14 = vpop.xlane.xlu0 %283 }
  0xe5   :  { %11988 = vst [vmem:[#allocation47_spill] sm:$0xff] %v6557_v15  ;;  %11989 = vst [vmem:[#allocation48_spill] sm:$0xff] %v6559_v14  ;;  %v507_v14 = vsel %vm155_vm0, %v140_v31, 0.0  ;;  %v141_v15 = vld [vmem:[%s11708_s0 + $0x3b0] sm:$0xff] }
  0xe6   :  { %v510_v31 = vsel %vm155_vm0, %v141_v15, 0.0  ;;  %v146_v15 = vld [vmem:[%s11708_s0 + $0x3d8] sm:$0xff] }
  0xe7   :  { %502 = vadd.xlane.f32.xlu1 %v501_v30  ;;  %499 = vadd.xlane.f32.xlu0 %v498_v46 }
  0xe8   :  { %v6569_v55 = vpop.xlane.xlu1 %292  ;;  %v6571_v54 = vpop.xlane.xlu0 %289 }
  0xe9   :  { %11990 = vst [vmem:[#allocation49_spill] sm:$0xff] %v6569_v55  ;;  %11991 = vst [vmem:[#allocation50_spill] sm:$0xff] %v6571_v54  ;;  %v513_v54 = vsel %vm155_vm0, %v142_v63, 0.0  ;;  %v143_v55 = vld [vmem:[%s11708_s0 + $0x3c0] sm:$0xff] }
  0xea   :  { %v516_v63 = vsel %vm155_vm0, %v143_v55, 0.0  ;;  %v148_v55 = vld [vmem:[%s11708_s0 + $0x3e8] sm:$0xff] }
  0xeb   :  { %508 = vadd.xlane.f32.xlu1 %v507_v14  ;;  %505 = vadd.xlane.f32.xlu0 %v504_v62 }
  0xec   :  { %v6581_v30 = vpop.xlane.xlu1 %298  ;;  %v6583_v46 = vpop.xlane.xlu0 %295 }
  0xed   :  { %11992 = vst [vmem:[#allocation51_spill] sm:$0xff] %v6581_v30  ;;  %11993 = vst [vmem:[#allocation52_spill] sm:$0xff] %v6583_v46  ;;  %v519_v46 = vsel %vm155_vm0, %v144_v47, 0.0  ;;  %v145_v30 = vld [vmem:[%s11708_s0 + $0x3d0] sm:$0xff] }
  0xee   :  { %v522_v47 = vsel %vm155_vm0, %v145_v30, 0.0  ;;  %v150_v30 = vld [vmem:[%s11708_s0 + $0x3f8] sm:$0xff] }
  0xef   :  { %514 = vadd.xlane.f32.xlu1 %v513_v54  ;;  %511 = vadd.xlane.f32.xlu0 %v510_v31 }
  0xf0   :  { %v6593_v14 = vpop.xlane.xlu1 %304  ;;  %v6595_v62 = vpop.xlane.xlu0 %301 }
  0xf1   :  { %11994 = vst [vmem:[#allocation53_spill] sm:$0xff] %v6593_v14  ;;  %11995 = vst [vmem:[#allocation54_spill] sm:$0xff] %v6595_v62  ;;  %v525_v62 = vsel %vm155_vm0, %v146_v15, 0.0  ;;  %v147_v14 = vld [vmem:[%s11708_s0 + $0x3e0] sm:$0xff] }
  0xf2   :  { %v528_v15 = vsel %vm155_vm0, %v147_v14, 0.0  ;;  %v152_v14 = vld [vmem:[%s11708_s0 + $0x408] sm:$0xff] }
  0xf3   :  { %520 = vadd.xlane.f32.xlu1 %v519_v46  ;;  %517 = vadd.xlane.f32.xlu0 %v516_v63 }
  0xf4   :  { %v6605_v54 = vpop.xlane.xlu1 %310  ;;  %v6607_v31 = vpop.xlane.xlu0 %307 }
  0xf5   :  { %11996 = vst [vmem:[#allocation55_spill] sm:$0xff] %v6605_v54  ;;  %11997 = vst [vmem:[#allocation56_spill] sm:$0xff] %v6607_v31  ;;  %v531_v31 = vsel %vm155_vm0, %v148_v55, 0.0  ;;  %v149_v54 = vld [vmem:[%s11708_s0 + $0x3f0] sm:$0xff] }
  0xf6   :  { %v534_v55 = vsel %vm155_vm0, %v149_v54, 0.0  ;;  %v154_v54 = vld [vmem:[%s11708_s0 + $0x418] sm:$0xff] }
  0xf7   :  { %526 = vadd.xlane.f32.xlu1 %v525_v62  ;;  %523 = vadd.xlane.f32.xlu0 %v522_v47 }
  0xf8   :  { %v6617_v46 = vpop.xlane.xlu1 %316  ;;  %v6619_v63 = vpop.xlane.xlu0 %313 }
  0xf9   :  { %11998 = vst [vmem:[#allocation57_spill] sm:$0xff] %v6617_v46  ;;  %11999 = vst [vmem:[#allocation58_spill] sm:$0xff] %v6619_v63  ;;  %v537_v63 = vsel %vm155_vm0, %v150_v30, 0.0  ;;  %v151_v46 = vld [vmem:[%s11708_s0 + $0x400] sm:$0xff] }
  0xfa   :  { %v540_v30 = vsel %vm155_vm0, %v151_v46, 0.0  ;;  %v685_v46 = vmul.f32 %v5865_v5, %v5865_v5 }
  0xfb   :  { %532 = vadd.xlane.f32.xlu1 %v531_v31  ;;  %529 = vadd.xlane.f32.xlu0 %v528_v15 }
  0xfc   :  { %v6629_v62 = vpop.xlane.xlu1 %322  ;;  %v6631_v47 = vpop.xlane.xlu0 %319 }
  0xfd   :  { %12000 = vst [vmem:[#allocation59_spill] sm:$0xff] %v6629_v62  ;;  %12001 = vst [vmem:[#allocation60_spill] sm:$0xff] %v6631_v47  ;;  %v543_v47 = vsel %vm155_vm0, %v152_v14, 0.0  ;;  %v153_v62 = vld [vmem:[%s11708_s0 + $0x410] sm:$0xff] }
  0xfe   :  { %v546_v14 = vsel %vm155_vm0, %v153_v62, 0.0  ;;  %v686_v62 = vmul.f32 %v5846_v0, %v5846_v0 }
  0xff   :  { %538 = vadd.xlane.f32.xlu1 %v537_v63  ;;  %535 = vadd.xlane.f32.xlu0 %v534_v55 }
 0x100   :  { %v6641_v31 = vpop.xlane.xlu1 %328  ;;  %v6643_v15 = vpop.xlane.xlu0 %325 }
 0x101   :  { %12002 = vst [vmem:[#allocation61_spill] sm:$0xff] %v6641_v31  ;;  %12003 = vst [vmem:[#allocation62_spill] sm:$0xff] %v6643_v15  ;;  %v549_v15 = vsel %vm155_vm0, %v154_v54, 0.0  ;;  %v684_v31 = vmul.f32 %v5851_v1, %v5851_v1  ;;  %v687_v54 = vmul.f32 %v5856_v2, %v5856_v2 }
 0x103   :  { %544 = vadd.xlane.f32.xlu1 %v543_v47  ;;  %541 = vadd.xlane.f32.xlu0 %v540_v30  ;;  %v819_v30 = vsel %vm155_vm0, %v685_v46, 0.0  ;;  %v689_v46 = vmul.f32 %v5874_v8, %v5874_v8 }
 0x104   :  { %v6653_v63 = vpop.xlane.xlu1 %334  ;;  %v6655_v55 = vpop.xlane.xlu0 %331 }
 0x105   :  { %12004 = vst [vmem:[#allocation63_spill] sm:$0xff] %v6655_v55  ;;  %v816_v55 = vsel %vm155_vm0, %v684_v31, 0.0  ;;  %v688_v31 = vmul.f32 %v5879_v9, %v5879_v9 }
 0x107   :  { %550 = vadd.xlane.f32.xlu1 %v549_v15  ;;  %547 = vadd.xlane.f32.xlu0 %v546_v14  ;;  %v825_v15 = vsel %vm155_vm0, %v687_v54, 0.0  ;;  %v822_v14 = vsel %vm155_vm0, %v686_v62, 0.0  ;;  %v691_v54 = vmul.f32 %v5888_v12, %v5888_v12  ;;  %v690_v62 = vmul.f32 %v5893_v13, %v5893_v13 }
 0x108   :  { %v6663_v39 = vpop.xlane.xlu1 %340  ;;  %v6665_v47 = vpop.xlane.xlu0 %337 }
 0x109   :  { %12005 = vst [vmem:[#allocation64_spill] sm:$0xff] %v6663_v39  ;;  %12006 = vst [vmem:[#allocation65_spill] sm:$0xff] %v6665_v47  ;;  %v5636_v47 = vld [vmem:[%s11708_s0 + $0x370] sm:$0xff] }
 0x10b   :  { %820 = vadd.xlane.f32.xlu1 %v819_v30  ;;  %817 = vadd.xlane.f32.xlu0 %v816_v55  ;;  %v831_v55 = vsel %vm155_vm0, %v689_v46, 0.0  ;;  %v828_v30 = vsel %vm155_vm0, %v688_v31, 0.0  ;;  %v693_v46 = vmul.f32 %v5902_v16, %v5902_v16  ;;  %v692_v31 = vmul.f32 %v5907_v17, %v5907_v17 }
 0x10c   :  { %v6673_v5 = vpop.xlane.xlu1 %346  ;;  %v6675_v1 = vpop.xlane.xlu0 %343 }
 0x10d   :  { %12007 = vst [vmem:[#allocation66_spill] sm:$0xff] %v6673_v5  ;;  %12008 = vst [vmem:[#allocation67_spill] sm:$0xff] %v6675_v1 }
 0x10f   :  { %826 = vadd.xlane.f32.xlu1 %v825_v15  ;;  %823 = vadd.xlane.f32.xlu0 %v822_v14  ;;  %v837_v15 = vsel %vm155_vm0, %v691_v54, 0.0  ;;  %v834_v14 = vsel %vm155_vm0, %v690_v62, 0.0  ;;  %v695_v54 = vmul.f32 %v5916_v20, %v5916_v20  ;;  %v694_v62 = vmul.f32 %v5921_v21, %v5921_v21 }
 0x110   :  { %v6683_v2 = vpop.xlane.xlu1 %352  ;;  %v6685_v0 = vpop.xlane.xlu0 %349 }
 0x111   :  { %12009 = vst [vmem:[#allocation68_spill] sm:$0xff] %v6683_v2  ;;  %12010 = vst [vmem:[#allocation69_spill] sm:$0xff] %v6685_v0  ;;  %v5632_v0 = vld [vmem:[%s11708_s0 + $0x350] sm:$0xff] }
 0x113   :  { %832 = vadd.xlane.f32.xlu1 %v831_v55  ;;  %829 = vadd.xlane.f32.xlu0 %v828_v30  ;;  %v843_v55 = vsel %vm155_vm0, %v693_v46, 0.0  ;;  %v840_v30 = vsel %vm155_vm0, %v692_v31, 0.0  ;;  %v697_v46 = vmul.f32 %v5930_v24, %v5930_v24  ;;  %v696_v31 = vmul.f32 %v5935_v25, %v5935_v25 }
 0x114   :  { %v6693_v8 = vpop.xlane.xlu1 %358  ;;  %v6695_v9 = vpop.xlane.xlu0 %355 }
 0x115   :  { %12011 = vst [vmem:[#allocation70_spill] sm:$0xff] %v6693_v8  ;;  %12012 = vst [vmem:[#allocation71_spill] sm:$0xff] %v6695_v9  ;;  %v5630_v9 = vld [vmem:[%s11708_s0 + $0x340] sm:$0xff]  ;;  %v4649_v8 = vld [vmem:[%s11709_s1 + $0x28] sm:$0xff] }
 0x117   :  { %838 = vadd.xlane.f32.xlu1 %v837_v15  ;;  %835 = vadd.xlane.f32.xlu0 %v834_v14  ;;  %v849_v15 = vsel %vm155_vm0, %v695_v54, 0.0  ;;  %v846_v14 = vsel %vm155_vm0, %v694_v62, 0.0  ;;  %v699_v54 = vmul.f32 %v5944_v28, %v5944_v28  ;;  %v698_v62 = vmul.f32 %v5949_v29, %v5949_v29 }
 0x118   :  { %v6703_v12 = vpop.xlane.xlu1 %364  ;;  %v6705_v13 = vpop.xlane.xlu0 %361 }
 0x119   :  { %12013 = vst [vmem:[#allocation72_spill] sm:$0xff] %v6703_v12  ;;  %12014 = vst [vmem:[#allocation73_spill] sm:$0xff] %v6705_v13  ;;  %v5628_v13 = vld [vmem:[%s11708_s0 + $0x330] sm:$0xff] }
 0x11a   :  { %v5656_v12 = vld [vmem:[%s11708_s0 + $0x410] sm:$0xff] }
 0x11b   :  { %844 = vadd.xlane.f32.xlu1 %v843_v55  ;;  %841 = vadd.xlane.f32.xlu0 %v840_v30  ;;  %v855_v55 = vsel %vm155_vm0, %v697_v46, 0.0  ;;  %v852_v30 = vsel %vm155_vm0, %v696_v31, 0.0  ;;  %v701_v46 = vmul.f32 %v5958_v32, %v5958_v32  ;;  %v700_v31 = vmul.f32 %v5963_v33, %v5963_v33 }
 0x11c   :  { %v6713_v16 = vpop.xlane.xlu1 %370  ;;  %v6715_v17 = vpop.xlane.xlu0 %367 }
 0x11d   :  { %12015 = vst [vmem:[#allocation74_spill] sm:$0xff] %v6713_v16  ;;  %12016 = vst [vmem:[#allocation75_spill] sm:$0xff] %v6715_v17  ;;  %v5626_v17 = vld [vmem:[%s11708_s0 + $0x320] sm:$0xff]  ;;  %v5652_v16 = vld [vmem:[%s11708_s0 + $0x3f0] sm:$0xff] }
 0x11f   :  { %850 = vadd.xlane.f32.xlu1 %v849_v15  ;;  %847 = vadd.xlane.f32.xlu0 %v846_v14  ;;  %v861_v15 = vsel %vm155_vm0, %v699_v54, 0.0  ;;  %v858_v14 = vsel %vm155_vm0, %v698_v62, 0.0  ;;  %v703_v54 = vmul.f32 %v5972_v36, %v5972_v36  ;;  %v702_v62 = vmul.f32 %v5977_v37, %v5977_v37 }
 0x120   :  { %v6723_v20 = vpop.xlane.xlu1 %376  ;;  %v6725_v21 = vpop.xlane.xlu0 %373 }
 0x121   :  { %12017 = vst [vmem:[#allocation76_spill] sm:$0xff] %v6723_v20  ;;  %12018 = vst [vmem:[#allocation77_spill] sm:$0xff] %v6725_v21  ;;  %v5624_v21 = vld [vmem:[%s11708_s0 + $0x310] sm:$0xff] }
 0x122   :  { %v5648_v20 = vld [vmem:[%s11708_s0 + $0x3d0] sm:$0xff] }
 0x123   :  { %856 = vadd.xlane.f32.xlu1 %v855_v55  ;;  %853 = vadd.xlane.f32.xlu0 %v852_v30  ;;  %v867_v55 = vsel %vm155_vm0, %v701_v46, 0.0  ;;  %v864_v30 = vsel %vm155_vm0, %v700_v31, 0.0  ;;  %v705_v46 = vmul.f32 %v5986_v40, %v5986_v40  ;;  %v704_v31 = vmul.f32 %v5991_v41, %v5991_v41 }
 0x124   :  { %v6733_v24 = vpop.xlane.xlu1 %382  ;;  %v6735_v25 = vpop.xlane.xlu0 %379 }
 0x125   :  { %12019 = vst [vmem:[#allocation78_spill] sm:$0xff] %v6733_v24  ;;  %12020 = vst [vmem:[#allocation79_spill] sm:$0xff] %v6735_v25  ;;  %v5622_v25 = vld [vmem:[%s11708_s0 + $0x300] sm:$0xff]  ;;  %v5644_v24 = vld [vmem:[%s11708_s0 + $0x3b0] sm:$0xff] }
 0x127   :  { %862 = vadd.xlane.f32.xlu1 %v861_v15  ;;  %859 = vadd.xlane.f32.xlu0 %v858_v14  ;;  %v873_v15 = vsel %vm155_vm0, %v703_v54, 0.0  ;;  %v870_v14 = vsel %vm155_vm0, %v702_v62, 0.0  ;;  %v707_v54 = vmul.f32 %v6000_v44, %v6000_v44  ;;  %v706_v62 = vmul.f32 %v6005_v45, %v6005_v45 }
 0x128   :  { %v6743_v28 = vpop.xlane.xlu1 %388  ;;  %v6745_v29 = vpop.xlane.xlu0 %385 }
 0x129   :  { %12021 = vst [vmem:[#allocation80_spill] sm:$0xff] %v6743_v28  ;;  %12022 = vst [vmem:[#allocation81_spill] sm:$0xff] %v6745_v29  ;;  %v5620_v29 = vld [vmem:[%s11708_s0 + $0x2f0] sm:$0xff]  ;;  %v5643_v28 = vld [vmem:[%s11708_s0 + $0x3b8] sm:$0xff] }
 0x12b   :  { %868 = vadd.xlane.f32.xlu1 %v867_v55  ;;  %865 = vadd.xlane.f32.xlu0 %v864_v30  ;;  %v879_v55 = vsel %vm155_vm0, %v705_v46, 0.0  ;;  %v876_v30 = vsel %vm155_vm0, %v704_v31, 0.0  ;;  %v709_v46 = vmul.f32 %v6014_v48, %v6014_v48  ;;  %v708_v31 = vmul.f32 %v6019_v49, %v6019_v49 }
 0x12c   :  { %v6753_v32 = vpop.xlane.xlu1 %394  ;;  %v6755_v33 = vpop.xlane.xlu0 %391 }
 0x12d   :  { %12023 = vst [vmem:[#allocation82_spill] sm:$0xff] %v6753_v32  ;;  %12024 = vst [vmem:[#allocation83_spill] sm:$0xff] %v6755_v33  ;;  %v5618_v33 = vld [vmem:[%s11708_s0 + $0x2e0] sm:$0xff] }
 0x12e   :  { %v5642_v32 = vld [vmem:[%s11708_s0 + $0x3a0] sm:$0xff] }
 0x12f   :  { %874 = vadd.xlane.f32.xlu1 %v873_v15  ;;  %871 = vadd.xlane.f32.xlu0 %v870_v14  ;;  %v885_v15 = vsel %vm155_vm0, %v707_v54, 0.0  ;;  %v882_v14 = vsel %vm155_vm0, %v706_v62, 0.0  ;;  %v711_v54 = vmul.f32 %v6028_v52, %v6028_v52  ;;  %v710_v62 = vmul.f32 %v6033_v53, %v6033_v53 }
 0x130   :  { %v6763_v36 = vpop.xlane.xlu1 %400  ;;  %v6765_v37 = vpop.xlane.xlu0 %397 }
 0x131   :  { %12025 = vst [vmem:[#allocation84_spill] sm:$0xff] %v6763_v36  ;;  %12026 = vst [vmem:[#allocation85_spill] sm:$0xff] %v6765_v37  ;;  %v5616_v37 = vld [vmem:[%s11708_s0 + $0x2d0] sm:$0xff]  ;;  %v5641_v36 = vld [vmem:[%s11708_s0 + $0x3a8] sm:$0xff] }
 0x133   :  { %880 = vadd.xlane.f32.xlu1 %v879_v55  ;;  %877 = vadd.xlane.f32.xlu0 %v876_v30  ;;  %v891_v55 = vsel %vm155_vm0, %v709_v46, 0.0  ;;  %v888_v30 = vsel %vm155_vm0, %v708_v31, 0.0  ;;  %v713_v46 = vmul.f32 %v6042_v56, %v6042_v56  ;;  %v712_v31 = vmul.f32 %v6047_v57, %v6047_v57 }
 0x134   :  { %v6773_v40 = vpop.xlane.xlu1 %406  ;;  %v6775_v41 = vpop.xlane.xlu0 %403 }
 0x135   :  { %12027 = vst [vmem:[#allocation86_spill] sm:$0xff] %v6773_v40  ;;  %12028 = vst [vmem:[#allocation87_spill] sm:$0xff] %v6775_v41  ;;  %v5614_v41 = vld [vmem:[%s11708_s0 + $0x2c0] sm:$0xff]  ;;  %v5640_v40 = vld [vmem:[%s11708_s0 + $0x390] sm:$0xff] }
 0x137   :  { %886 = vadd.xlane.f32.xlu1 %v885_v15  ;;  %883 = vadd.xlane.f32.xlu0 %v882_v14  ;;  %v897_v15 = vsel %vm155_vm0, %v711_v54, 0.0  ;;  %v894_v14 = vsel %vm155_vm0, %v710_v62, 0.0  ;;  %v715_v54 = vmul.f32 %v6056_v60, %v6056_v60  ;;  %v714_v62 = vmul.f32 %v6061_v61, %v6061_v61 }
 0x138   :  { %v6783_v44 = vpop.xlane.xlu1 %412  ;;  %v6785_v45 = vpop.xlane.xlu0 %409 }
 0x139   :  { %12029 = vst [vmem:[#allocation88_spill] sm:$0xff] %v6783_v44  ;;  %12030 = vst [vmem:[#allocation89_spill] sm:$0xff] %v6785_v45  ;;  %v5612_v45 = vld [vmem:[%s11708_s0 + $0x2b0] sm:$0xff]  ;;  %v5639_v44 = vld [vmem:[%s11708_s0 + $0x398] sm:$0xff] }
 0x13b   :  { %892 = vadd.xlane.f32.xlu1 %v891_v55  ;;  %889 = vadd.xlane.f32.xlu0 %v888_v30  ;;  %v903_v55 = vsel %vm155_vm0, %v713_v46, 0.0  ;;  %v900_v30 = vsel %vm155_vm0, %v712_v31, 0.0  ;;  %v717_v46 = vmul.f32 %v6070_v3, %v6070_v3  ;;  %v716_v31 = vmul.f32 %v6075_v4, %v6075_v4 }
 0x13c   :  { %v6793_v48 = vpop.xlane.xlu1 %418  ;;  %v6795_v49 = vpop.xlane.xlu0 %415 }
 0x13d   :  { %12031 = vst [vmem:[#allocation90_spill] sm:$0xff] %v6793_v48  ;;  %12032 = vst [vmem:[#allocation91_spill] sm:$0xff] %v6795_v49  ;;  %v5610_v49 = vld [vmem:[%s11708_s0 + $0x2a0] sm:$0xff] }
 0x13e   :  { %v5638_v48 = vld [vmem:[%s11708_s0 + $0x380] sm:$0xff] }
 0x13f   :  { %898 = vadd.xlane.f32.xlu1 %v897_v15  ;;  %895 = vadd.xlane.f32.xlu0 %v894_v14  ;;  %v909_v15 = vsel %vm155_vm0, %v715_v54, 0.0  ;;  %v906_v14 = vsel %vm155_vm0, %v714_v62, 0.0  ;;  %v719_v54 = vmul.f32 %v6084_v10, %v6084_v10  ;;  %v718_v62 = vmul.f32 %v6089_v11, %v6089_v11 }
 0x140   :  { %v6803_v52 = vpop.xlane.xlu1 %424  ;;  %v6805_v53 = vpop.xlane.xlu0 %421 }
 0x141   :  { %12033 = vst [vmem:[#allocation92_spill] sm:$0xff] %v6803_v52  ;;  %12034 = vst [vmem:[#allocation93_spill] sm:$0xff] %v6805_v53  ;;  %v5608_v53 = vld [vmem:[%s11708_s0 + $0x290] sm:$0xff]  ;;  %v5637_v52 = vld [vmem:[%s11708_s0 + $0x388] sm:$0xff] }
 0x143   :  { %904 = vadd.xlane.f32.xlu1 %v903_v55  ;;  %901 = vadd.xlane.f32.xlu0 %v900_v30  ;;  %v915_v55 = vsel %vm155_vm0, %v717_v46, 0.0  ;;  %v912_v30 = vsel %vm155_vm0, %v716_v31, 0.0  ;;  %v721_v46 = vmul.f32 %v6098_v18, %v6098_v18  ;;  %v720_v31 = vmul.f32 %v6103_v19, %v6103_v19 }
 0x144   :  { %v6813_v56 = vpop.xlane.xlu1 %430  ;;  %v6815_v57 = vpop.xlane.xlu0 %427 }
 0x145   :  { %12035 = vst [vmem:[#allocation94_spill] sm:$0xff] %v6813_v56  ;;  %12036 = vst [vmem:[#allocation95_spill] sm:$0xff] %v6815_v57  ;;  %v5606_v57 = vld [vmem:[%s11708_s0 + $0x280] sm:$0xff]  ;;  %v5635_v56 = vld [vmem:[%s11708_s0 + $0x378] sm:$0xff] }
 0x147   :  { %910 = vadd.xlane.f32.xlu1 %v909_v15  ;;  %907 = vadd.xlane.f32.xlu0 %v906_v14  ;;  %v921_v15 = vsel %vm155_vm0, %v719_v54, 0.0  ;;  %v918_v14 = vsel %vm155_vm0, %v718_v62, 0.0  ;;  %v723_v54 = vmul.f32 %v6112_v26, %v6112_v26  ;;  %v722_v62 = vmul.f32 %v6117_v27, %v6117_v27 }
 0x148   :  { %v6823_v60 = vpop.xlane.xlu1 %436  ;;  %v6825_v61 = vpop.xlane.xlu0 %433 }
 0x149   :  { %12037 = vst [vmem:[#allocation96_spill] sm:$0xff] %v6823_v60  ;;  %12038 = vst [vmem:[#allocation97_spill] sm:$0xff] %v6825_v61  ;;  %v5604_v61 = vld [vmem:[%s11708_s0 + $0x270] sm:$0xff] }
 0x14b   :  { %916 = vadd.xlane.f32.xlu1 %v915_v55  ;;  %913 = vadd.xlane.f32.xlu0 %v912_v30  ;;  %v927_v55 = vsel %vm155_vm0, %v721_v46, 0.0  ;;  %v924_v30 = vsel %vm155_vm0, %v720_v31, 0.0  ;;  %v725_v46 = vmul.f32 %v6126_v34, %v6126_v34  ;;  %v724_v31 = vmul.f32 %v6131_v35, %v6131_v35 }
 0x14c   :  { %v6833_v3 = vpop.xlane.xlu1 %442  ;;  %v6835_v4 = vpop.xlane.xlu0 %439 }
 0x14d   :  { %12039 = vst [vmem:[#allocation98_spill] sm:$0xff] %v6833_v3  ;;  %12040 = vst [vmem:[#allocation99_spill] sm:$0xff] %v6835_v4  ;;  %v5602_v4 = vld [vmem:[%s11708_s0 + $0x260] sm:$0xff] }
 0x14f   :  { %922 = vadd.xlane.f32.xlu1 %v921_v15  ;;  %919 = vadd.xlane.f32.xlu0 %v918_v14  ;;  %v933_v15 = vsel %vm155_vm0, %v723_v54, 0.0  ;;  %v930_v14 = vsel %vm155_vm0, %v722_v62, 0.0  ;;  %v727_v54 = vmul.f32 %v6140_v42, %v6140_v42  ;;  %v726_v62 = vmul.f32 %v6145_v43, %v6145_v43 }
 0x150   :  { %v6843_v10 = vpop.xlane.xlu1 %448  ;;  %v6845_v11 = vpop.xlane.xlu0 %445 }
 0x151   :  { %12041 = vst [vmem:[#allocation100_spill] sm:$0xff] %v6843_v10  ;;  %12042 = vst [vmem:[#allocation101_spill] sm:$0xff] %v6845_v11  ;;  %v5594_v11 = vld [vmem:[%s11708_s0 + $0x220] sm:$0xff] }
 0x153   :  { %928 = vadd.xlane.f32.xlu1 %v927_v55  ;;  %925 = vadd.xlane.f32.xlu0 %v924_v30  ;;  %v939_v55 = vsel %vm155_vm0, %v725_v46, 0.0  ;;  %v936_v30 = vsel %vm155_vm0, %v724_v31, 0.0  ;;  %v729_v46 = vmul.f32 %v6154_v50, %v6154_v50  ;;  %v728_v31 = vmul.f32 %v6159_v51, %v6159_v51 }
 0x154   :  { %v6853_v18 = vpop.xlane.xlu1 %454  ;;  %v6855_v19 = vpop.xlane.xlu0 %451 }
 0x155   :  { %12043 = vst [vmem:[#allocation102_spill] sm:$0xff] %v6853_v18  ;;  %12044 = vst [vmem:[#allocation103_spill] sm:$0xff] %v6855_v19  ;;  %v5592_v19 = vld [vmem:[%s11708_s0 + $0x210] sm:$0xff]  ;;  %v5627_v18 = vld [vmem:[%s11708_s0 + $0x338] sm:$0xff] }
 0x157   :  { %934 = vadd.xlane.f32.xlu1 %v933_v15  ;;  %931 = vadd.xlane.f32.xlu0 %v930_v14  ;;  %v945_v15 = vsel %vm155_vm0, %v727_v54, 0.0  ;;  %v942_v14 = vsel %vm155_vm0, %v726_v62, 0.0  ;;  %v731_v54 = vmul.f32 %v6168_v58, %v6168_v58  ;;  %v730_v62 = vmul.f32 %v6173_v59, %v6173_v59 }
 0x158   :  { %v6863_v26 = vpop.xlane.xlu1 %460  ;;  %v6865_v27 = vpop.xlane.xlu0 %457 }
 0x159   :  { %12045 = vst [vmem:[#allocation104_spill] sm:$0xff] %v6863_v26  ;;  %12046 = vst [vmem:[#allocation105_spill] sm:$0xff] %v6865_v27  ;;  %v5590_v27 = vld [vmem:[%s11708_s0 + $0x200] sm:$0xff]  ;;  %v5625_v26 = vld [vmem:[%s11708_s0 + $0x328] sm:$0xff] }
 0x15b   :  { %940 = vadd.xlane.f32.xlu1 %v939_v55  ;;  %937 = vadd.xlane.f32.xlu0 %v936_v30  ;;  %v951_v55 = vsel %vm155_vm0, %v729_v46, 0.0  ;;  %v948_v30 = vsel %vm155_vm0, %v728_v31, 0.0  ;;  %v733_v46 = vmul.f32 %v6182_v6, %v6182_v6  ;;  %v732_v31 = vmul.f32 %v6187_v7, %v6187_v7 }
 0x15c   :  { %v6873_v34 = vpop.xlane.xlu1 %466  ;;  %v6875_v35 = vpop.xlane.xlu0 %463 }
 0x15d   :  { %12047 = vst [vmem:[#allocation106_spill] sm:$0xff] %v6873_v34  ;;  %12048 = vst [vmem:[#allocation107_spill] sm:$0xff] %v6875_v35  ;;  %v5588_v35 = vld [vmem:[%s11708_s0 + $0x1f0] sm:$0xff]  ;;  %v5623_v34 = vld [vmem:[%s11708_s0 + $0x318] sm:$0xff] }
 0x15f   :  { %946 = vadd.xlane.f32.xlu1 %v945_v15  ;;  %943 = vadd.xlane.f32.xlu0 %v942_v14  ;;  %v957_v15 = vsel %vm155_vm0, %v731_v54, 0.0  ;;  %v954_v14 = vsel %vm155_vm0, %v730_v62, 0.0  ;;  %v735_v54 = vmul.f32 %v6196_v22, %v6196_v22  ;;  %v734_v62 = vmul.f32 %v6201_v23, %v6201_v23 }
 0x160   :  { %v6883_v42 = vpop.xlane.xlu1 %472  ;;  %v6885_v43 = vpop.xlane.xlu0 %469 }
 0x161   :  { %12049 = vst [vmem:[#allocation108_spill] sm:$0xff] %v6883_v42  ;;  %12050 = vst [vmem:[#allocation109_spill] sm:$0xff] %v6885_v43  ;;  %v5586_v43 = vld [vmem:[%s11708_s0 + $0x1e0] sm:$0xff]  ;;  %v5621_v42 = vld [vmem:[%s11708_s0 + $0x308] sm:$0xff] }
 0x163   :  { %952 = vadd.xlane.f32.xlu1 %v951_v55  ;;  %949 = vadd.xlane.f32.xlu0 %v948_v30  ;;  %v963_v55 = vsel %vm155_vm0, %v733_v46, 0.0  ;;  %v960_v30 = vsel %vm155_vm0, %v732_v31, 0.0  ;;  %v737_v46 = vmul.f32 %v6210_v38, %v6210_v38  ;;  %v12057_v31 = vld [vmem:[#allocation2_spill] sm:$0xff] }
 0x164   :  { %v6893_v50 = vpop.xlane.xlu1 %478  ;;  %v6895_v51 = vpop.xlane.xlu0 %475 }
 0x165   :  { %12051 = vst [vmem:[#allocation110_spill] sm:$0xff] %v6893_v50  ;;  %12052 = vst [vmem:[#allocation111_spill] sm:$0xff] %v6895_v51  ;;  %v5619_v50 = vld [vmem:[%s11708_s0 + $0x2f8] sm:$0xff] }
 0x167   :  { %958 = vadd.xlane.f32.xlu1 %v957_v15  ;;  %955 = vadd.xlane.f32.xlu0 %v954_v14  ;;  %v969_v15 = vsel %vm155_vm0, %v735_v54, 0.0  ;;  %v966_v14 = vsel %vm155_vm0, %v734_v62, 0.0  ;;  %v12061_v62 = vld [vmem:[#allocation4_spill] sm:$0xff] }
 0x168   :  { %v6903_v58 = vpop.xlane.xlu1 %484  ;;  %v6905_v59 = vpop.xlane.xlu0 %481  ;;  %v738_v51 = vmul.f32 %v12061_v62, %v12061_v62 }
 0x169   :  { %12053 = vst [vmem:[#allocation112_spill] sm:$0xff] %v6903_v58  ;;  %12054 = vst [vmem:[#allocation113_spill] sm:$0xff] %v6905_v59  ;;  %v736_v59 = vmul.f32 %v12057_v31, %v12057_v31  ;;  %v5617_v58 = vld [vmem:[%s11708_s0 + $0x2e8] sm:$0xff] }
 0x16a   :  { %v978_v31 = vsel %vm155_vm0, %v738_v51, 0.0 }
 0x16b   :  { %964 = vadd.xlane.f32.xlu1 %v963_v55  ;;  %961 = vadd.xlane.f32.xlu0 %v960_v30  ;;  %v975_v55 = vsel %vm155_vm0, %v737_v46, 0.0  ;;  %v972_v30 = vsel %vm155_vm0, %v736_v59, 0.0  ;;  %v5581_v59 = vld [vmem:[%s11708_s0 + $0x1c8] sm:$0xff] }
 0x16c   :  { %v6913_v6 = vpop.xlane.xlu1 %490  ;;  %v6915_v7 = vpop.xlane.xlu0 %487  ;;  %v741_v46 = vmul.f32 %v5581_v59, %v5581_v59 }
 0x16d   :  { %12055 = vst [vmem:[#allocation114_spill] sm:$0xff] %v6913_v6  ;;  %12056 = vst [vmem:[#allocation115_spill] sm:$0xff] %v6915_v7  ;;  %v12060_v7 = vld [vmem:[#allocation3_spill] sm:$0xff]  ;;  %v5615_v6 = vld [vmem:[%s11708_s0 + $0x2d8] sm:$0xff] }
 0x16e   :  { %v739_v54 = vmul.f32 %v12060_v7, %v12060_v7  ;;  %v5582_v7 = vld [vmem:[%s11708_s0 + $0x1c0] sm:$0xff] }
 0x16f   :  { %970 = vadd.xlane.f32.xlu1 %v969_v15  ;;  %967 = vadd.xlane.f32.xlu0 %v966_v14  ;;  %v740_v62 = vmul.f32 %v5582_v7, %v5582_v7 }
 0x170   :  { %v6923_v22 = vpop.xlane.xlu1 %496  ;;  %v6925_v23 = vpop.xlane.xlu0 %493  ;;  %v981_v14 = vsel %vm155_vm0, %v739_v54, 0.0  ;;  %v987_v54 = vsel %vm155_vm0, %v741_v46, 0.0 }
 0x171   :  { %12058 = vst [vmem:[#allocation2_spill] sm:$0xff] %v6923_v22  ;;  %12059 = vst [vmem:[#allocation116_spill] sm:$0xff] %v6925_v23  ;;  %v984_v51 = vsel %vm155_vm0, %v740_v62, 0.0  ;;  %v5584_v23 = vld [vmem:[%s11708_s0 + $0x1d0] sm:$0xff]  ;;  %v5613_v22 = vld [vmem:[%s11708_s0 + $0x2c8] sm:$0xff] }
 0x172   :  { %v742_v7 = vmul.f32 %v5584_v23, %v5584_v23  ;;  %v744_v23 = vmul.f32 %v5586_v43, %v5586_v43  ;;  %v746_v43 = vmul.f32 %v5588_v35, %v5588_v35  ;;  %v748_v35 = vmul.f32 %v5590_v27, %v5590_v27 }
 0x173   :  { %976 = vadd.xlane.f32.xlu1 %v975_v55  ;;  %973 = vadd.xlane.f32.xlu0 %v972_v30  ;;  %v750_v27 = vmul.f32 %v5592_v19, %v5592_v19  ;;  %v752_v19 = vmul.f32 %v5594_v11, %v5594_v11 }
 0x174   :  { %v6933_v38 = vpop.xlane.xlu1 %502  ;;  %v6935_v15 = vpop.xlane.xlu0 %499  ;;  %v990_v62 = vsel %vm155_vm0, %v742_v7, 0.0  ;;  %v996_v7 = vsel %vm155_vm0, %v744_v23, 0.0  ;;  %v1002_v23 = vsel %vm155_vm0, %v746_v43, 0.0  ;;  %v1008_v43 = vsel %vm155_vm0, %v748_v35, 0.0 }
 0x175   :  { %12062 = vst [vmem:[#allocation3_spill] sm:$0xff] %v6933_v38  ;;  %12063 = vst [vmem:[#allocation4_spill] sm:$0xff] %v6935_v15  ;;  %v5583_v15 = vld [vmem:[%s11708_s0 + $0x1d8] sm:$0xff]  ;;  %v1014_v35 = vsel %vm155_vm0, %v750_v27, 0.0  ;;  %v1020_v27 = vsel %vm155_vm0, %v752_v19, 0.0 }
 0x176   :  { %v743_v59 = vmul.f32 %v5583_v15, %v5583_v15  ;;  %v5611_v38 = vld [vmem:[%s11708_s0 + $0x2b8] sm:$0xff] }
 0x177   :  { %982 = vadd.xlane.f32.xlu1 %v981_v14  ;;  %979 = vadd.xlane.f32.xlu0 %v978_v31 }
 0x178   :  { %v6945_v55 = vpop.xlane.xlu1 %508  ;;  %v6947_v30 = vpop.xlane.xlu0 %505  ;;  %v993_v46 = vsel %vm155_vm0, %v743_v59, 0.0 }
 0x179   :  { %12064 = vst [vmem:[#allocation117_spill] sm:$0xff] %v6945_v55  ;;  %12065 = vst [vmem:[#allocation118_spill] sm:$0xff] %v6947_v30  ;;  %v5585_v30 = vld [vmem:[%s11708_s0 + $0x1e8] sm:$0xff] }
 0x17a   :  { %v745_v15 = vmul.f32 %v5585_v30, %v5585_v30  ;;  %v5609_v55 = vld [vmem:[%s11708_s0 + $0x2a8] sm:$0xff] }
 0x17b   :  { %988 = vadd.xlane.f32.xlu1 %v987_v54  ;;  %985 = vadd.xlane.f32.xlu0 %v984_v51 }
 0x17c   :  { %v6957_v14 = vpop.xlane.xlu1 %514  ;;  %v6959_v31 = vpop.xlane.xlu0 %511  ;;  %v999_v59 = vsel %vm155_vm0, %v745_v15, 0.0 }
 0x17d   :  { %12066 = vst [vmem:[#allocation119_spill] sm:$0xff] %v6957_v14  ;;  %12067 = vst [vmem:[#allocation120_spill] sm:$0xff] %v6959_v31  ;;  %v5587_v31 = vld [vmem:[%s11708_s0 + $0x1f8] sm:$0xff] }
 0x17e   :  { %v747_v30 = vmul.f32 %v5587_v31, %v5587_v31  ;;  %v5607_v14 = vld [vmem:[%s11708_s0 + $0x298] sm:$0xff] }
 0x17f   :  { %994 = vadd.xlane.f32.xlu1 %v993_v46  ;;  %991 = vadd.xlane.f32.xlu0 %v990_v62 }
 0x180   :  { %v6969_v54 = vpop.xlane.xlu1 %520  ;;  %v6971_v51 = vpop.xlane.xlu0 %517  ;;  %v1005_v15 = vsel %vm155_vm0, %v747_v30, 0.0 }
 0x181   :  { %12068 = vst [vmem:[#allocation121_spill] sm:$0xff] %v6969_v54  ;;  %12069 = vst [vmem:[#allocation122_spill] sm:$0xff] %v6971_v51  ;;  %v5589_v51 = vld [vmem:[%s11708_s0 + $0x208] sm:$0xff] }
 0x182   :  { %v749_v31 = vmul.f32 %v5589_v51, %v5589_v51  ;;  %v5605_v54 = vld [vmem:[%s11708_s0 + $0x288] sm:$0xff] }
 0x183   :  { %1000 = vadd.xlane.f32.xlu1 %v999_v59  ;;  %997 = vadd.xlane.f32.xlu0 %v996_v7 }
 0x184   :  { %v6981_v46 = vpop.xlane.xlu1 %526  ;;  %v6983_v62 = vpop.xlane.xlu0 %523  ;;  %v1011_v30 = vsel %vm155_vm0, %v749_v31, 0.0 }
 0x185   :  { %12070 = vst [vmem:[#allocation123_spill] sm:$0xff] %v6981_v46  ;;  %12071 = vst [vmem:[#allocation124_spill] sm:$0xff] %v6983_v62  ;;  %v5591_v62 = vld [vmem:[%s11708_s0 + $0x218] sm:$0xff] }
 0x186   :  { %v751_v51 = vmul.f32 %v5591_v62, %v5591_v62  ;;  %v5603_v46 = vld [vmem:[%s11708_s0 + $0x278] sm:$0xff] }
 0x187   :  { %1006 = vadd.xlane.f32.xlu1 %v1005_v15  ;;  %1003 = vadd.xlane.f32.xlu0 %v1002_v23 }
 0x188   :  { %v6993_v59 = vpop.xlane.xlu1 %532  ;;  %v6995_v7 = vpop.xlane.xlu0 %529  ;;  %v1017_v31 = vsel %vm155_vm0, %v751_v51, 0.0 }
 0x189   :  { %12072 = vst [vmem:[#allocation125_spill] sm:$0xff] %v6993_v59  ;;  %12073 = vst [vmem:[#allocation126_spill] sm:$0xff] %v6995_v7  ;;  %v5593_v7 = vld [vmem:[%s11708_s0 + $0x228] sm:$0xff] }
 0x18a   :  { %v753_v62 = vmul.f32 %v5593_v7, %v5593_v7  ;;  %v5601_v59 = vld [vmem:[%s11708_s0 + $0x268] sm:$0xff] }
 0x18b   :  { %1012 = vadd.xlane.f32.xlu1 %v1011_v30  ;;  %1009 = vadd.xlane.f32.xlu0 %v1008_v43 }
 0x18c   :  { %v7005_v15 = vpop.xlane.xlu1 %538  ;;  %v7007_v23 = vpop.xlane.xlu0 %535  ;;  %v1023_v51 = vsel %vm155_vm0, %v753_v62, 0.0 }
 0x18d   :  { %12074 = vst [vmem:[#allocation127_spill] sm:$0xff] %v7005_v15  ;;  %12075 = vst [vmem:[#allocation128_spill] sm:$0xff] %v7007_v23  ;;  %v5595_v23 = vld [vmem:[%s11708_s0 + $0x238] sm:$0xff]  ;;  %v5596_v15 = vld [vmem:[%s11708_s0 + $0x230] sm:$0xff] }
 0x18e   :  { %v755_v7 = vmul.f32 %v5595_v23, %v5595_v23  ;;  %v754_v11 = vmul.f32 %v5596_v15, %v5596_v15 }
 0x18f   :  { %1018 = vadd.xlane.f32.xlu1 %v1017_v31  ;;  %1015 = vadd.xlane.f32.xlu0 %v1014_v35 }
 0x190   :  { %v7017_v30 = vpop.xlane.xlu1 %544  ;;  %v7019_v43 = vpop.xlane.xlu0 %541  ;;  %v1029_v62 = vsel %vm155_vm0, %v755_v7, 0.0  ;;  %v1026_v19 = vsel %vm155_vm0, %v754_v11, 0.0 }
 0x191   :  { %12076 = vst [vmem:[#allocation129_spill] sm:$0xff] %v7017_v30  ;;  %12077 = vst [vmem:[#allocation130_spill] sm:$0xff] %v7019_v43  ;;  %v5597_v43 = vld [vmem:[%s11708_s0 + $0x248] sm:$0xff]  ;;  %v5598_v30 = vld [vmem:[%s11708_s0 + $0x240] sm:$0xff] }
 0x192   :  { %v757_v23 = vmul.f32 %v5597_v43, %v5597_v43  ;;  %v756_v15 = vmul.f32 %v5598_v30, %v5598_v30 }
 0x193   :  { %1024 = vadd.xlane.f32.xlu1 %v1023_v51  ;;  %1021 = vadd.xlane.f32.xlu0 %v1020_v27 }
 0x194   :  { %v7029_v31 = vpop.xlane.xlu1 %550  ;;  %v7031_v35 = vpop.xlane.xlu0 %547  ;;  %v1035_v7 = vsel %vm155_vm0, %v757_v23, 0.0  ;;  %v1032_v11 = vsel %vm155_vm0, %v756_v15, 0.0 }
 0x195   :  { %12078 = vst [vmem:[#allocation131_spill] sm:$0xff] %v7029_v31  ;;  %12079 = vst [vmem:[#allocation132_spill] sm:$0xff] %v7031_v35  ;;  %v5599_v35 = vld [vmem:[%s11708_s0 + $0x258] sm:$0xff]  ;;  %v5600_v31 = vld [vmem:[%s11708_s0 + $0x250] sm:$0xff] }
 0x196   :  { %v759_v43 = vmul.f32 %v5599_v35, %v5599_v35  ;;  %v758_v30 = vmul.f32 %v5600_v31, %v5600_v31  ;;  %v761_v35 = vmul.f32 %v5601_v59, %v5601_v59  ;;  %v760_v31 = vmul.f32 %v5602_v4, %v5602_v4 }
 0x197   :  { %1030 = vadd.xlane.f32.xlu1 %v1029_v62  ;;  %1027 = vadd.xlane.f32.xlu0 %v1026_v19  ;;  %v763_v59 = vmul.f32 %v5603_v46, %v5603_v46  ;;  %v762_v4 = vmul.f32 %v5604_v61, %v5604_v61  ;;  %v765_v46 = vmul.f32 %v5605_v54, %v5605_v54 }
 0x198   :  { %v7041_v51 = vpop.xlane.xlu1 %820  ;;  %v7043_v27 = vpop.xlane.xlu0 %817  ;;  %v1041_v23 = vsel %vm155_vm0, %v759_v43, 0.0  ;;  %v1038_v15 = vsel %vm155_vm0, %v758_v30, 0.0  ;;  %v1047_v43 = vsel %vm155_vm0, %v761_v35, 0.0  ;;  %v1044_v30 = vsel %vm155_vm0, %v760_v31, 0.0 }
 0x199   :  { %v1053_v35 = vsel %vm155_vm0, %v763_v59, 0.0  ;;  %v1050_v31 = vsel %vm155_vm0, %v762_v4, 0.0  ;;  %v764_v61 = vmul.f32 %v5606_v57, %v5606_v57  ;;  %v1059_v59 = vsel %vm155_vm0, %v765_v46, 0.0 }
 0x19a   :  { %v767_v54 = vmul.f32 %v5607_v14, %v5607_v14  ;;  %v766_v57 = vmul.f32 %v5608_v53, %v5608_v53  ;;  %v769_v14 = vmul.f32 %v5609_v55, %v5609_v55  ;;  %v768_v53 = vmul.f32 %v5610_v49, %v5610_v49 }
 0x19b   :  { %1036 = vadd.xlane.f32.xlu1 %v1035_v7  ;;  %1033 = vadd.xlane.f32.xlu0 %v1032_v11  ;;  %v1056_v4 = vsel %vm155_vm0, %v764_v61, 0.0  ;;  %v771_v55 = vmul.f32 %v5611_v38, %v5611_v38  ;;  %v770_v49 = vmul.f32 %v5612_v45, %v5612_v45  ;;  %v773_v38 = vmul.f32 %v5613_v22, %v5613_v22 }
 0x19c   :  { %v7053_v62 = vpop.xlane.xlu1 %826  ;;  %v7055_v19 = vpop.xlane.xlu0 %823  ;;  %v1065_v46 = vsel %vm155_vm0, %v767_v54, 0.0  ;;  %v1062_v61 = vsel %vm155_vm0, %v766_v57, 0.0  ;;  %v1071_v54 = vsel %vm155_vm0, %v769_v14, 0.0  ;;  %v1068_v57 = vsel %vm155_vm0, %v768_v53, 0.0 }
 0x19d   :  { %v1077_v14 = vsel %vm155_vm0, %v771_v55, 0.0  ;;  %v1074_v53 = vsel %vm155_vm0, %v770_v49, 0.0  ;;  %v772_v45 = vmul.f32 %v5614_v41, %v5614_v41  ;;  %v1083_v55 = vsel %vm155_vm0, %v773_v38, 0.0 }
 0x19e   :  { %v775_v22 = vmul.f32 %v5615_v6, %v5615_v6  ;;  %v774_v41 = vmul.f32 %v5616_v37, %v5616_v37  ;;  %v777_v6 = vmul.f32 %v5617_v58, %v5617_v58  ;;  %v776_v37 = vmul.f32 %v5618_v33, %v5618_v33 }
 0x19f   :  { %1042 = vadd.xlane.f32.xlu1 %v1041_v23  ;;  %1039 = vadd.xlane.f32.xlu0 %v1038_v15  ;;  %v1080_v49 = vsel %vm155_vm0, %v772_v45, 0.0  ;;  %v779_v58 = vmul.f32 %v5619_v50, %v5619_v50  ;;  %v778_v33 = vmul.f32 %v5620_v29, %v5620_v29  ;;  %v781_v50 = vmul.f32 %v5621_v42, %v5621_v42 }
 0x1a0   :  { %v7065_v7 = vpop.xlane.xlu1 %832  ;;  %v7067_v11 = vpop.xlane.xlu0 %829  ;;  %v1089_v38 = vsel %vm155_vm0, %v775_v22, 0.0  ;;  %v1086_v45 = vsel %vm155_vm0, %v774_v41, 0.0  ;;  %v1095_v22 = vsel %vm155_vm0, %v777_v6, 0.0  ;;  %v1092_v41 = vsel %vm155_vm0, %v776_v37, 0.0 }
 0x1a1   :  { %v1101_v6 = vsel %vm155_vm0, %v779_v58, 0.0  ;;  %v1098_v37 = vsel %vm155_vm0, %v778_v33, 0.0  ;;  %v780_v29 = vmul.f32 %v5622_v25, %v5622_v25  ;;  %v1107_v58 = vsel %vm155_vm0, %v781_v50, 0.0 }
 0x1a2   :  { %v783_v42 = vmul.f32 %v5623_v34, %v5623_v34  ;;  %v782_v25 = vmul.f32 %v5624_v21, %v5624_v21  ;;  %v785_v34 = vmul.f32 %v5625_v26, %v5625_v26  ;;  %v784_v21 = vmul.f32 %v5626_v17, %v5626_v17 }
 0x1a3   :  { %1048 = vadd.xlane.f32.xlu1 %v1047_v43  ;;  %1045 = vadd.xlane.f32.xlu0 %v1044_v30  ;;  %v1104_v33 = vsel %vm155_vm0, %v780_v29, 0.0  ;;  %v787_v26 = vmul.f32 %v5627_v18, %v5627_v18  ;;  %v786_v17 = vmul.f32 %v5628_v13, %v5628_v13  ;;  %v788_v13 = vmul.f32 %v5630_v9, %v5630_v9 }
 0x1a4   :  { %v7077_v23 = vpop.xlane.xlu1 %838  ;;  %v7079_v15 = vpop.xlane.xlu0 %835  ;;  %v1113_v50 = vsel %vm155_vm0, %v783_v42, 0.0  ;;  %v1110_v29 = vsel %vm155_vm0, %v782_v25, 0.0  ;;  %v1119_v42 = vsel %vm155_vm0, %v785_v34, 0.0  ;;  %v1116_v25 = vsel %vm155_vm0, %v784_v21, 0.0 }
 0x1a5   :  { %v1125_v10 = vsel %vm155_vm0, %v787_v26, 0.0  ;;  %v1122_v18 = vsel %vm155_vm0, %v786_v17, 0.0  ;;  %v1128_v3 = vsel %vm155_vm0, %v788_v13, 0.0  ;;  %v5631_v26 = vld [vmem:[%s11708_s0 + $0x358] sm:$0xff]  ;;  %v790_v9 = vmul.f32 %v5632_v0, %v5632_v0  ;;  %v5634_v0 = vld [vmem:[%s11708_s0 + $0x360] sm:$0xff] }
 0x1a6   :  { %v791_v17 = vmul.f32 %v5631_v26, %v5631_v26  ;;  %v5633_v26 = vld [vmem:[%s11708_s0 + $0x368] sm:$0xff] }
 0x1a7   :  { %1054 = vadd.xlane.f32.xlu1 %v1053_v35  ;;  %1051 = vadd.xlane.f32.xlu0 %v1050_v31  ;;  %v1134_v60 = vsel %vm155_vm0, %v790_v9, 0.0  ;;  %v793_v1 = vmul.f32 %v5633_v26, %v5633_v26  ;;  %v795_v26 = vmul.f32 %v5635_v56, %v5635_v56  ;;  %v797_v56 = vmul.f32 %v5637_v52, %v5637_v52 }
 0x1a8   :  { %v7089_v43 = vpop.xlane.xlu1 %844  ;;  %v7091_v30 = vpop.xlane.xlu0 %841  ;;  %v1137_v13 = vsel %vm155_vm0, %v791_v17, 0.0  ;;  %v799_v52 = vmul.f32 %v5639_v44, %v5639_v44  ;;  %v801_v44 = vmul.f32 %v5641_v36, %v5641_v36  ;;  %v803_v36 = vmul.f32 %v5643_v28, %v5643_v28 }
 0x1a9   :  { %v1143_v17 = vsel %vm155_vm0, %v793_v1, 0.0  ;;  %v1149_v1 = vsel %vm155_vm0, %v795_v26, 0.0  ;;  %v1155_v26 = vsel %vm155_vm0, %v797_v56, 0.0 }
 0x1aa   :  { %v1161_v56 = vsel %vm155_vm0, %v799_v52, 0.0  ;;  %v1167_v52 = vsel %vm155_vm0, %v801_v44, 0.0  ;;  %v1173_v44 = vsel %vm155_vm0, %v803_v36, 0.0 }
 0x1ab   :  { %1060 = vadd.xlane.f32.xlu1 %v1059_v59  ;;  %1057 = vadd.xlane.f32.xlu0 %v1056_v4 }
 0x1ac   :  { %v7101_v35 = vpop.xlane.xlu1 %850  ;;  %v7103_v31 = vpop.xlane.xlu0 %847 }
 0x1af   :  { %1066 = vadd.xlane.f32.xlu1 %v1065_v46  ;;  %1063 = vadd.xlane.f32.xlu0 %v1062_v61 }
 0x1b0   :  { %v7113_v59 = vpop.xlane.xlu1 %856  ;;  %v7115_v4 = vpop.xlane.xlu0 %853 }
 0x1b3   :  { %1072 = vadd.xlane.f32.xlu1 %v1071_v54  ;;  %1069 = vadd.xlane.f32.xlu0 %v1068_v57 }
 0x1b4   :  { %v7125_v46 = vpop.xlane.xlu1 %862  ;;  %v7127_v61 = vpop.xlane.xlu0 %859 }
 0x1b7   :  { %1078 = vadd.xlane.f32.xlu1 %v1077_v14  ;;  %1075 = vadd.xlane.f32.xlu0 %v1074_v53 }
 0x1b8   :  { %v7137_v54 = vpop.xlane.xlu1 %868  ;;  %v7139_v57 = vpop.xlane.xlu0 %865 }
 0x1bb   :  { %1084 = vadd.xlane.f32.xlu1 %v1083_v55  ;;  %1081 = vadd.xlane.f32.xlu0 %v1080_v49 }
 0x1bc   :  { %v7149_v14 = vpop.xlane.xlu1 %874  ;;  %v7151_v53 = vpop.xlane.xlu0 %871 }
 0x1bf   :  { %1090 = vadd.xlane.f32.xlu1 %v1089_v38  ;;  %1087 = vadd.xlane.f32.xlu0 %v1086_v45 }
 0x1c0   :  { %v7161_v55 = vpop.xlane.xlu1 %880  ;;  %v7163_v49 = vpop.xlane.xlu0 %877 }
 0x1c3   :  { %1096 = vadd.xlane.f32.xlu1 %v1095_v22  ;;  %1093 = vadd.xlane.f32.xlu0 %v1092_v41 }
 0x1c4   :  { %v7173_v38 = vpop.xlane.xlu1 %886  ;;  %v7175_v45 = vpop.xlane.xlu0 %883 }
 0x1c7   :  { %1102 = vadd.xlane.f32.xlu1 %v1101_v6  ;;  %1099 = vadd.xlane.f32.xlu0 %v1098_v37 }
 0x1c8   :  { %v7185_v22 = vpop.xlane.xlu1 %892  ;;  %v7187_v41 = vpop.xlane.xlu0 %889 }
 0x1cb   :  { %1108 = vadd.xlane.f32.xlu1 %v1107_v58  ;;  %1105 = vadd.xlane.f32.xlu0 %v1104_v33 }
 0x1cc   :  { %v7197_v6 = vpop.xlane.xlu1 %898  ;;  %v7199_v37 = vpop.xlane.xlu0 %895 }
 0x1cf   :  { %1114 = vadd.xlane.f32.xlu1 %v1113_v50  ;;  %1111 = vadd.xlane.f32.xlu0 %v1110_v29  ;;  %v5629_v50 = vld [vmem:[%s11708_s0 + $0x348] sm:$0xff] }
 0x1d0   :  { %v7209_v58 = vpop.xlane.xlu1 %904  ;;  %v7211_v33 = vpop.xlane.xlu0 %901  ;;  %v789_v29 = vmul.f32 %v5629_v50, %v5629_v50 }
 0x1d3   :  { %1120 = vadd.xlane.f32.xlu1 %v1119_v42  ;;  %1117 = vadd.xlane.f32.xlu0 %v1116_v25  ;;  %v1131_v42 = vsel %vm155_vm0, %v789_v29, 0.0 }
 0x1d4   :  { %v7224_v34 = vpop.xlane.xlu1 %910  ;;  %v7226_v21 = vpop.xlane.xlu0 %907 }
 0x1d5   :  { %12080 = vst [vmem:[#allocation133_spill] sm:$0xff] %v7226_v21 }
 0x1d7   :  { %1126 = vadd.xlane.f32.xlu1 %v1125_v10  ;;  %1123 = vadd.xlane.f32.xlu0 %v1122_v18  ;;  %v5807_v10 = vmov 0  }
 0x1d8   :  { %v7234_v25 = vpop.xlane.xlu1 %916  ;;  %v7236_v50 = vpop.xlane.xlu0 %913  ;;  %5279 = vset.pattern.permute.xlu0 %v5807_v10  ;;  %5280 = vset.pattern.permute.xlu1 %v5807_v10  ;;  %v792_v10 = vmul.f32 %v5634_v0, %v5634_v0  ;;  %v794_v0 = vmul.f32 %v5636_v47, %v5636_v47  ;;  %v796_v47 = vmul.f32 %v5638_v48, %v5638_v48 }
 0x1d9   :  { %12081 = vst [vmem:[#allocation134_spill] sm:$0xff] %v7236_v50  ;;  %v798_v48 = vmul.f32 %v5640_v40, %v5640_v40  ;;  %v800_v40 = vmul.f32 %v5642_v32, %v5642_v32  ;;  %v802_v32 = vmul.f32 %v5644_v24, %v5644_v24 }
 0x1da   :  { %v1140_v9 = vsel %vm155_vm0, %v792_v10, 0.0  ;;  %v1146_v10 = vsel %vm155_vm0, %v794_v0, 0.0  ;;  %v1152_v0 = vsel %vm155_vm0, %v796_v47, 0.0 }
 0x1db   :  { %1132 = vadd.xlane.f32.xlu1 %v1131_v42  ;;  %1129 = vadd.xlane.f32.xlu0 %v1128_v3  ;;  %v1158_v47 = vsel %vm155_vm0, %v798_v48, 0.0  ;;  %v1164_v48 = vsel %vm155_vm0, %v800_v40, 0.0  ;;  %v1170_v40 = vsel %vm155_vm0, %v802_v32, 0.0 }
 0x1dc   :  { %v7245_v29 = vpop.xlane.xlu1 %922  ;;  %v7247_v18 = vpop.xlane.xlu0 %919 }
 0x1dd   :  { %12082 = vst [vmem:[#allocation135_spill] sm:$0xff] %v7247_v18  ;;  %v4648_v18 = vld [vmem:[%s11709_s1 + $0x20] sm:$0xff] }
 0x1de   :  { %v4662_v2 = vsel %vm155_vm0, %v4648_v18, 0.0 }
 0x1df   :  { %1138 = vadd.xlane.f32.xlu1 %v1137_v13  ;;  %1135 = vadd.xlane.f32.xlu0 %v1134_v60 }
 0x1e0   :  { %v7257_v3 = vpop.xlane.xlu1 %928  ;;  %v7259_v42 = vpop.xlane.xlu0 %925 }
 0x1e1   :  { %12083 = vst [vmem:[#allocation136_spill] sm:$0xff] %v7259_v42 }
 0x1e3   :  { %1144 = vadd.xlane.f32.xlu1 %v1143_v17  ;;  %1141 = vadd.xlane.f32.xlu0 %v1140_v9 }
 0x1e4   :  { %v7269_v60 = vpop.xlane.xlu1 %934  ;;  %v7271_v13 = vpop.xlane.xlu0 %931 }
 0x1e5   :  { %12084 = vst [vmem:[#allocation137_spill] sm:$0xff] %v7271_v13  ;;  %v5654_v13 = vld [vmem:[%s11708_s0 + $0x400] sm:$0xff] }
 0x1e7   :  { %1150 = vadd.xlane.f32.xlu1 %v1149_v1  ;;  %1147 = vadd.xlane.f32.xlu0 %v1146_v10 }
 0x1e8   :  { %v7281_v17 = vpop.xlane.xlu1 %940  ;;  %v7283_v9 = vpop.xlane.xlu0 %937 }
 0x1e9   :  { %12085 = vst [vmem:[#allocation138_spill] sm:$0xff] %v7283_v9  ;;  %v5650_v9 = vld [vmem:[%s11708_s0 + $0x3e0] sm:$0xff] }
 0x1eb   :  { %1156 = vadd.xlane.f32.xlu1 %v1155_v26  ;;  %1153 = vadd.xlane.f32.xlu0 %v1152_v0 }
 0x1ec   :  { %v7293_v1 = vpop.xlane.xlu1 %946  ;;  %v7295_v10 = vpop.xlane.xlu0 %943 }
 0x1ed   :  { %12086 = vst [vmem:[#allocation139_spill] sm:$0xff] %v7295_v10  ;;  %v5646_v10 = vld [vmem:[%s11708_s0 + $0x3c0] sm:$0xff] }
 0x1ee   :  { %v804_v24 = vmul.f32 %v5646_v10, %v5646_v10  ;;  %v806_v10 = vmul.f32 %v5648_v20, %v5648_v20  ;;  %v808_v20 = vmul.f32 %v5650_v9, %v5650_v9  ;;  %v810_v9 = vmul.f32 %v5652_v16, %v5652_v16 }
 0x1ef   :  { %1162 = vadd.xlane.f32.xlu1 %v1161_v56  ;;  %1159 = vadd.xlane.f32.xlu0 %v1158_v47  ;;  %v812_v16 = vmul.f32 %v5654_v13, %v5654_v13  ;;  %v814_v13 = vmul.f32 %v5656_v12, %v5656_v12 }
 0x1f0   :  { %v7305_v26 = vpop.xlane.xlu1 %952  ;;  %v7307_v0 = vpop.xlane.xlu0 %949  ;;  %v1176_v32 = vsel %vm155_vm0, %v804_v24, 0.0  ;;  %v1182_v24 = vsel %vm155_vm0, %v806_v10, 0.0  ;;  %v1188_v10 = vsel %vm155_vm0, %v808_v20, 0.0  ;;  %v1194_v20 = vsel %vm155_vm0, %v810_v9, 0.0 }
 0x1f1   :  { %12087 = vst [vmem:[#allocation140_spill] sm:$0xff] %v7307_v0  ;;  %v5645_v0 = vld [vmem:[%s11708_s0 + $0x3c8] sm:$0xff]  ;;  %v1200_v9 = vsel %vm155_vm0, %v812_v16, 0.0  ;;  %v1206_v16 = vsel %vm155_vm0, %v814_v13, 0.0  ;;  %v4647_v13 = vld [vmem:[%s11709_s1 + $0x18] sm:$0xff] }
 0x1f2   :  { %v805_v28 = vmul.f32 %v5645_v0, %v5645_v0 }
 0x1f3   :  { %1168 = vadd.xlane.f32.xlu1 %v1167_v52  ;;  %1165 = vadd.xlane.f32.xlu0 %v1164_v48 }
 0x1f4   :  { %v7317_v56 = vpop.xlane.xlu1 %958  ;;  %v7319_v47 = vpop.xlane.xlu0 %955  ;;  %v1179_v36 = vsel %vm155_vm0, %v805_v28, 0.0 }
 0x1f5   :  { %12088 = vst [vmem:[#allocation141_spill] sm:$0xff] %v7319_v47  ;;  %v5647_v47 = vld [vmem:[%s11708_s0 + $0x3d8] sm:$0xff] }
 0x1f6   :  { %v807_v0 = vmul.f32 %v5647_v47, %v5647_v47 }
 0x1f7   :  { %1174 = vadd.xlane.f32.xlu1 %v1173_v44  ;;  %1171 = vadd.xlane.f32.xlu0 %v1170_v40 }
 0x1f8   :  { %v7329_v52 = vpop.xlane.xlu1 %964  ;;  %v7331_v48 = vpop.xlane.xlu0 %961  ;;  %v1185_v28 = vsel %vm155_vm0, %v807_v0, 0.0 }
 0x1f9   :  { %12089 = vst [vmem:[#allocation142_spill] sm:$0xff] %v7331_v48  ;;  %v5649_v48 = vld [vmem:[%s11708_s0 + $0x3e8] sm:$0xff] }
 0x1fa   :  { %v809_v47 = vmul.f32 %v5649_v48, %v5649_v48 }
 0x1fb   :  { %1180 = vadd.xlane.f32.xlu1 %v1179_v36  ;;  %1177 = vadd.xlane.f32.xlu0 %v1176_v32 }
 0x1fc   :  { %v7341_v44 = vpop.xlane.xlu1 %970  ;;  %v7343_v40 = vpop.xlane.xlu0 %967  ;;  %v1191_v0 = vsel %vm155_vm0, %v809_v47, 0.0 }
 0x1fd   :  { %12090 = vst [vmem:[#allocation143_spill] sm:$0xff] %v7343_v40  ;;  %v5651_v40 = vld [vmem:[%s11708_s0 + $0x3f8] sm:$0xff] }
 0x1fe   :  { %v811_v48 = vmul.f32 %v5651_v40, %v5651_v40 }
 0x1ff   :  { %1186 = vadd.xlane.f32.xlu1 %v1185_v28  ;;  %1183 = vadd.xlane.f32.xlu0 %v1182_v24 }
 0x200   :  { %v7353_v36 = vpop.xlane.xlu1 %976  ;;  %v7355_v32 = vpop.xlane.xlu0 %973  ;;  %v1197_v47 = vsel %vm155_vm0, %v811_v48, 0.0 }
 0x201   :  { %12091 = vst [vmem:[#allocation144_spill] sm:$0xff] %v7355_v32  ;;  %v5653_v32 = vld [vmem:[%s11708_s0 + $0x408] sm:$0xff] }
 0x202   :  { %v813_v40 = vmul.f32 %v5653_v32, %v5653_v32 }
 0x203   :  { %1192 = vadd.xlane.f32.xlu1 %v1191_v0  ;;  %1189 = vadd.xlane.f32.xlu0 %v1188_v10 }
 0x204   :  { %v7365_v28 = vpop.xlane.xlu1 %982  ;;  %v7367_v24 = vpop.xlane.xlu0 %979  ;;  %v1203_v48 = vsel %vm155_vm0, %v813_v40, 0.0 }
 0x205   :  { %12092 = vst [vmem:[#allocation145_spill] sm:$0xff] %v7367_v24  ;;  %v5655_v24 = vld [vmem:[%s11708_s0 + $0x418] sm:$0xff] }
 0x206   :  { %v815_v32 = vmul.f32 %v5655_v24, %v5655_v24  ;;  %v4645_v24 = vld [vmem:[%s11709_s1 + $0x8] sm:$0xff] }
 0x207   :  { %1198 = vadd.xlane.f32.xlu1 %v1197_v47  ;;  %1195 = vadd.xlane.f32.xlu0 %v1194_v20 }
 0x208   :  { %v7377_v0 = vpop.xlane.xlu1 %988  ;;  %v7379_v10 = vpop.xlane.xlu0 %985  ;;  %v1209_v40 = vsel %vm155_vm0, %v815_v32, 0.0  ;;  %v4653_v32 = vsel %vm155_vm0, %v4645_v24, 0.0 }
 0x209   :  { %12093 = vst [vmem:[#allocation146_spill] sm:$0xff] %v7379_v10  ;;  %v4644_v10 = vld [vmem:[%s11709_s1] sm:$0xff] }
 0x20a   :  { %v4674_v50 = vmul.f32 %v4644_v10, %v4644_v10 }
 0x20b   :  { %1204 = vadd.xlane.f32.xlu1 %v1203_v48  ;;  %1201 = vadd.xlane.f32.xlu0 %v1200_v9  ;;  %v4650_v9 = vsel %vm155_vm0, %v4644_v10, 0.0 }
 0x20c   :  { %v7389_v47 = vpop.xlane.xlu1 %994  ;;  %v7391_v20 = vpop.xlane.xlu0 %991 }
 0x20d   :  { %12094 = vst [vmem:[#allocation147_spill] sm:$0xff] %v7389_v47  ;;  %12095 = vst [vmem:[#allocation148_spill] sm:$0xff] %v7391_v20  ;;  %v4646_v20 = vld [vmem:[%s11709_s1 + $0x10] sm:$0xff] }
 0x20e   :  { %v4656_v42 = vsel %vm155_vm0, %v4646_v20, 0.0 }
 0x20f   :  { %1210 = vadd.xlane.f32.xlu1 %v1209_v40  ;;  %1207 = vadd.xlane.f32.xlu0 %v1206_v16 }
 0x210   :  { %v7401_v12 = vpop.xlane.xlu1 %1000  ;;  %v7403_v48 = vpop.xlane.xlu0 %997 }
 0x211   :  { %12096 = vst [vmem:[#allocation149_spill] sm:$0xff] %v7401_v12  ;;  %12097 = vst [vmem:[#allocation150_spill] sm:$0xff] %v7403_v48  ;;  %v4659_v48 = vsel %vm155_vm0, %v4647_v13, 0.0 }
 0x213   :  { %4651 = vadd.xlane.f32.xlu1 %v4650_v9  ;;  %4654 = vadd.xlane.f32.xlu0 %v4653_v32 }
 0x214   :  { %v7413_v40 = vpop.xlane.xlu1 %1006  ;;  %v7415_v16 = vpop.xlane.xlu0 %1003 }
 0x215   :  { %12098 = vst [vmem:[#allocation151_spill] sm:$0xff] %v7413_v40  ;;  %12099 = vst [vmem:[#allocation152_spill] sm:$0xff] %v7415_v16  ;;  %v4665_v16 = vsel %vm155_vm0, %v4649_v8, 0.0  ;;  %v4675_v40 = vmul.f32 %v4645_v24, %v4645_v24  ;;  %v4679_v24 = vmul.f32 %v4649_v8, %v4649_v8 }
 0x217   :  { %4660 = vadd.xlane.f32.xlu1 %v4659_v48  ;;  %4657 = vadd.xlane.f32.xlu0 %v4656_v42  ;;  %v4683_v21 = vsel %vm155_vm0, %v4675_v40, 0.0  ;;  %v4680_v42 = vsel %vm155_vm0, %v4674_v50, 0.0  ;;  %v4677_v48 = vmul.f32 %v4647_v13, %v4647_v13  ;;  %v4695_v50 = vsel %vm155_vm0, %v4679_v24, 0.0  ;;  %v4855_v13 = vld [vmem:[%s11710_s2 + $0x8] sm:$0xff] }
 0x218   :  { %v7425_v9 = vpop.xlane.xlu1 %1012  ;;  %v7427_v32 = vpop.xlane.xlu0 %1009 }
 0x219   :  { %12100 = vst [vmem:[#allocation153_spill] sm:$0xff] %v7425_v9  ;;  %12101 = vst [vmem:[#allocation154_spill] sm:$0xff] %v7427_v32  ;;  %v4676_v9 = vmul.f32 %v4646_v20, %v4646_v20  ;;  %v4689_v10 = vsel %vm155_vm0, %v4677_v48, 0.0  ;;  %v4854_v20 = vld [vmem:[%s11710_s2] sm:$0xff]  ;;  %v4857_v48 = vld [vmem:[%s11710_s2 + $0x18] sm:$0xff] }
 0x21b   :  { %4666 = vadd.xlane.f32.xlu1 %v4665_v16  ;;  %4663 = vadd.xlane.f32.xlu0 %v4662_v2  ;;  %v4686_v2 = vsel %vm155_vm0, %v4676_v9, 0.0  ;;  %v4678_v16 = vmul.f32 %v4648_v18, %v4648_v18  ;;  %v4860_v9 = vsel %vm155_vm0, %v4854_v20, 0.0 }
 0x21c   :  { %v7431_v5 = vpop.xlane.xlu1 %1018  ;;  %v7433_v12 = vpop.xlane.xlu0 %1015 }
 0x21d   :  { %12102 = vst [vmem:[#allocation155_spill] sm:$0xff] %v7431_v5  ;;  %12103 = vst [vmem:[#allocation156_spill] sm:$0xff] %v7433_v12  ;;  %v12116_v5 = vld [vmem:[#allocation6_spill] sm:$0xff] }
 0x21f   :  { %4684 = vadd.xlane.f32.xlu1 %v4683_v21  ;;  %4681 = vadd.xlane.f32.xlu0 %v4680_v42  ;;  %v4692_v21 = vsel %vm155_vm0, %v4678_v16, 0.0  ;;  %v4863_v42 = vsel %vm155_vm0, %v4855_v13, 0.0  ;;  %v4869_v16 = vsel %vm155_vm0, %v4857_v48, 0.0 }
 0x220   :  { %v7437_v32 = vpop.xlane.xlu1 %1024  ;;  %v7439_v39 = vpop.xlane.xlu0 %1021 }
 0x221   :  { %12104 = vst [vmem:[#allocation157_spill] sm:$0xff] %v7437_v32  ;;  %12105 = vst [vmem:[#allocation158_spill] sm:$0xff] %v7439_v39  ;;  %v4885_v39 = vmul.f32 %v4855_v13, %v4855_v13 }
 0x223   :  { %4690 = vadd.xlane.f32.xlu1 %v4689_v10  ;;  %4687 = vadd.xlane.f32.xlu0 %v4686_v2  ;;  %v4856_v10 = vld [vmem:[%s11710_s2 + $0x10] sm:$0xff]  ;;  %v4893_v32 = vsel %vm155_vm0, %v4885_v39, 0.0  ;;  %v1476_v39 = vmul.f32 0.020408163, %v7043_v27  ;;  %v5064_v27 = vld [vmem:[%s11711_s3] sm:$0xff] }
 0x224   :  { %v7443_v12 = vpop.xlane.xlu1 %1030  ;;  %v7445_v40 = vpop.xlane.xlu0 %1027 }
 0x225   :  { %12106 = vst [vmem:[#allocation159_spill] sm:$0xff] %v7443_v12  ;;  %12107 = vst [vmem:[#allocation160_spill] sm:$0xff] %v7445_v40 }
 0x227   :  { %4696 = vadd.xlane.f32.xlu1 %v4695_v50  ;;  %4693 = vadd.xlane.f32.xlu0 %v4692_v21  ;;  %v4866_v50 = vsel %vm155_vm0, %v4856_v10, 0.0  ;;  %v4859_v21 = vld [vmem:[%s11710_s2 + $0x28] sm:$0xff] }
 0x228   :  { %v7455_v8 = vpop.xlane.xlu1 %1036  ;;  %v7457_v18 = vpop.xlane.xlu0 %1033 }
 0x229   :  { %12108 = vst [vmem:[#allocation161_spill] sm:$0xff] %v7455_v8  ;;  %12109 = vst [vmem:[#allocation162_spill] sm:$0xff] %v7457_v18  ;;  %v4858_v18 = vld [vmem:[%s11710_s2 + $0x20] sm:$0xff] }
 0x22a   :  { %v4872_v40 = vsel %vm155_vm0, %v4858_v18, 0.0 }
 0x22b   :  { %4861 = vadd.xlane.f32.xlu1 %v4860_v9  ;;  %4864 = vadd.xlane.f32.xlu0 %v4863_v42 }
 0x22c   :  { %v7467_v2 = vpop.xlane.xlu1 %1042  ;;  %v7469_v24 = vpop.xlane.xlu0 %1039 }
 0x22d   :  { %12110 = vst [vmem:[#allocation163_spill] sm:$0xff] %v7467_v2  ;;  %12111 = vst [vmem:[#allocation164_spill] sm:$0xff] %v7469_v24  ;;  %v4875_v24 = vsel %vm155_vm0, %v4859_v21, 0.0  ;;  %v4884_v2 = vmul.f32 %v4854_v20, %v4854_v20 }
 0x22f   :  { %4870 = vadd.xlane.f32.xlu1 %v4869_v16  ;;  %4867 = vadd.xlane.f32.xlu0 %v4866_v50  ;;  %v4890_v16 = vsel %vm155_vm0, %v4884_v2, 0.0  ;;  %v4887_v50 = vmul.f32 %v4857_v48, %v4857_v48  ;;  %v12120_v48 = vld [vmem:[#allocation13_spill] sm:$0xff] }
 0x230   :  { %v7479_v9 = vpop.xlane.xlu1 %1048  ;;  %v7481_v42 = vpop.xlane.xlu0 %1045 }
 0x231   :  { %12112 = vst [vmem:[#allocation165_spill] sm:$0xff] %v7479_v9  ;;  %12113 = vst [vmem:[#allocation166_spill] sm:$0xff] %v7481_v42  ;;  %v4886_v9 = vmul.f32 %v4856_v10, %v4856_v10  ;;  %v7492_v42 = vmul.f32 0.020408163, %v12116_v5 }
 0x233   :  { %4876 = vadd.xlane.f32.xlu1 %v4875_v24  ;;  %4873 = vadd.xlane.f32.xlu0 %v4872_v40  ;;  %12117 = vst [vmem:[#allocation6_spill] sm:$0xff] %v7492_v42  ;;  %v4899_v40 = vsel %vm155_vm0, %v4887_v50, 0.0  ;;  %v4896_v13 = vsel %vm155_vm0, %v4886_v9, 0.0  ;;  %v4889_v24 = vmul.f32 %v4859_v21, %v4859_v21  ;;  %v1608_v5 = vmul.f32 %v7492_v42, %v7492_v42 }
 0x234   :  { %v7485_v8 = vpop.xlane.xlu1 %1054  ;;  %v7487_v12 = vpop.xlane.xlu0 %1051  ;;  %v1485_v50 = vmul.f32 0.020408163, %v7089_v43  ;;  %v5070_v42 = vsel %vm155_vm0, %v5064_v27, 0.0  ;;  %v5065_v43 = vld [vmem:[%s11711_s3 + $0x8] sm:$0xff] }
 0x235   :  { %12114 = vst [vmem:[#allocation167_spill] sm:$0xff] %v7485_v8  ;;  %12115 = vst [vmem:[#allocation168_spill] sm:$0xff] %v7487_v12  ;;  %v4888_v12 = vmul.f32 %v4858_v18, %v4858_v18  ;;  %v7518_v18 = vld [vmem:[%s11711_s3 + $0x28] sm:$0xff]  ;;  %v1740_v21 = vsub.f32 %v1476_v39, %v1608_v5 }
 0x237   :  { %4894 = vadd.xlane.f32.xlu1 %v4893_v32  ;;  %4891 = vadd.xlane.f32.xlu0 %v4890_v16  ;;  %v7504_v32 = vmul.f32 0.020408163, %v12120_v48  ;;  %v4905_v16 = vsel %vm155_vm0, %v4889_v24, 0.0  ;;  %v4902_v9 = vsel %vm155_vm0, %v4888_v12, 0.0  ;;  %v1872_v39 = vmax.f32 %v1740_v21, 0.0 }
 0x238   :  { %v7494_v47 = vpop.xlane.xlu1 %1060  ;;  %v7496_v20 = vpop.xlane.xlu0 %1057 }
 0x239   :  { %12118 = vst [vmem:[#allocation169_spill] sm:$0xff] %v7494_v47  ;;  %12119 = vst [vmem:[#allocation170_spill] sm:$0xff] %v7496_v20  ;;  %v2004_v21 = vadd.f32 1e-05, %v1872_v39  ;;  %v7567_v39 = vld [vmem:[%s11711_s3 + $0x18] sm:$0xff]  ;;  %v5094_v47 = vmul.f32 %v5064_v27, %v5064_v27 }
 0x23a   :  { %12121 = vst [vmem:[#allocation13_spill] sm:$0xff] %v7504_v32 }
 0x23b   :  { %4900 = vadd.xlane.f32.xlu1 %v4899_v40  ;;  %4897 = vadd.xlane.f32.xlu0 %v4896_v13  ;;  %v1617_v40 = vmul.f32 %v7504_v32, %v7504_v32  ;;  %v12124_v13 = vld [vmem:[#allocation15_spill] sm:$0xff]  ;;  %5281 = vrsqrt.f32 %v2004_v21  ;;  %v7584_v21 = vld [vmem:[%s11711_s3 + $0x20] sm:$0xff]  ;;  %v5100_v27 = vsel %vm155_vm0, %v5094_v47, 0.0 }
 0x23c   :  { %v7506_v10 = vpop.xlane.xlu1 %1066  ;;  %v7508_v2 = vpop.xlane.xlu0 %1063  ;;  %v7524_v24 = vmul.f32 0.020408163, %v12124_v13 }
 0x23d   :  { %12122 = vst [vmem:[#allocation171_spill] sm:$0xff] %v7506_v10  ;;  %12123 = vst [vmem:[#allocation172_spill] sm:$0xff] %v7508_v2  ;;  %v5085_v2 = vsel %vm155_vm0, %v7518_v18, 0.0  ;;  %v1749_v5 = vsub.f32 %v1485_v50, %v1617_v40  ;;  %v1489_v10 = vmul.f32 0.020408163, %v7113_v59  ;;  %v12132_v40 = vld [vmem:[#allocation19_spill] sm:$0xff] }
 0x23e   :  { %12125 = vst [vmem:[#allocation15_spill] sm:$0xff] %v7524_v24  ;;  %v1619_v32 = vmul.f32 %v7524_v24, %v7524_v24 }
 0x23f   :  { %4906 = vadd.xlane.f32.xlu1 %v4905_v16  ;;  %4903 = vadd.xlane.f32.xlu0 %v4902_v9  ;;  %v1487_v16 = vmul.f32 0.020408163, %v7101_v35  ;;  %v12128_v9 = vld [vmem:[#allocation17_spill] sm:$0xff]  ;;  %v7551_v35 = vld [vmem:[%s11711_s3 + $0x10] sm:$0xff]  ;;  %v1881_v50 = vmax.f32 %v1749_v5, 0.0 }
 0x240   :  { %v7526_v12 = vpop.xlane.xlu1 %1072  ;;  %v7528_v48 = vpop.xlane.xlu0 %1069  ;;  %v7538_v13 = vmul.f32 0.020408163, %v12128_v9  ;;  %v7556_v9 = vmul.f32 0.020408163, %v12132_v40  ;;  %v5076_v59 = vsel %vm155_vm0, %v7551_v35, 0.0  ;;  %v12136_v40 = vld [vmem:[#allocation21_spill] sm:$0xff] }
 0x241   :  { %12126 = vst [vmem:[#allocation173_spill] sm:$0xff] %v7526_v12  ;;  %12127 = vst [vmem:[#allocation174_spill] sm:$0xff] %v7528_v48  ;;  %v5073_v12 = vsel %vm155_vm0, %v5065_v43, 0.0 }
 0x242   :  { %12129 = vst [vmem:[#allocation17_spill] sm:$0xff] %v7538_v13  ;;  %12133 = vst [vmem:[#allocation19_spill] sm:$0xff] %v7556_v9 }
 0x243   :  { %5071 = vadd.xlane.f32.xlu1 %v5070_v42  ;;  %5086 = vadd.xlane.f32.xlu0 %v5085_v2  ;;  %v1751_v42 = vsub.f32 %v1487_v16, %v1619_v32  ;;  %v1621_v2 = vmul.f32 %v7538_v13, %v7538_v13  ;;  %v2013_v32 = vadd.f32 1e-05, %v1881_v50  ;;  %v1623_v16 = vmul.f32 %v7556_v9, %v7556_v9 }
 0x244   :  { %v7542_v48 = vpop.xlane.xlu1 %1078  ;;  %v7544_v20 = vpop.xlane.xlu0 %1075  ;;  %v7573_v13 = vmul.f32 0.020408163, %v12136_v40  ;;  %v12140_v40 = vld [vmem:[#allocation23_spill] sm:$0xff] }
 0x245   :  { %12130 = vst [vmem:[#allocation175_spill] sm:$0xff] %v7542_v48  ;;  %12131 = vst [vmem:[#allocation176_spill] sm:$0xff] %v7544_v20  ;;  %v1753_v48 = vsub.f32 %v1489_v10, %v1621_v2  ;;  %v1883_v5 = vmax.f32 %v1751_v42, 0.0  ;;  %v5079_v2 = vsel %vm155_vm0, %v7567_v39, 0.0  ;;  %5283 = vrsqrt.f32 %v2013_v32 }
 0x246   :  { %12137 = vst [vmem:[#allocation21_spill] sm:$0xff] %v7573_v13  ;;  %v1493_v42 = vmul.f32 0.020408163, %v7137_v54  ;;  %v7590_v9 = vmul.f32 0.020408163, %v12140_v40  ;;  %v12144_v40 = vld [vmem:[#allocation25_spill] sm:$0xff] }
 0x247   :  { %5074 = vadd.xlane.f32.xlu1 %v5073_v12  ;;  %v1491_v12 = vmul.f32 0.020408163, %v7125_v46  ;;  %v2015_v46 = vadd.f32 1e-05, %v1883_v5  ;;  %v1495_v54 = vmul.f32 0.020408163, %v7149_v14 }
 0x248   :  { %v7558_v24 = vpop.xlane.xlu1 %1084  ;;  %v7560_v20 = vpop.xlane.xlu0 %1081  ;;  %12141 = vst [vmem:[#allocation23_spill] sm:$0xff] %v7590_v9 }
 0x249   :  { %12134 = vst [vmem:[#allocation177_spill] sm:$0xff] %v7558_v24  ;;  %12135 = vst [vmem:[#allocation178_spill] sm:$0xff] %v7560_v20  ;;  %v1885_v24 = vmax.f32 %v1753_v48, 0.0  ;;  %v1755_v50 = vsub.f32 %v1491_v12, %v1623_v16  ;;  %5285 = vrsqrt.f32 %v2015_v46  ;;  %v5282_v16 = vpop.eup %5281  ;;  %v5095_v46 = vmul.f32 %v5065_v43, %v5065_v43 }
 0x24b   :  { %5077 = vadd.xlane.f32.xlu1 %v5076_v59  ;;  %v1625_v59 = vmul.f32 %v7573_v13, %v7573_v13  ;;  %v2017_v32 = vadd.f32 1e-05, %v1885_v24  ;;  %v1887_v5 = vmax.f32 %v1755_v50, 0.0  ;;  %v7602_v13 = vmul.f32 0.020408163, %v12144_v40  ;;  %v2268_v24 = vld [vmem:[%s11712_s4] sm:$0xff] }
 0x24c   :  { %v7575_v20 = vpop.xlane.xlu1 %1090  ;;  %v7577_v10 = vpop.xlane.xlu0 %1087  ;;  %v5103_v43 = vsel %vm155_vm0, %v5095_v46, 0.0  ;;  %v12154_v46 = vld [vmem:[#allocation29_spill] sm:$0xff] }
 0x24d   :  { %12138 = vst [vmem:[#allocation179_spill] sm:$0xff] %v7575_v20  ;;  %12139 = vst [vmem:[#allocation180_spill] sm:$0xff] %v7577_v10  ;;  %v5082_v20 = vsel %vm155_vm0, %v7584_v21, 0.0  ;;  %v1757_v12 = vsub.f32 %v1493_v42, %v1625_v59  ;;  %5287 = vrsqrt.f32 %v2017_v32  ;;  %v2019_v14 = vadd.f32 1e-05, %v1887_v5  ;;  %v12148_v59 = vld [vmem:[#allocation27_spill] sm:$0xff] }
 0x24e   :  { %12145 = vst [vmem:[#allocation25_spill] sm:$0xff] %v7602_v13  ;;  %v1497_v42 = vmul.f32 0.020408163, %v7161_v55  ;;  %v7614_v40 = vmul.f32 0.020408163, %v12148_v59  ;;  %v1629_v47 = vmul.f32 %v7602_v13, %v7602_v13  ;;  %v2277_v55 = vld [vmem:[%s11712_s4 + $0x48] sm:$0xff]  ;;  %v5096_v32 = vmul.f32 %v7551_v35, %v7551_v35 }
 0x24f   :  { %5080 = vadd.xlane.f32.xlu1 %v5079_v2  ;;  %v1627_v2 = vmul.f32 %v7590_v9, %v7590_v9  ;;  %v7616_v9 = vmul.f32 %v5282_v16, %v2268_v24  ;;  %v12152_v5 = vld [vmem:[#allocation8_spill] sm:$0xff]  ;;  %5289 = vrsqrt.f32 %v2019_v14  ;;  %v7638_v59 = vmul.f32 0.020408163, %v12154_v46 }
 0x250   :  { %v7592_v10 = vpop.xlane.xlu1 %1096  ;;  %v7594_v48 = vpop.xlane.xlu0 %1093  ;;  %12149 = vst [vmem:[#allocation27_spill] sm:$0xff] %v7614_v40  ;;  %v1631_v24 = vmul.f32 %v7614_v40, %v7614_v40  ;;  %v5106_v14 = vsel %vm155_vm0, %v5096_v32, 0.0  ;;  %v1501_v32 = vmul.f32 0.020408163, %v7185_v22  ;;  %v12160_v40 = vld [vmem:[#allocation31_spill] sm:$0xff] }
 0x251   :  { %12142 = vst [vmem:[#allocation181_spill] sm:$0xff] %v7592_v10  ;;  %12143 = vst [vmem:[#allocation182_spill] sm:$0xff] %v7594_v48  ;;  %v1759_v50 = vsub.f32 %v1495_v54, %v1627_v2  ;;  %v1499_v54 = vmul.f32 0.020408163, %v7173_v38  ;;  %v2281_v22 = vld [vmem:[%s11712_s4 + $0x68] sm:$0xff] }
 0x252   :  { %12150 = vst [vmem:[#allocation185_spill] sm:$0xff] %v7616_v9  ;;  %12155 = vst [vmem:[#allocation29_spill] sm:$0xff] %v7638_v59 }
 0x253   :  { %5083 = vadd.xlane.f32.xlu1 %v5082_v20  ;;  %v1889_v20 = vmax.f32 %v1757_v12, 0.0  ;;  %v7631_v12 = vmul.f32 0.020408163, %v12152_v5  ;;  %v1891_v2 = vmax.f32 %v1759_v50, 0.0  ;;  %v1477_v5 = vmul.f32 0.020408163, %v7041_v51 }
 0x254   :  { %v7604_v10 = vpop.xlane.xlu1 %1102  ;;  %v7606_v48 = vpop.xlane.xlu0 %1099  ;;  %v5097_v50 = vmul.f32 %v7567_v39, %v7567_v39  ;;  %v1763_v51 = vsub.f32 %v1499_v54, %v1631_v24  ;;  %v7663_v39 = vmul.f32 0.020408163, %v12160_v40  ;;  %v1478_v54 = vmul.f32 0.020408163, %v7055_v19 }
 0x255   :  { %12146 = vst [vmem:[#allocation183_spill] sm:$0xff] %v7604_v10  ;;  %12147 = vst [vmem:[#allocation184_spill] sm:$0xff] %v7606_v48  ;;  %v5284_v48 = vpop.eup %5283  ;;  %v2021_v16 = vadd.f32 1e-05, %v1889_v20  ;;  %v2279_v20 = vld [vmem:[%s11712_s4 + $0x58] sm:$0xff]  ;;  %v5098_v40 = vmul.f32 %v7584_v21, %v7584_v21 }
 0x256   :  { %12153 = vst [vmem:[#allocation8_spill] sm:$0xff] %v7631_v12  ;;  %v7640_v13 = vmul.f32 %v5284_v48, %v2277_v55  ;;  %v5286_v35 = vpop.eup %5285  ;;  %v1609_v48 = vmul.f32 %v7631_v12, %v7631_v12  ;;  %12161 = vst [vmem:[#allocation31_spill] sm:$0xff] %v7663_v39  ;;  %v1895_v19 = vmax.f32 %v1763_v51, 0.0  ;;  %v1479_v21 = vmul.f32 0.020408163, %v7053_v62 }
 0x257   :  { %5101 = vadd.xlane.f32.xlu1 %v5100_v27  ;;  %v1761_v27 = vsub.f32 %v1497_v42, %v1629_v47  ;;  %v12158_v42 = vld [vmem:[#allocation5_spill] sm:$0xff]  ;;  %5291 = vrsqrt.f32 %v2021_v16  ;;  %v5288_v46 = vpop.eup %5287 }
 0x258   :  { %v7620_v10 = vpop.xlane.xlu1 %1108  ;;  %v7622_v8 = vpop.xlane.xlu0 %1105  ;;  %12156 = vst [vmem:[#allocation187_spill] sm:$0xff] %v7640_v13  ;;  %v7654_v47 = vmul.f32 0.020408163, %v12158_v42  ;;  %v7665_v42 = vmul.f32 %v5286_v35, %v2279_v20  ;;  %v12163_v35 = vld [vmem:[#allocation7_spill] sm:$0xff] }
 0x259   :  { %12151 = vst [vmem:[#allocation186_spill] sm:$0xff] %v7622_v8  ;;  %2930 = vperm.xlu0 %5279, %v7616_v9   ;;  %v1893_v55 = vmax.f32 %v1761_v27, 0.0  ;;  %v1633_v9 = vmul.f32 %v7638_v59, %v7638_v59  ;;  %v12165_v59 = vld [vmem:[#allocation33_spill] sm:$0xff] }
 0x25a   :  { %12159 = vst [vmem:[#allocation5_spill] sm:$0xff] %v7654_v47  ;;  %12162 = vst [vmem:[#allocation189_spill] sm:$0xff] %v7665_v42  ;;  %v1610_v27 = vmul.f32 %v7654_v47, %v7654_v47  ;;  %v7691_v47 = vmul.f32 %v5288_v46, %v2281_v22 }
 0x25b   :  { %5104 = vadd.xlane.f32.xlu1 %v5103_v43  ;;  %v2023_v43 = vadd.f32 1e-05, %v1891_v2  ;;  %v5109_v2 = vsel %vm155_vm0, %v5097_v50, 0.0  ;;  %v1765_v20 = vsub.f32 %v1501_v32, %v1633_v9  ;;  %v1503_v50 = vmul.f32 0.020408163, %v7197_v6  ;;  %v2283_v9 = vld [vmem:[%s11712_s4 + $0x78] sm:$0xff] }
 0x25c   :  { %v7643_v8 = vpop.xlane.xlu1 %1114  ;;  %v7645_v38 = vpop.xlane.xlu0 %1111  ;;  %12167 = vst [vmem:[#allocation190_spill] sm:$0xff] %v7691_v47  ;;  %v1742_v12 = vsub.f32 %v1478_v54, %v1610_v27  ;;  %v5112_v6 = vsel %vm155_vm0, %v5098_v40, 0.0  ;;  %v12170_v40 = vld [vmem:[#allocation35_spill] sm:$0xff] }
 0x25d   :  { %12157 = vst [vmem:[#allocation188_spill] sm:$0xff] %v7645_v38  ;;  %2975 = vperm.xlu0 %5279, %v7640_v13   ;;  %v1741_v38 = vsub.f32 %v1477_v5, %v1609_v48  ;;  %v7681_v5 = vmul.f32 0.020408163, %v12163_v35  ;;  %5293 = vrsqrt.f32 %v2023_v43  ;;  %v1635_v48 = vmul.f32 %v7663_v39, %v7663_v39  ;;  %v5290_v35 = vpop.eup %5289 }
 0x25e   :  { %v7688_v13 = vmul.f32 0.020408163, %v12165_v59  ;;  %v5099_v59 = vmul.f32 %v7518_v18, %v7518_v18  ;;  %v1897_v46 = vmax.f32 %v1765_v20, 0.0  ;;  %v7713_v27 = vmul.f32 0.020408163, %v12170_v40 }
 0x25f   :  { %5107 = vadd.xlane.f32.xlu1 %v5106_v14  ;;  %12164 = vst [vmem:[#allocation7_spill] sm:$0xff] %v7681_v5  ;;  %v2025_v14 = vadd.f32 1e-05, %v1893_v55  ;;  %v1873_v51 = vmax.f32 %v1741_v38, 0.0  ;;  %v1611_v62 = vmul.f32 %v7681_v5, %v7681_v5  ;;  %v12168_v55 = vld [vmem:[#allocation10_spill] sm:$0xff]  ;;  %v1767_v54 = vsub.f32 %v1503_v50, %v1635_v48 }
 0x260   :  { %v7668_v24 = vpop.xlane.xlu1 %1120  ;;  %v7670_v16 = vpop.xlane.xlu0 %1117  ;;  %12166 = vst [vmem:[#allocation33_spill] sm:$0xff] %v7688_v13  ;;  %v7706_v32 = vmul.f32 0.020408163, %v12168_v55  ;;  %v2027_v38 = vadd.f32 1e-05, %v1895_v19  ;;  %v1637_v22 = vmul.f32 %v7688_v13, %v7688_v13  ;;  %12171 = vst [vmem:[#allocation35_spill] sm:$0xff] %v7713_v27  ;;  %v7715_v39 = vmul.f32 %v5290_v35, %v2283_v9 }
 0x261   :  { %2985 = vperm.xlu0 %5279, %v7665_v42   ;;  %5295 = vrsqrt.f32 %v2025_v14  ;;  %v1743_v18 = vsub.f32 %v1479_v21, %v1611_v62  ;;  %v2285_v19 = vld [vmem:[%s11712_s4 + $0x88] sm:$0xff]  ;;  %v5292_v55 = vpop.eup %5291  ;;  %v2005_v14 = vadd.f32 1e-05, %v1873_v51  ;;  %v1874_v20 = vmax.f32 %v1742_v12, 0.0  ;;  %v12173_v13 = vld [vmem:[#allocation9_spill] sm:$0xff] }
 0x262   :  { %12169 = vst [vmem:[#allocation10_spill] sm:$0xff] %v7706_v32  ;;  %12172 = vst [vmem:[#allocation191_spill] sm:$0xff] %v7715_v39  ;;  %v1480_v50 = vmul.f32 0.020408163, %v7067_v11  ;;  %v5115_v40 = vsel %vm155_vm0, %v5099_v59, 0.0  ;;  %v1612_v35 = vmul.f32 %v7706_v32, %v7706_v32  ;;  %5297 = vrsqrt.f32 %v2027_v38  ;;  %v12175_v62 = vld [vmem:[#allocation37_spill] sm:$0xff] }
 0x263   :  { %5110 = vadd.xlane.f32.xlu1 %v5109_v2  ;;  %v1505_v2 = vmul.f32 0.020408163, %v7209_v58  ;;  %v7727_v21 = vmul.f32 0.020408163, %v12173_v13  ;;  %v1899_v51 = vmax.f32 %v1767_v54, 0.0  ;;  %v1639_v9 = vmul.f32 %v7713_v27, %v7713_v27 }
 0x264   :  { %v7693_v42 = vpop.xlane.xlu1 %1126  ;;  %v7695_v43 = vpop.xlane.xlu0 %1123  ;;  %v1507_v11 = vmul.f32 0.020408163, %v7224_v34  ;;  %v1875_v59 = vmax.f32 %v1743_v18, 0.0  ;;  %v7738_v13 = vmul.f32 %v5292_v55, %v2285_v19  ;;  %5299 = vrsqrt.f32 %v2005_v14  ;;  %v2287_v34 = vld [vmem:[%s11712_s4 + $0x98] sm:$0xff]  ;;  %v12178_v18 = vld [vmem:[#allocation12_spill] sm:$0xff] }
 0x265   :  { %2995 = vperm.xlu0 %5279, %v7691_v47   ;;  %12174 = vst [vmem:[#allocation9_spill] sm:$0xff] %v7727_v21  ;;  %v1769_v12 = vsub.f32 %v1505_v2, %v1637_v22  ;;  %v7736_v47 = vmul.f32 0.020408163, %v12175_v62  ;;  %v2006_v38 = vadd.f32 1e-05, %v1874_v20  ;;  %v1613_v22 = vmul.f32 %v7727_v21, %v7727_v21 }
 0x266   :  { %12177 = vst [vmem:[#allocation192_spill] sm:$0xff] %v7738_v13  ;;  %v1481_v32 = vmul.f32 0.020408163, %v7065_v7  ;;  %v7751_v19 = vmul.f32 0.020408163, %v12178_v18  ;;  %v1771_v20 = vsub.f32 %v1507_v11, %v1639_v9 }
 0x267   :  { %5113 = vadd.xlane.f32.xlu1 %v5112_v6  ;;  %v2029_v6 = vadd.f32 1e-05, %v1897_v46  ;;  %12176 = vst [vmem:[#allocation37_spill] sm:$0xff] %v7736_v47  ;;  %v5294_v5 = vpop.eup %5293  ;;  %v1744_v46 = vsub.f32 %v1480_v50, %v1612_v35  ;;  %v1509_v55 = vmul.f32 0.020408163, %v7234_v25  ;;  %v1901_v14 = vmax.f32 %v1769_v12, 0.0 }
 0x268   :  { %v7721_v58 = vpop.xlane.xlu1 %1132  ;;  %v7723_v48 = vpop.xlane.xlu0 %1129  ;;  %12179 = vst [vmem:[#allocation12_spill] sm:$0xff] %v7751_v19  ;;  %v2031_v7 = vadd.f32 1e-05, %v1899_v51  ;;  %v1641_v50 = vmul.f32 %v7736_v47, %v7736_v47  ;;  %v2007_v62 = vadd.f32 1e-05, %v1875_v59  ;;  %v7760_v27 = vmul.f32 %v5294_v5, %v2287_v34  ;;  %v2289_v51 = vld [vmem:[%s11712_s4 + $0xa8] sm:$0xff] }
 0x269   :  { %3005 = vperm.xlu0 %5279, %v7715_v39   ;;  %5301 = vrsqrt.f32 %v2029_v6  ;;  %v1745_v18 = vsub.f32 %v1481_v32, %v1613_v22  ;;  %v1876_v21 = vmax.f32 %v1744_v46, 0.0  ;;  %v1482_v25 = vmul.f32 0.020408163, %v7079_v15  ;;  %v12183_v12 = vld [vmem:[#allocation11_spill] sm:$0xff]  ;;  %v12185_v34 = vld [vmem:[#allocation41_spill] sm:$0xff] }
 0x26a   :  { %12182 = vst [vmem:[#allocation193_spill] sm:$0xff] %v7760_v27  ;;  %5303 = vrsqrt.f32 %v2006_v38  ;;  %v7771_v11 = vmul.f32 0.020408163, %v12183_v12  ;;  %v1614_v5 = vmul.f32 %v7751_v19, %v7751_v19  ;;  %v1773_v9 = vsub.f32 %v1509_v55, %v1641_v50 }
 0x26b   :  { %5116 = vadd.xlane.f32.xlu1 %v5115_v40  ;;  %v12180_v40 = vld [vmem:[#allocation39_spill] sm:$0xff]  ;;  %v5296_v39 = vpop.eup %5295  ;;  %5305 = vrsqrt.f32 %v2031_v7  ;;  %v2033_v32 = vadd.f32 1e-05, %v1901_v14  ;;  %v1903_v15 = vmax.f32 %v1771_v20, 0.0  ;;  %v1511_v59 = vmul.f32 0.020408163, %v7245_v29 }
 0x26c   :  { %v7741_v54 = vpop.xlane.xlu1 %1138  ;;  %v7743_v2 = vpop.xlane.xlu0 %1135  ;;  %v7758_v35 = vmul.f32 0.020408163, %v12180_v40  ;;  %12184 = vst [vmem:[#allocation11_spill] sm:$0xff] %v7771_v11  ;;  %v7780_v22 = vmul.f32 0.020408163, %v12185_v34  ;;  %v7783_v12 = vmul.f32 %v5296_v39, %v2289_v51  ;;  %5307 = vrsqrt.f32 %v2007_v62  ;;  %v2291_v29 = vld [vmem:[%s11712_s4 + $0xb8] sm:$0xff] }
 0x26d   :  { %3015 = vperm.xlu0 %5279, %v7738_v13   ;;  %v5298_v38 = vpop.eup %5297  ;;  %v1483_v40 = vmul.f32 0.020408163, %v7077_v23  ;;  %v1877_v55 = vmax.f32 %v1745_v18, 0.0  ;;  %v2008_v50 = vadd.f32 1e-05, %v1876_v21  ;;  %v1746_v19 = vsub.f32 %v1482_v25, %v1614_v5  ;;  %v12188_v34 = vld [vmem:[#allocation14_spill] sm:$0xff] }
 0x26e   :  { %12181 = vst [vmem:[#allocation39_spill] sm:$0xff] %v7758_v35  ;;  %v1643_v46 = vmul.f32 %v7758_v35, %v7758_v35  ;;  %12186 = vst [vmem:[#allocation41_spill] sm:$0xff] %v7780_v22  ;;  %v1615_v20 = vmul.f32 %v7771_v11, %v7771_v11  ;;  %v7795_v35 = vmul.f32 0.020408163, %v12188_v34  ;;  %v1905_v23 = vmax.f32 %v1773_v9, 0.0  ;;  %v5300_v39 = vpop.eup %5299  ;;  %v2269_v25 = vld [vmem:[%s11712_s4 + $0x8] sm:$0xff] }
 0x26f   :  { %12187 = vst [vmem:[#allocation194_spill] sm:$0xff] %v7783_v12  ;;  %5309 = vrsqrt.f32 %v2033_v32  ;;  %v2035_v21 = vadd.f32 1e-05, %v1903_v15  ;;  %v1513_v18 = vmul.f32 0.020408163, %v7257_v3  ;;  %v1645_v51 = vmul.f32 %v7780_v22, %v7780_v22  ;;  %v12190_v5 = vld [vmem:[#allocation43_spill] sm:$0xff] }
 0x270   :  { %v7763_v13 = vpop.xlane.xlu1 %1144  ;;  %v7765_v6 = vpop.xlane.xlu0 %1141  ;;  %12189 = vst [vmem:[#allocation14_spill] sm:$0xff] %v7795_v35  ;;  %v1775_v62 = vsub.f32 %v1511_v59, %v1643_v46  ;;  %v7805_v47 = vmul.f32 0.020408163, %v12190_v5  ;;  %v1747_v34 = vsub.f32 %v1483_v40, %v1615_v20  ;;  %v7807_v9 = vmul.f32 %v5298_v38, %v2291_v29  ;;  %v2293_v46 = vld [vmem:[%s11712_s4 + $0xc8] sm:$0xff]  ;;  %v12193_v40 = vld [vmem:[#allocation16_spill] sm:$0xff] }
 0x271   :  { %3025 = vperm.xlu0 %5279, %v7760_v27   ;;  %v2009_v27 = vadd.f32 1e-05, %v1877_v55  ;;  %5311 = vrsqrt.f32 %v2008_v50  ;;  %v1878_v32 = vmax.f32 %v1746_v19, 0.0  ;;  %v1484_v15 = vmul.f32 0.020408163, %v7091_v30  ;;  %v2270_v22 = vld [vmem:[%s11712_s4 + $0x10] sm:$0xff] }
 0x272   :  { %12191 = vst [vmem:[#allocation43_spill] sm:$0xff] %v7805_v47  ;;  %12192 = vst [vmem:[#allocation195_spill] sm:$0xff] %v7807_v9  ;;  %v1616_v5 = vmul.f32 %v7795_v35, %v7795_v35  ;;  %v7820_v38 = vmul.f32 0.020408163, %v12193_v40  ;;  %v2037_v29 = vadd.f32 1e-05, %v1905_v23  ;;  %v7823_v19 = vmul.f32 %v5300_v39, %v2269_v25 }
 0x273   :  { %5313 = vrsqrt.f32 %v2035_v21  ;;  %v1907_v55 = vmax.f32 %v1775_v62, 0.0  ;;  %v1777_v50 = vsub.f32 %v1513_v18, %v1645_v51  ;;  %v1515_v20 = vmul.f32 0.020408163, %v7269_v60  ;;  %v12196_v40 = vld [vmem:[#allocation45_spill] sm:$0xff] }
 0x274   :  { %v7785_v7 = vpop.xlane.xlu1 %1150  ;;  %v7787_v14 = vpop.xlane.xlu0 %1147  ;;  %12194 = vst [vmem:[#allocation16_spill] sm:$0xff] %v7820_v38  ;;  %12195 = vst [vmem:[#allocation196_spill] sm:$0xff] %v7823_v19  ;;  %v1647_v35 = vmul.f32 %v7805_v47, %v7805_v47  ;;  %v7832_v11 = vmul.f32 0.020408163, %v12196_v40  ;;  %v1879_v23 = vmax.f32 %v1747_v34, 0.0  ;;  %5315 = vrsqrt.f32 %v2009_v27  ;;  %v2295_v51 = vld [vmem:[%s11712_s4 + $0xd8] sm:$0xff] }
 0x275   :  { %3035 = vperm.xlu0 %5279, %v7783_v12   ;;  %v5302_v12 = vpop.eup %5301  ;;  %v2010_v21 = vadd.f32 1e-05, %v1878_v32  ;;  %v1748_v62 = vsub.f32 %v1484_v15, %v1616_v5  ;;  %v1486_v18 = vmul.f32 0.020408163, %v7103_v31  ;;  %v12199_v34 = vld [vmem:[#allocation18_spill] sm:$0xff]  ;;  %5317 = vrsqrt.f32 %v2037_v29  ;;  %v2271_v47 = vld [vmem:[%s11712_s4 + $0x18] sm:$0xff] }
 0x276   :  { %v5304_v30 = vpop.eup %5303  ;;  %12197 = vst [vmem:[#allocation45_spill] sm:$0xff] %v7832_v11  ;;  %v2039_v32 = vadd.f32 1e-05, %v1907_v55  ;;  %v1909_v15 = vmax.f32 %v1777_v50, 0.0  ;;  %v1779_v5 = vsub.f32 %v1515_v20, %v1647_v35  ;;  %v1517_v40 = vmul.f32 0.020408163, %v7281_v17 }
 0x277   :  { %v5306_v39 = vpop.eup %5305  ;;  %v7851_v31 = vmul.f32 %v5304_v30, %v2270_v22  ;;  %v2011_v29 = vadd.f32 1e-05, %v1879_v23  ;;  %5319 = vrsqrt.f32 %v2010_v21  ;;  %v1880_v30 = vmax.f32 %v1748_v62, 0.0  ;;  %v2297_v20 = vld [vmem:[%s11712_s4 + $0xe8] sm:$0xff] }
 0x278   :  { %v7810_v3 = vpop.xlane.xlu1 %1156  ;;  %v7812_v59 = vpop.xlane.xlu0 %1153  ;;  %v1488_v35 = vmul.f32 0.020408163, %v7115_v4  ;;  %v1519_v21 = vmul.f32 0.020408163, %v7293_v1  ;;  %5321 = vrsqrt.f32 %v2039_v32 }
 0x279   :  { %3045 = vperm.xlu0 %5279, %v7807_v9   ;;  %v7834_v9 = vmul.f32 %v5302_v12, %v2293_v46  ;;  %v1618_v12 = vmul.f32 %v7820_v38, %v7820_v38  ;;  %v7848_v46 = vmul.f32 0.020408163, %v12199_v34  ;;  %12201 = vst [vmem:[#allocation198_spill] sm:$0xff] %v7851_v31  ;;  %v5308_v27 = vpop.eup %5307  ;;  %v1649_v38 = vmul.f32 %v7832_v11, %v7832_v11  ;;  %v12202_v34 = vld [vmem:[#allocation47_spill] sm:$0xff]  ;;  %v2272_v11 = vld [vmem:[%s11712_s4 + $0x20] sm:$0xff] }
 0x27a   :  { %v5310_v22 = vpop.eup %5309  ;;  %v7880_v4 = vmul.f32 %v5308_v27, %v2271_v47  ;;  %5323 = vrsqrt.f32 %v2011_v29  ;;  %v2012_v27 = vadd.f32 1e-05, %v1880_v30 }
 0x27b   :  { %12198 = vst [vmem:[#allocation197_spill] sm:$0xff] %v7834_v9  ;;  %12200 = vst [vmem:[#allocation18_spill] sm:$0xff] %v7848_v46  ;;  %v1750_v55 = vsub.f32 %v1486_v18, %v1618_v12  ;;  %v1620_v23 = vmul.f32 %v7848_v46, %v7848_v46  ;;  %v5312_v62 = vpop.eup %5311  ;;  %v2041_v18 = vadd.f32 1e-05, %v1909_v15  ;;  %v1911_v12 = vmax.f32 %v1779_v5, 0.0 }
 0x27c   :  { %v7837_v60 = vpop.xlane.xlu1 %1162  ;;  %2935 = vperm.xlu1 %5280, %v7823_v19   ;;  %v7840_v25 = vpop.xlane.xlu0 %1159  ;;  %v7860_v19 = vmul.f32 0.020408163, %v12202_v34  ;;  %v1781_v34 = vsub.f32 %v1517_v40, %v1649_v38  ;;  %v7890_v1 = vmul.f32 %v5310_v22, %v2297_v20  ;;  %v1490_v15 = vmul.f32 0.020408163, %v7127_v61  ;;  %v2299_v40 = vld [vmem:[%s11712_s4 + $0xf8] sm:$0xff]  ;;  %v12211_v22 = vld [vmem:[#allocation22_spill] sm:$0xff] }
 0x27d   :  { %3055 = vperm.xlu0 %5279, %v7834_v9   ;;  %v7862_v9 = vmul.f32 %v5306_v39, %v2295_v51  ;;  %v12205_v39 = vld [vmem:[#allocation20_spill] sm:$0xff]  ;;  %v5314_v47 = vpop.eup %5313  ;;  %v1752_v32 = vsub.f32 %v1488_v35, %v1620_v23  ;;  %v7904_v20 = vmul.f32 0.020408163, %v12211_v22  ;;  %v7907_v61 = vmul.f32 %v5312_v62, %v2272_v11 }
 0x27e   :  { %12203 = vst [vmem:[#allocation47_spill] sm:$0xff] %v7860_v19  ;;  %v7876_v51 = vmul.f32 0.020408163, %v12205_v39  ;;  %v1651_v46 = vmul.f32 %v7860_v19, %v7860_v19  ;;  %v12207_v39 = vld [vmem:[#allocation49_spill] sm:$0xff]  ;;  %12209 = vst [vmem:[#allocation200_spill] sm:$0xff] %v7890_v1  ;;  %5325 = vrsqrt.f32 %v2041_v18  ;;  %v1913_v23 = vmax.f32 %v1781_v34, 0.0 }
 0x27f   :  { %12204 = vst [vmem:[#allocation199_spill] sm:$0xff] %v7862_v9  ;;  %12212 = vst [vmem:[#allocation22_spill] sm:$0xff] %v7904_v20  ;;  %v2043_v35 = vadd.f32 1e-05, %v1911_v12  ;;  %v2273_v19 = vld [vmem:[%s11712_s4 + $0x28] sm:$0xff]  ;;  %5327 = vrsqrt.f32 %v2012_v27  ;;  %v1884_v18 = vmax.f32 %v1752_v32, 0.0 }
 0x280   :  { %v7865_v17 = vpop.xlane.xlu1 %1168  ;;  %2940 = vperm.xlu1 %5280, %v7851_v31   ;;  %v7868_v50 = vpop.xlane.xlu0 %1165  ;;  %12206 = vst [vmem:[#allocation20_spill] sm:$0xff] %v7876_v51  ;;  %v7888_v31 = vmul.f32 0.020408163, %v12207_v39  ;;  %v1622_v29 = vmul.f32 %v7876_v51, %v7876_v51  ;;  %v1783_v30 = vsub.f32 %v1519_v21, %v1651_v46  ;;  %12213 = vst [vmem:[#allocation202_spill] sm:$0xff] %v7907_v61  ;;  %v1521_v39 = vmul.f32 0.020408163, %v7305_v26 }
 0x281   :  { %3065 = vperm.xlu0 %5279, %v7862_v9   ;;  %v1882_v9 = vmax.f32 %v1750_v55, 0.0  ;;  %v5316_v55 = vpop.eup %5315  ;;  %v12214_v51 = vld [vmem:[#allocation51_spill] sm:$0xff]  ;;  %v1492_v11 = vmul.f32 0.020408163, %v7139_v57  ;;  %v7919_v21 = vmul.f32 %v5314_v47, %v2299_v40  ;;  %v12218_v57 = vld [vmem:[#allocation24_spill] sm:$0xff]  ;;  %5329 = vrsqrt.f32 %v2043_v35 }
 0x282   :  { %12208 = vst [vmem:[#allocation49_spill] sm:$0xff] %v7888_v31  ;;  %v1653_v22 = vmul.f32 %v7888_v31, %v7888_v31  ;;  %v7916_v46 = vmul.f32 0.020408163, %v12214_v51  ;;  %v1754_v12 = vsub.f32 %v1490_v15, %v1622_v29  ;;  %v2301_v31 = vld [vmem:[%s11712_s4 + $0x108] sm:$0xff]  ;;  %v1624_v51 = vmul.f32 %v7904_v20, %v7904_v20 }
 0x283   :  { %12216 = vst [vmem:[#allocation203_spill] sm:$0xff] %v7919_v21  ;;  %v2014_v62 = vadd.f32 1e-05, %v1882_v9  ;;  %v7932_v47 = vmul.f32 0.020408163, %v12218_v57  ;;  %v1915_v27 = vmax.f32 %v1783_v30, 0.0  ;;  %v7935_v9 = vmul.f32 %v5316_v55, %v2273_v19 }
 0x284   :  { %v7893_v38 = vpop.xlane.xlu1 %1174  ;;  %2945 = vperm.xlu1 %5280, %v7880_v4   ;;  %v7896_v5 = vpop.xlane.xlu0 %1171  ;;  %12215 = vst [vmem:[#allocation51_spill] sm:$0xff] %v7916_v46  ;;  %v2045_v15 = vadd.f32 1e-05, %v1913_v23  ;;  %v1785_v40 = vsub.f32 %v1521_v39, %v1653_v22  ;;  %v1523_v29 = vmul.f32 0.020408163, %v7317_v56  ;;  %v1655_v20 = vmul.f32 %v7916_v46, %v7916_v46  ;;  %v12220_v57 = vld [vmem:[#allocation53_spill] sm:$0xff] }
 0x285   :  { %12210 = vst [vmem:[#allocation201_spill] sm:$0xff] %v7896_v5  ;;  %3075 = vperm.xlu0 %5279, %v7890_v1   ;;  %v5318_v5 = vpop.eup %5317  ;;  %12219 = vst [vmem:[#allocation24_spill] sm:$0xff] %v7932_v47  ;;  %v7944_v1 = vmul.f32 0.020408163, %v12220_v57  ;;  %v1756_v30 = vsub.f32 %v1492_v11, %v1624_v51  ;;  %5331 = vrsqrt.f32 %v2014_v62  ;;  %v2016_v55 = vadd.f32 1e-05, %v1884_v18 }
 0x286   :  { %v5320_v32 = vpop.eup %5319  ;;  %v1886_v35 = vmax.f32 %v1754_v12, 0.0  ;;  %v1494_v23 = vmul.f32 0.020408163, %v7151_v53  ;;  %v2303_v22 = vld [vmem:[%s11712_s4 + $0x118] sm:$0xff]  ;;  %v2047_v62 = vadd.f32 1e-05, %v1915_v27  ;;  %5333 = vrsqrt.f32 %v2045_v15 }
 0x287   :  { %12221 = vst [vmem:[#allocation53_spill] sm:$0xff] %v7944_v1  ;;  %v5322_v19 = vpop.eup %5321  ;;  %v1917_v18 = vmax.f32 %v1785_v40, 0.0  ;;  %v1787_v12 = vsub.f32 %v1523_v29, %v1655_v20  ;;  %v1525_v51 = vmul.f32 0.020408163, %v7329_v52  ;;  %v2275_v46 = vld [vmem:[%s11712_s4 + $0x38] sm:$0xff]  ;;  %v1888_v27 = vmax.f32 %v1756_v30, 0.0 }
 0x288   :  { %v7921_v26 = vpop.xlane.xlu1 %1180  ;;  %2950 = vperm.xlu1 %5280, %v7907_v61   ;;  %v7924_v34 = vpop.xlane.xlu0 %1177  ;;  %v2274_v61 = vld [vmem:[%s11712_s4 + $0x30] sm:$0xff]  ;;  %5335 = vrsqrt.f32 %v2016_v55  ;;  %v1496_v20 = vmul.f32 0.020408163, %v7163_v49  ;;  %v2305_v29 = vld [vmem:[%s11712_s4 + $0x128] sm:$0xff] }
 0x289   :  { %12217 = vst [vmem:[#allocation204_spill] sm:$0xff] %v7924_v34  ;;  %3085 = vperm.xlu0 %5279, %v7919_v21   ;;  %v7946_v21 = vmul.f32 %v5318_v5, %v2301_v31  ;;  %v5324_v57 = vpop.eup %5323  ;;  %v1626_v31 = vmul.f32 %v7932_v47, %v7932_v47  ;;  %v12224_v5 = vld [vmem:[#allocation26_spill] sm:$0xff]  ;;  %v7963_v53 = vmul.f32 %v5320_v32, %v2274_v61  ;;  %v2018_v32 = vadd.f32 1e-05, %v1886_v35 }
 0x28a   :  { %v7960_v11 = vmul.f32 0.020408163, %v12224_v5  ;;  %v1657_v47 = vmul.f32 %v7944_v1, %v7944_v1  ;;  %v7974_v34 = vmul.f32 %v5322_v19, %v2303_v22  ;;  %v5326_v61 = vpop.eup %5325  ;;  %v12230_v19 = vld [vmem:[#allocation28_spill] sm:$0xff]  ;;  %5337 = vrsqrt.f32 %v2047_v62  ;;  %v2276_v1 = vld [vmem:[%s11712_s4 + $0x40] sm:$0xff] }
 0x28b   :  { %12222 = vst [vmem:[#allocation205_spill] sm:$0xff] %v7946_v21  ;;  %12226 = vst [vmem:[#allocation207_spill] sm:$0xff] %v7963_v53  ;;  %v1758_v15 = vsub.f32 %v1494_v23, %v1626_v31  ;;  %v7991_v49 = vmul.f32 %v5324_v57, %v2275_v46  ;;  %v5328_v55 = vpop.eup %5327  ;;  %v2049_v35 = vadd.f32 1e-05, %v1917_v18  ;;  %v1919_v23 = vmax.f32 %v1787_v12, 0.0 }
 0x28c   :  { %v7949_v56 = vpop.xlane.xlu1 %1186  ;;  %2955 = vperm.xlu1 %5280, %v7935_v9   ;;  %v7952_v39 = vpop.xlane.xlu0 %1183  ;;  %12225 = vst [vmem:[#allocation26_spill] sm:$0xff] %v7960_v11  ;;  %12229 = vst [vmem:[#allocation208_spill] sm:$0xff] %v7974_v34  ;;  %v1628_v30 = vmul.f32 %v7960_v11, %v7960_v11  ;;  %v1789_v22 = vsub.f32 %v1525_v51, %v1657_v47  ;;  %v1527_v31 = vmul.f32 0.020408163, %v7341_v44  ;;  %v2020_v62 = vadd.f32 1e-05, %v1888_v27 }
 0x28d   :  { %12223 = vst [vmem:[#allocation206_spill] sm:$0xff] %v7952_v39  ;;  %3095 = vperm.xlu0 %5279, %v7946_v21   ;;  %v12227_v39 = vld [vmem:[#allocation55_spill] sm:$0xff]  ;;  %v5330_v46 = vpop.eup %5329  ;;  %5339 = vrsqrt.f32 %v2018_v32  ;;  %v1890_v57 = vmax.f32 %v1758_v15, 0.0  ;;  %v1498_v47 = vmul.f32 0.020408163, %v7175_v45  ;;  %v2307_v51 = vld [vmem:[%s11712_s4 + $0x138] sm:$0xff]  ;;  %v8020_v45 = vmul.f32 %v5328_v55, %v2276_v1 }
 0x28e   :  { %v7972_v5 = vmul.f32 0.020408163, %v12227_v39  ;;  %v7988_v39 = vmul.f32 0.020408163, %v12230_v19  ;;  %v12232_v19 = vld [vmem:[#allocation57_spill] sm:$0xff]  ;;  %v1760_v18 = vsub.f32 %v1496_v20, %v1628_v30  ;;  %5341 = vrsqrt.f32 %v2049_v35 }
 0x28f   :  { %v1529_v32 = vmul.f32 0.020408163, %v7353_v36  ;;  %12237 = vst [vmem:[#allocation210_spill] sm:$0xff] %v8020_v45  ;;  %v5332_v15 = vpop.eup %5331  ;;  %v2051_v20 = vadd.f32 1e-05, %v1919_v23  ;;  %v1921_v30 = vmax.f32 %v1789_v22, 0.0  ;;  %5343 = vrsqrt.f32 %v2020_v62 }
 0x290   :  { %12228 = vst [vmem:[#allocation55_spill] sm:$0xff] %v7972_v5  ;;  %v7977_v52 = vpop.xlane.xlu1 %1192  ;;  %2960 = vperm.xlu1 %5280, %v7963_v53   ;;  %v7980_v40 = vpop.xlane.xlu0 %1189  ;;  %12231 = vst [vmem:[#allocation28_spill] sm:$0xff] %v7988_v39  ;;  %v1659_v11 = vmul.f32 %v7972_v5, %v7972_v5  ;;  %v8000_v53 = vmul.f32 0.020408163, %v12232_v19  ;;  %v1630_v27 = vmul.f32 %v7988_v39, %v7988_v39  ;;  %v2278_v5 = vld [vmem:[%s11712_s4 + $0x50] sm:$0xff] }
 0x291   :  { %3105 = vperm.xlu0 %5279, %v7974_v34   ;;  %v8002_v34 = vmul.f32 %v5326_v61, %v2305_v29  ;;  %v12235_v61 = vld [vmem:[#allocation30_spill] sm:$0xff]  ;;  %v8030_v36 = vmul.f32 %v5330_v46, %v2307_v51  ;;  %v5334_v1 = vpop.eup %5333  ;;  %v2022_v55 = vadd.f32 1e-05, %v1890_v57  ;;  %v1500_v23 = vmul.f32 0.020408163, %v7187_v41  ;;  %v12240_v46 = vld [vmem:[#allocation32_spill] sm:$0xff] }
 0x292   :  { %12233 = vst [vmem:[#allocation57_spill] sm:$0xff] %v8000_v53  ;;  %v8016_v29 = vmul.f32 0.020408163, %v12235_v61  ;;  %v1791_v19 = vsub.f32 %v1527_v31, %v1659_v11  ;;  %v1661_v39 = vmul.f32 %v8000_v53, %v8000_v53  ;;  %v12238_v61 = vld [vmem:[#allocation59_spill] sm:$0xff]  ;;  %v1762_v35 = vsub.f32 %v1498_v47, %v1630_v27  ;;  %v2280_v53 = vld [vmem:[%s11712_s4 + $0x60] sm:$0xff] }
 0x293   :  { %12234 = vst [vmem:[#allocation209_spill] sm:$0xff] %v8002_v34  ;;  %v8028_v21 = vmul.f32 0.020408163, %v12238_v61  ;;  %v2309_v31 = vld [vmem:[%s11712_s4 + $0x148] sm:$0xff]  ;;  %v8044_v51 = vmul.f32 0.020408163, %v12240_v46  ;;  %v8047_v41 = vmul.f32 %v5332_v15, %v2278_v5  ;;  %5345 = vrsqrt.f32 %v2051_v20 }
 0x294   :  { %v8005_v44 = vpop.xlane.xlu1 %1198  ;;  %2965 = vperm.xlu1 %5280, %v7991_v49   ;;  %v8008_v12 = vpop.xlane.xlu0 %1195  ;;  %12236 = vst [vmem:[#allocation30_spill] sm:$0xff] %v8016_v29  ;;  %v1632_v62 = vmul.f32 %v8016_v29, %v8016_v29  ;;  %v1793_v57 = vsub.f32 %v1529_v32, %v1661_v39  ;;  %v2053_v47 = vadd.f32 1e-05, %v1921_v30  ;;  %v1923_v27 = vmax.f32 %v1791_v19, 0.0  ;;  %v12243_v29 = vld [vmem:[#allocation61_spill] sm:$0xff] }
 0x295   :  { %3115 = vperm.xlu0 %5279, %v8002_v34   ;;  %12239 = vst [vmem:[#allocation59_spill] sm:$0xff] %v8028_v21  ;;  %v1892_v34 = vmax.f32 %v1760_v18, 0.0  ;;  %12241 = vst [vmem:[#allocation32_spill] sm:$0xff] %v8044_v51  ;;  %v5336_v18 = vpop.eup %5335  ;;  %v1531_v61 = vmul.f32 0.020408163, %v7365_v28  ;;  %v1663_v46 = vmul.f32 %v8028_v21, %v8028_v21  ;;  %v8059_v32 = vmul.f32 %v5334_v1, %v2309_v31  ;;  %v2311_v21 = vld [vmem:[%s11712_s4 + $0x158] sm:$0xff] }
 0x296   :  { %12242 = vst [vmem:[#allocation211_spill] sm:$0xff] %v8047_v41  ;;  %v8056_v39 = vmul.f32 0.020408163, %v12243_v29  ;;  %v1502_v5 = vmul.f32 0.020408163, %v7199_v37  ;;  %5347 = vrsqrt.f32 %v2022_v55  ;;  %v1894_v20 = vmax.f32 %v1762_v35, 0.0 }
 0x297   :  { %12245 = vst [vmem:[#allocation212_spill] sm:$0xff] %v8059_v32  ;;  %v2024_v15 = vadd.f32 1e-05, %v1892_v34  ;;  %v1764_v30 = vsub.f32 %v1500_v23, %v1632_v62  ;;  %v1634_v29 = vmul.f32 %v8044_v51, %v8044_v51  ;;  %v12246_v37 = vld [vmem:[#allocation34_spill] sm:$0xff]  ;;  %v1925_v55 = vmax.f32 %v1793_v57, 0.0 }
 0x298   :  { %v8033_v11 = vpop.xlane.xlu1 %1204  ;;  %2970 = vperm.xlu1 %5280, %v8020_v45   ;;  %v8036_v22 = vpop.xlane.xlu0 %1201  ;;  %12244 = vst [vmem:[#allocation61_spill] sm:$0xff] %v8056_v39  ;;  %v8072_v1 = vmul.f32 0.020408163, %v12246_v37  ;;  %v8075_v34 = vmul.f32 %v5336_v18, %v2280_v53  ;;  %5349 = vrsqrt.f32 %v2053_v47  ;;  %v2055_v23 = vadd.f32 1e-05, %v1923_v27 }
 0x299   :  { %3125 = vperm.xlu0 %5279, %v8030_v36   ;;  %v5338_v45 = vpop.eup %5337  ;;  %v1795_v31 = vsub.f32 %v1531_v61, %v1663_v46  ;;  %v1533_v62 = vmul.f32 0.020408163, %v7377_v0  ;;  %v1665_v51 = vmul.f32 %v8056_v39, %v8056_v39  ;;  %v8084_v37 = vmul.f32 0.020408163, %v6653_v63  ;;  %v2313_v63 = vld [vmem:[%s11712_s4 + $0x168] sm:$0xff]  ;;  %v12257_v39 = vld [vmem:[#allocation64_spill] sm:$0xff] }
 0x29a   :  { %12247 = vst [vmem:[#allocation34_spill] sm:$0xff] %v8072_v1  ;;  %12248 = vst [vmem:[#allocation213_spill] sm:$0xff] %v8075_v34  ;;  %v5340_v35 = vpop.eup %5339  ;;  %v1766_v57 = vsub.f32 %v1502_v5, %v1634_v29  ;;  %5351 = vrsqrt.f32 %v2024_v15  ;;  %v2026_v18 = vadd.f32 1e-05, %v1894_v20  ;;  %v1896_v47 = vmax.f32 %v1764_v30, 0.0  ;;  %v12256_v29 = vld [vmem:[#allocation147_spill] sm:$0xff] }
 0x29b   :  { %12249 = vst [vmem:[#allocation214_spill] sm:$0xff] %v8084_v37  ;;  %v5342_v53 = vpop.eup %5341  ;;  %v1504_v27 = vmul.f32 0.020408163, %v7211_v33  ;;  %v2057_v15 = vadd.f32 1e-05, %v1925_v55  ;;  %5353 = vrsqrt.f32 %v2055_v23  ;;  %v1927_v20 = vmax.f32 %v1795_v31, 0.0 }
 0x29c   :  { %v8061_v28 = vpop.xlane.xlu1 %1210  ;;  %2980 = vperm.xlu1 %5280, %v8047_v41   ;;  %v8064_v19 = vpop.xlane.xlu0 %1207  ;;  %v2282_v41 = vld [vmem:[%s11712_s4 + $0x70] sm:$0xff]  ;;  %v1797_v30 = vsub.f32 %v1533_v62, %v1665_v51  ;;  %v1898_v55 = vmax.f32 %v1766_v57, 0.0  ;;  %5355 = vrsqrt.f32 %v2026_v18  ;;  %v12260_v51 = vld [vmem:[#allocation133_spill] sm:$0xff] }
 0x29d   :  { %3135 = vperm.xlu0 %5279, %v8059_v32   ;;  %v8086_v32 = vmul.f32 %v5338_v45, %v2311_v21  ;;  %v5344_v46 = vpop.eup %5343  ;;  %v1636_v21 = vmul.f32 %v8072_v1, %v8072_v1  ;;  %v12253_v45 = vld [vmem:[#allocation36_spill] sm:$0xff]  ;;  %v8103_v33 = vmul.f32 %v5340_v35, %v2282_v41  ;;  %v1667_v1 = vmul.f32 %v8084_v37, %v8084_v37 }
 0x29e   :  { %v8100_v5 = vmul.f32 0.020408163, %v12253_v45  ;;  %v8112_v45 = vmul.f32 0.020408163, %v12257_v39  ;;  %v5346_v41 = vpop.eup %5345  ;;  %v2028_v35 = vadd.f32 1e-05, %v1896_v47  ;;  %5357 = vrsqrt.f32 %v2057_v15 }
 0x29f   :  { %12250 = vst [vmem:[#allocation215_spill] sm:$0xff] %v8086_v32  ;;  %12255 = vst [vmem:[#allocation218_spill] sm:$0xff] %v8103_v33  ;;  %v1768_v23 = vsub.f32 %v1504_v27, %v1636_v21  ;;  %v1506_v31 = vmul.f32 0.020408163, %v12260_v51  ;;  %v2315_v39 = vld [vmem:[%s11712_s4 + $0x178] sm:$0xff]  ;;  %v1929_v21 = vmax.f32 %v1797_v30, 0.0 }
 0x2a0   :  { %v8089_v0 = vpop.xlane.xlu1 %4651  ;;  %2990 = vperm.xlu1 %5280, %v8075_v34   ;;  %v8092_v61 = vpop.xlane.xlu0 %4654  ;;  %12254 = vst [vmem:[#allocation36_spill] sm:$0xff] %v8100_v5  ;;  %12258 = vst [vmem:[#allocation147_spill] sm:$0xff] %v8112_v45  ;;  %v8114_v34 = vmul.f32 %v5342_v53, %v2313_v63  ;;  %v1638_v57 = vmul.f32 %v8100_v5, %v8100_v5  ;;  %v12263_v53 = vld [vmem:[#allocation38_spill] sm:$0xff]  ;;  %v2059_v27 = vadd.f32 1e-05, %v1927_v20  ;;  %v2286_v37 = vld [vmem:[%s11712_s4 + $0x90] sm:$0xff]  ;;  %5359 = vrsqrt.f32 %v2028_v35 }
 0x2a1   :  { %12251 = vst [vmem:[#allocation216_spill] sm:$0xff] %v8089_v0  ;;  %12252 = vst [vmem:[#allocation217_spill] sm:$0xff] %v8092_v61  ;;  %3145 = vperm.xlu0 %5279, %v8086_v32   ;;  %v1535_v61 = vmul.f32 0.020408163, %v12256_v29  ;;  %v2284_v0 = vld [vmem:[%s11712_s4 + $0x80] sm:$0xff]  ;;  %v5348_v47 = vpop.eup %5347  ;;  %v1669_v5 = vmul.f32 %v8112_v45, %v8112_v45  ;;  %v12275_v35 = vld [vmem:[#allocation151_spill] sm:$0xff] }
 0x2a2   :  { %12259 = vst [vmem:[#allocation64_spill] sm:$0xff] %v8114_v34  ;;  %v8128_v63 = vmul.f32 0.020408163, %v12263_v53  ;;  %v8131_v18 = vmul.f32 %v5344_v46, %v2284_v0  ;;  %v12267_v53 = vld [vmem:[#allocation66_spill] sm:$0xff]  ;;  %v2030_v15 = vadd.f32 1e-05, %v1898_v55  ;;  %v5350_v0 = vpop.eup %5349  ;;  %v1770_v20 = vsub.f32 %v1506_v31, %v1638_v57 }
 0x2a3   :  { %v1799_v51 = vsub.f32 %v1535_v61, %v1667_v1  ;;  %v1900_v46 = vmax.f32 %v1768_v23, 0.0  ;;  %v12270_v1 = vld [vmem:[#allocation134_spill] sm:$0xff]  ;;  %v1539_v23 = vmul.f32 0.020408163, %v12275_v35  ;;  %v8160_v31 = vmul.f32 %v5348_v47, %v2286_v37 }
 0x2a4   :  { %v8117_v62 = vpop.xlane.xlu1 %4660  ;;  %3000 = vperm.xlu1 %5280, %v8103_v33   ;;  %v8120_v29 = vpop.xlane.xlu0 %4657  ;;  %12264 = vst [vmem:[#allocation38_spill] sm:$0xff] %v8128_v63  ;;  %12265 = vst [vmem:[#allocation220_spill] sm:$0xff] %v8131_v18  ;;  %v8140_v33 = vmul.f32 0.020408163, %v12267_v53  ;;  %v1508_v61 = vmul.f32 0.020408163, %v12270_v1  ;;  %v1640_v55 = vmul.f32 %v8128_v63, %v8128_v63  ;;  %5361 = vrsqrt.f32 %v2059_v27 }
 0x2a5   :  { %12261 = vst [vmem:[#allocation133_spill] sm:$0xff] %v8117_v62  ;;  %12262 = vst [vmem:[#allocation219_spill] sm:$0xff] %v8120_v29  ;;  %3155 = vperm.xlu0 %5279, %v8114_v34   ;;  %v12266_v29 = vld [vmem:[#allocation149_spill] sm:$0xff]  ;;  %v8142_v34 = vmul.f32 %v5346_v41, %v2315_v39  ;;  %v2317_v53 = vld [vmem:[%s11712_s4 + $0x188] sm:$0xff]  ;;  %v5352_v57 = vpop.eup %5351  ;;  %v2061_v1 = vadd.f32 1e-05, %v1929_v21  ;;  %5363 = vrsqrt.f32 %v2030_v15 }
 0x2a6   :  { %v1537_v62 = vmul.f32 0.020408163, %v12266_v29  ;;  %12268 = vst [vmem:[#allocation149_spill] sm:$0xff] %v8140_v33  ;;  %v12273_v41 = vld [vmem:[#allocation40_spill] sm:$0xff]  ;;  %12276 = vst [vmem:[#allocation151_spill] sm:$0xff] %v8160_v31  ;;  %v2288_v45 = vld [vmem:[%s11712_s4 + $0xa0] sm:$0xff]  ;;  %v1671_v63 = vmul.f32 %v8140_v33, %v8140_v33  ;;  %v8170_v35 = vmul.f32 %v5350_v0, %v2317_v53  ;;  %v5354_v37 = vpop.eup %5353  ;;  %v1772_v27 = vsub.f32 %v1508_v61, %v1640_v55 }
 0x2a7   :  { %12269 = vst [vmem:[#allocation66_spill] sm:$0xff] %v8142_v34  ;;  %v8156_v39 = vmul.f32 0.020408163, %v12273_v41  ;;  %v12277_v41 = vld [vmem:[#allocation68_spill] sm:$0xff]  ;;  %v2032_v47 = vadd.f32 1e-05, %v1900_v46  ;;  %v5356_v61 = vpop.eup %5355  ;;  %5365 = vrsqrt.f32 %v2061_v1 }
 0x2a8   :  { %v8145_v30 = vpop.xlane.xlu1 %4666  ;;  %3010 = vperm.xlu1 %5280, %v8131_v18   ;;  %v8148_v29 = vpop.xlane.xlu0 %4663  ;;  %v8168_v18 = vmul.f32 0.020408163, %v12277_v41  ;;  %12279 = vst [vmem:[#allocation222_spill] sm:$0xff] %v8170_v35  ;;  %v12280_v21 = vld [vmem:[#allocation135_spill] sm:$0xff]  ;;  %v2319_v41 = vld [vmem:[%s11712_s4 + $0x198] sm:$0xff]  ;;  %v12283_v0 = vld [vmem:[#allocation42_spill] sm:$0xff]  ;;  %v1803_v46 = vsub.f32 %v1539_v23, %v1671_v63 }
 0x2a9   :  { %12271 = vst [vmem:[#allocation134_spill] sm:$0xff] %v8145_v30  ;;  %12272 = vst [vmem:[#allocation221_spill] sm:$0xff] %v8148_v29  ;;  %3165 = vperm.xlu0 %5279, %v8142_v34   ;;  %v1931_v29 = vmax.f32 %v1799_v51, 0.0  ;;  %v1801_v30 = vsub.f32 %v1537_v62, %v1669_v5  ;;  %v1902_v34 = vmax.f32 %v1770_v20, 0.0  ;;  %v1510_v51 = vmul.f32 0.020408163, %v12280_v21 }
 0x2aa   :  { %12274 = vst [vmem:[#allocation40_spill] sm:$0xff] %v8156_v39  ;;  %12278 = vst [vmem:[#allocation68_spill] sm:$0xff] %v8168_v18  ;;  %v1642_v15 = vmul.f32 %v8156_v39, %v8156_v39  ;;  %v8184_v53 = vmul.f32 0.020408163, %v12283_v0  ;;  %v8187_v20 = vmul.f32 %v5352_v57, %v2288_v45  ;;  %v2290_v33 = vld [vmem:[%s11712_s4 + $0xb0] sm:$0xff]  ;;  %v1673_v0 = vmul.f32 %v8168_v18, %v8168_v18  ;;  %v12287_v39 = vld [vmem:[#allocation70_spill] sm:$0xff] }
 0x2ab   :  { %v2063_v55 = vadd.f32 1e-05, %v1931_v29  ;;  %v1933_v21 = vmax.f32 %v1801_v30, 0.0  ;;  %v8196_v63 = vmul.f32 0.020408163, %v12287_v39  ;;  %v12289_v23 = vld [vmem:[#allocation136_spill] sm:$0xff]  ;;  %v8199_v57 = vmul.f32 %v5354_v37, %v2319_v41 }
 0x2ac   :  { %v8173_v5 = vpop.xlane.xlu1 %4684  ;;  %3020 = vperm.xlu1 %5280, %v8160_v31   ;;  %v8176_v62 = vpop.xlane.xlu0 %4681  ;;  %12284 = vst [vmem:[#allocation42_spill] sm:$0xff] %v8184_v53  ;;  %12285 = vst [vmem:[#allocation224_spill] sm:$0xff] %v8187_v20  ;;  %v1512_v45 = vmul.f32 0.020408163, %v12289_v23  ;;  %5367 = vrsqrt.f32 %v2032_v47  ;;  %v2034_v29 = vadd.f32 1e-05, %v1902_v34  ;;  %v1774_v1 = vsub.f32 %v1510_v51, %v1642_v15 }
 0x2ad   :  { %12281 = vst [vmem:[#allocation135_spill] sm:$0xff] %v8173_v5  ;;  %12282 = vst [vmem:[#allocation223_spill] sm:$0xff] %v8176_v62  ;;  %3175 = vperm.xlu0 %5279, %v8170_v35   ;;  %v12286_v5 = vld [vmem:[#allocation153_spill] sm:$0xff]  ;;  %v5358_v31 = vpop.eup %5357  ;;  %v1904_v30 = vmax.f32 %v1772_v27, 0.0  ;;  %v2321_v18 = vld [vmem:[%s11712_s4 + $0x1a8] sm:$0xff]  ;;  %v1644_v39 = vmul.f32 %v8184_v53, %v8184_v53  ;;  %v1935_v47 = vmax.f32 %v1803_v46, 0.0  ;;  %v8215_v34 = vmul.f32 %v5356_v61, %v2290_v33 }
 0x2ae   :  { %v1541_v62 = vmul.f32 0.020408163, %v12286_v5  ;;  %12288 = vst [vmem:[#allocation153_spill] sm:$0xff] %v8196_v63  ;;  %12290 = vst [vmem:[#allocation70_spill] sm:$0xff] %v8199_v57  ;;  %v12293_v23 = vld [vmem:[#allocation44_spill] sm:$0xff]  ;;  %v5360_v27 = vpop.eup %5359  ;;  %5369 = vrsqrt.f32 %v2063_v55  ;;  %v12296_v15 = vld [vmem:[#allocation155_spill] sm:$0xff]  ;;  %v1675_v53 = vmul.f32 %v8196_v63, %v8196_v63 }
 0x2af   :  { %v8212_v37 = vmul.f32 0.020408163, %v12293_v23  ;;  %12295 = vst [vmem:[#allocation226_spill] sm:$0xff] %v8215_v34  ;;  %v2065_v51 = vadd.f32 1e-05, %v1933_v21  ;;  %v12297_v23 = vld [vmem:[#allocation72_spill] sm:$0xff]  ;;  %v1776_v46 = vsub.f32 %v1512_v45, %v1644_v39  ;;  %v5362_v33 = vpop.eup %5361  ;;  %5371 = vrsqrt.f32 %v2034_v29 }
 0x2b0   :  { %v8201_v5 = vpop.xlane.xlu1 %4690  ;;  %3030 = vperm.xlu1 %5280, %v8187_v20   ;;  %v8204_v35 = vpop.xlane.xlu0 %4687  ;;  %v1805_v41 = vsub.f32 %v1541_v62, %v1673_v0  ;;  %v8224_v20 = vmul.f32 0.020408163, %v12297_v23  ;;  %v2036_v61 = vadd.f32 1e-05, %v1904_v30  ;;  %v1906_v55 = vmax.f32 %v1774_v1, 0.0  ;;  %v12300_v62 = vld [vmem:[#allocation137_spill] sm:$0xff] }
 0x2b1   :  { %12291 = vst [vmem:[#allocation136_spill] sm:$0xff] %v8201_v5  ;;  %12292 = vst [vmem:[#allocation225_spill] sm:$0xff] %v8204_v35  ;;  %3185 = vperm.xlu0 %5279, %v8199_v57   ;;  %v1543_v35 = vmul.f32 0.020408163, %v12296_v15  ;;  %v2292_v5 = vld [vmem:[%s11712_s4 + $0xc0] sm:$0xff]  ;;  %v8226_v57 = vmul.f32 %v5358_v31, %v2321_v18  ;;  %v2323_v23 = vld [vmem:[%s11712_s4 + $0x1b8] sm:$0xff]  ;;  %v5364_v63 = vpop.eup %5363  ;;  %v1646_v18 = vmul.f32 %v8212_v37, %v8212_v37  ;;  %5373 = vrsqrt.f32 %v2065_v51 }
 0x2b2   :  { %12294 = vst [vmem:[#allocation44_spill] sm:$0xff] %v8212_v37  ;;  %12298 = vst [vmem:[#allocation155_spill] sm:$0xff] %v8224_v20  ;;  %v1514_v21 = vmul.f32 0.020408163, %v12300_v62  ;;  %v12303_v31 = vld [vmem:[#allocation46_spill] sm:$0xff]  ;;  %v8243_v30 = vmul.f32 %v5360_v27, %v2292_v5  ;;  %v1937_v1 = vmax.f32 %v1805_v41, 0.0  ;;  %v1677_v37 = vmul.f32 %v8224_v20, %v8224_v20  ;;  %v5366_v5 = vpop.eup %5365 }
 0x2b3   :  { %12299 = vst [vmem:[#allocation72_spill] sm:$0xff] %v8226_v57  ;;  %v8240_v45 = vmul.f32 0.020408163, %v12303_v31  ;;  %v2067_v29 = vadd.f32 1e-05, %v1935_v47  ;;  %v1807_v39 = vsub.f32 %v1543_v35, %v1675_v53  ;;  %v12306_v62 = vld [vmem:[#allocation157_spill] sm:$0xff]  ;;  %v8254_v32 = vmul.f32 %v5362_v33, %v2323_v23 }
 0x2b4   :  { %v8229_v0 = vpop.xlane.xlu1 %4696  ;;  %3040 = vperm.xlu1 %5280, %v8215_v34   ;;  %v8232_v15 = vpop.xlane.xlu0 %4693  ;;  %12305 = vst [vmem:[#allocation228_spill] sm:$0xff] %v8243_v30  ;;  %v12307_v34 = vld [vmem:[#allocation74_spill] sm:$0xff]  ;;  %v1908_v47 = vmax.f32 %v1776_v46, 0.0  ;;  %5375 = vrsqrt.f32 %v2036_v61  ;;  %v2038_v27 = vadd.f32 1e-05, %v1906_v55  ;;  %v1778_v51 = vsub.f32 %v1514_v21, %v1646_v18  ;;  %v12313_v33 = vld [vmem:[#allocation48_spill] sm:$0xff] }
 0x2b5   :  { %12301 = vst [vmem:[#allocation137_spill] sm:$0xff] %v8229_v0  ;;  %12302 = vst [vmem:[#allocation227_spill] sm:$0xff] %v8232_v15  ;;  %3195 = vperm.xlu0 %5279, %v8226_v57   ;;  %v1545_v15 = vmul.f32 0.020408163, %v12306_v62  ;;  %v2294_v0 = vld [vmem:[%s11712_s4 + $0xd0] sm:$0xff]  ;;  %v12310_v35 = vld [vmem:[#allocation138_spill] sm:$0xff]  ;;  %v1648_v46 = vmul.f32 %v8240_v45, %v8240_v45  ;;  %5377 = vrsqrt.f32 %v2067_v29 }
 0x2b6   :  { %12304 = vst [vmem:[#allocation46_spill] sm:$0xff] %v8240_v45  ;;  %v8252_v31 = vmul.f32 0.020408163, %v12307_v34  ;;  %12309 = vst [vmem:[#allocation74_spill] sm:$0xff] %v8254_v32  ;;  %v1516_v53 = vmul.f32 0.020408163, %v12310_v35  ;;  %v8271_v61 = vmul.f32 %v5364_v63, %v2294_v0  ;;  %v5368_v55 = vpop.eup %5367  ;;  %5379 = vrsqrt.f32 %v2038_v27 }
 0x2b7   :  { %v2325_v34 = vld [vmem:[%s11712_s4 + $0x1c8] sm:$0xff]  ;;  %v8268_v23 = vmul.f32 0.020408163, %v12313_v33  ;;  %v2069_v21 = vadd.f32 1e-05, %v1937_v1  ;;  %v1939_v18 = vmax.f32 %v1807_v39, 0.0  ;;  %v1809_v35 = vsub.f32 %v1545_v15, %v1677_v37 }
 0x2b8   :  { %12308 = vst [vmem:[#allocation157_spill] sm:$0xff] %v8252_v31  ;;  %v8257_v41 = vpop.xlane.xlu1 %4861  ;;  %3050 = vperm.xlu1 %5280, %v8243_v30   ;;  %v8260_v62 = vpop.xlane.xlu0 %4864  ;;  %12315 = vst [vmem:[#allocation230_spill] sm:$0xff] %v8271_v61  ;;  %v2296_v20 = vld [vmem:[%s11712_s4 + $0xe0] sm:$0xff]  ;;  %v1679_v45 = vmul.f32 %v8252_v31, %v8252_v31  ;;  %v12317_v33 = vld [vmem:[#allocation76_spill] sm:$0xff]  ;;  %v2040_v29 = vadd.f32 1e-05, %v1908_v47  ;;  %v1780_v1 = vsub.f32 %v1516_v53, %v1648_v46 }
 0x2b9   :  { %12311 = vst [vmem:[#allocation138_spill] sm:$0xff] %v8257_v41  ;;  %12312 = vst [vmem:[#allocation229_spill] sm:$0xff] %v8260_v62  ;;  %3205 = vperm.xlu0 %5279, %v8254_v32   ;;  %v12316_v62 = vld [vmem:[#allocation159_spill] sm:$0xff]  ;;  %v8280_v30 = vmul.f32 0.020408163, %v12317_v33  ;;  %v8282_v32 = vmul.f32 %v5366_v5, %v2325_v34  ;;  %v5370_v63 = vpop.eup %5369  ;;  %v1910_v0 = vmax.f32 %v1778_v51, 0.0  ;;  %v1650_v47 = vmul.f32 %v8268_v23, %v8268_v23 }
 0x2ba   :  { %12314 = vst [vmem:[#allocation48_spill] sm:$0xff] %v8268_v23  ;;  %v1547_v41 = vmul.f32 0.020408163, %v12316_v62  ;;  %v12320_v37 = vld [vmem:[#allocation139_spill] sm:$0xff]  ;;  %v2327_v33 = vld [vmem:[%s11712_s4 + $0x1d8] sm:$0xff]  ;;  %v12323_v5 = vld [vmem:[#allocation50_spill] sm:$0xff]  ;;  %v8300_v53 = vmul.f32 %v5368_v55, %v2296_v20  ;;  %v5372_v46 = vpop.eup %5371  ;;  %5381 = vrsqrt.f32 %v2069_v21 }
 0x2bb   :  { %12318 = vst [vmem:[#allocation159_spill] sm:$0xff] %v8280_v30  ;;  %12319 = vst [vmem:[#allocation76_spill] sm:$0xff] %v8282_v32  ;;  %v1518_v15 = vmul.f32 0.020408163, %v12320_v37  ;;  %v8296_v34 = vmul.f32 0.020408163, %v12323_v5  ;;  %v1681_v23 = vmul.f32 %v8280_v30, %v8280_v30  ;;  %5383 = vrsqrt.f32 %v2040_v29  ;;  %v5374_v20 = vpop.eup %5373 }
 0x2bc   :  { %v8285_v39 = vpop.xlane.xlu1 %4870  ;;  %3060 = vperm.xlu1 %5280, %v8271_v61   ;;  %v8288_v62 = vpop.xlane.xlu0 %4867  ;;  %v12325_v27 = vld [vmem:[#allocation161_spill] sm:$0xff]  ;;  %v2071_v37 = vadd.f32 1e-05, %v1939_v18  ;;  %v2298_v31 = vld [vmem:[%s11712_s4 + $0xf0] sm:$0xff]  ;;  %v12327_v5 = vld [vmem:[#allocation78_spill] sm:$0xff] }
 0x2bd   :  { %12321 = vst [vmem:[#allocation139_spill] sm:$0xff] %v8285_v39  ;;  %12322 = vst [vmem:[#allocation231_spill] sm:$0xff] %v8288_v62  ;;  %v1549_v51 = vmul.f32 0.020408163, %v12325_v27  ;;  %3215 = vperm.xlu0 %5279, %v8282_v32   ;;  %v1941_v39 = vmax.f32 %v1809_v35, 0.0  ;;  %v1811_v62 = vsub.f32 %v1547_v41, %v1679_v45  ;;  %v8310_v27 = vmul.f32 %v5370_v63, %v2327_v33  ;;  %v12330_v18 = vld [vmem:[#allocation140_spill] sm:$0xff] }
 0x2be   :  { %12324 = vst [vmem:[#allocation50_spill] sm:$0xff] %v8296_v34  ;;  %12326 = vst [vmem:[#allocation161_spill] sm:$0xff] %v8300_v53  ;;  %v8308_v61 = vmul.f32 0.020408163, %v12327_v5  ;;  %v2042_v55 = vadd.f32 1e-05, %v1910_v0  ;;  %v1782_v21 = vsub.f32 %v1518_v15, %v1650_v47  ;;  %v1652_v29 = vmul.f32 %v8296_v34, %v8296_v34  ;;  %v5376_v15 = vpop.eup %5375 }
 0x2bf   :  { %12329 = vst [vmem:[#allocation232_spill] sm:$0xff] %v8310_v27  ;;  %v1912_v32 = vmax.f32 %v1780_v1, 0.0  ;;  %v1520_v35 = vmul.f32 0.020408163, %v12330_v18  ;;  %v2329_v5 = vld [vmem:[%s11712_s4 + $0x1e8] sm:$0xff]  ;;  %v12333_v63 = vld [vmem:[#allocation52_spill] sm:$0xff]  ;;  %v1813_v0 = vsub.f32 %v1549_v51, %v1681_v23  ;;  %v8327_v1 = vmul.f32 %v5372_v46, %v2298_v31 }
 0x2c0   :  { %12328 = vst [vmem:[#allocation78_spill] sm:$0xff] %v8308_v61  ;;  %v8313_v45 = vpop.xlane.xlu1 %4876  ;;  %3070 = vperm.xlu1 %5280, %v8300_v53   ;;  %v8316_v41 = vpop.xlane.xlu0 %4873  ;;  %v8324_v33 = vmul.f32 0.020408163, %v12333_v63  ;;  %5385 = vrsqrt.f32 %v2071_v37  ;;  %v2073_v47 = vadd.f32 1e-05, %v1941_v39  ;;  %v1943_v18 = vmax.f32 %v1811_v62, 0.0 }
 0x2c1   :  { %12331 = vst [vmem:[#allocation140_spill] sm:$0xff] %v8313_v45  ;;  %12332 = vst [vmem:[#allocation233_spill] sm:$0xff] %v8316_v41  ;;  %3225 = vperm.xlu0 %5279, %v8310_v27   ;;  %v12336_v45 = vld [vmem:[#allocation163_spill] sm:$0xff]  ;;  %v2300_v30 = vld [vmem:[%s11712_s4 + $0x100] sm:$0xff]  ;;  %v5378_v53 = vpop.eup %5377  ;;  %v1683_v63 = vmul.f32 %v8308_v61, %v8308_v61  ;;  %v8339_v46 = vmul.f32 %v5374_v20, %v2329_v5  ;;  %5387 = vrsqrt.f32 %v2042_v55  ;;  %v2044_v39 = vadd.f32 1e-05, %v1912_v32 }
 0x2c2   :  { %12334 = vst [vmem:[#allocation52_spill] sm:$0xff] %v8324_v33  ;;  %12335 = vst [vmem:[#allocation234_spill] sm:$0xff] %v8327_v1  ;;  %v1551_v41 = vmul.f32 0.020408163, %v12336_v45  ;;  %v12337_v34 = vld [vmem:[#allocation80_spill] sm:$0xff]  ;;  %v12339_v51 = vld [vmem:[#allocation141_spill] sm:$0xff]  ;;  %v1784_v37 = vsub.f32 %v1520_v35, %v1652_v29  ;;  %v8355_v32 = vmul.f32 %v5376_v15, %v2300_v30  ;;  %5389 = vrsqrt.f32 %v2073_v47 }
 0x2c3   :  { %v8336_v23 = vmul.f32 0.020408163, %v12337_v34  ;;  %v1522_v31 = vmul.f32 0.020408163, %v12339_v51  ;;  %12340 = vst [vmem:[#allocation80_spill] sm:$0xff] %v8339_v46  ;;  %v1914_v62 = vmax.f32 %v1782_v21, 0.0  ;;  %v1654_v34 = vmul.f32 %v8324_v33, %v8324_v33  ;;  %v5380_v21 = vpop.eup %5379 }
 0x2c4   :  { %v8341_v45 = vpop.xlane.xlu1 %4894  ;;  %3080 = vperm.xlu1 %5280, %v8327_v1   ;;  %v8344_v27 = vpop.xlane.xlu0 %4891  ;;  %v2331_v61 = vld [vmem:[%s11712_s4 + $0x1f8] sm:$0xff]  ;;  %v12343_v51 = vld [vmem:[#allocation54_spill] sm:$0xff]  ;;  %v1945_v55 = vmax.f32 %v1813_v0, 0.0  ;;  %12345 = vst [vmem:[#allocation236_spill] sm:$0xff] %v8355_v32  ;;  %v2075_v35 = vadd.f32 1e-05, %v1943_v18  ;;  %v1815_v5 = vsub.f32 %v1551_v41, %v1683_v63  ;;  %5391 = vrsqrt.f32 %v2044_v39 }
 0x2c5   :  { %12338 = vst [vmem:[#allocation163_spill] sm:$0xff] %v8336_v23  ;;  %12341 = vst [vmem:[#allocation141_spill] sm:$0xff] %v8341_v45  ;;  %v8352_v20 = vmul.f32 0.020408163, %v12343_v51  ;;  %3235 = vperm.xlu0 %5279, %v8339_v46   ;;  %v12346_v29 = vld [vmem:[#allocation165_spill] sm:$0xff]  ;;  %v1685_v33 = vmul.f32 %v8336_v23, %v8336_v23  ;;  %v12347_v51 = vld [vmem:[#allocation82_spill] sm:$0xff]  ;;  %v1786_v0 = vsub.f32 %v1522_v31, %v1654_v34  ;;  %v5382_v30 = vpop.eup %5381 }
 0x2c6   :  { %12342 = vst [vmem:[#allocation235_spill] sm:$0xff] %v8344_v27  ;;  %v1553_v45 = vmul.f32 0.020408163, %v12346_v29  ;;  %v2302_v27 = vld [vmem:[%s11712_s4 + $0x110] sm:$0xff]  ;;  %v8364_v1 = vmul.f32 0.020408163, %v12347_v51  ;;  %v8366_v46 = vmul.f32 %v5378_v53, %v2331_v61  ;;  %v5384_v23 = vpop.eup %5383  ;;  %5393 = vrsqrt.f32 %v2075_v35 }
 0x2c7   :  { %12344 = vst [vmem:[#allocation54_spill] sm:$0xff] %v8352_v20  ;;  %v2046_v15 = vadd.f32 1e-05, %v1914_v62  ;;  %v1916_v47 = vmax.f32 %v1784_v37, 0.0  ;;  %v12350_v41 = vld [vmem:[#allocation142_spill] sm:$0xff]  ;;  %v2333_v51 = vld [vmem:[%s11712_s4 + $0x208] sm:$0xff]  ;;  %v1656_v61 = vmul.f32 %v8352_v20, %v8352_v20  ;;  %v8383_v62 = vmul.f32 %v5380_v21, %v2302_v27 }
 0x2c8   :  { %12348 = vst [vmem:[#allocation165_spill] sm:$0xff] %v8364_v1  ;;  %12349 = vst [vmem:[#allocation82_spill] sm:$0xff] %v8366_v46  ;;  %v1524_v18 = vmul.f32 0.020408163, %v12350_v41  ;;  %v8369_v63 = vpop.xlane.xlu1 %4900  ;;  %3090 = vperm.xlu1 %5280, %v8355_v32   ;;  %v8372_v29 = vpop.xlane.xlu0 %4897  ;;  %v12353_v53 = vld [vmem:[#allocation56_spill] sm:$0xff]  ;;  %v1947_v37 = vmax.f32 %v1815_v5, 0.0  ;;  %v1817_v34 = vsub.f32 %v1553_v45, %v1685_v33  ;;  %v1687_v20 = vmul.f32 %v8364_v1, %v8364_v1 }
 0x2c9   :  { %12351 = vst [vmem:[#allocation142_spill] sm:$0xff] %v8369_v63  ;;  %12352 = vst [vmem:[#allocation237_spill] sm:$0xff] %v8372_v29  ;;  %v8380_v31 = vmul.f32 0.020408163, %v12353_v53  ;;  %v2077_v39 = vadd.f32 1e-05, %v1945_v55  ;;  %3245 = vperm.xlu0 %5279, %v8366_v46   ;;  %v8394_v57 = vmul.f32 %v5382_v30, %v2333_v51  ;;  %5395 = vrsqrt.f32 %v2046_v15 }
 0x2ca   :  { %12355 = vst [vmem:[#allocation238_spill] sm:$0xff] %v8383_v62  ;;  %v12356_v41 = vld [vmem:[#allocation167_spill] sm:$0xff]  ;;  %v2304_v29 = vld [vmem:[%s11712_s4 + $0x120] sm:$0xff]  ;;  %v12357_v32 = vld [vmem:[#allocation84_spill] sm:$0xff]  ;;  %v1918_v55 = vmax.f32 %v1786_v0, 0.0  ;;  %v5386_v27 = vpop.eup %5385  ;;  %v1788_v35 = vsub.f32 %v1524_v18, %v1656_v61  ;;  %v1949_v61 = vmax.f32 %v1817_v34, 0.0 }
 0x2cb   :  { %12354 = vst [vmem:[#allocation56_spill] sm:$0xff] %v8380_v31  ;;  %v1555_v63 = vmul.f32 0.020408163, %v12356_v41  ;;  %v8392_v53 = vmul.f32 0.020408163, %v12357_v32  ;;  %12359 = vst [vmem:[#allocation84_spill] sm:$0xff] %v8394_v57  ;;  %v1658_v0 = vmul.f32 %v8380_v31, %v8380_v31  ;;  %5397 = vrsqrt.f32 %v2077_v39 }
 0x2cc   :  { %v2048_v21 = vadd.f32 1e-05, %v1916_v47  ;;  %v12360_v33 = vld [vmem:[#allocation143_spill] sm:$0xff]  ;;  %v8397_v5 = vpop.xlane.xlu1 %4906  ;;  %3100 = vperm.xlu1 %5280, %v8383_v62   ;;  %v8400_v41 = vpop.xlane.xlu0 %4903  ;;  %v2335_v32 = vld [vmem:[%s11712_s4 + $0x218] sm:$0xff]  ;;  %v12363_v30 = vld [vmem:[#allocation58_spill] sm:$0xff]  ;;  %v8411_v15 = vmul.f32 %v5384_v23, %v2304_v29  ;;  %v1920_v29 = vmax.f32 %v1788_v35, 0.0 }
 0x2cd   :  { %12358 = vst [vmem:[#allocation167_spill] sm:$0xff] %v8392_v53  ;;  %v1526_v45 = vmul.f32 0.020408163, %v12360_v33  ;;  %12361 = vst [vmem:[#allocation143_spill] sm:$0xff] %v8397_v5  ;;  %v8408_v51 = vmul.f32 0.020408163, %v12363_v30  ;;  %3255 = vperm.xlu0 %5279, %v8394_v57   ;;  %v5388_v47 = vpop.eup %5387  ;;  %v1819_v33 = vsub.f32 %v1555_v63, %v1687_v20  ;;  %v1689_v31 = vmul.f32 %v8392_v53, %v8392_v53 }
 0x2ce   :  { %12362 = vst [vmem:[#allocation239_spill] sm:$0xff] %v8400_v41  ;;  %12365 = vst [vmem:[#allocation240_spill] sm:$0xff] %v8411_v15  ;;  %v2079_v18 = vadd.f32 1e-05, %v1947_v37  ;;  %v12366_v5 = vld [vmem:[#allocation169_spill] sm:$0xff]  ;;  %v2306_v1 = vld [vmem:[%s11712_s4 + $0x130] sm:$0xff]  ;;  %v8422_v57 = vmul.f32 %v5386_v27, %v2335_v32  ;;  %v5390_v23 = vpop.eup %5389  ;;  %5399 = vrsqrt.f32 %v2048_v21 }
 0x2cf   :  { %12364 = vst [vmem:[#allocation58_spill] sm:$0xff] %v8408_v51  ;;  %v1557_v41 = vmul.f32 0.020408163, %v12366_v5  ;;  %v12367_v30 = vld [vmem:[#allocation86_spill] sm:$0xff]  ;;  %v2050_v39 = vadd.f32 1e-05, %v1918_v55  ;;  %v1790_v37 = vsub.f32 %v1526_v45, %v1658_v0  ;;  %v8438_v35 = vmul.f32 %v5388_v47, %v2306_v1  ;;  %v5392_v45 = vpop.eup %5391 }
 0x2d0   :  { %v8420_v62 = vmul.f32 0.020408163, %v12367_v30  ;;  %12369 = vst [vmem:[#allocation86_spill] sm:$0xff] %v8422_v57  ;;  %v12370_v20 = vld [vmem:[#allocation144_spill] sm:$0xff]  ;;  %v8425_v34 = vpop.xlane.xlu1 %5071  ;;  %3110 = vperm.xlu1 %5280, %v8411_v15   ;;  %v2337_v5 = vld [vmem:[%s11712_s4 + $0x228] sm:$0xff]  ;;  %v1660_v30 = vmul.f32 %v8408_v51, %v8408_v51  ;;  %5401 = vrsqrt.f32 %v2079_v18  ;;  %v8440_v53 = vpop.xlane.xlu0 %5086  ;;  %v2308_v51 = vld [vmem:[%s11712_s4 + $0x140] sm:$0xff] }
 0x2d1   :  { %v1528_v63 = vmul.f32 0.020408163, %v12370_v20  ;;  %12371 = vst [vmem:[#allocation144_spill] sm:$0xff] %v8425_v34  ;;  %v12372_v55 = vld [vmem:[#allocation60_spill] sm:$0xff]  ;;  %v12374_v32 = vld [vmem:[#allocation171_spill] sm:$0xff]  ;;  %3265 = vperm.xlu0 %5279, %v8422_v57   ;;  %v1951_v20 = vmax.f32 %v1819_v33, 0.0  ;;  %v1821_v34 = vsub.f32 %v1557_v41, %v1689_v31  ;;  %5403 = vrsqrt.f32 %v2050_v39  ;;  %v5394_v47 = vpop.eup %5393 }
 0x2d2   :  { %12368 = vst [vmem:[#allocation169_spill] sm:$0xff] %v8420_v62  ;;  %v8434_v27 = vmul.f32 0.020408163, %v12372_v55  ;;  %v1559_v21 = vmul.f32 0.020408163, %v12374_v32  ;;  %12375 = vst [vmem:[#allocation171_spill] sm:$0xff] %v8438_v35  ;;  %v1691_v55 = vmul.f32 %v8420_v62, %v8420_v62  ;;  %v8450_v1 = vmul.f32 %v5390_v23, %v2337_v5 }
 0x2d3   :  { %v2081_v0 = vadd.f32 1e-05, %v1949_v61  ;;  %12376 = vst [vmem:[#allocation241_spill] sm:$0xff] %v8440_v53  ;;  %v12377_v15 = vld [vmem:[#allocation88_spill] sm:$0xff]  ;;  %v2052_v18 = vadd.f32 1e-05, %v1920_v29  ;;  %v1792_v33 = vsub.f32 %v1528_v63, %v1660_v30  ;;  %v8465_v29 = vmul.f32 %v5392_v45, %v2308_v51 }
 0x2d4   :  { %12373 = vst [vmem:[#allocation60_spill] sm:$0xff] %v8434_v27  ;;  %v8448_v32 = vmul.f32 0.020408163, %v12377_v15  ;;  %12379 = vst [vmem:[#allocation242_spill] sm:$0xff] %v8450_v1  ;;  %v1922_v61 = vmax.f32 %v1790_v37, 0.0  ;;  %v12380_v31 = vld [vmem:[#allocation145_spill] sm:$0xff]  ;;  %v8453_v53 = vpop.xlane.xlu1 %5074  ;;  %3120 = vperm.xlu1 %5280, %v8438_v35   ;;  %v1662_v15 = vmul.f32 %v8434_v27, %v8434_v27  ;;  %v1823_v5 = vsub.f32 %v1559_v21, %v1691_v55  ;;  %v5396_v37 = vpop.eup %5395 }
 0x2d5   :  { %v1530_v41 = vmul.f32 0.020408163, %v12380_v31  ;;  %12381 = vst [vmem:[#allocation145_spill] sm:$0xff] %v8453_v53  ;;  %v2339_v62 = vld [vmem:[%s11712_s4 + $0x238] sm:$0xff]  ;;  %v12382_v39 = vld [vmem:[#allocation62_spill] sm:$0xff]  ;;  %3275 = vperm.xlu0 %5279, %v8450_v1   ;;  %12384 = vst [vmem:[#allocation243_spill] sm:$0xff] %v8465_v29  ;;  %5405 = vrsqrt.f32 %v2081_v0  ;;  %v5398_v57 = vpop.eup %5397 }
 0x2d6   :  { %12378 = vst [vmem:[#allocation88_spill] sm:$0xff] %v8448_v32  ;;  %v8462_v23 = vmul.f32 0.020408163, %v12382_v39  ;;  %v2083_v63 = vadd.f32 1e-05, %v1951_v20  ;;  %v1953_v30 = vmax.f32 %v1821_v34, 0.0  ;;  %v1693_v39 = vmul.f32 %v8448_v32, %v8448_v32 }
 0x2d7   :  { %v12385_v31 = vld [vmem:[#allocation173_spill] sm:$0xff]  ;;  %v2310_v35 = vld [vmem:[%s11712_s4 + $0x150] sm:$0xff]  ;;  %v12386_v27 = vld [vmem:[#allocation90_spill] sm:$0xff]  ;;  %v8477_v45 = vmul.f32 %v5394_v47, %v2339_v62  ;;  %5407 = vrsqrt.f32 %v2052_v18  ;;  %v2054_v0 = vadd.f32 1e-05, %v1922_v61  ;;  %v1924_v34 = vmax.f32 %v1792_v33, 0.0 }
 0x2d8   :  { %12383 = vst [vmem:[#allocation62_spill] sm:$0xff] %v8462_v23  ;;  %v1561_v53 = vmul.f32 0.020408163, %v12385_v31  ;;  %v8474_v21 = vmul.f32 0.020408163, %v12386_v27  ;;  %v12388_v55 = vld [vmem:[#allocation146_spill] sm:$0xff]  ;;  %v1794_v20 = vsub.f32 %v1530_v41, %v1662_v15  ;;  %v8479_v31 = vpop.xlane.xlu1 %5077  ;;  %3130 = vperm.xlu1 %5280, %v8465_v29   ;;  %v8482_v1 = vpop.permute.xlu0 %2930  ;;  %v1664_v27 = vmul.f32 %v8462_v23, %v8462_v23 }
 0x2d9   :  { %v1532_v51 = vmul.f32 0.020408163, %v12388_v55  ;;  %12389 = vst [vmem:[#allocation90_spill] sm:$0xff] %v8477_v45  ;;  %12390 = vst [vmem:[#allocation146_spill] sm:$0xff] %v8479_v31  ;;  %v2341_v32 = vld [vmem:[%s11712_s4 + $0x248] sm:$0xff]  ;;  %v1955_v47 = vmax.f32 %v1823_v5, 0.0  ;;  %3285 = vperm.xlu0 %5279, %v8477_v45   ;;  %v8493_v18 = vmul.f32 %v5396_v37, %v2310_v35  ;;  %v5400_v61 = vpop.eup %5399  ;;  %5409 = vrsqrt.f32 %v2083_v63 }
 0x2da   :  { %12387 = vst [vmem:[#allocation173_spill] sm:$0xff] %v8474_v21  ;;  %12391 = vst [vmem:[#allocation244_spill] sm:$0xff] %v8482_v1  ;;  %v12392_v55 = vld [vmem:[#allocation63_spill] sm:$0xff]  ;;  %v2085_v33 = vadd.f32 1e-05, %v1953_v30  ;;  %v1825_v41 = vsub.f32 %v1561_v53, %v1693_v39  ;;  %v2312_v1 = vld [vmem:[%s11712_s4 + $0x160] sm:$0xff]  ;;  %v1695_v23 = vmul.f32 %v8474_v21, %v8474_v21  ;;  %v8504_v45 = vmul.f32 %v5398_v57, %v2341_v32  ;;  %v5402_v35 = vpop.eup %5401 }
 0x2db   :  { %v8490_v62 = vmul.f32 0.020408163, %v12392_v55  ;;  %12394 = vst [vmem:[#allocation245_spill] sm:$0xff] %v8493_v18  ;;  %v12395_v15 = vld [vmem:[#allocation175_spill] sm:$0xff]  ;;  %v12396_v55 = vld [vmem:[#allocation92_spill] sm:$0xff]  ;;  %v1796_v5 = vsub.f32 %v1532_v51, %v1664_v27  ;;  %5411 = vrsqrt.f32 %v2054_v0  ;;  %v1926_v63 = vmax.f32 %v1794_v20, 0.0  ;;  %v5404_v21 = vpop.eup %5403 }
 0x2dc   :  { %v1563_v31 = vmul.f32 0.020408163, %v12395_v15  ;;  %v8502_v29 = vmul.f32 0.020408163, %v12396_v55  ;;  %v2056_v37 = vadd.f32 1e-05, %v1924_v34  ;;  %v8507_v39 = vpop.xlane.xlu1 %5080  ;;  %3140 = vperm.xlu1 %5280, %v8493_v18   ;;  %v8510_v15 = vpop.permute.xlu0 %2975  ;;  %v8521_v34 = vmul.f32 %v5400_v61, %v2312_v1 }
 0x2dd   :  { %12393 = vst [vmem:[#allocation63_spill] sm:$0xff] %v8490_v62  ;;  %v12398_v53 = vld [vmem:[#allocation148_spill] sm:$0xff]  ;;  %12399 = vst [vmem:[#allocation92_spill] sm:$0xff] %v8507_v39  ;;  %v2343_v55 = vld [vmem:[%s11712_s4 + $0x258] sm:$0xff]  ;;  %v1666_v57 = vmul.f32 %v8490_v62, %v8490_v62  ;;  %v2087_v0 = vadd.f32 1e-05, %v1955_v47  ;;  %3295 = vperm.xlu0 %5279, %v8504_v45   ;;  %5413 = vrsqrt.f32 %v2085_v33 }
 0x2de   :  { %12397 = vst [vmem:[#allocation175_spill] sm:$0xff] %v8502_v29  ;;  %v1534_v30 = vmul.f32 0.020408163, %v12398_v53  ;;  %12400 = vst [vmem:[#allocation148_spill] sm:$0xff] %v8510_v15  ;;  %v12401_v32 = vld [vmem:[#allocation65_spill] sm:$0xff]  ;;  %v1957_v20 = vmax.f32 %v1825_v41, 0.0  ;;  %v1827_v27 = vsub.f32 %v1563_v31, %v1695_v23  ;;  %v1697_v62 = vmul.f32 %v8502_v29, %v8502_v29 }
 0x2df   :  { %v8518_v51 = vmul.f32 0.020408163, %v12401_v32  ;;  %12403 = vst [vmem:[#allocation246_spill] sm:$0xff] %v8521_v34  ;;  %v12404_v53 = vld [vmem:[#allocation177_spill] sm:$0xff]  ;;  %v2314_v15 = vld [vmem:[%s11712_s4 + $0x170] sm:$0xff]  ;;  %v12405_v18 = vld [vmem:[#allocation94_spill] sm:$0xff]  ;;  %v8532_v46 = vmul.f32 %v5402_v35, %v2343_v55  ;;  %v5406_v1 = vpop.eup %5405  ;;  %5415 = vrsqrt.f32 %v2056_v37 }
 0x2e0   :  { %v1565_v39 = vmul.f32 0.020408163, %v12404_v53  ;;  %v8530_v32 = vmul.f32 0.020408163, %v12405_v18  ;;  %v1928_v47 = vmax.f32 %v1796_v5, 0.0  ;;  %v1798_v33 = vsub.f32 %v1534_v30, %v1666_v57  ;;  %v12408_v23 = vld [vmem:[#allocation150_spill] sm:$0xff]  ;;  %v8535_v41 = vpop.xlane.xlu1 %5083  ;;  %3150 = vperm.xlu1 %5280, %v8521_v34   ;;  %v8538_v53 = vpop.permute.xlu0 %2985 }
 0x2e1   :  { %12402 = vst [vmem:[#allocation65_spill] sm:$0xff] %v8518_v51  ;;  %12407 = vst [vmem:[#allocation94_spill] sm:$0xff] %v8532_v46  ;;  %v2058_v61 = vadd.f32 1e-05, %v1926_v63  ;;  %v1536_v31 = vmul.f32 0.020408163, %v12408_v23  ;;  %v1668_v5 = vmul.f32 %v8518_v51, %v8518_v51  ;;  %5417 = vrsqrt.f32 %v2087_v0  ;;  %3305 = vperm.xlu0 %5279, %v8532_v46   ;;  %v5408_v63 = vpop.eup %5407 }
 0x2e2   :  { %12406 = vst [vmem:[#allocation177_spill] sm:$0xff] %v8530_v32  ;;  %12409 = vst [vmem:[#allocation150_spill] sm:$0xff] %v8535_v41  ;;  %v2345_v18 = vld [vmem:[%s11712_s4 + $0x268] sm:$0xff]  ;;  %v8549_v37 = vmul.f32 %v5404_v21, %v2314_v15  ;;  %v2089_v30 = vadd.f32 1e-05, %v1957_v20  ;;  %v1959_v57 = vmax.f32 %v1827_v27, 0.0  ;;  %v1829_v23 = vsub.f32 %v1565_v39, %v1697_v62 }
 0x2e3   :  { %12410 = vst [vmem:[#allocation247_spill] sm:$0xff] %v8538_v53  ;;  %v12411_v35 = vld [vmem:[#allocation67_spill] sm:$0xff]  ;;  %v2316_v53 = vld [vmem:[%s11712_s4 + $0x180] sm:$0xff]  ;;  %v1699_v51 = vmul.f32 %v8530_v32, %v8530_v32  ;;  %v2060_v0 = vadd.f32 1e-05, %v1928_v47  ;;  %v8560_v46 = vmul.f32 %v5406_v1, %v2345_v18  ;;  %v5410_v21 = vpop.eup %5409  ;;  %5419 = vrsqrt.f32 %v2058_v61  ;;  %v12418_v62 = vld [vmem:[#allocation152_spill] sm:$0xff] }
 0x2e4   :  { %v8546_v55 = vmul.f32 0.020408163, %v12411_v35  ;;  %12413 = vst [vmem:[#allocation248_spill] sm:$0xff] %v8549_v37  ;;  %v12414_v41 = vld [vmem:[#allocation179_spill] sm:$0xff]  ;;  %v12415_v35 = vld [vmem:[#allocation96_spill] sm:$0xff]  ;;  %v1930_v15 = vmax.f32 %v1798_v33, 0.0  ;;  %v1800_v20 = vsub.f32 %v1536_v31, %v1668_v5  ;;  %v8563_v27 = vpop.xlane.xlu1 %5101  ;;  %3160 = vperm.xlu1 %5280, %v8549_v37   ;;  %v8578_v31 = vmul.f32 %v5408_v63, %v2316_v53 }
 0x2e5   :  { %v1567_v29 = vmul.f32 0.020408163, %v12414_v41  ;;  %v8558_v34 = vmul.f32 0.020408163, %v12415_v35  ;;  %12417 = vst [vmem:[#allocation96_spill] sm:$0xff] %v8560_v46  ;;  %12419 = vst [vmem:[#allocation152_spill] sm:$0xff] %v8563_v27  ;;  %v8566_v41 = vpop.permute.xlu0 %2995  ;;  %3315 = vperm.xlu0 %5279, %v8560_v46   ;;  %v5412_v5 = vpop.eup %5411  ;;  %5421 = vrsqrt.f32 %v2089_v30 }
 0x2e6   :  { %12412 = vst [vmem:[#allocation67_spill] sm:$0xff] %v8546_v55  ;;  %v1538_v39 = vmul.f32 0.020408163, %v12418_v62  ;;  %12420 = vst [vmem:[#allocation249_spill] sm:$0xff] %v8566_v41  ;;  %v2347_v35 = vld [vmem:[%s11712_s4 + $0x278] sm:$0xff]  ;;  %v1670_v47 = vmul.f32 %v8546_v55, %v8546_v55  ;;  %v1961_v27 = vmax.f32 %v1829_v23, 0.0  ;;  %5423 = vrsqrt.f32 %v2060_v0 }
 0x2e7   :  { %12416 = vst [vmem:[#allocation179_spill] sm:$0xff] %v8558_v34  ;;  %v12421_v1 = vld [vmem:[#allocation69_spill] sm:$0xff]  ;;  %v2091_v62 = vadd.f32 1e-05, %v1959_v57  ;;  %v1831_v32 = vsub.f32 %v1567_v29, %v1699_v51  ;;  %v2318_v41 = vld [vmem:[%s11712_s4 + $0x190] sm:$0xff]  ;;  %v1701_v55 = vmul.f32 %v8558_v34, %v8558_v34  ;;  %v5414_v53 = vpop.eup %5413  ;;  %v1932_v46 = vmax.f32 %v1800_v20, 0.0 }
 0x2e8   :  { %v8574_v18 = vmul.f32 0.020408163, %v12421_v1  ;;  %v12423_v61 = vld [vmem:[#allocation181_spill] sm:$0xff]  ;;  %v12425_v1 = vld [vmem:[#allocation98_spill] sm:$0xff]  ;;  %v2062_v63 = vadd.f32 1e-05, %v1930_v15  ;;  %v1802_v30 = vsub.f32 %v1538_v39, %v1670_v47  ;;  %v8591_v29 = vpop.xlane.xlu1 %5104  ;;  %3170 = vperm.xlu1 %5280, %v8578_v31   ;;  %v8605_v20 = vmul.f32 %v5412_v5, %v2318_v41 }
 0x2e9   :  { %v1569_v33 = vmul.f32 0.020408163, %v12423_v61  ;;  %12424 = vst [vmem:[#allocation181_spill] sm:$0xff] %v8578_v31  ;;  %v8586_v37 = vmul.f32 0.020408163, %v12425_v1  ;;  %v8588_v61 = vmul.f32 %v5410_v21, %v2347_v35  ;;  %v12428_v57 = vld [vmem:[#allocation154_spill] sm:$0xff]  ;;  %v8594_v51 = vpop.permute.xlu0 %3005  ;;  %v5416_v39 = vpop.eup %5415  ;;  %5425 = vrsqrt.f32 %v2091_v62 }
 0x2ea   :  { %12422 = vst [vmem:[#allocation69_spill] sm:$0xff] %v8574_v18  ;;  %v1540_v23 = vmul.f32 0.020408163, %v12428_v57  ;;  %12429 = vst [vmem:[#allocation154_spill] sm:$0xff] %v8591_v29  ;;  %v2349_v1 = vld [vmem:[%s11712_s4 + $0x288] sm:$0xff]  ;;  %v1672_v0 = vmul.f32 %v8574_v18, %v8574_v18  ;;  %v1963_v57 = vmax.f32 %v1831_v32, 0.0  ;;  %5427 = vrsqrt.f32 %v2062_v63 }
 0x2eb   :  { %12426 = vst [vmem:[#allocation98_spill] sm:$0xff] %v8586_v37  ;;  %12427 = vst [vmem:[#allocation250_spill] sm:$0xff] %v8588_v61  ;;  %v12431_v21 = vld [vmem:[#allocation71_spill] sm:$0xff]  ;;  %v1833_v15 = vsub.f32 %v1569_v33, %v1701_v55  ;;  %3325 = vperm.xlu0 %5279, %v8588_v61   ;;  %v2093_v47 = vadd.f32 1e-05, %v1961_v27  ;;  %v5418_v31 = vpop.eup %5417  ;;  %v12434_v18 = vld [vmem:[#allocation100_spill] sm:$0xff]  ;;  %v8617_v5 = vmul.f32 %v5414_v53, %v2349_v1 }
 0x2ec   :  { %12430 = vst [vmem:[#allocation251_spill] sm:$0xff] %v8594_v51  ;;  %v8602_v35 = vmul.f32 0.020408163, %v12431_v21  ;;  %v12433_v29 = vld [vmem:[#allocation183_spill] sm:$0xff]  ;;  %v2320_v51 = vld [vmem:[%s11712_s4 + $0x1a0] sm:$0xff]  ;;  %v1703_v21 = vmul.f32 %v8586_v37, %v8586_v37  ;;  %v12436_v33 = vld [vmem:[#allocation156_spill] sm:$0xff]  ;;  %v1804_v62 = vsub.f32 %v1540_v23, %v1672_v0  ;;  %3180 = vperm.xlu1 %5280, %v8605_v20  }
 0x2ed   :  { %v1571_v34 = vmul.f32 0.020408163, %v12433_v29  ;;  %v8614_v55 = vmul.f32 0.020408163, %v12434_v18  ;;  %v1542_v41 = vmul.f32 0.020408163, %v12436_v33  ;;  %v8619_v29 = vpop.xlane.xlu1 %5107  ;;  %v8622_v61 = vpop.permute.xlu0 %3015  ;;  %5429 = vrsqrt.f32 %v2093_v47 }
 0x2ee   :  { %12432 = vst [vmem:[#allocation71_spill] sm:$0xff] %v8602_v35  ;;  %12437 = vst [vmem:[#allocation100_spill] sm:$0xff] %v8617_v5  ;;  %v2064_v27 = vadd.f32 1e-05, %v1932_v46  ;;  %v1934_v32 = vmax.f32 %v1802_v30, 0.0  ;;  %v2351_v37 = vld [vmem:[%s11712_s4 + $0x298] sm:$0xff]  ;;  %v1674_v18 = vmul.f32 %v8602_v35, %v8602_v35  ;;  %v8633_v46 = vmul.f32 %v5416_v39, %v2320_v51  ;;  %v5420_v30 = vpop.eup %5419 }
 0x2ef   :  { %12435 = vst [vmem:[#allocation183_spill] sm:$0xff] %v8614_v55  ;;  %12438 = vst [vmem:[#allocation156_spill] sm:$0xff] %v8619_v29  ;;  %v12440_v33 = vld [vmem:[#allocation73_spill] sm:$0xff]  ;;  %v1965_v63 = vmax.f32 %v1833_v15, 0.0  ;;  %3335 = vperm.xlu0 %5279, %v8617_v5   ;;  %v2095_v23 = vadd.f32 1e-05, %v1963_v57  ;;  %v1835_v1 = vsub.f32 %v1571_v34, %v1703_v21  ;;  %v1705_v35 = vmul.f32 %v8614_v55, %v8614_v55  ;;  %v5422_v51 = vpop.eup %5421 }
 0x2f0   :  { %12439 = vst [vmem:[#allocation252_spill] sm:$0xff] %v8622_v61  ;;  %v8630_v53 = vmul.f32 0.020408163, %v12440_v33  ;;  %12442 = vst [vmem:[#allocation253_spill] sm:$0xff] %v8633_v46  ;;  %v1573_v0 = vmul.f32 0.020408163, %v7620_v10  ;;  %v1806_v15 = vsub.f32 %v1542_v41, %v1674_v18  ;;  %v8644_v5 = vmul.f32 %v5418_v31, %v2351_v37  ;;  %3190 = vperm.xlu1 %5280, %v8633_v46   ;;  %v5424_v55 = vpop.eup %5423 }
 0x2f1   :  { %v2322_v29 = vld [vmem:[%s11712_s4 + $0x1b0] sm:$0xff]  ;;  %v12443_v33 = vld [vmem:[#allocation102_spill] sm:$0xff]  ;;  %5431 = vrsqrt.f32 %v2064_v27  ;;  %v2066_v39 = vadd.f32 1e-05, %v1934_v32  ;;  %v1936_v47 = vmax.f32 %v1804_v62, 0.0  ;;  %v8647_v10 = vpop.xlane.xlu1 %5110  ;;  %v8650_v21 = vpop.permute.xlu0 %3025  ;;  %v12448_v31 = vld [vmem:[#allocation75_spill] sm:$0xff] }
 0x2f2   :  { %12441 = vst [vmem:[#allocation73_spill] sm:$0xff] %v8630_v53  ;;  %v8642_v61 = vmul.f32 0.020408163, %v12443_v33  ;;  %v12445_v34 = vld [vmem:[#allocation158_spill] sm:$0xff]  ;;  %12447 = vst [vmem:[#allocation254_spill] sm:$0xff] %v8650_v21  ;;  %v2353_v33 = vld [vmem:[%s11712_s4 + $0x2a8] sm:$0xff]  ;;  %v1676_v37 = vmul.f32 %v8630_v53, %v8630_v53  ;;  %v8661_v32 = vmul.f32 %v5420_v30, %v2322_v29  ;;  %5433 = vrsqrt.f32 %v2095_v23 }
 0x2f3   :  { %v1544_v57 = vmul.f32 0.020408163, %v12445_v34  ;;  %12446 = vst [vmem:[#allocation158_spill] sm:$0xff] %v8647_v10  ;;  %v8658_v41 = vmul.f32 0.020408163, %v12448_v31  ;;  %3345 = vperm.xlu0 %5279, %v8644_v5   ;;  %v1967_v62 = vmax.f32 %v1835_v1, 0.0  ;;  %v1837_v18 = vsub.f32 %v1573_v0, %v1705_v35  ;;  %v5426_v29 = vpop.eup %5425 }
 0x2f4   :  { %12444 = vst [vmem:[#allocation102_spill] sm:$0xff] %v8642_v61  ;;  %v2097_v27 = vadd.f32 1e-05, %v1965_v63  ;;  %v1575_v34 = vmul.f32 0.020408163, %v7643_v8  ;;  %v2324_v10 = vld [vmem:[%s11712_s4 + $0x1c0] sm:$0xff]  ;;  %v1707_v53 = vmul.f32 %v8642_v61, %v8642_v61  ;;  %v8672_v46 = vmul.f32 %v5422_v51, %v2353_v33  ;;  %3200 = vperm.xlu1 %5280, %v8661_v32  }
 0x2f5   :  { %12449 = vst [vmem:[#allocation75_spill] sm:$0xff] %v8658_v41  ;;  %v12450_v21 = vld [vmem:[#allocation104_spill] sm:$0xff]  ;;  %v1938_v63 = vmax.f32 %v1806_v15, 0.0  ;;  %5435 = vrsqrt.f32 %v2066_v39  ;;  %v2068_v30 = vadd.f32 1e-05, %v1936_v47  ;;  %v1808_v23 = vsub.f32 %v1544_v57, %v1676_v37  ;;  %v8675_v8 = vpop.xlane.xlu1 %5113  ;;  %v8678_v0 = vpop.permute.xlu0 %3035  ;;  %v12456_v51 = vld [vmem:[#allocation77_spill] sm:$0xff] }
 0x2f6   :  { %v8670_v31 = vmul.f32 0.020408163, %v12450_v21  ;;  %12452 = vst [vmem:[#allocation255_spill] sm:$0xff] %v8672_v46  ;;  %v12453_v35 = vld [vmem:[#allocation160_spill] sm:$0xff]  ;;  %12455 = vst [vmem:[#allocation256_spill] sm:$0xff] %v8678_v0  ;;  %v2355_v21 = vld [vmem:[%s11712_s4 + $0x2b8] sm:$0xff]  ;;  %v1678_v15 = vmul.f32 %v8658_v41, %v8658_v41  ;;  %5437 = vrsqrt.f32 %v2097_v27  ;;  %v8689_v39 = vmul.f32 %v5424_v55, %v2324_v10  ;;  %v5428_v47 = vpop.eup %5427 }
 0x2f7   :  { %v1546_v1 = vmul.f32 0.020408163, %v12453_v35  ;;  %12454 = vst [vmem:[#allocation160_spill] sm:$0xff] %v8675_v8  ;;  %v8686_v33 = vmul.f32 0.020408163, %v12456_v51  ;;  %3355 = vperm.xlu0 %5279, %v8672_v46   ;;  %v1969_v37 = vmax.f32 %v1837_v18, 0.0  ;;  %v1839_v35 = vsub.f32 %v1575_v34, %v1707_v53  ;;  %v5430_v55 = vpop.eup %5429 }
 0x2f8   :  { %12451 = vst [vmem:[#allocation104_spill] sm:$0xff] %v8670_v31  ;;  %v2099_v57 = vadd.f32 1e-05, %v1967_v62  ;;  %v1577_v8 = vmul.f32 0.020408163, %v7668_v24  ;;  %v2326_v61 = vld [vmem:[%s11712_s4 + $0x1d0] sm:$0xff]  ;;  %v1709_v41 = vmul.f32 %v8670_v31, %v8670_v31  ;;  %v8700_v46 = vmul.f32 %v5426_v29, %v2355_v21  ;;  %3210 = vperm.xlu1 %5280, %v8689_v39  }
 0x2f9   :  { %12457 = vst [vmem:[#allocation77_spill] sm:$0xff] %v8686_v33  ;;  %v12458_v51 = vld [vmem:[#allocation106_spill] sm:$0xff]  ;;  %v2070_v27 = vadd.f32 1e-05, %v1938_v63  ;;  %5439 = vrsqrt.f32 %v2068_v30  ;;  %v1940_v10 = vmax.f32 %v1808_v23, 0.0  ;;  %v1810_v62 = vsub.f32 %v1546_v1, %v1678_v15  ;;  %v8703_v24 = vpop.xlane.xlu1 %5116  ;;  %v8706_v34 = vpop.permute.xlu0 %3045  ;;  %v12464_v29 = vld [vmem:[#allocation79_spill] sm:$0xff] }
 0x2fa   :  { %v8698_v0 = vmul.f32 0.020408163, %v12458_v51  ;;  %12460 = vst [vmem:[#allocation257_spill] sm:$0xff] %v8700_v46  ;;  %v12461_v53 = vld [vmem:[#allocation162_spill] sm:$0xff]  ;;  %12463 = vst [vmem:[#allocation258_spill] sm:$0xff] %v8706_v34  ;;  %v2357_v51 = vld [vmem:[%s11712_s4 + $0x2c8] sm:$0xff]  ;;  %v1680_v63 = vmul.f32 %v8686_v33, %v8686_v33  ;;  %v8718_v23 = vmul.f32 %v5428_v47, %v2326_v61  ;;  %5441 = vrsqrt.f32 %v2099_v57 }
 0x2fb   :  { %v1548_v18 = vmul.f32 0.020408163, %v12461_v53  ;;  %12462 = vst [vmem:[#allocation162_spill] sm:$0xff] %v8703_v24  ;;  %v8714_v21 = vmul.f32 0.020408163, %v12464_v29  ;;  %3365 = vperm.xlu0 %5279, %v8700_v46   ;;  %v5432_v1 = vpop.eup %5431  ;;  %v1971_v53 = vmax.f32 %v1839_v35, 0.0  ;;  %v1841_v24 = vsub.f32 %v1577_v8, %v1709_v41 }
 0x2fc   :  { %12459 = vst [vmem:[#allocation106_spill] sm:$0xff] %v8698_v0  ;;  %v1579_v30 = vmul.f32 0.020408163, %v7693_v42  ;;  %12466 = vst [vmem:[#allocation259_spill] sm:$0xff] %v8718_v23  ;;  %v2101_v15 = vadd.f32 1e-05, %v1969_v37  ;;  %v1711_v33 = vmul.f32 %v8698_v0, %v8698_v0  ;;  %5443 = vrsqrt.f32 %v2070_v27  ;;  %v5434_v61 = vpop.eup %5433  ;;  %3220 = vperm.xlu1 %5280, %v8718_v23  }
 0x2fd   :  { %12465 = vst [vmem:[#allocation79_spill] sm:$0xff] %v8714_v21  ;;  %v2328_v31 = vld [vmem:[%s11712_s4 + $0x1e0] sm:$0xff]  ;;  %v12467_v29 = vld [vmem:[#allocation108_spill] sm:$0xff]  ;;  %v8728_v42 = vmul.f32 %v5430_v55, %v2357_v51  ;;  %v2072_v47 = vadd.f32 1e-05, %v1940_v10  ;;  %v1942_v46 = vmax.f32 %v1810_v62, 0.0  ;;  %v1812_v57 = vsub.f32 %v1548_v18, %v1680_v63  ;;  %v8731_v41 = vpop.permute.xlu1 %2935  ;;  %v8734_v8 = vpop.permute.xlu0 %3055 }
 0x2fe   :  { %v8726_v34 = vmul.f32 0.020408163, %v12467_v29  ;;  %v12470_v37 = vld [vmem:[#allocation164_spill] sm:$0xff]  ;;  %v2359_v29 = vld [vmem:[%s11712_s4 + $0x2d8] sm:$0xff]  ;;  %v1682_v27 = vmul.f32 %v8714_v21, %v8714_v21  ;;  %v1843_v10 = vsub.f32 %v1579_v30, %v1711_v33  ;;  %v8745_v62 = vmul.f32 %v5432_v1, %v2328_v31  ;;  %v12475_v21 = vld [vmem:[#allocation110_spill] sm:$0xff] }
 0x2ff   :  { %12469 = vst [vmem:[#allocation260_spill] sm:$0xff] %v8728_v42  ;;  %v1550_v35 = vmul.f32 0.020408163, %v12470_v37  ;;  %12471 = vst [vmem:[#allocation164_spill] sm:$0xff] %v8734_v8  ;;  %v12472_v55 = vld [vmem:[#allocation81_spill] sm:$0xff]  ;;  %3375 = vperm.xlu0 %5279, %v8728_v42   ;;  %v5436_v18 = vpop.eup %5435  ;;  %5445 = vrsqrt.f32 %v2101_v15  ;;  %v1973_v37 = vmax.f32 %v1841_v24, 0.0  ;;  %v8757_v1 = vmul.f32 %v5434_v61, %v2359_v29 }
 0x300   :  { %12468 = vst [vmem:[#allocation108_spill] sm:$0xff] %v8726_v34  ;;  %v8742_v51 = vmul.f32 0.020408163, %v12472_v55  ;;  %12474 = vst [vmem:[#allocation261_spill] sm:$0xff] %v8745_v62  ;;  %v2103_v63 = vadd.f32 1e-05, %v1971_v53  ;;  %v5438_v23 = vpop.eup %5437  ;;  %v1713_v55 = vmul.f32 %v8726_v34, %v8726_v34  ;;  %5447 = vrsqrt.f32 %v2072_v47  ;;  %3230 = vperm.xlu1 %5280, %v8745_v62  }
 0x301   :  { %v1581_v0 = vmul.f32 0.020408163, %v7721_v58  ;;  %v2330_v8 = vld [vmem:[%s11712_s4 + $0x1f0] sm:$0xff]  ;;  %v8754_v33 = vmul.f32 0.020408163, %v12475_v21  ;;  %v12477_v30 = vld [vmem:[#allocation166_spill] sm:$0xff]  ;;  %v1814_v53 = vsub.f32 %v1550_v35, %v1682_v27  ;;  %v8759_v58 = vpop.permute.xlu1 %2940  ;;  %v8762_v42 = vpop.permute.xlu0 %3065 }
 0x302   :  { %12473 = vst [vmem:[#allocation81_spill] sm:$0xff] %v8742_v51  ;;  %v1552_v31 = vmul.f32 0.020408163, %v12477_v30  ;;  %12478 = vst [vmem:[#allocation166_spill] sm:$0xff] %v8757_v1  ;;  %v2074_v15 = vadd.f32 1e-05, %v1942_v46  ;;  %v1684_v21 = vmul.f32 %v8742_v51, %v8742_v51  ;;  %v8773_v46 = vmul.f32 %v5436_v18, %v2330_v8 }
 0x303   :  { %12476 = vst [vmem:[#allocation110_spill] sm:$0xff] %v8754_v33  ;;  %v1944_v24 = vmax.f32 %v1812_v57, 0.0  ;;  %12479 = vst [vmem:[#allocation262_spill] sm:$0xff] %v8759_v58  ;;  %v2361_v34 = vld [vmem:[%s11712_s4 + $0x2e8] sm:$0xff]  ;;  %v1975_v47 = vmax.f32 %v1843_v10, 0.0  ;;  %3385 = vperm.xlu0 %5279, %v8757_v1   ;;  %v5440_v57 = vpop.eup %5439  ;;  %5449 = vrsqrt.f32 %v2103_v63  ;;  %v1845_v29 = vsub.f32 %v1581_v0, %v1713_v55  ;;  %v2332_v58 = vld [vmem:[%s11712_s4 + $0x200] sm:$0xff] }
 0x304   :  { %12480 = vst [vmem:[#allocation263_spill] sm:$0xff] %v8762_v42  ;;  %v12481_v30 = vld [vmem:[#allocation83_spill] sm:$0xff]  ;;  %12483 = vst [vmem:[#allocation264_spill] sm:$0xff] %v8773_v46  ;;  %v2105_v35 = vadd.f32 1e-05, %v1973_v37  ;;  %v1715_v51 = vmul.f32 %v8754_v33, %v8754_v33  ;;  %v1816_v10 = vsub.f32 %v1552_v31, %v1684_v21  ;;  %v8784_v1 = vmul.f32 %v5438_v23, %v2361_v34  ;;  %v5442_v8 = vpop.eup %5441  ;;  %v12486_v0 = vld [vmem:[#allocation168_spill] sm:$0xff] }
 0x305   :  { %v8770_v61 = vmul.f32 0.020408163, %v12481_v30  ;;  %v1583_v27 = vmul.f32 0.020408163, %v7741_v54  ;;  %v12484_v30 = vld [vmem:[#allocation112_spill] sm:$0xff]  ;;  %5451 = vrsqrt.f32 %v2074_v15  ;;  %v1946_v63 = vmax.f32 %v1814_v53, 0.0  ;;  %v8787_v54 = vpop.permute.xlu1 %2945  ;;  %3240 = vperm.xlu1 %5280, %v8773_v46   ;;  %v8790_v55 = vpop.permute.xlu0 %3075 }
 0x306   :  { %v8782_v42 = vmul.f32 0.020408163, %v12484_v30  ;;  %v2076_v18 = vadd.f32 1e-05, %v1944_v24  ;;  %v1554_v37 = vmul.f32 0.020408163, %v12486_v0  ;;  %v5444_v33 = vpop.eup %5443  ;;  %v8801_v24 = vmul.f32 %v5440_v57, %v2332_v58 }
 0x307   :  { %12482 = vst [vmem:[#allocation83_spill] sm:$0xff] %v8770_v61  ;;  %12487 = vst [vmem:[#allocation168_spill] sm:$0xff] %v8790_v55  ;;  %v2363_v30 = vld [vmem:[%s11712_s4 + $0x2f8] sm:$0xff]  ;;  %v1686_v34 = vmul.f32 %v8770_v61, %v8770_v61  ;;  %v2107_v15 = vadd.f32 1e-05, %v1975_v47  ;;  %3395 = vperm.xlu0 %5279, %v8784_v1   ;;  %5453 = vrsqrt.f32 %v2105_v35  ;;  %v1977_v53 = vmax.f32 %v1845_v29, 0.0 }
 0x308   :  { %12485 = vst [vmem:[#allocation112_spill] sm:$0xff] %v8782_v42  ;;  %v12488_v23 = vld [vmem:[#allocation85_spill] sm:$0xff]  ;;  %v1847_v21 = vsub.f32 %v1583_v27, %v1715_v51  ;;  %v1585_v0 = vmul.f32 0.020408163, %v7763_v13  ;;  %v2334_v55 = vld [vmem:[%s11712_s4 + $0x210] sm:$0xff]  ;;  %v1717_v61 = vmul.f32 %v8782_v42, %v8782_v42  ;;  %v12490_v46 = vld [vmem:[#allocation114_spill] sm:$0xff]  ;;  %v8812_v62 = vmul.f32 %v5442_v8, %v2363_v30 }
 0x309   :  { %v8798_v31 = vmul.f32 0.020408163, %v12488_v23  ;;  %v8810_v23 = vmul.f32 0.020408163, %v12490_v46  ;;  %v1948_v47 = vmax.f32 %v1816_v10, 0.0  ;;  %v5446_v58 = vpop.eup %5445  ;;  %5455 = vrsqrt.f32 %v2076_v18  ;;  %v12493_v51 = vld [vmem:[#allocation170_spill] sm:$0xff]  ;;  %v8815_v13 = vpop.permute.xlu1 %2950  ;;  %3250 = vperm.xlu1 %5280, %v8801_v24  }
 0x30a   :  { %12492 = vst [vmem:[#allocation265_spill] sm:$0xff] %v8812_v62  ;;  %v2078_v57 = vadd.f32 1e-05, %v1946_v63  ;;  %v1818_v35 = vsub.f32 %v1554_v37, %v1686_v34  ;;  %v1556_v29 = vmul.f32 0.020408163, %v12493_v51  ;;  %12494 = vst [vmem:[#allocation170_spill] sm:$0xff] %v8815_v13  ;;  %v8818_v27 = vpop.permute.xlu0 %3085  ;;  %5457 = vrsqrt.f32 %v2107_v15  ;;  %v5448_v63 = vpop.eup %5447 }
 0x30b   :  { %12489 = vst [vmem:[#allocation85_spill] sm:$0xff] %v8798_v31  ;;  %12491 = vst [vmem:[#allocation114_spill] sm:$0xff] %v8810_v23  ;;  %v2365_v46 = vld [vmem:[%s11712_s4 + $0x308] sm:$0xff]  ;;  %v1688_v10 = vmul.f32 %v8798_v31, %v8798_v31  ;;  %3405 = vperm.xlu0 %5279, %v8812_v62   ;;  %v8829_v18 = vmul.f32 %v5444_v33, %v2334_v55  ;;  %v2109_v37 = vadd.f32 1e-05, %v1977_v53  ;;  %v1979_v34 = vmax.f32 %v1847_v21, 0.0 }
 0x30c   :  { %12495 = vst [vmem:[#allocation266_spill] sm:$0xff] %v8818_v27  ;;  %v12496_v8 = vld [vmem:[#allocation87_spill] sm:$0xff]  ;;  %v1849_v51 = vsub.f32 %v1585_v0, %v1717_v61  ;;  %v1587_v42 = vmul.f32 0.020408163, %v7785_v7  ;;  %v2336_v13 = vld [vmem:[%s11712_s4 + $0x220] sm:$0xff]  ;;  %v1719_v31 = vmul.f32 %v8810_v23, %v8810_v23  ;;  %v8840_v62 = vmul.f32 %v5446_v58, %v2365_v46  ;;  %v12502_v61 = vld [vmem:[#allocation172_spill] sm:$0xff] }
 0x30d   :  { %v8826_v30 = vmul.f32 0.020408163, %v12496_v8  ;;  %12498 = vst [vmem:[#allocation267_spill] sm:$0xff] %v8829_v18  ;;  %v12499_v8 = vld [vmem:[#allocation2_spill] sm:$0xff]  ;;  %v2080_v15 = vadd.f32 1e-05, %v1948_v47  ;;  %v5450_v33 = vpop.eup %5449  ;;  %5459 = vrsqrt.f32 %v2078_v57  ;;  %v1820_v53 = vsub.f32 %v1556_v29, %v1688_v10  ;;  %v8843_v7 = vpop.permute.xlu1 %2955  ;;  %3260 = vperm.xlu1 %5280, %v8829_v18  }
 0x30e   :  { %v8838_v27 = vmul.f32 0.020408163, %v12499_v8  ;;  %12501 = vst [vmem:[#allocation268_spill] sm:$0xff] %v8840_v62  ;;  %v1950_v55 = vmax.f32 %v1818_v35, 0.0  ;;  %v1558_v21 = vmul.f32 0.020408163, %v12502_v61  ;;  %v8846_v0 = vpop.permute.xlu0 %3095  ;;  %v8858_v35 = vmul.f32 %v5448_v63, %v2336_v13 }
 0x30f   :  { %12497 = vst [vmem:[#allocation87_spill] sm:$0xff] %v8826_v30  ;;  %12503 = vst [vmem:[#allocation172_spill] sm:$0xff] %v8846_v0  ;;  %v2367_v8 = vld [vmem:[%s11712_s4 + $0x318] sm:$0xff]  ;;  %v1690_v47 = vmul.f32 %v8826_v30, %v8826_v30  ;;  %v1589_v57 = vmul.f32 0.020408163, %v7810_v3  ;;  %3415 = vperm.xlu0 %5279, %v8840_v62   ;;  %v5452_v29 = vpop.eup %5451  ;;  %5461 = vrsqrt.f32 %v2109_v37  ;;  %v1981_v61 = vmax.f32 %v1849_v51, 0.0 }
 0x310   :  { %12500 = vst [vmem:[#allocation2_spill] sm:$0xff] %v8838_v27  ;;  %v12504_v58 = vld [vmem:[#allocation89_spill] sm:$0xff]  ;;  %v2111_v10 = vadd.f32 1e-05, %v1979_v34  ;;  %v1851_v23 = vsub.f32 %v1587_v42, %v1719_v31  ;;  %v2338_v0 = vld [vmem:[%s11712_s4 + $0x230] sm:$0xff]  ;;  %v1721_v30 = vmul.f32 %v8838_v27, %v8838_v27  ;;  %5463 = vrsqrt.f32 %v2080_v15  ;;  %v12509_v34 = vld [vmem:[#allocation174_spill] sm:$0xff] }
 0x311   :  { %v8854_v46 = vmul.f32 0.020408163, %v12504_v58  ;;  %v12506_v58 = vld [vmem:[#allocation3_spill] sm:$0xff]  ;;  %v8868_v3 = vmul.f32 %v5450_v33, %v2367_v8  ;;  %v5454_v13 = vpop.eup %5453  ;;  %v2082_v63 = vadd.f32 1e-05, %v1950_v55  ;;  %v1952_v62 = vmax.f32 %v1820_v53, 0.0  ;;  %v8871_v42 = vpop.permute.xlu1 %2960  ;;  %3270 = vperm.xlu1 %5280, %v8858_v35  }
 0x312   :  { %v8866_v18 = vmul.f32 0.020408163, %v12506_v58  ;;  %v1822_v37 = vsub.f32 %v1558_v21, %v1690_v47  ;;  %v1560_v51 = vmul.f32 0.020408163, %v12509_v34  ;;  %12510 = vst [vmem:[#allocation174_spill] sm:$0xff] %v8871_v42  ;;  %v8874_v31 = vpop.permute.xlu0 %3105  ;;  %v2369_v58 = vld [vmem:[%s11712_s4 + $0x328] sm:$0xff]  ;;  %v1853_v55 = vsub.f32 %v1589_v57, %v1721_v30 }
 0x313   :  { %12505 = vst [vmem:[#allocation89_spill] sm:$0xff] %v8854_v46  ;;  %12508 = vst [vmem:[#allocation269_spill] sm:$0xff] %v8868_v3  ;;  %v1692_v15 = vmul.f32 %v8854_v46, %v8854_v46  ;;  %v12512_v33 = vld [vmem:[#allocation91_spill] sm:$0xff]  ;;  %3425 = vperm.xlu0 %5279, %v8868_v3   ;;  %v8885_v53 = vmul.f32 %v5452_v29, %v2338_v0  ;;  %v5456_v21 = vpop.eup %5455  ;;  %5465 = vrsqrt.f32 %v2111_v10  ;;  %v2113_v47 = vadd.f32 1e-05, %v1981_v61  ;;  %v2340_v42 = vld [vmem:[%s11712_s4 + $0x240] sm:$0xff] }
 0x314   :  { %12507 = vst [vmem:[#allocation3_spill] sm:$0xff] %v8866_v18  ;;  %12511 = vst [vmem:[#allocation270_spill] sm:$0xff] %v8874_v31  ;;  %v8882_v8 = vmul.f32 0.020408163, %v12512_v33  ;;  %v1983_v34 = vmax.f32 %v1851_v23, 0.0  ;;  %v5458_v31 = vpop.eup %5457  ;;  %v1723_v33 = vmul.f32 %v8866_v18, %v8866_v18  ;;  %v12515_v46 = vld [vmem:[#allocation117_spill] sm:$0xff]  ;;  %v8897_v29 = vmul.f32 %v5454_v13, %v2369_v58 }
 0x315   :  { %12514 = vst [vmem:[#allocation271_spill] sm:$0xff] %v8885_v53  ;;  %v1591_v27 = vmul.f32 0.020408163, %v7837_v60  ;;  %v8894_v30 = vmul.f32 0.020408163, %v12515_v46  ;;  %v12517_v57 = vld [vmem:[#allocation176_spill] sm:$0xff]  ;;  %5467 = vrsqrt.f32 %v2082_v63  ;;  %v1824_v61 = vsub.f32 %v1560_v51, %v1692_v15  ;;  %v8899_v60 = vpop.permute.xlu1 %2965  ;;  %3280 = vperm.xlu1 %5280, %v8885_v53  }
 0x316   :  { %12513 = vst [vmem:[#allocation91_spill] sm:$0xff] %v8882_v8  ;;  %v1562_v0 = vmul.f32 0.020408163, %v12517_v57  ;;  %12518 = vst [vmem:[#allocation176_spill] sm:$0xff] %v8897_v29  ;;  %v2084_v10 = vadd.f32 1e-05, %v1952_v62  ;;  %v8902_v3 = vpop.permute.xlu0 %3115  ;;  %v1694_v46 = vmul.f32 %v8882_v8, %v8882_v8  ;;  %v8913_v62 = vmul.f32 %v5456_v21, %v2340_v42 }
 0x317   :  { %12516 = vst [vmem:[#allocation117_spill] sm:$0xff] %v8894_v30  ;;  %v1954_v23 = vmax.f32 %v1822_v37, 0.0  ;;  %12519 = vst [vmem:[#allocation272_spill] sm:$0xff] %v8902_v3  ;;  %v2371_v18 = vld [vmem:[%s11712_s4 + $0x338] sm:$0xff]  ;;  %v1985_v63 = vmax.f32 %v1853_v55, 0.0  ;;  %3435 = vperm.xlu0 %5279, %v8897_v29   ;;  %v5460_v37 = vpop.eup %5459  ;;  %5469 = vrsqrt.f32 %v2113_v47  ;;  %v1855_v58 = vsub.f32 %v1591_v27, %v1723_v33  ;;  %v2342_v3 = vld [vmem:[%s11712_s4 + $0x250] sm:$0xff] }
 0x318   :  { %v12520_v57 = vld [vmem:[#allocation93_spill] sm:$0xff]  ;;  %12522 = vst [vmem:[#allocation273_spill] sm:$0xff] %v8913_v62  ;;  %v2115_v51 = vadd.f32 1e-05, %v1983_v34  ;;  %v1593_v15 = vmul.f32 0.020408163, %v7865_v17  ;;  %v1725_v8 = vmul.f32 %v8894_v30, %v8894_v30  ;;  %v1826_v55 = vsub.f32 %v1562_v0, %v1694_v46 }
 0x319   :  { %v8910_v13 = vmul.f32 0.020408163, %v12520_v57  ;;  %v12523_v57 = vld [vmem:[#allocation119_spill] sm:$0xff]  ;;  %v8924_v29 = vmul.f32 %v5458_v31, %v2371_v18  ;;  %v5462_v42 = vpop.eup %5461  ;;  %5471 = vrsqrt.f32 %v2084_v10  ;;  %v2086_v21 = vadd.f32 1e-05, %v1954_v23  ;;  %v12525_v27 = vld [vmem:[#allocation178_spill] sm:$0xff]  ;;  %v8927_v17 = vpop.permute.xlu1 %2970  ;;  %3290 = vperm.xlu1 %5280, %v8913_v62  }
 0x31a   :  { %v8922_v53 = vmul.f32 0.020408163, %v12523_v57  ;;  %v1956_v47 = vmax.f32 %v1824_v61, 0.0  ;;  %v1564_v34 = vmul.f32 0.020408163, %v12525_v27  ;;  %12526 = vst [vmem:[#allocation178_spill] sm:$0xff] %v8927_v17  ;;  %v8930_v33 = vpop.permute.xlu0 %3125  ;;  %v5464_v30 = vpop.eup %5463  ;;  %v8941_v23 = vmul.f32 %v5460_v37, %v2342_v3 }
 0x31b   :  { %12521 = vst [vmem:[#allocation93_spill] sm:$0xff] %v8910_v13  ;;  %12527 = vst [vmem:[#allocation274_spill] sm:$0xff] %v8930_v33  ;;  %v2373_v57 = vld [vmem:[%s11712_s4 + $0x348] sm:$0xff]  ;;  %v1696_v18 = vmul.f32 %v8910_v13, %v8910_v13  ;;  %v2117_v10 = vadd.f32 1e-05, %v1985_v63  ;;  %3445 = vperm.xlu0 %5279, %v8924_v29   ;;  %5473 = vrsqrt.f32 %v2115_v51  ;;  %v1987_v61 = vmax.f32 %v1855_v58, 0.0 }
 0x31c   :  { %12524 = vst [vmem:[#allocation119_spill] sm:$0xff] %v8922_v53  ;;  %v12528_v31 = vld [vmem:[#allocation95_spill] sm:$0xff]  ;;  %v1857_v46 = vsub.f32 %v1593_v15, %v1725_v8  ;;  %v1595_v27 = vmul.f32 0.020408163, %v7893_v38  ;;  %v2344_v33 = vld [vmem:[%s11712_s4 + $0x260] sm:$0xff]  ;;  %v1727_v13 = vmul.f32 %v8922_v53, %v8922_v53  ;;  %v12530_v17 = vld [vmem:[#allocation121_spill] sm:$0xff]  ;;  %v8952_v62 = vmul.f32 %v5462_v42, %v2373_v57 }
 0x31d   :  { %v8938_v0 = vmul.f32 0.020408163, %v12528_v31  ;;  %v8950_v31 = vmul.f32 0.020408163, %v12530_v17  ;;  %v1958_v63 = vmax.f32 %v1826_v55, 0.0  ;;  %v5466_v3 = vpop.eup %5465  ;;  %5475 = vrsqrt.f32 %v2086_v21  ;;  %v12533_v8 = vld [vmem:[#allocation180_spill] sm:$0xff]  ;;  %v8955_v38 = vpop.permute.xlu1 %2980  ;;  %3300 = vperm.xlu1 %5280, %v8941_v23  }
 0x31e   :  { %12532 = vst [vmem:[#allocation275_spill] sm:$0xff] %v8952_v62  ;;  %v2088_v37 = vadd.f32 1e-05, %v1956_v47  ;;  %v1828_v51 = vsub.f32 %v1564_v34, %v1696_v18  ;;  %v1566_v58 = vmul.f32 0.020408163, %v12533_v8  ;;  %12534 = vst [vmem:[#allocation180_spill] sm:$0xff] %v8955_v38  ;;  %v8958_v15 = vpop.permute.xlu0 %3135  ;;  %5477 = vrsqrt.f32 %v2117_v10 }
 0x31f   :  { %12529 = vst [vmem:[#allocation95_spill] sm:$0xff] %v8938_v0  ;;  %12531 = vst [vmem:[#allocation121_spill] sm:$0xff] %v8950_v31  ;;  %v2375_v17 = vld [vmem:[%s11712_s4 + $0x358] sm:$0xff]  ;;  %v1698_v55 = vmul.f32 %v8938_v0, %v8938_v0  ;;  %3455 = vperm.xlu0 %5279, %v8952_v62   ;;  %v8969_v21 = vmul.f32 %v5464_v30, %v2344_v33  ;;  %v5468_v47 = vpop.eup %5467  ;;  %v2119_v34 = vadd.f32 1e-05, %v1987_v61  ;;  %v1989_v18 = vmax.f32 %v1857_v46, 0.0 }
 0x320   :  { %12535 = vst [vmem:[#allocation276_spill] sm:$0xff] %v8958_v15  ;;  %v12536_v42 = vld [vmem:[#allocation97_spill] sm:$0xff]  ;;  %v1859_v8 = vsub.f32 %v1595_v27, %v1727_v13  ;;  %v1597_v53 = vmul.f32 0.020408163, %v7921_v26  ;;  %v2346_v15 = vld [vmem:[%s11712_s4 + $0x270] sm:$0xff]  ;;  %v1729_v0 = vmul.f32 %v8950_v31, %v8950_v31  ;;  %v8980_v62 = vmul.f32 %v5466_v3, %v2375_v17  ;;  %v12541_v13 = vld [vmem:[#allocation182_spill] sm:$0xff] }
 0x321   :  { %v8966_v57 = vmul.f32 0.020408163, %v12536_v42  ;;  %v12538_v42 = vld [vmem:[#allocation123_spill] sm:$0xff]  ;;  %v2090_v10 = vadd.f32 1e-05, %v1958_v63  ;;  %v5470_v30 = vpop.eup %5469  ;;  %5479 = vrsqrt.f32 %v2088_v37  ;;  %v1960_v33 = vmax.f32 %v1828_v51, 0.0  ;;  %v8983_v26 = vpop.permute.xlu1 %2990  ;;  %3310 = vperm.xlu1 %5280, %v8969_v21  }
 0x322   :  { %v8978_v38 = vmul.f32 0.020408163, %v12538_v42  ;;  %12540 = vst [vmem:[#allocation277_spill] sm:$0xff] %v8980_v62  ;;  %v1830_v61 = vsub.f32 %v1566_v58, %v1698_v55  ;;  %v1568_v46 = vmul.f32 0.020408163, %v12541_v13  ;;  %12542 = vst [vmem:[#allocation182_spill] sm:$0xff] %v8983_v26  ;;  %v8986_v27 = vpop.permute.xlu0 %3145  ;;  %v8998_v51 = vmul.f32 %v5468_v47, %v2346_v15 }
 0x323   :  { %12537 = vst [vmem:[#allocation97_spill] sm:$0xff] %v8966_v57  ;;  %12543 = vst [vmem:[#allocation278_spill] sm:$0xff] %v8986_v27  ;;  %v2377_v42 = vld [vmem:[%s11712_s4 + $0x368] sm:$0xff]  ;;  %v1700_v63 = vmul.f32 %v8966_v57, %v8966_v57  ;;  %v1599_v37 = vmul.f32 0.020408163, %v7949_v56  ;;  %3465 = vperm.xlu0 %5279, %v8980_v62   ;;  %v5472_v58 = vpop.eup %5471  ;;  %5481 = vrsqrt.f32 %v2119_v34  ;;  %v1991_v13 = vmax.f32 %v1859_v8, 0.0 }
 0x324   :  { %12539 = vst [vmem:[#allocation123_spill] sm:$0xff] %v8978_v38  ;;  %v12544_v3 = vld [vmem:[#allocation99_spill] sm:$0xff]  ;;  %12546 = vst [vmem:[#allocation279_spill] sm:$0xff] %v8998_v51  ;;  %v2121_v55 = vadd.f32 1e-05, %v1989_v18  ;;  %v1861_v31 = vsub.f32 %v1597_v53, %v1729_v0  ;;  %v2348_v27 = vld [vmem:[%s11712_s4 + $0x280] sm:$0xff]  ;;  %v1731_v57 = vmul.f32 %v8978_v38, %v8978_v38  ;;  %5483 = vrsqrt.f32 %v2090_v10 }
 0x325   :  { %v8994_v17 = vmul.f32 0.020408163, %v12544_v3  ;;  %v12547_v3 = vld [vmem:[#allocation125_spill] sm:$0xff]  ;;  %v9008_v56 = vmul.f32 %v5470_v30, %v2377_v42  ;;  %v5474_v15 = vpop.eup %5473  ;;  %v2092_v47 = vadd.f32 1e-05, %v1960_v33  ;;  %v1962_v62 = vmax.f32 %v1830_v61, 0.0  ;;  %v9011_v53 = vpop.permute.xlu1 %3000  ;;  %3320 = vperm.xlu1 %5280, %v8998_v51  }
 0x326   :  { %v9006_v26 = vmul.f32 0.020408163, %v12547_v3  ;;  %v1832_v34 = vsub.f32 %v1568_v46, %v1700_v63  ;;  %v12550_v18 = vld [vmem:[#allocation184_spill] sm:$0xff]  ;;  %v9014_v0 = vpop.permute.xlu0 %3155  ;;  %v2379_v3 = vld [vmem:[%s11712_s4 + $0x378] sm:$0xff]  ;;  %v1863_v33 = vsub.f32 %v1599_v37, %v1731_v57  ;;  %v9025_v61 = vmul.f32 %v5472_v58, %v2348_v27  ;;  %v12557_v37 = vld [vmem:[#allocation127_spill] sm:$0xff] }
 0x327   :  { %12545 = vst [vmem:[#allocation99_spill] sm:$0xff] %v8994_v17  ;;  %12549 = vst [vmem:[#allocation280_spill] sm:$0xff] %v9008_v56  ;;  %v1570_v8 = vmul.f32 0.020408163, %v12550_v18  ;;  %v1702_v10 = vmul.f32 %v8994_v17, %v8994_v17  ;;  %v12553_v30 = vld [vmem:[#allocation101_spill] sm:$0xff]  ;;  %3475 = vperm.xlu0 %5279, %v9008_v56   ;;  %v5476_v46 = vpop.eup %5475  ;;  %5485 = vrsqrt.f32 %v2121_v55  ;;  %v1993_v18 = vmax.f32 %v1861_v31, 0.0 }
 0x328   :  { %12548 = vst [vmem:[#allocation125_spill] sm:$0xff] %v9006_v26  ;;  %12551 = vst [vmem:[#allocation184_spill] sm:$0xff] %v9011_v53  ;;  %v9022_v42 = vmul.f32 0.020408163, %v12553_v30  ;;  %v2123_v63 = vadd.f32 1e-05, %v1991_v13  ;;  %v5478_v53 = vpop.eup %5477  ;;  %v1733_v57 = vmul.f32 %v9006_v26, %v9006_v26  ;;  %v9039_v58 = vmul.f32 %v5474_v15, %v2379_v3 }
 0x329   :  { %12552 = vst [vmem:[#allocation281_spill] sm:$0xff] %v9014_v0  ;;  %v1601_v38 = vmul.f32 0.020408163, %v7977_v52  ;;  %v2350_v0 = vld [vmem:[%s11712_s4 + $0x290] sm:$0xff]  ;;  %v12555_v17 = vld [vmem:[#allocation103_spill] sm:$0xff]  ;;  %5487 = vrsqrt.f32 %v2092_v47  ;;  %v1964_v55 = vmax.f32 %v1832_v34, 0.0  ;;  %v1834_v52 = vsub.f32 %v1570_v8, %v1702_v10  ;;  %v9041_v13 = vpop.permute.xlu1 %3010  ;;  %3330 = vperm.xlu1 %5280, %v9025_v61  }
 0x32a   :  { %12554 = vst [vmem:[#allocation101_spill] sm:$0xff] %v9022_v42  ;;  %v9032_v51 = vmul.f32 0.020408163, %v12555_v17  ;;  %v9037_v27 = vmul.f32 0.020408163, %v12557_v37  ;;  %12559 = vst [vmem:[#allocation282_spill] sm:$0xff] %v9041_v13  ;;  %v9044_v30 = vpop.permute.xlu0 %3165  ;;  %v9051_v15 = vmul.f32 %v5476_v46, %v2350_v0  ;;  %5489 = vrsqrt.f32 %v2123_v63 }
 0x32b   :  { %v2094_v31 = vadd.f32 1e-05, %v1962_v62  ;;  %12560 = vst [vmem:[#allocation283_spill] sm:$0xff] %v9044_v30  ;;  %v2381_v17 = vld [vmem:[%s11712_s4 + $0x388] sm:$0xff]  ;;  %v12561_v26 = vld [vmem:[#allocation186_spill] sm:$0xff]  ;;  %v1995_v37 = vmax.f32 %v1863_v33, 0.0  ;;  %3485 = vperm.xlu0 %5279, %v9039_v58   ;;  %v5480_v62 = vpop.eup %5479  ;;  %v1865_v34 = vsub.f32 %v1601_v38, %v1733_v57  ;;  %v1704_v10 = vmul.f32 %v9022_v42, %v9022_v42 }
 0x32c   :  { %12556 = vst [vmem:[#allocation103_spill] sm:$0xff] %v9032_v51  ;;  %12558 = vst [vmem:[#allocation127_spill] sm:$0xff] %v9037_v27  ;;  %v1572_v56 = vmul.f32 0.020408163, %v12561_v26  ;;  %v2125_v47 = vadd.f32 1e-05, %v1993_v18  ;;  %v1706_v26 = vmul.f32 %v9032_v51, %v9032_v51  ;;  %v9064_v0 = vmul.f32 %v5478_v53, %v2381_v17 }
 0x32d   :  { %12562 = vst [vmem:[#allocation186_spill] sm:$0xff] %v9051_v15  ;;  %v1603_v8 = vmul.f32 0.020408163, %v8005_v44  ;;  %v2352_v3 = vld [vmem:[%s11712_s4 + $0x2a0] sm:$0xff]  ;;  %v12563_v33 = vld [vmem:[#allocation129_spill] sm:$0xff]  ;;  %v5482_v46 = vpop.eup %5481  ;;  %v1735_v38 = vmul.f32 %v9037_v27, %v9037_v27  ;;  %5491 = vrsqrt.f32 %v2094_v31  ;;  %v1966_v63 = vmax.f32 %v1834_v52, 0.0  ;;  %v9068_v18 = vpop.permute.xlu1 %3020  ;;  %3340 = vperm.xlu1 %5280, %v9051_v15  }
 0x32e   :  { %v9062_v30 = vmul.f32 0.020408163, %v12563_v33  ;;  %12565 = vst [vmem:[#allocation284_spill] sm:$0xff] %v9064_v0  ;;  %v2096_v44 = vadd.f32 1e-05, %v1964_v55  ;;  %12566 = vst [vmem:[#allocation285_spill] sm:$0xff] %v9068_v18  ;;  %v9071_v57 = vpop.permute.xlu0 %3175  ;;  %v5484_v51 = vpop.eup %5483  ;;  %v1836_v53 = vsub.f32 %v1572_v56, %v1704_v10  ;;  %v9078_v31 = vmul.f32 %v5480_v62, %v2352_v3 }
 0x32f   :  { %12567 = vst [vmem:[#allocation286_spill] sm:$0xff] %v9071_v57  ;;  %v2383_v33 = vld [vmem:[%s11712_s4 + $0x398] sm:$0xff]  ;;  %v12568_v17 = vld [vmem:[#allocation188_spill] sm:$0xff]  ;;  %v2127_v13 = vadd.f32 1e-05, %v1995_v37  ;;  %3495 = vperm.xlu0 %5279, %v9064_v0   ;;  %5493 = vrsqrt.f32 %v2125_v47  ;;  %v1997_v52 = vmax.f32 %v1865_v34, 0.0  ;;  %v1867_v27 = vsub.f32 %v1603_v8, %v1735_v38 }
 0x330   :  { %12564 = vst [vmem:[#allocation129_spill] sm:$0xff] %v9062_v30  ;;  %v1574_v42 = vmul.f32 0.020408163, %v12568_v17  ;;  %v2354_v55 = vld [vmem:[%s11712_s4 + $0x2b0] sm:$0xff]  ;;  %v1605_v57 = vmul.f32 0.020408163, %v8033_v11  ;;  %v1737_v37 = vmul.f32 %v9062_v30, %v9062_v30  ;;  %v9092_v62 = vmul.f32 %v5482_v46, %v2383_v33 }
 0x331   :  { %v12569_v18 = vld [vmem:[#allocation105_spill] sm:$0xff]  ;;  %v12571_v56 = vld [vmem:[#allocation107_spill] sm:$0xff]  ;;  %v5486_v3 = vpop.eup %5485  ;;  %5495 = vrsqrt.f32 %v2096_v44  ;;  %v2098_v47 = vadd.f32 1e-05, %v1966_v63  ;;  %v9097_v34 = vpop.permute.xlu1 %3030  ;;  %3350 = vperm.xlu1 %5280, %v9078_v31   ;;  %v9102_v8 = vmul.f32 %v5484_v51, %v2354_v55  ;;  %v1968_v46 = vmax.f32 %v1836_v53, 0.0  ;;  %v2356_v51 = vld [vmem:[%s11712_s4 + $0x2c0] sm:$0xff] }
 0x332   :  { %v9085_v15 = vmul.f32 0.020408163, %v12569_v18  ;;  %v9088_v10 = vmul.f32 0.020408163, %v12571_v56  ;;  %v12573_v17 = vld [vmem:[#allocation131_spill] sm:$0xff]  ;;  %v9100_v11 = vpop.permute.xlu0 %3185  ;;  %v1838_v18 = vsub.f32 %v1574_v42, %v1706_v26  ;;  %5497 = vrsqrt.f32 %v2127_v13 }
 0x333   :  { %v9095_v0 = vmul.f32 0.020408163, %v12573_v17  ;;  %v2385_v38 = vld [vmem:[%s11712_s4 + $0x3a8] sm:$0xff]  ;;  %v1576_v33 = vmul.f32 0.020408163, %v7670_v16  ;;  %3505 = vperm.xlu0 %5279, %v9092_v62   ;;  %v5488_v44 = vpop.eup %5487  ;;  %v1999_v56 = vmax.f32 %v1867_v27, 0.0  ;;  %v1869_v17 = vsub.f32 %v1605_v57, %v1737_v37 }
 0x334   :  { %12570 = vst [vmem:[#allocation188_spill] sm:$0xff] %v9085_v15  ;;  %12572 = vst [vmem:[#allocation105_spill] sm:$0xff] %v9088_v10  ;;  %v2129_v63 = vadd.f32 1e-05, %v1997_v52  ;;  %v1607_v30 = vmul.f32 0.020408163, %v8061_v28  ;;  %v1708_v55 = vmul.f32 %v9085_v15, %v9085_v15  ;;  %v9115_v53 = vmul.f32 %v5486_v3, %v2385_v38  ;;  %v5490_v42 = vpop.eup %5489 }
 0x335   :  { %12574 = vst [vmem:[#allocation107_spill] sm:$0xff] %v9095_v0  ;;  %v1710_v16 = vmul.f32 %v9088_v10, %v9088_v10  ;;  %v1739_v13 = vmul.f32 %v9095_v0, %v9095_v0  ;;  %5499 = vrsqrt.f32 %v2098_v47  ;;  %v1578_v27 = vmul.f32 0.020408163, %v7695_v43  ;;  %v9122_v28 = vpop.permute.xlu1 %3040  ;;  %3360 = vperm.xlu1 %5280, %v9102_v8   ;;  %v2387_v57 = vld [vmem:[%s11712_s4 + $0x3b8] sm:$0xff] }
 0x336   :  { %12575 = vst [vmem:[#allocation131_spill] sm:$0xff] %v9122_v28  ;;  %v9125_v26 = vpop.permute.xlu0 %3195  ;;  %v2100_v52 = vadd.f32 1e-05, %v1968_v46  ;;  %v1970_v37 = vmax.f32 %v1838_v18, 0.0  ;;  %v1840_v3 = vsub.f32 %v1576_v33, %v1708_v55  ;;  %v9131_v38 = vmul.f32 %v5488_v44, %v2356_v51  ;;  %v12577_v15 = vld [vmem:[#allocation109_spill] sm:$0xff]  ;;  %v2358_v46 = vld [vmem:[%s11712_s4 + $0x2d0] sm:$0xff] }
 0x337   :  { %12576 = vst [vmem:[#allocation287_spill] sm:$0xff] %v9125_v26  ;;  %3515 = vperm.xlu0 %5279, %v9115_v53   ;;  %v5492_v47 = vpop.eup %5491  ;;  %5501 = vrsqrt.f32 %v2129_v63  ;;  %v2131_v43 = vadd.f32 1e-05, %v1999_v56  ;;  %v2001_v10 = vmax.f32 %v1869_v17, 0.0  ;;  %v1871_v0 = vsub.f32 %v1607_v30, %v1739_v13  ;;  %v2389_v30 = vld [vmem:[%s11712_s4 + $0x3c8] sm:$0xff] }
 0x338   :  { %v9134_v28 = vmul.f32 0.020408163, %v12577_v15  ;;  %v9136_v26 = vmul.f32 %v5490_v42, %v2387_v57  ;;  %v1842_v33 = vsub.f32 %v1578_v27, %v1710_v16  ;;  %5503 = vrsqrt.f32 %v2100_v52  ;;  %v12580_v57 = vld [vmem:[#allocation111_spill] sm:$0xff] }
 0x339   :  { %v5494_v18 = vpop.eup %5493  ;;  %v9141_v55 = vpop.permute.xlu1 %3050  ;;  %3370 = vperm.xlu1 %5280, %v9131_v38   ;;  %v2102_v15 = vadd.f32 1e-05, %v1970_v37  ;;  %v1972_v63 = vmax.f32 %v1840_v3, 0.0  ;;  %v1580_v56 = vmul.f32 0.020408163, %v7723_v48  ;;  %5505 = vrsqrt.f32 %v2131_v43  ;;  %v2360_v48 = vld [vmem:[%s11712_s4 + $0x2e0] sm:$0xff] }
 0x33a   :  { %12578 = vst [vmem:[#allocation109_spill] sm:$0xff] %v9134_v28  ;;  %v9144_v44 = vpop.permute.xlu0 %3205  ;;  %v2133_v51 = vadd.f32 1e-05, %v2001_v10  ;;  %v2003_v42 = vmax.f32 %v1871_v0, 0.0  ;;  %v9151_v16 = vmul.f32 %v5492_v47, %v2358_v46  ;;  %v1712_v27 = vmul.f32 %v9134_v28, %v9134_v28  ;;  %v2391_v10 = vld [vmem:[%s11712_s4 + $0x3d8] sm:$0xff] }
 0x33b   :  { %12579 = vst [vmem:[#allocation288_spill] sm:$0xff] %v9144_v44  ;;  %3525 = vperm.xlu0 %5279, %v9136_v26   ;;  %v5496_v17 = vpop.eup %5495  ;;  %v9156_v44 = vmul.f32 0.020408163, %v12580_v57  ;;  %v9158_v52 = vmul.f32 %v5494_v18, %v2389_v30  ;;  %v1974_v37 = vmax.f32 %v1842_v33, 0.0  ;;  %5507 = vrsqrt.f32 %v2102_v15  ;;  %v12584_v28 = vld [vmem:[#allocation113_spill] sm:$0xff]  ;;  %v2362_v15 = vld [vmem:[%s11712_s4 + $0x2f0] sm:$0xff] }
 0x33c   :  { %v5498_v13 = vpop.eup %5497  ;;  %v2104_v47 = vadd.f32 1e-05, %v1972_v63  ;;  %v1844_v43 = vsub.f32 %v1580_v56, %v1712_v27  ;;  %v1582_v46 = vmul.f32 0.020408163, %v7743_v2  ;;  %5509 = vrsqrt.f32 %v2133_v51  ;;  %v2393_v51 = vld [vmem:[%s11712_s4 + $0x3e8] sm:$0xff] }
 0x33d   :  { %12581 = vst [vmem:[#allocation111_spill] sm:$0xff] %v9156_v44  ;;  %v9163_v3 = vpop.permute.xlu1 %3060  ;;  %3380 = vperm.xlu1 %5280, %v9151_v16   ;;  %v2135_v33 = vadd.f32 1e-05, %v2003_v42  ;;  %v9173_v30 = vmul.f32 %v5496_v17, %v2360_v48  ;;  %v1714_v57 = vmul.f32 %v9156_v44, %v9156_v44  ;;  %v2106_v63 = vadd.f32 1e-05, %v1974_v37 }
 0x33e   :  { %12582 = vst [vmem:[#allocation289_spill] sm:$0xff] %v9163_v3  ;;  %v9166_v0 = vpop.permute.xlu0 %3215  ;;  %v9180_v3 = vmul.f32 %v5498_v13, %v2391_v10  ;;  %5511 = vrsqrt.f32 %v2104_v47  ;;  %v1584_v13 = vmul.f32 0.020408163, %v7765_v6  ;;  %v12587_v10 = vld [vmem:[#allocation115_spill] sm:$0xff]  ;;  %v2364_v47 = vld [vmem:[%s11712_s4 + $0x300] sm:$0xff] }
 0x33f   :  { %12583 = vst [vmem:[#allocation290_spill] sm:$0xff] %v9166_v0  ;;  %3535 = vperm.xlu0 %5279, %v9158_v52   ;;  %v5500_v18 = vpop.eup %5499  ;;  %v9178_v0 = vmul.f32 0.020408163, %v12584_v28  ;;  %v1976_v28 = vmax.f32 %v1844_v43, 0.0  ;;  %v1846_v42 = vsub.f32 %v1582_v46, %v1714_v57  ;;  %5513 = vrsqrt.f32 %v2135_v33 }
 0x340   :  { %v9195_v27 = vmul.f32 %v5500_v18, %v2362_v15  ;;  %v9200_v44 = vmul.f32 0.020408163, %v12587_v10  ;;  %5515 = vrsqrt.f32 %v2106_v63  ;;  %v2395_v18 = vld [vmem:[%s11712_s4 + $0x3f8] sm:$0xff] }
 0x341   :  { %12585 = vst [vmem:[#allocation113_spill] sm:$0xff] %v9178_v0  ;;  %v5502_v2 = vpop.eup %5501  ;;  %v9185_v56 = vpop.permute.xlu1 %3070  ;;  %3390 = vperm.xlu1 %5280, %v9173_v30   ;;  %v1716_v37 = vmul.f32 %v9178_v0, %v9178_v0  ;;  %v2108_v33 = vadd.f32 1e-05, %v1976_v28  ;;  %v1978_v57 = vmax.f32 %v1846_v42, 0.0  ;;  %v2366_v28 = vld [vmem:[%s11712_s4 + $0x310] sm:$0xff] }
 0x342   :  { %v9188_v17 = vpop.permute.xlu0 %3225  ;;  %v5504_v48 = vpop.eup %5503  ;;  %12588 = vst [vmem:[#allocation115_spill] sm:$0xff] %v9200_v44 }
 0x343   :  { %12586 = vst [vmem:[#allocation291_spill] sm:$0xff] %v9188_v17  ;;  %3545 = vperm.xlu0 %5279, %v9180_v3   ;;  %v9202_v17 = vmul.f32 %v5502_v2, %v2393_v51  ;;  %v5506_v43 = vpop.eup %5505  ;;  %v1848_v15 = vsub.f32 %v1584_v13, %v1716_v37  ;;  %v1586_v2 = vmul.f32 0.020408163, %v7787_v14  ;;  %v12591_v51 = vld [vmem:[#allocation116_spill] sm:$0xff]  ;;  %v9220_v63 = vmul.f32 %v5504_v48, %v2364_v47  ;;  %v2397_v48 = vld [vmem:[%s11712_s4 + $0x408] sm:$0xff] }
 0x344   :  { %v9218_v10 = vmul.f32 0.020408163, %v12591_v51  ;;  %v1588_v14 = vmul.f32 0.020408163, %v7812_v59  ;;  %5517 = vrsqrt.f32 %v2108_v33  ;;  %v2110_v47 = vadd.f32 1e-05, %v1978_v57 }
 0x345   :  { %v9207_v6 = vpop.permute.xlu1 %3080  ;;  %3400 = vperm.xlu1 %5280, %v9195_v27   ;;  %12593 = vst [vmem:[#allocation294_spill] sm:$0xff] %v9220_v63  ;;  %v5508_v0 = vpop.eup %5507  ;;  %v2368_v33 = vld [vmem:[%s11712_s4 + $0x320] sm:$0xff] }
 0x346   :  { %12589 = vst [vmem:[#allocation292_spill] sm:$0xff] %v9207_v6  ;;  %v9210_v46 = vpop.permute.xlu0 %3235  ;;  %12592 = vst [vmem:[#allocation116_spill] sm:$0xff] %v9218_v10  ;;  %v9224_v6 = vmul.f32 %v5506_v43, %v2395_v18  ;;  %v5510_v42 = vpop.eup %5509  ;;  %v1980_v43 = vmax.f32 %v1848_v15, 0.0  ;;  %v1720_v51 = vmul.f32 %v9218_v10, %v9218_v10  ;;  %v9241_v59 = vmul.f32 %v5508_v0, %v2366_v28  ;;  %v2399_v0 = vld [vmem:[%s11712_s4 + $0x418] sm:$0xff] }
 0x347   :  { %12590 = vst [vmem:[#allocation293_spill] sm:$0xff] %v9210_v46  ;;  %3555 = vperm.xlu0 %5279, %v9202_v17   ;;  %v1718_v46 = vmul.f32 %v9200_v44, %v9200_v44  ;;  %5519 = vrsqrt.f32 %v2110_v47  ;;  %v2370_v47 = vld [vmem:[%s11712_s4 + $0x330] sm:$0xff] }
 0x348   :  { %12596 = vst [vmem:[#allocation297_spill] sm:$0xff] %v9241_v59  ;;  %v5512_v44 = vpop.eup %5511  ;;  %v1852_v15 = vsub.f32 %v1588_v14, %v1720_v51  ;;  %v2112_v28 = vadd.f32 1e-05, %v1980_v43  ;;  %v12602_v51 = vld [vmem:[#allocation118_spill] sm:$0xff]  ;;  %v12605_v43 = vld [vmem:[#allocation8_spill] sm:$0xff] }
 0x349   :  { %v9230_v13 = vpop.permute.xlu1 %3090  ;;  %3410 = vperm.xlu1 %5280, %v9220_v63   ;;  %v1850_v18 = vsub.f32 %v1586_v2, %v1718_v46  ;;  %v5514_v57 = vpop.eup %5513  ;;  %v9261_v10 = vmul.f32 %v5512_v44, %v2368_v33  ;;  %v2401_v33 = vld [vmem:[%s11713_s5 + $0x8] sm:$0xff] }
 0x34a   :  { %12594 = vst [vmem:[#allocation295_spill] sm:$0xff] %v9230_v13  ;;  %v9233_v37 = vpop.permute.xlu0 %3245  ;;  %v12597_v13 = vld [vmem:[#allocation4_spill] sm:$0xff]  ;;  %5521 = vrsqrt.f32 %v2112_v28  ;;  %v2372_v28 = vld [vmem:[%s11712_s4 + $0x340] sm:$0xff] }
 0x34b   :  { %12595 = vst [vmem:[#allocation296_spill] sm:$0xff] %v9233_v37  ;;  %3565 = vperm.xlu0 %5279, %v9224_v6   ;;  %v9244_v63 = vmul.f32 0.020408163, %v12597_v13  ;;  %v9246_v37 = vmul.f32 %v5510_v42, %v2397_v48  ;;  %v1982_v42 = vmax.f32 %v1850_v18, 0.0  ;;  %v1590_v13 = vmul.f32 0.020408163, %v7840_v25  ;;  %v5516_v48 = vpop.eup %5515 }
 0x34c   :  { %v12606_v18 = vld [vmem:[#allocation196_spill] sm:$0xff] }
 0x34d   :  { %12598 = vst [vmem:[#allocation4_spill] sm:$0xff] %v9244_v63  ;;  %12599 = vst [vmem:[#allocation298_spill] sm:$0xff] %v9246_v37  ;;  %v9251_v46 = vpop.permute.xlu1 %3100  ;;  %3420 = vperm.xlu1 %5280, %v9241_v59   ;;  %v1722_v14 = vmul.f32 %v9244_v63, %v9244_v63  ;;  %v2665_v25 = vmul.f32 %v12606_v18, %v12605_v43  ;;  %v1984_v59 = vmax.f32 %v1852_v15, 0.0  ;;  %v12610_v18 = vld [vmem:[#allocation120_spill] sm:$0xff] }
 0x34e   :  { %12600 = vst [vmem:[#allocation299_spill] sm:$0xff] %v9251_v46  ;;  %v9254_v2 = vpop.permute.xlu0 %3255  ;;  %v9266_v46 = vmul.f32 0.020408163, %v12602_v51  ;;  %v1592_v51 = vmul.f32 0.020408163, %v7868_v50  ;;  %v9285_v63 = vmul.f32 %v5516_v48, %v2370_v47  ;;  %v5518_v15 = vpop.eup %5517  ;;  %v2403_v47 = vld [vmem:[%s11713_s5 + $0x18] sm:$0xff] }
 0x34f   :  { %12601 = vst [vmem:[#allocation300_spill] sm:$0xff] %v9254_v2  ;;  %3575 = vperm.xlu0 %5279, %v9246_v37   ;;  %v9268_v2 = vmul.f32 %v5514_v57, %v2399_v0  ;;  %v2114_v57 = vadd.f32 1e-05, %v1982_v42  ;;  %v1854_v0 = vsub.f32 %v1590_v13, %v1722_v14  ;;  %v12612_v42 = vld [vmem:[#allocation7_spill] sm:$0xff]  ;;  %v2116_v50 = vadd.f32 1e-05, %v1984_v59 }
 0x350   :  { %12603 = vst [vmem:[#allocation118_spill] sm:$0xff] %v9266_v46  ;;  %12609 = vst [vmem:[#allocation302_spill] sm:$0xff] %v9285_v63  ;;  %v1724_v43 = vmul.f32 %v9266_v46, %v9266_v46  ;;  %v2667_v13 = vmul.f32 %v7880_v4, %v12612_v42  ;;  %v12616_v42 = vld [vmem:[#allocation122_spill] sm:$0xff] }
 0x351   :  { %12604 = vst [vmem:[#allocation301_spill] sm:$0xff] %v9268_v2  ;;  %v9275_v37 = vpop.permute.xlu1 %3110  ;;  %3430 = vperm.xlu1 %5280, %v9261_v10   ;;  %5523 = vrsqrt.f32 %v2114_v57  ;;  %v5520_v4 = vpop.eup %5519  ;;  %v12618_v57 = vld [vmem:[#allocation9_spill] sm:$0xff] }
 0x352   :  { %12607 = vst [vmem:[#allocation8_spill] sm:$0xff] %v9275_v37  ;;  %v9278_v44 = vpop.permute.xlu0 %3265  ;;  %v9290_v37 = vmul.f32 0.020408163, %v12610_v18  ;;  %v12615_v18 = vld [vmem:[#allocation201_spill] sm:$0xff]  ;;  %5525 = vrsqrt.f32 %v2116_v50 }
 0x353   :  { %12608 = vst [vmem:[#allocation196_spill] sm:$0xff] %v9278_v44  ;;  %3585 = vperm.xlu0 %5279, %v9268_v2   ;;  %v2797_v44 = vsub.f32 %v2401_v33, %v2665_v25  ;;  %v1986_v25 = vmax.f32 %v1854_v0, 0.0  ;;  %v1856_v33 = vsub.f32 %v1592_v51, %v1724_v43  ;;  %v1594_v46 = vmul.f32 0.020408163, %v12615_v18 }
 0x354   :  { %12611 = vst [vmem:[#allocation120_spill] sm:$0xff] %v9290_v37  ;;  %v9306_v2 = vmul.f32 %v5518_v15, %v2372_v28  ;;  %v1726_v59 = vmul.f32 %v9290_v37, %v9290_v37  ;;  %v2669_v0 = vmul.f32 %v7935_v9, %v12618_v57  ;;  %v2405_v15 = vld [vmem:[%s11713_s5 + $0x28] sm:$0xff]  ;;  %v5522_v50 = vpop.eup %5521 }
 0x355   :  { %v9297_v14 = vpop.permute.xlu1 %3120  ;;  %3440 = vperm.xlu1 %5280, %v9285_v63   ;;  %v2374_v63 = vld [vmem:[%s11712_s4 + $0x350] sm:$0xff]  ;;  %v2118_v43 = vadd.f32 1e-05, %v1986_v25  ;;  %v1988_v28 = vmax.f32 %v1856_v33, 0.0  ;;  %v12625_v25 = vld [vmem:[#allocation11_spill] sm:$0xff]  ;;  %v12626_v33 = vld [vmem:[#allocation206_spill] sm:$0xff] }
 0x356   :  { %12613 = vst [vmem:[#allocation7_spill] sm:$0xff] %v9297_v14  ;;  %v9300_v48 = vpop.permute.xlu0 %3275  ;;  %v9311_v14 = vmul.f32 0.020408163, %v12616_v42  ;;  %v12622_v42 = vld [vmem:[#allocation124_spill] sm:$0xff]  ;;  %v9330_v9 = vmul.f32 %v5520_v4, %v2374_v63  ;;  %v2407_v4 = vld [vmem:[%s11713_s5 + $0x38] sm:$0xff] }
 0x357   :  { %12614 = vst [vmem:[#allocation303_spill] sm:$0xff] %v9300_v48  ;;  %3727 = vperm.xlu0 %5279, %v2797_v44   ;;  %v2799_v48 = vsub.f32 %v2403_v47, %v2667_v13  ;;  %v1858_v13 = vsub.f32 %v1594_v46, %v1726_v59  ;;  %v12621_v47 = vld [vmem:[#allocation204_spill] sm:$0xff]  ;;  %v9328_v37 = vmul.f32 0.020408163, %v12622_v42  ;;  %v2671_v46 = vmul.f32 %v7991_v49, %v12625_v25 }
 0x358   :  { %12617 = vst [vmem:[#allocation201_spill] sm:$0xff] %v9311_v14  ;;  %v1596_v18 = vmul.f32 0.020408163, %v12621_v47  ;;  %12624 = vst [vmem:[#allocation124_spill] sm:$0xff] %v9330_v9  ;;  %v1728_v57 = vmul.f32 %v9311_v14, %v9311_v14  ;;  %v1598_v59 = vmul.f32 0.020408163, %v12626_v33  ;;  %5527 = vrsqrt.f32 %v2118_v43 }
 0x359   :  { %v9318_v51 = vpop.permute.xlu1 %3130  ;;  %3450 = vperm.xlu1 %5280, %v9306_v2   ;;  %12623 = vst [vmem:[#allocation204_spill] sm:$0xff] %v9328_v37  ;;  %v1730_v49 = vmul.f32 %v9328_v37, %v9328_v37  ;;  %v12629_v33 = vld [vmem:[#allocation126_spill] sm:$0xff]  ;;  %v12632_v43 = vld [vmem:[#allocation187_spill] sm:$0xff] }
 0x35a   :  { %12619 = vst [vmem:[#allocation122_spill] sm:$0xff] %v9318_v51  ;;  %v9321_v44 = vpop.permute.xlu0 %3285  ;;  %v2376_v51 = vld [vmem:[%s11712_s4 + $0x360] sm:$0xff]  ;;  %v1860_v47 = vsub.f32 %v1596_v18, %v1728_v57  ;;  %v9353_v14 = vmul.f32 0.020408163, %v12629_v33 }
 0x35b   :  { %12620 = vst [vmem:[#allocation9_spill] sm:$0xff] %v9321_v44  ;;  %3737 = vperm.xlu0 %5279, %v2799_v48   ;;  %v2801_v44 = vsub.f32 %v2405_v15, %v2669_v0  ;;  %v2120_v0 = vadd.f32 1e-05, %v1988_v28  ;;  %v1990_v15 = vmax.f32 %v1858_v13, 0.0  ;;  %v9350_v42 = vmul.f32 %v5522_v50, %v2376_v51  ;;  %v5524_v25 = vpop.eup %5523  ;;  %v2409_v51 = vld [vmem:[%s11713_s5 + $0x48] sm:$0xff]  ;;  %v2380_v37 = vld [vmem:[%s11712_s4 + $0x380] sm:$0xff] }
 0x35c   :  { %12630 = vst [vmem:[#allocation126_spill] sm:$0xff] %v9353_v14  ;;  %v1862_v13 = vsub.f32 %v1598_v59, %v1730_v49  ;;  %v1992_v57 = vmax.f32 %v1860_v47, 0.0  ;;  %v12634_v59 = vld [vmem:[#allocation128_spill] sm:$0xff] }
 0x35d   :  { %v9340_v48 = vpop.permute.xlu1 %3140  ;;  %3460 = vperm.xlu1 %5280, %v9330_v9   ;;  %v12631_v9 = vld [vmem:[#allocation13_spill] sm:$0xff]  ;;  %5529 = vrsqrt.f32 %v2120_v0  ;;  %v2122_v50 = vadd.f32 1e-05, %v1990_v15  ;;  %v9374_v49 = vmul.f32 0.020408163, %v12634_v59  ;;  %v12636_v0 = vld [vmem:[#allocation15_spill] sm:$0xff] }
 0x35e   :  { %12627 = vst [vmem:[#allocation11_spill] sm:$0xff] %v9340_v48  ;;  %v9343_v63 = vpop.permute.xlu0 %3295  ;;  %v2803_v48 = vsub.f32 %v2407_v4, %v2671_v46  ;;  %v2673_v28 = vmul.f32 %v12632_v43, %v12631_v9  ;;  %v1600_v46 = vmul.f32 0.020408163, %v7980_v40  ;;  %v5526_v4 = vpop.eup %5525  ;;  %v1732_v9 = vmul.f32 %v9353_v14, %v9353_v14  ;;  %v12637_v15 = vld [vmem:[#allocation189_spill] sm:$0xff] }
 0x35f   :  { %12628 = vst [vmem:[#allocation206_spill] sm:$0xff] %v9343_v63  ;;  %3747 = vperm.xlu0 %5279, %v2801_v44   ;;  %v2378_v63 = vld [vmem:[%s11712_s4 + $0x370] sm:$0xff]  ;;  %12635 = vst [vmem:[#allocation187_spill] sm:$0xff] %v9374_v49  ;;  %v2675_v47 = vmul.f32 %v12637_v15, %v12636_v0  ;;  %5531 = vrsqrt.f32 %v2122_v50  ;;  %v9390_v59 = vmul.f32 %v5526_v4, %v2380_v37  ;;  %v12640_v15 = vld [vmem:[#allocation130_spill] sm:$0xff] }
 0x360   :  { %v9369_v33 = vmul.f32 %v5524_v25, %v2378_v63  ;;  %v2805_v43 = vsub.f32 %v2409_v51, %v2673_v28  ;;  %v2411_v63 = vld [vmem:[%s11713_s5 + $0x58] sm:$0xff]  ;;  %v2124_v25 = vadd.f32 1e-05, %v1992_v57  ;;  %v1864_v28 = vsub.f32 %v1600_v46, %v1732_v9  ;;  %v12643_v57 = vld [vmem:[#allocation190_spill] sm:$0xff]  ;;  %v2413_v4 = vld [vmem:[%s11713_s5 + $0x68] sm:$0xff] }
 0x361   :  { %v9360_v18 = vpop.permute.xlu1 %3150  ;;  %3470 = vperm.xlu1 %5280, %v9350_v42   ;;  %v1602_v51 = vmul.f32 0.020408163, %v8008_v12  ;;  %v9395_v14 = vmul.f32 0.020408163, %v12640_v15  ;;  %v12642_v50 = vld [vmem:[#allocation17_spill] sm:$0xff] }
 0x362   :  { %v9363_v44 = vpop.permute.xlu0 %3305  ;;  %v5528_v0 = vpop.eup %5527  ;;  %v2677_v46 = vmul.f32 %v12643_v57, %v12642_v50  ;;  %5533 = vrsqrt.f32 %v2124_v25  ;;  %v12647_v57 = vld [vmem:[#allocation132_spill] sm:$0xff]  ;;  %v12649_v25 = vld [vmem:[#allocation19_spill] sm:$0xff] }
 0x363   :  { %12633 = vst [vmem:[#allocation13_spill] sm:$0xff] %v9363_v44  ;;  %3757 = vperm.xlu0 %5279, %v2803_v48   ;;  %v1994_v44 = vmax.f32 %v1862_v13, 0.0  ;;  %v1734_v13 = vmul.f32 %v9374_v49, %v9374_v49  ;;  %12641 = vst [vmem:[#allocation189_spill] sm:$0xff] %v9395_v14  ;;  %v9416_v49 = vmul.f32 0.020408163, %v12647_v57 }
 0x365   :  { %v9381_v40 = vpop.permute.xlu1 %3160  ;;  %3480 = vperm.xlu1 %5280, %v9369_v33   ;;  %v2126_v9 = vadd.f32 1e-05, %v1994_v44  ;;  %v1736_v44 = vmul.f32 %v9395_v14, %v9395_v14  ;;  %12648 = vst [vmem:[#allocation132_spill] sm:$0xff] %v9416_v49  ;;  %v2386_v14 = vld [vmem:[%s11712_s4 + $0x3b0] sm:$0xff] }
 0x366   :  { %12638 = vst [vmem:[#allocation128_spill] sm:$0xff] %v9381_v40  ;;  %v9384_v48 = vpop.permute.xlu0 %3315  ;;  %v2382_v40 = vld [vmem:[%s11712_s4 + $0x390] sm:$0xff] }
 0x367   :  { %12639 = vst [vmem:[#allocation15_spill] sm:$0xff] %v9384_v48  ;;  %3767 = vperm.xlu0 %5279, %v2805_v43   ;;  %v2807_v48 = vsub.f32 %v2411_v63, %v2675_v47  ;;  %v1996_v43 = vmax.f32 %v1864_v28, 0.0  ;;  %v1866_v47 = vsub.f32 %v1602_v51, %v1734_v13  ;;  %v1604_v63 = vmul.f32 0.020408163, %v8036_v22  ;;  %v5530_v50 = vpop.eup %5529  ;;  %v12650_v28 = vld [vmem:[#allocation191_spill] sm:$0xff] }
 0x368   :  { %v9411_v15 = vmul.f32 %v5528_v0, %v2382_v40  ;;  %v2679_v51 = vmul.f32 %v12650_v28, %v12649_v25  ;;  %5535 = vrsqrt.f32 %v2126_v9  ;;  %v1738_v9 = vmul.f32 %v9416_v49, %v9416_v49 }
 0x369   :  { %v9402_v12 = vpop.permute.xlu1 %3170  ;;  %3490 = vperm.xlu1 %5280, %v9390_v59   ;;  %v2128_v0 = vadd.f32 1e-05, %v1996_v43  ;;  %v1998_v13 = vmax.f32 %v1866_v47, 0.0  ;;  %v5532_v25 = vpop.eup %5531 }
 0x36a   :  { %12644 = vst [vmem:[#allocation130_spill] sm:$0xff] %v9402_v12  ;;  %v9405_v37 = vpop.permute.xlu0 %3325  ;;  %12646 = vst [vmem:[#allocation190_spill] sm:$0xff] %v9411_v15  ;;  %v2384_v12 = vld [vmem:[%s11712_s4 + $0x3a0] sm:$0xff] }
 0x36b   :  { %12645 = vst [vmem:[#allocation17_spill] sm:$0xff] %v9405_v37  ;;  %3777 = vperm.xlu0 %5279, %v2807_v48   ;;  %v2809_v37 = vsub.f32 %v2413_v4, %v2677_v46  ;;  %v2415_v48 = vld [vmem:[%s11713_s5 + $0x78] sm:$0xff]  ;;  %v1868_v46 = vsub.f32 %v1604_v63, %v1736_v44  ;;  %v1606_v4 = vmul.f32 0.020408163, %v8064_v19  ;;  %v9432_v57 = vmul.f32 %v5530_v50, %v2384_v12  ;;  %v2417_v12 = vld [vmem:[%s11713_s5 + $0x88] sm:$0xff] }
 0x36c   :  { %v2811_v28 = vsub.f32 %v2415_v48, %v2679_v51  ;;  %5537 = vrsqrt.f32 %v2128_v0  ;;  %v9449_v50 = vmul.f32 %v5532_v25, %v2386_v14  ;;  %v5534_v44 = vpop.eup %5533  ;;  %v12657_v48 = vld [vmem:[#allocation193_spill] sm:$0xff] }
 0x36d   :  { %v9423_v22 = vpop.permute.xlu1 %3180  ;;  %3500 = vperm.xlu1 %5280, %v9411_v15   ;;  %v2000_v47 = vmax.f32 %v1868_v46, 0.0  ;;  %v1870_v63 = vsub.f32 %v1606_v4, %v1738_v9  ;;  %v2419_v14 = vld [vmem:[%s11713_s5 + $0x98] sm:$0xff]  ;;  %v2390_v9 = vld [vmem:[%s11712_s4 + $0x3d0] sm:$0xff] }
 0x36e   :  { %12651 = vst [vmem:[#allocation19_spill] sm:$0xff] %v9423_v22  ;;  %v9426_v40 = vpop.permute.xlu0 %3335  ;;  %v12654_v22 = vld [vmem:[#allocation192_spill] sm:$0xff] }
 0x36f   :  { %12652 = vst [vmem:[#allocation191_spill] sm:$0xff] %v9426_v40  ;;  %3787 = vperm.xlu0 %5279, %v2809_v37   ;;  %v12653_v40 = vld [vmem:[#allocation21_spill] sm:$0xff]  ;;  %v2130_v37 = vadd.f32 1e-05, %v1998_v13  ;;  %v2132_v13 = vadd.f32 1e-05, %v2000_v47 }
 0x370   :  { %v2681_v15 = vmul.f32 %v12654_v22, %v12653_v40  ;;  %v2388_v22 = vld [vmem:[%s11712_s4 + $0x3c0] sm:$0xff]  ;;  %v12656_v40 = vld [vmem:[#allocation23_spill] sm:$0xff] }
 0x371   :  { %v9441_v43 = vpop.permute.xlu1 %3190  ;;  %3510 = vperm.xlu1 %5280, %v9432_v57   ;;  %v2683_v49 = vmul.f32 %v12657_v48, %v12656_v40  ;;  %5539 = vrsqrt.f32 %v2130_v37  ;;  %v9464_v4 = vmul.f32 %v5534_v44, %v2388_v22  ;;  %v2421_v37 = vld [vmem:[%s11713_s5 + $0xa8] sm:$0xff] }
 0x372   :  { %v9444_v19 = vpop.permute.xlu0 %3345  ;;  %v2813_v51 = vsub.f32 %v2417_v12, %v2681_v15  ;;  %v2002_v15 = vmax.f32 %v1870_v63, 0.0  ;;  %v5536_v46 = vpop.eup %5535  ;;  %v12660_v12 = vld [vmem:[#allocation194_spill] sm:$0xff]  ;;  %5541 = vrsqrt.f32 %v2132_v13  ;;  %v12662_v22 = vld [vmem:[#allocation27_spill] sm:$0xff]  ;;  %v2423_v13 = vld [vmem:[%s11713_s5 + $0xb8] sm:$0xff] }
 0x373   :  { %12655 = vst [vmem:[#allocation21_spill] sm:$0xff] %v9444_v19  ;;  %3797 = vperm.xlu0 %5279, %v2811_v28   ;;  %v2815_v25 = vsub.f32 %v2419_v14, %v2683_v49  ;;  %v12659_v28 = vld [vmem:[#allocation25_spill] sm:$0xff]  ;;  %v9479_v49 = vmul.f32 %v5536_v46, %v2390_v9  ;;  %v12663_v14 = vld [vmem:[#allocation195_spill] sm:$0xff]  ;;  %v2394_v9 = vld [vmem:[%s11712_s4 + $0x3f0] sm:$0xff] }
 0x374   :  { %v2685_v40 = vmul.f32 %v12660_v12, %v12659_v28  ;;  %v2134_v47 = vadd.f32 1e-05, %v2002_v15  ;;  %v2687_v28 = vmul.f32 %v12663_v14, %v12662_v22 }
 0x375   :  { %v9456_v19 = vpop.permute.xlu1 %3200  ;;  %3520 = vperm.xlu1 %5280, %v9449_v50  }
 0x376   :  { %v9459_v0 = vpop.permute.xlu0 %3355  ;;  %v5538_v63 = vpop.eup %5537  ;;  %v2817_v44 = vsub.f32 %v2421_v37, %v2685_v40  ;;  %5543 = vrsqrt.f32 %v2134_v47  ;;  %v12667_v40 = vld [vmem:[#allocation29_spill] sm:$0xff]  ;;  %v2425_v47 = vld [vmem:[%s11713_s5 + $0xc8] sm:$0xff] }
 0x377   :  { %12658 = vst [vmem:[#allocation192_spill] sm:$0xff] %v9459_v0  ;;  %3807 = vperm.xlu0 %5279, %v2813_v51   ;;  %v2392_v51 = vld [vmem:[%s11712_s4 + $0x3e0] sm:$0xff]  ;;  %v12668_v37 = vld [vmem:[#allocation197_spill] sm:$0xff] }
 0x378   :  { %v9494_v15 = vmul.f32 %v5538_v63, %v2392_v51  ;;  %v2689_v22 = vmul.f32 %v12668_v37, %v12667_v40  ;;  %v12673_v40 = vld [vmem:[#allocation199_spill] sm:$0xff] }
 0x379   :  { %v9471_v48 = vpop.permute.xlu1 %3210  ;;  %3530 = vperm.xlu1 %5280, %v9464_v4  }
 0x37a   :  { %v9474_v0 = vpop.permute.xlu0 %3365  ;;  %12666 = vst [vmem:[#allocation194_spill] sm:$0xff] %v9494_v15  ;;  %v2821_v51 = vsub.f32 %v2425_v47, %v2689_v22  ;;  %v2398_v47 = vld [vmem:[%s11712_s4 + $0x410] sm:$0xff] }
 0x37b   :  { %12661 = vst [vmem:[#allocation23_spill] sm:$0xff] %v9474_v0  ;;  %3817 = vperm.xlu0 %5279, %v2815_v25   ;;  %v5540_v46 = vpop.eup %5539  ;;  %v2819_v25 = vsub.f32 %v2423_v13, %v2687_v28  ;;  %v2396_v28 = vld [vmem:[%s11712_s4 + $0x400] sm:$0xff]  ;;  %v12672_v13 = vld [vmem:[#allocation31_spill] sm:$0xff] }
 0x37c   :  { %v9509_v63 = vmul.f32 %v5540_v46, %v2394_v9  ;;  %v2691_v37 = vmul.f32 %v12673_v40, %v12672_v13  ;;  %v2427_v46 = vld [vmem:[%s11713_s5 + $0xd8] sm:$0xff]  ;;  %v12678_v40 = vld [vmem:[#allocation200_spill] sm:$0xff] }
 0x37d   :  { %v9486_v12 = vpop.permute.xlu1 %3220  ;;  %3540 = vperm.xlu1 %5280, %v9479_v49   ;;  %v12677_v13 = vld [vmem:[#allocation33_spill] sm:$0xff] }
 0x37e   :  { %12664 = vst [vmem:[#allocation193_spill] sm:$0xff] %v9486_v12  ;;  %v9489_v0 = vpop.permute.xlu0 %3375  ;;  %12671 = vst [vmem:[#allocation29_spill] sm:$0xff] %v9509_v63  ;;  %v2823_v22 = vsub.f32 %v2427_v46, %v2691_v37  ;;  %v12683_v37 = vld [vmem:[#allocation185_spill] sm:$0xff] }
 0x37f   :  { %12665 = vst [vmem:[#allocation25_spill] sm:$0xff] %v9489_v0  ;;  %3827 = vperm.xlu0 %5279, %v2817_v44   ;;  %v5542_v44 = vpop.eup %5541 }
 0x380   :  { %v5544_v9 = vpop.eup %5543 }
 0x381   :  { %v9501_v14 = vpop.permute.xlu1 %3230  ;;  %3550 = vperm.xlu1 %5280, %v9494_v15  }
 0x382   :  { %12669 = vst [vmem:[#allocation27_spill] sm:$0xff] %v9501_v14  ;;  %v9504_v0 = vpop.permute.xlu0 %3385 }
 0x383   :  { %12670 = vst [vmem:[#allocation195_spill] sm:$0xff] %v9504_v0  ;;  %3837 = vperm.xlu0 %5279, %v2819_v25   ;;  %v9524_v25 = vmul.f32 %v5542_v44, %v2396_v28  ;;  %v2429_v44 = vld [vmem:[%s11713_s5 + $0xe8] sm:$0xff]  ;;  %v12682_v28 = vld [vmem:[#allocation6_spill] sm:$0xff] }
 0x384   :  { %v2664_v46 = vmul.f32 %v12683_v37, %v12682_v28  ;;  %v12690_v37 = vld [vmem:[#allocation37_spill] sm:$0xff] }
 0x385   :  { %v9516_v14 = vpop.permute.xlu1 %3240  ;;  %3560 = vperm.xlu1 %5280, %v9509_v63   ;;  %12676 = vst [vmem:[#allocation199_spill] sm:$0xff] %v9524_v25 }
 0x386   :  { %12674 = vst [vmem:[#allocation197_spill] sm:$0xff] %v9516_v14  ;;  %v9519_v0 = vpop.permute.xlu0 %3395  ;;  %v2693_v14 = vmul.f32 %v12678_v40, %v12677_v13  ;;  %v2400_v13 = vld [vmem:[%s11713_s5] sm:$0xff]  ;;  %v12684_v40 = vld [vmem:[#allocation35_spill] sm:$0xff] }
 0x387   :  { %12675 = vst [vmem:[#allocation31_spill] sm:$0xff] %v9519_v0  ;;  %3847 = vperm.xlu0 %5279, %v2821_v51   ;;  %v9539_v51 = vmul.f32 %v5544_v9, %v2398_v47  ;;  %v2431_v9 = vld [vmem:[%s11713_s5 + $0xf8] sm:$0xff]  ;;  %v12689_v47 = vld [vmem:[#allocation198_spill] sm:$0xff] }
 0x388   :  { %v2825_v63 = vsub.f32 %v2429_v44, %v2693_v14  ;;  %v12688_v14 = vld [vmem:[#allocation5_spill] sm:$0xff] }
 0x389   :  { %v9531_v12 = vpop.permute.xlu1 %3250  ;;  %3570 = vperm.xlu1 %5280, %v9524_v25   ;;  %12681 = vst [vmem:[#allocation304_spill] sm:$0xff] %v9539_v51  ;;  %v2666_v44 = vmul.f32 %v12689_v47, %v12688_v14  ;;  %v2404_v47 = vld [vmem:[%s11713_s5 + $0x20] sm:$0xff] }
 0x38a   :  { %12679 = vst [vmem:[#allocation33_spill] sm:$0xff] %v9531_v12  ;;  %v9534_v0 = vpop.permute.xlu0 %3405  ;;  %v12685_v12 = vld [vmem:[#allocation203_spill] sm:$0xff] }
 0x38b   :  { %12680 = vst [vmem:[#allocation200_spill] sm:$0xff] %v9534_v0  ;;  %3857 = vperm.xlu0 %5279, %v2823_v22   ;;  %v2695_v25 = vmul.f32 %v12685_v12, %v12684_v40  ;;  %v2796_v22 = vsub.f32 %v2400_v13, %v2664_v46  ;;  %v2402_v12 = vld [vmem:[%s11713_s5 + $0x10] sm:$0xff]  ;;  %v12691_v40 = vld [vmem:[#allocation205_spill] sm:$0xff]  ;;  %v12694_v13 = vld [vmem:[#allocation10_spill] sm:$0xff] }
 0x38c   :  { %v2798_v46 = vsub.f32 %v2402_v12, %v2666_v44  ;;  %v2435_v44 = vld [vmem:[%s11713_s5 + $0x118] sm:$0xff]  ;;  %v12700_v12 = vld [vmem:[#allocation12_spill] sm:$0xff] }
 0x38d   :  { %v9548_v15 = vpop.permute.xlu1 %3260  ;;  %3580 = vperm.xlu1 %5280, %v9539_v51   ;;  %v2827_v28 = vsub.f32 %v2431_v9, %v2695_v25  ;;  %v12695_v25 = vld [vmem:[#allocation202_spill] sm:$0xff] }
 0x38e   :  { %12686 = vst [vmem:[#allocation6_spill] sm:$0xff] %v9548_v15  ;;  %v9551_v0 = vpop.permute.xlu0 %3415  ;;  %v2697_v15 = vmul.f32 %v12691_v40, %v12690_v37  ;;  %v2668_v9 = vmul.f32 %v12695_v25, %v12694_v13  ;;  %v12696_v37 = vld [vmem:[#allocation39_spill] sm:$0xff]  ;;  %v12697_v40 = vld [vmem:[#allocation208_spill] sm:$0xff] }
 0x38f   :  { %12687 = vst [vmem:[#allocation185_spill] sm:$0xff] %v9551_v0  ;;  %3867 = vperm.xlu0 %5279, %v2825_v63   ;;  %v2433_v63 = vld [vmem:[%s11713_s5 + $0x108] sm:$0xff]  ;;  %v2406_v25 = vld [vmem:[%s11713_s5 + $0x30] sm:$0xff] }
 0x390   :  { %v2829_v14 = vsub.f32 %v2433_v63, %v2697_v15  ;;  %v12701_v15 = vld [vmem:[#allocation207_spill] sm:$0xff] }
 0x391   :  { %v9563_v51 = vpop.permute.xlu1 %3270  ;;  %3722 = vperm.xlu1 %5280, %v2796_v22   ;;  %v2670_v63 = vmul.f32 %v12701_v15, %v12700_v12  ;;  %v2408_v15 = vld [vmem:[%s11713_s5 + $0x40] sm:$0xff] }
 0x392   :  { %12692 = vst [vmem:[#allocation35_spill] sm:$0xff] %v9563_v51  ;;  %v9565_v0 = vpop.permute.xlu0 %3425  ;;  %v2699_v51 = vmul.f32 %v12697_v40, %v12696_v37  ;;  %v12702_v37 = vld [vmem:[#allocation41_spill] sm:$0xff] }
 0x393   :  { %12693 = vst [vmem:[#allocation203_spill] sm:$0xff] %v9565_v0  ;;  %3877 = vperm.xlu0 %5279, %v2827_v28   ;;  %v2800_v28 = vsub.f32 %v2404_v47, %v2668_v9  ;;  %v12703_v40 = vld [vmem:[#allocation209_spill] sm:$0xff]  ;;  %v2437_v9 = vld [vmem:[%s11713_s5 + $0x128] sm:$0xff]  ;;  %v12706_v47 = vld [vmem:[#allocation14_spill] sm:$0xff] }
 0x394   :  { %v2831_v13 = vsub.f32 %v2435_v44, %v2699_v51  ;;  %v12707_v51 = vld [vmem:[#allocation210_spill] sm:$0xff] }
 0x395   :  { %v9577_v22 = vpop.permute.xlu1 %3280  ;;  %3732 = vperm.xlu1 %5280, %v2798_v46   ;;  %v2672_v44 = vmul.f32 %v12707_v51, %v12706_v47  ;;  %v2410_v51 = vld [vmem:[%s11713_s5 + $0x50] sm:$0xff] }
 0x396   :  { %12698 = vst [vmem:[#allocation5_spill] sm:$0xff] %v9577_v22  ;;  %v9579_v0 = vpop.permute.xlu0 %3435  ;;  %v2701_v22 = vmul.f32 %v12703_v40, %v12702_v37  ;;  %v12708_v37 = vld [vmem:[#allocation43_spill] sm:$0xff] }
 0x397   :  { %12699 = vst [vmem:[#allocation198_spill] sm:$0xff] %v9579_v0  ;;  %3887 = vperm.xlu0 %5279, %v2829_v14   ;;  %v2802_v14 = vsub.f32 %v2406_v25, %v2670_v63  ;;  %v2703_v40 = vmul.f32 %v8030_v36, %v12708_v37  ;;  %v2439_v63 = vld [vmem:[%s11713_s5 + $0x138] sm:$0xff]  ;;  %v12711_v25 = vld [vmem:[#allocation16_spill] sm:$0xff] }
 0x398   :  { %v2833_v12 = vsub.f32 %v2437_v9, %v2701_v22  ;;  %v12712_v22 = vld [vmem:[#allocation211_spill] sm:$0xff]  ;;  %v12713_v36 = vld [vmem:[#allocation45_spill] sm:$0xff]  ;;  %v12714_v37 = vld [vmem:[#allocation212_spill] sm:$0xff] }
 0x399   :  { %v9591_v46 = vpop.permute.xlu1 %3290  ;;  %3742 = vperm.xlu1 %5280, %v2800_v28   ;;  %v2674_v9 = vmul.f32 %v12712_v22, %v12711_v25  ;;  %v2835_v47 = vsub.f32 %v2439_v63, %v2703_v40  ;;  %v12718_v40 = vld [vmem:[#allocation213_spill] sm:$0xff]  ;;  %v2412_v22 = vld [vmem:[%s11713_s5 + $0x60] sm:$0xff] }
 0x39a   :  { %12704 = vst [vmem:[#allocation37_spill] sm:$0xff] %v9591_v46  ;;  %v9593_v0 = vpop.permute.xlu0 %3445 }
 0x39b   :  { %12705 = vst [vmem:[#allocation205_spill] sm:$0xff] %v9593_v0  ;;  %3897 = vperm.xlu0 %5279, %v2831_v13   ;;  %v2804_v13 = vsub.f32 %v2408_v15, %v2672_v44  ;;  %v2441_v44 = vld [vmem:[%s11713_s5 + $0x148] sm:$0xff]  ;;  %v12717_v15 = vld [vmem:[#allocation18_spill] sm:$0xff] }
 0x39c   :  { %v2676_v63 = vmul.f32 %v12718_v40, %v12717_v15  ;;  %v2414_v40 = vld [vmem:[%s11713_s5 + $0x70] sm:$0xff] }
 0x39d   :  { %v9605_v28 = vpop.permute.xlu1 %3300  ;;  %3752 = vperm.xlu1 %5280, %v2802_v14  }
 0x39e   :  { %12709 = vst [vmem:[#allocation10_spill] sm:$0xff] %v9605_v28  ;;  %v9607_v0 = vpop.permute.xlu0 %3455  ;;  %v2705_v28 = vmul.f32 %v12714_v37, %v12713_v36  ;;  %v12719_v36 = vld [vmem:[#allocation47_spill] sm:$0xff] }
 0x39f   :  { %12710 = vst [vmem:[#allocation202_spill] sm:$0xff] %v9607_v0  ;;  %3907 = vperm.xlu0 %5279, %v2833_v12   ;;  %v2806_v12 = vsub.f32 %v2410_v51, %v2674_v9  ;;  %v12720_v37 = vld [vmem:[#allocation215_spill] sm:$0xff]  ;;  %v2443_v9 = vld [vmem:[%s11713_s5 + $0x158] sm:$0xff]  ;;  %v12723_v51 = vld [vmem:[#allocation20_spill] sm:$0xff] }
 0x3a0   :  { %v2837_v25 = vsub.f32 %v2441_v44, %v2705_v28  ;;  %v12724_v28 = vld [vmem:[#allocation218_spill] sm:$0xff] }
 0x3a1   :  { %v9619_v14 = vpop.permute.xlu1 %3310  ;;  %3762 = vperm.xlu1 %5280, %v2804_v13   ;;  %v2678_v44 = vmul.f32 %v12724_v28, %v12723_v51  ;;  %v2416_v28 = vld [vmem:[%s11713_s5 + $0x80] sm:$0xff] }
 0x3a2   :  { %12715 = vst [vmem:[#allocation39_spill] sm:$0xff] %v9619_v14  ;;  %v9621_v0 = vpop.permute.xlu0 %3465  ;;  %v2707_v14 = vmul.f32 %v12720_v37, %v12719_v36  ;;  %v12725_v36 = vld [vmem:[#allocation49_spill] sm:$0xff]  ;;  %v12726_v37 = vld [vmem:[#allocation64_spill] sm:$0xff] }
 0x3a3   :  { %12716 = vst [vmem:[#allocation208_spill] sm:$0xff] %v9621_v0  ;;  %3917 = vperm.xlu0 %5279, %v2835_v47   ;;  %v2808_v47 = vsub.f32 %v2412_v22, %v2676_v63  ;;  %v2445_v63 = vld [vmem:[%s11713_s5 + $0x168] sm:$0xff]  ;;  %v12729_v22 = vld [vmem:[#allocation22_spill] sm:$0xff] }
 0x3a4   :  { %v2839_v15 = vsub.f32 %v2443_v9, %v2707_v14  ;;  %v12730_v14 = vld [vmem:[#allocation220_spill] sm:$0xff] }
 0x3a5   :  { %v9633_v13 = vpop.permute.xlu1 %3320  ;;  %3772 = vperm.xlu1 %5280, %v2806_v12   ;;  %v2680_v9 = vmul.f32 %v12730_v14, %v12729_v22  ;;  %v2418_v14 = vld [vmem:[%s11713_s5 + $0x90] sm:$0xff] }
 0x3a6   :  { %12721 = vst [vmem:[#allocation12_spill] sm:$0xff] %v9633_v13  ;;  %v9635_v0 = vpop.permute.xlu0 %3475  ;;  %v2709_v13 = vmul.f32 %v12726_v37, %v12725_v36  ;;  %v12731_v36 = vld [vmem:[#allocation51_spill] sm:$0xff]  ;;  %v12732_v37 = vld [vmem:[#allocation66_spill] sm:$0xff] }
 0x3a7   :  { %12722 = vst [vmem:[#allocation207_spill] sm:$0xff] %v9635_v0  ;;  %3927 = vperm.xlu0 %5279, %v2837_v25   ;;  %v2810_v25 = vsub.f32 %v2414_v40, %v2678_v44  ;;  %v2447_v44 = vld [vmem:[%s11713_s5 + $0x178] sm:$0xff]  ;;  %v12735_v40 = vld [vmem:[#allocation24_spill] sm:$0xff] }
 0x3a8   :  { %v2841_v51 = vsub.f32 %v2445_v63, %v2709_v13  ;;  %v12736_v13 = vld [vmem:[#allocation151_spill] sm:$0xff] }
 0x3a9   :  { %v9647_v12 = vpop.permute.xlu1 %3330  ;;  %3782 = vperm.xlu1 %5280, %v2808_v47   ;;  %v2682_v63 = vmul.f32 %v12736_v13, %v12735_v40  ;;  %v2420_v13 = vld [vmem:[%s11713_s5 + $0xa0] sm:$0xff] }
 0x3aa   :  { %12727 = vst [vmem:[#allocation41_spill] sm:$0xff] %v9647_v12  ;;  %v9649_v0 = vpop.permute.xlu0 %3485  ;;  %v2711_v12 = vmul.f32 %v12732_v37, %v12731_v36  ;;  %v12737_v36 = vld [vmem:[#allocation53_spill] sm:$0xff]  ;;  %v12738_v37 = vld [vmem:[#allocation222_spill] sm:$0xff] }
 0x3ab   :  { %12728 = vst [vmem:[#allocation209_spill] sm:$0xff] %v9649_v0  ;;  %3937 = vperm.xlu0 %5279, %v2839_v15   ;;  %v2812_v15 = vsub.f32 %v2416_v28, %v2680_v9  ;;  %v2449_v9 = vld [vmem:[%s11713_s5 + $0x188] sm:$0xff]  ;;  %v12741_v28 = vld [vmem:[#allocation26_spill] sm:$0xff] }
 0x3ac   :  { %v2843_v22 = vsub.f32 %v2447_v44, %v2711_v12  ;;  %v12742_v12 = vld [vmem:[#allocation224_spill] sm:$0xff] }
 0x3ad   :  { %v9661_v47 = vpop.permute.xlu1 %3340  ;;  %3792 = vperm.xlu1 %5280, %v2810_v25   ;;  %v2684_v44 = vmul.f32 %v12742_v12, %v12741_v28  ;;  %v2422_v12 = vld [vmem:[%s11713_s5 + $0xb0] sm:$0xff] }
 0x3ae   :  { %12733 = vst [vmem:[#allocation14_spill] sm:$0xff] %v9661_v47  ;;  %v9663_v0 = vpop.permute.xlu0 %3495  ;;  %v2713_v47 = vmul.f32 %v12738_v37, %v12737_v36  ;;  %v12743_v36 = vld [vmem:[#allocation55_spill] sm:$0xff]  ;;  %v12744_v37 = vld [vmem:[#allocation70_spill] sm:$0xff] }
 0x3af   :  { %12734 = vst [vmem:[#allocation210_spill] sm:$0xff] %v9663_v0  ;;  %3947 = vperm.xlu0 %5279, %v2841_v51   ;;  %v2814_v51 = vsub.f32 %v2418_v14, %v2682_v63  ;;  %v2451_v63 = vld [vmem:[%s11713_s5 + $0x198] sm:$0xff]  ;;  %v12747_v14 = vld [vmem:[#allocation28_spill] sm:$0xff] }
 0x3b0   :  { %v2845_v40 = vsub.f32 %v2449_v9, %v2713_v47  ;;  %v12748_v47 = vld [vmem:[#allocation226_spill] sm:$0xff] }
 0x3b1   :  { %v9675_v25 = vpop.permute.xlu1 %3350  ;;  %3802 = vperm.xlu1 %5280, %v2812_v15   ;;  %v2686_v9 = vmul.f32 %v12748_v47, %v12747_v14  ;;  %v2424_v47 = vld [vmem:[%s11713_s5 + $0xc0] sm:$0xff] }
 0x3b2   :  { %12739 = vst [vmem:[#allocation43_spill] sm:$0xff] %v9675_v25  ;;  %v9677_v0 = vpop.permute.xlu0 %3505  ;;  %v2715_v25 = vmul.f32 %v12744_v37, %v12743_v36  ;;  %v12749_v36 = vld [vmem:[#allocation57_spill] sm:$0xff]  ;;  %v12750_v37 = vld [vmem:[#allocation72_spill] sm:$0xff] }
 0x3b3   :  { %12740 = vst [vmem:[#allocation16_spill] sm:$0xff] %v9677_v0  ;;  %3957 = vperm.xlu0 %5279, %v2843_v22   ;;  %v2816_v22 = vsub.f32 %v2420_v13, %v2684_v44  ;;  %v2453_v44 = vld [vmem:[%s11713_s5 + $0x1a8] sm:$0xff]  ;;  %v12753_v13 = vld [vmem:[#allocation30_spill] sm:$0xff] }
 0x3b4   :  { %v2847_v28 = vsub.f32 %v2451_v63, %v2715_v25  ;;  %v12754_v25 = vld [vmem:[#allocation228_spill] sm:$0xff] }
 0x3b5   :  { %v9689_v15 = vpop.permute.xlu1 %3360  ;;  %3812 = vperm.xlu1 %5280, %v2814_v51   ;;  %v2688_v63 = vmul.f32 %v12754_v25, %v12753_v13  ;;  %v2426_v25 = vld [vmem:[%s11713_s5 + $0xd0] sm:$0xff] }
 0x3b6   :  { %12745 = vst [vmem:[#allocation211_spill] sm:$0xff] %v9689_v15  ;;  %v9691_v0 = vpop.permute.xlu0 %3515  ;;  %v2717_v15 = vmul.f32 %v12750_v37, %v12749_v36  ;;  %v12755_v36 = vld [vmem:[#allocation59_spill] sm:$0xff]  ;;  %v12756_v37 = vld [vmem:[#allocation74_spill] sm:$0xff] }
 0x3b7   :  { %12746 = vst [vmem:[#allocation45_spill] sm:$0xff] %v9691_v0  ;;  %3967 = vperm.xlu0 %5279, %v2845_v40   ;;  %v2818_v40 = vsub.f32 %v2422_v12, %v2686_v9  ;;  %v2455_v9 = vld [vmem:[%s11713_s5 + $0x1b8] sm:$0xff]  ;;  %v12759_v12 = vld [vmem:[#allocation32_spill] sm:$0xff] }
 0x3b8   :  { %v2849_v14 = vsub.f32 %v2453_v44, %v2717_v15  ;;  %v12760_v15 = vld [vmem:[#allocation230_spill] sm:$0xff] }
 0x3b9   :  { %v9703_v51 = vpop.permute.xlu1 %3370  ;;  %3822 = vperm.xlu1 %5280, %v2816_v22   ;;  %v2690_v44 = vmul.f32 %v12760_v15, %v12759_v12  ;;  %v2428_v15 = vld [vmem:[%s11713_s5 + $0xe0] sm:$0xff] }
 0x3ba   :  { %12751 = vst [vmem:[#allocation212_spill] sm:$0xff] %v9703_v51  ;;  %v9705_v0 = vpop.permute.xlu0 %3525  ;;  %v2719_v51 = vmul.f32 %v12756_v37, %v12755_v36  ;;  %v12761_v36 = vld [vmem:[#allocation61_spill] sm:$0xff]  ;;  %v12762_v37 = vld [vmem:[#allocation76_spill] sm:$0xff] }
 0x3bb   :  { %12752 = vst [vmem:[#allocation18_spill] sm:$0xff] %v9705_v0  ;;  %3977 = vperm.xlu0 %5279, %v2847_v28   ;;  %v2820_v28 = vsub.f32 %v2424_v47, %v2688_v63  ;;  %v2457_v63 = vld [vmem:[%s11713_s5 + $0x1c8] sm:$0xff]  ;;  %v12765_v47 = vld [vmem:[#allocation34_spill] sm:$0xff] }
 0x3bc   :  { %v2851_v13 = vsub.f32 %v2455_v9, %v2719_v51  ;;  %v12766_v51 = vld [vmem:[#allocation161_spill] sm:$0xff] }
 0x3bd   :  { %v9717_v22 = vpop.permute.xlu1 %3380  ;;  %3832 = vperm.xlu1 %5280, %v2818_v40   ;;  %v2692_v9 = vmul.f32 %v12766_v51, %v12765_v47  ;;  %v2430_v51 = vld [vmem:[%s11713_s5 + $0xf0] sm:$0xff] }
 0x3be   :  { %12757 = vst [vmem:[#allocation213_spill] sm:$0xff] %v9717_v22  ;;  %v9719_v0 = vpop.permute.xlu0 %3535  ;;  %v2721_v22 = vmul.f32 %v12762_v37, %v12761_v36  ;;  %v12767_v36 = vld [vmem:[#allocation214_spill] sm:$0xff]  ;;  %v12768_v37 = vld [vmem:[#allocation232_spill] sm:$0xff] }
 0x3bf   :  { %12758 = vst [vmem:[#allocation47_spill] sm:$0xff] %v9719_v0  ;;  %3987 = vperm.xlu0 %5279, %v2849_v14   ;;  %v2822_v14 = vsub.f32 %v2426_v25, %v2690_v44  ;;  %v2459_v44 = vld [vmem:[%s11713_s5 + $0x1d8] sm:$0xff]  ;;  %v12771_v25 = vld [vmem:[#allocation36_spill] sm:$0xff] }
 0x3c0   :  { %v2853_v12 = vsub.f32 %v2457_v63, %v2721_v22  ;;  %v12772_v22 = vld [vmem:[#allocation234_spill] sm:$0xff] }
 0x3c1   :  { %v9731_v40 = vpop.permute.xlu1 %3390  ;;  %3842 = vperm.xlu1 %5280, %v2820_v28   ;;  %v2694_v63 = vmul.f32 %v12772_v22, %v12771_v25  ;;  %v2432_v22 = vld [vmem:[%s11713_s5 + $0x100] sm:$0xff] }
 0x3c2   :  { %12763 = vst [vmem:[#allocation215_spill] sm:$0xff] %v9731_v40  ;;  %v9733_v0 = vpop.permute.xlu0 %3545  ;;  %v2723_v40 = vmul.f32 %v12768_v37, %v12767_v36  ;;  %v12773_v36 = vld [vmem:[#allocation147_spill] sm:$0xff]  ;;  %v12774_v37 = vld [vmem:[#allocation80_spill] sm:$0xff] }
 0x3c3   :  { %12764 = vst [vmem:[#allocation20_spill] sm:$0xff] %v9733_v0  ;;  %3997 = vperm.xlu0 %5279, %v2851_v13   ;;  %v2824_v13 = vsub.f32 %v2428_v15, %v2692_v9  ;;  %v2461_v9 = vld [vmem:[%s11713_s5 + $0x1e8] sm:$0xff]  ;;  %v12777_v15 = vld [vmem:[#allocation38_spill] sm:$0xff] }
 0x3c4   :  { %v2855_v47 = vsub.f32 %v2459_v44, %v2723_v40  ;;  %v12778_v40 = vld [vmem:[#allocation236_spill] sm:$0xff] }
 0x3c5   :  { %v9745_v28 = vpop.permute.xlu1 %3400  ;;  %3852 = vperm.xlu1 %5280, %v2822_v14   ;;  %v2696_v44 = vmul.f32 %v12778_v40, %v12777_v15  ;;  %v2434_v40 = vld [vmem:[%s11713_s5 + $0x110] sm:$0xff] }
 0x3c6   :  { %12769 = vst [vmem:[#allocation218_spill] sm:$0xff] %v9745_v28  ;;  %v9747_v0 = vpop.permute.xlu0 %3555  ;;  %v2725_v28 = vmul.f32 %v12774_v37, %v12773_v36  ;;  %v12779_v36 = vld [vmem:[#allocation149_spill] sm:$0xff]  ;;  %v12780_v37 = vld [vmem:[#allocation82_spill] sm:$0xff] }
 0x3c7   :  { %12770 = vst [vmem:[#allocation49_spill] sm:$0xff] %v9747_v0  ;;  %4007 = vperm.xlu0 %5279, %v2853_v12   ;;  %v2826_v12 = vsub.f32 %v2430_v51, %v2694_v63  ;;  %v2463_v63 = vld [vmem:[%s11713_s5 + $0x1f8] sm:$0xff]  ;;  %v12783_v51 = vld [vmem:[#allocation40_spill] sm:$0xff] }
 0x3c8   :  { %v2857_v25 = vsub.f32 %v2461_v9, %v2725_v28  ;;  %v12784_v28 = vld [vmem:[#allocation238_spill] sm:$0xff] }
 0x3c9   :  { %v9759_v14 = vpop.permute.xlu1 %3410  ;;  %3862 = vperm.xlu1 %5280, %v2824_v13   ;;  %v2698_v9 = vmul.f32 %v12784_v28, %v12783_v51  ;;  %v5657_v51 = vld [vmem:[%s11708_s0 + $0x8] sm:$0xff] }
 0x3ca   :  { %12775 = vst [vmem:[#allocation64_spill] sm:$0xff] %v9759_v14  ;;  %v9761_v0 = vpop.permute.xlu0 %3565  ;;  %v2727_v14 = vmul.f32 %v12780_v37, %v12779_v36  ;;  %v12785_v36 = vld [vmem:[#allocation68_spill] sm:$0xff]  ;;  %v3589_v28 = vmul.f32 %v5657_v51, %v8731_v41 }
 0x3cb   :  { %12776 = vst [vmem:[#allocation22_spill] sm:$0xff] %v9761_v0  ;;  %4017 = vperm.xlu0 %5279, %v2855_v47   ;;  %v2828_v47 = vsub.f32 %v2432_v22, %v2696_v44  ;;  %v12786_v37 = vld [vmem:[#allocation84_spill] sm:$0xff]  ;;  %v2465_v44 = vld [vmem:[%s11713_s5 + $0x208] sm:$0xff]  ;;  %v12789_v22 = vld [vmem:[#allocation42_spill] sm:$0xff] }
 0x3cc   :  { %v2859_v15 = vsub.f32 %v2463_v63, %v2727_v14  ;;  %v12790_v14 = vld [vmem:[#allocation240_spill] sm:$0xff] }
 0x3cd   :  { %v9773_v13 = vpop.permute.xlu1 %3420  ;;  %3872 = vperm.xlu1 %5280, %v2826_v12   ;;  %v2700_v63 = vmul.f32 %v12790_v14, %v12789_v22  ;;  %v12793_v41 = vld [vmem:[#allocation44_spill] sm:$0xff]  ;;  %v5658_v14 = vld [vmem:[%s11708_s0 + $0x18] sm:$0xff] }
 0x3ce   :  { %12781 = vst [vmem:[#allocation220_spill] sm:$0xff] %v9773_v13  ;;  %v9775_v0 = vpop.permute.xlu0 %3575  ;;  %v2729_v13 = vmul.f32 %v12786_v37, %v12785_v36  ;;  %v12791_v37 = vld [vmem:[#allocation153_spill] sm:$0xff]  ;;  %v2438_v51 = vld [vmem:[%s11713_s5 + $0x130] sm:$0xff] }
 0x3cf   :  { %12782 = vst [vmem:[#allocation51_spill] sm:$0xff] %v9775_v0  ;;  %4027 = vperm.xlu0 %5279, %v2857_v25   ;;  %v2830_v25 = vsub.f32 %v2434_v40, %v2698_v9 }
 0x3d0   :  { %v2861_v36 = vsub.f32 %v2465_v44, %v2729_v13  ;;  %v12794_v13 = vld [vmem:[#allocation171_spill] sm:$0xff] }
 0x3d1   :  { %v9787_v12 = vpop.permute.xlu1 %3430  ;;  %3882 = vperm.xlu1 %5280, %v2828_v47   ;;  %v2436_v47 = vld [vmem:[%s11713_s5 + $0x120] sm:$0xff]  ;;  %v2702_v44 = vmul.f32 %v12794_v13, %v12793_v41  ;;  %v5659_v13 = vld [vmem:[%s11708_s0 + $0x28] sm:$0xff] }
 0x3d2   :  { %12787 = vst [vmem:[#allocation66_spill] sm:$0xff] %v9787_v12  ;;  %v9789_v0 = vpop.permute.xlu0 %3585  ;;  %v2832_v22 = vsub.f32 %v2436_v47, %v2700_v63  ;;  %v12795_v63 = vld [vmem:[#allocation155_spill] sm:$0xff] }
 0x3d3   :  { %12788 = vst [vmem:[#allocation24_spill] sm:$0xff] %v9789_v0  ;;  %4037 = vperm.xlu0 %5279, %v2859_v15   ;;  %v12792_v0 = vld [vmem:[#allocation86_spill] sm:$0xff]  ;;  %v2467_v15 = vld [vmem:[%s11713_s5 + $0x218] sm:$0xff]  ;;  %v2834_v41 = vsub.f32 %v2438_v51, %v2702_v44 }
 0x3d4   :  { %v2731_v12 = vmul.f32 %v12792_v0, %v12791_v37  ;;  %v3591_v0 = vmul.f32 %v5658_v14, %v8787_v54  ;;  %v2469_v54 = vld [vmem:[%s11713_s5 + $0x228] sm:$0xff]  ;;  %v3593_v14 = vmul.f32 %v5659_v13, %v8843_v7  ;;  %v12799_v44 = vld [vmem:[#allocation157_spill] sm:$0xff] }
 0x3d5   :  { %v9805_v46 = vpop.permute.xlu1 %3440  ;;  %3892 = vperm.xlu1 %5280, %v2830_v25   ;;  %v2471_v7 = vld [vmem:[%s11713_s5 + $0x238] sm:$0xff] }
 0x3d6   :  { %v3728_v9 = vpop.permute.xlu0 %3727  ;;  %v2863_v25 = vsub.f32 %v2467_v15, %v2731_v12  ;;  %v12798_v12 = vld [vmem:[#allocation243_spill] sm:$0xff] }
 0x3d7   :  { %v4381_v40 = vadd.f32 %v3728_v9, %v3589_v28  ;;  %4047 = vperm.xlu0 %5279, %v2861_v36   ;;  %v12796_v28 = vld [vmem:[#allocation242_spill] sm:$0xff] }
 0x3d8   :  { %v2733_v36 = vmul.f32 %v12796_v28, %v12795_v63 }
 0x3d9   :  { %4513 = vst.msk [vmem:[%s11714_s6 + $0x8] sm:$0xff] %vm155_vm0, %v4381_v40  ;;  %v9825_v47 = vpop.permute.xlu1 %3450  ;;  %3902 = vperm.xlu1 %5280, %v2832_v22   ;;  %v12797_v40 = vld [vmem:[#allocation46_spill] sm:$0xff] }
 0x3da   :  { %v3738_v37 = vpop.permute.xlu0 %3737  ;;  %v2704_v15 = vmul.f32 %v12798_v12, %v12797_v40  ;;  %v2865_v22 = vsub.f32 %v2469_v54, %v2733_v36  ;;  %v12802_v36 = vld [vmem:[#allocation245_spill] sm:$0xff] }
 0x3db   :  { %v4383_v9 = vadd.f32 %v3738_v37, %v3591_v0  ;;  %4057 = vperm.xlu0 %5279, %v2863_v25   ;;  %v2440_v0 = vld [vmem:[%s11713_s5 + $0x140] sm:$0xff]  ;;  %v5660_v12 = vld [vmem:[%s11708_s0 + $0x38] sm:$0xff] }
 0x3dc   :  { %v12800_v25 = vld [vmem:[#allocation90_spill] sm:$0xff]  ;;  %v2836_v40 = vsub.f32 %v2440_v0, %v2704_v15  ;;  %v3595_v13 = vmul.f32 %v5660_v12, %v8899_v60  ;;  %v12803_v15 = vld [vmem:[#allocation159_spill] sm:$0xff] }
 0x3dd   :  { %4515 = vst.msk [vmem:[%s11714_s6 + $0x18] sm:$0xff] %vm155_vm0, %v4383_v9  ;;  %v2735_v51 = vmul.f32 %v12800_v25, %v12799_v44  ;;  %v9845_v63 = vpop.permute.xlu1 %3460  ;;  %3912 = vperm.xlu1 %5280, %v2834_v41   ;;  %v12801_v9 = vld [vmem:[#allocation48_spill] sm:$0xff]  ;;  %v2473_v60 = vld [vmem:[%s11713_s5 + $0x248] sm:$0xff]  ;;  %v2444_v12 = vld [vmem:[%s11713_s5 + $0x160] sm:$0xff] }
 0x3de   :  { %v3748_v28 = vpop.permute.xlu0 %3747  ;;  %v2706_v54 = vmul.f32 %v12802_v36, %v12801_v9  ;;  %v5661_v9 = vld [vmem:[%s11708_s0 + $0x48] sm:$0xff]  ;;  %v12806_v36 = vld [vmem:[#allocation148_spill] sm:$0xff] }
 0x3df   :  { %v4385_v37 = vadd.f32 %v3748_v28, %v3593_v14  ;;  %4067 = vperm.xlu0 %5279, %v2865_v22   ;;  %v2867_v41 = vsub.f32 %v2471_v7, %v2735_v51  ;;  %v2442_v14 = vld [vmem:[%s11713_s5 + $0x150] sm:$0xff]  ;;  %v2737_v22 = vmul.f32 %v8504_v45, %v12803_v15  ;;  %v12805_v51 = vld [vmem:[#allocation246_spill] sm:$0xff]  ;;  %v3597_v45 = vmul.f32 %v5661_v9, %v12806_v36  ;;  %v5662_v9 = vld [vmem:[%s11708_s0 + $0x58] sm:$0xff] }
 0x3e0   :  { %v2838_v28 = vsub.f32 %v2442_v14, %v2706_v54  ;;  %v12807_v54 = vld [vmem:[#allocation78_spill] sm:$0xff]  ;;  %v12812_v36 = vld [vmem:[#allocation247_spill] sm:$0xff] }
 0x3e1   :  { %4517 = vst.msk [vmem:[%s11714_s6 + $0x28] sm:$0xff] %vm155_vm0, %v4385_v37  ;;  %v9865_v0 = vpop.permute.xlu1 %3470  ;;  %3922 = vperm.xlu1 %5280, %v2836_v40   ;;  %v12804_v37 = vld [vmem:[#allocation50_spill] sm:$0xff]  ;;  %v2869_v40 = vsub.f32 %v2473_v60, %v2737_v22  ;;  %v12811_v22 = vld [vmem:[#allocation248_spill] sm:$0xff] }
 0x3e2   :  { %v3758_v44 = vpop.permute.xlu0 %3757  ;;  %v2708_v7 = vmul.f32 %v12805_v51, %v12804_v37 }
 0x3e3   :  { %v4387_v25 = vadd.f32 %v3758_v44, %v3595_v13  ;;  %4077 = vperm.xlu0 %5279, %v2867_v41   ;;  %v12808_v13 = vld [vmem:[#allocation94_spill] sm:$0xff]  ;;  %v2475_v44 = vld [vmem:[%s11713_s5 + $0x258] sm:$0xff] }
 0x3e4   :  { %v2739_v41 = vmul.f32 %v12808_v13, %v12807_v54  ;;  %v2840_v51 = vsub.f32 %v2444_v12, %v2708_v7  ;;  %v3599_v54 = vmul.f32 %v5662_v9, %v12812_v36  ;;  %v12813_v7 = vld [vmem:[#allocation163_spill] sm:$0xff] }
 0x3e5   :  { %4519 = vst.msk [vmem:[%s11714_s6 + $0x38] sm:$0xff] %vm155_vm0, %v4387_v25  ;;  %v9885_v14 = vpop.permute.xlu1 %3480  ;;  %3932 = vperm.xlu1 %5280, %v2838_v28   ;;  %v12810_v25 = vld [vmem:[#allocation52_spill] sm:$0xff]  ;;  %v5663_v36 = vld [vmem:[%s11708_s0 + $0x68] sm:$0xff] }
 0x3e6   :  { %12809 = vst [vmem:[#allocation151_spill] sm:$0xff] %v9885_v14  ;;  %v3768_v15 = vpop.permute.xlu0 %3767  ;;  %v2710_v60 = vmul.f32 %v12811_v22, %v12810_v25  ;;  %v2871_v28 = vsub.f32 %v2475_v44, %v2739_v41  ;;  %v2477_v25 = vld [vmem:[%s11713_s5 + $0x268] sm:$0xff]  ;;  %v12816_v41 = vld [vmem:[#allocation181_spill] sm:$0xff] }
 0x3e7   :  { %v4389_v37 = vadd.f32 %v3768_v15, %v3597_v45  ;;  %4087 = vperm.xlu0 %5279, %v2869_v40   ;;  %v2446_v45 = vld [vmem:[%s11713_s5 + $0x170] sm:$0xff]  ;;  %v12817_v14 = vld [vmem:[#allocation249_spill] sm:$0xff] }
 0x3e8   :  { %v12814_v40 = vld [vmem:[#allocation96_spill] sm:$0xff]  ;;  %v2842_v9 = vsub.f32 %v2446_v45, %v2710_v60  ;;  %v12818_v60 = vld [vmem:[#allocation165_spill] sm:$0xff] }
 0x3e9   :  { %4521 = vst.msk [vmem:[%s11714_s6 + $0x48] sm:$0xff] %vm155_vm0, %v4389_v37  ;;  %v2741_v12 = vmul.f32 %v12814_v40, %v12813_v7  ;;  %v9905_v13 = vpop.permute.xlu1 %3490  ;;  %3942 = vperm.xlu1 %5280, %v2840_v51   ;;  %v12815_v37 = vld [vmem:[#allocation54_spill] sm:$0xff]  ;;  %v3601_v7 = vmul.f32 %v5663_v36, %v12817_v14  ;;  %v2479_v14 = vld [vmem:[%s11713_s5 + $0x278] sm:$0xff]  ;;  %v12822_v36 = vld [vmem:[#allocation251_spill] sm:$0xff] }
 0x3ea   :  { %v3778_v15 = vpop.permute.xlu0 %3777  ;;  %v2712_v44 = vmul.f32 %v12816_v41, %v12815_v37 }
 0x3eb   :  { %v4391_v22 = vadd.f32 %v3778_v15, %v3599_v54  ;;  %4097 = vperm.xlu0 %5279, %v2871_v28   ;;  %v2873_v51 = vsub.f32 %v2477_v25, %v2741_v12  ;;  %v2448_v54 = vld [vmem:[%s11713_s5 + $0x180] sm:$0xff]  ;;  %v5664_v25 = vld [vmem:[%s11708_s0 + $0x78] sm:$0xff] }
 0x3ec   :  { %v12819_v28 = vld [vmem:[#allocation250_spill] sm:$0xff]  ;;  %v2844_v41 = vsub.f32 %v2448_v54, %v2712_v44  ;;  %v12823_v44 = vld [vmem:[#allocation167_spill] sm:$0xff] }
 0x3ed   :  { %4523 = vst.msk [vmem:[%s11714_s6 + $0x58] sm:$0xff] %vm155_vm0, %v4391_v22  ;;  %v2743_v45 = vmul.f32 %v12819_v28, %v12818_v60  ;;  %v9925_v40 = vpop.permute.xlu1 %3500  ;;  %3952 = vperm.xlu1 %5280, %v2842_v9   ;;  %v12821_v22 = vld [vmem:[#allocation56_spill] sm:$0xff]  ;;  %v3603_v60 = vmul.f32 %v5664_v25, %v12822_v36  ;;  %v5665_v36 = vld [vmem:[%s11708_s0 + $0x88] sm:$0xff] }
 0x3ee   :  { %12820 = vst [vmem:[#allocation53_spill] sm:$0xff] %v9925_v40  ;;  %v3788_v15 = vpop.permute.xlu0 %3787  ;;  %v2714_v12 = vmul.f32 %v8605_v20, %v12821_v22  ;;  %v12827_v40 = vld [vmem:[#allocation252_spill] sm:$0xff] }
 0x3ef   :  { %v4393_v37 = vadd.f32 %v3788_v15, %v3601_v7  ;;  %4107 = vperm.xlu0 %5279, %v2873_v51   ;;  %v2875_v9 = vsub.f32 %v2479_v14, %v2743_v45  ;;  %v2450_v7 = vld [vmem:[%s11713_s5 + $0x190] sm:$0xff]  ;;  %v2481_v15 = vld [vmem:[%s11713_s5 + $0x288] sm:$0xff]  ;;  %v12826_v45 = vld [vmem:[#allocation253_spill] sm:$0xff] }
 0x3f0   :  { %v12824_v51 = vld [vmem:[#allocation100_spill] sm:$0xff]  ;;  %v2846_v25 = vsub.f32 %v2450_v7, %v2714_v12  ;;  %v12828_v12 = vld [vmem:[#allocation169_spill] sm:$0xff] }
 0x3f1   :  { %4525 = vst.msk [vmem:[%s11714_s6 + $0x68] sm:$0xff] %vm155_vm0, %v4393_v37  ;;  %v2745_v54 = vmul.f32 %v12824_v51, %v12823_v44  ;;  %v9945_v20 = vpop.permute.xlu1 %3510  ;;  %3962 = vperm.xlu1 %5280, %v2844_v41   ;;  %v12825_v37 = vld [vmem:[#allocation58_spill] sm:$0xff]  ;;  %v3605_v44 = vmul.f32 %v5665_v36, %v12827_v40  ;;  %v2483_v40 = vld [vmem:[%s11713_s5 + $0x298] sm:$0xff]  ;;  %v2454_v36 = vld [vmem:[%s11713_s5 + $0x1b0] sm:$0xff] }
 0x3f2   :  { %v3798_v28 = vpop.permute.xlu0 %3797  ;;  %v2716_v14 = vmul.f32 %v12826_v45, %v12825_v37  ;;  %v12830_v45 = vld [vmem:[#allocation254_spill] sm:$0xff] }
 0x3f3   :  { %v4395_v22 = vadd.f32 %v3798_v28, %v3603_v60  ;;  %4117 = vperm.xlu0 %5279, %v2875_v9   ;;  %v2877_v41 = vsub.f32 %v2481_v15, %v2745_v54  ;;  %v2452_v60 = vld [vmem:[%s11713_s5 + $0x1a0] sm:$0xff]  ;;  %v2747_v9 = vmul.f32 %v8644_v5, %v12828_v12  ;;  %v5666_v15 = vld [vmem:[%s11708_s0 + $0x98] sm:$0xff]  ;;  %v2485_v12 = vld [vmem:[%s11713_s5 + $0x2a8] sm:$0xff] }
 0x3f4   :  { %v2848_v37 = vsub.f32 %v2452_v60, %v2716_v14  ;;  %v3607_v5 = vmul.f32 %v5666_v15, %v12830_v45  ;;  %v12831_v14 = vld [vmem:[#allocation88_spill] sm:$0xff] }
 0x3f5   :  { %4527 = vst.msk [vmem:[%s11714_s6 + $0x78] sm:$0xff] %vm155_vm0, %v4395_v22  ;;  %v9965_v7 = vpop.permute.xlu1 %3520  ;;  %3972 = vperm.xlu1 %5280, %v2846_v25   ;;  %v12829_v22 = vld [vmem:[#allocation60_spill] sm:$0xff]  ;;  %v2879_v25 = vsub.f32 %v2483_v40, %v2747_v9  ;;  %v5667_v40 = vld [vmem:[%s11708_s0 + $0xa8] sm:$0xff] }
 0x3f6   :  { %v3808_v51 = vpop.permute.xlu0 %3807  ;;  %v2718_v54 = vmul.f32 %v8661_v32, %v12829_v22  ;;  %v12834_v15 = vld [vmem:[#allocation256_spill] sm:$0xff] }
 0x3f7   :  { %v4397_v28 = vadd.f32 %v3808_v51, %v3605_v44  ;;  %4127 = vperm.xlu0 %5279, %v2877_v41   ;;  %v12832_v44 = vld [vmem:[#allocation255_spill] sm:$0xff]  ;;  %v3609_v45 = vmul.f32 %v5667_v40, %v12834_v15  ;;  %v5668_v40 = vld [vmem:[%s11708_s0 + $0xb8] sm:$0xff]  ;;  %v12840_v15 = vld [vmem:[#allocation258_spill] sm:$0xff] }
 0x3f8   :  { %v2749_v41 = vmul.f32 %v12832_v44, %v12831_v14  ;;  %v2850_v22 = vsub.f32 %v2454_v36, %v2718_v54  ;;  %v12835_v54 = vld [vmem:[#allocation173_spill] sm:$0xff] }
 0x3f9   :  { %4529 = vst.msk [vmem:[%s11714_s6 + $0x88] sm:$0xff] %vm155_vm0, %v4397_v28  ;;  %v9985_v32 = vpop.permute.xlu1 %3530  ;;  %3982 = vperm.xlu1 %5280, %v2848_v37   ;;  %v12833_v28 = vld [vmem:[#allocation62_spill] sm:$0xff]  ;;  %v2487_v44 = vld [vmem:[%s11713_s5 + $0x2b8] sm:$0xff] }
 0x3fa   :  { %v3818_v60 = vpop.permute.xlu0 %3817  ;;  %v2720_v9 = vmul.f32 %v8689_v39, %v12833_v28  ;;  %v2881_v37 = vsub.f32 %v2485_v12, %v2749_v41  ;;  %v12839_v41 = vld [vmem:[#allocation259_spill] sm:$0xff] }
 0x3fb   :  { %v4399_v51 = vadd.f32 %v3818_v60, %v3607_v5  ;;  %4137 = vperm.xlu0 %5279, %v2879_v25   ;;  %v2456_v5 = vld [vmem:[%s11713_s5 + $0x1c0] sm:$0xff]  ;;  %v12836_v25 = vld [vmem:[#allocation257_spill] sm:$0xff] }
 0x3fc   :  { %v2751_v36 = vmul.f32 %v12836_v25, %v12835_v54  ;;  %v2852_v28 = vsub.f32 %v2456_v5, %v2720_v9  ;;  %v3611_v54 = vmul.f32 %v5668_v40, %v12840_v15  ;;  %v12841_v9 = vld [vmem:[#allocation175_spill] sm:$0xff] }
 0x3fd   :  { %4531 = vst.msk [vmem:[%s11714_s6 + $0x98] sm:$0xff] %vm155_vm0, %v4399_v51  ;;  %v10005_v39 = vpop.permute.xlu1 %3540  ;;  %3992 = vperm.xlu1 %5280, %v2850_v22   ;;  %v12838_v51 = vld [vmem:[#allocation63_spill] sm:$0xff] }
 0x3fe   :  { %12837 = vst [vmem:[#allocation222_spill] sm:$0xff] %v10005_v39  ;;  %v3828_v14 = vpop.permute.xlu0 %3827  ;;  %v2722_v12 = vmul.f32 %v12839_v41, %v12838_v51  ;;  %v2883_v22 = vsub.f32 %v2487_v44, %v2751_v36  ;;  %v2489_v51 = vld [vmem:[%s11713_s5 + $0x2c8] sm:$0xff]  ;;  %v12845_v36 = vld [vmem:[#allocation261_spill] sm:$0xff]  ;;  %v12846_v39 = vld [vmem:[#allocation164_spill] sm:$0xff] }
 0x3ff   :  { %v4401_v60 = vadd.f32 %v3828_v14, %v3609_v45  ;;  %4147 = vperm.xlu0 %5279, %v2881_v37   ;;  %v2458_v45 = vld [vmem:[%s11713_s5 + $0x1d0] sm:$0xff]  ;;  %v5669_v15 = vld [vmem:[%s11708_s0 + $0xc8] sm:$0xff] }
 0x400   :  { %v12842_v37 = vld [vmem:[#allocation260_spill] sm:$0xff]  ;;  %v2854_v40 = vsub.f32 %v2458_v45, %v2722_v12  ;;  %v12847_v12 = vld [vmem:[#allocation177_spill] sm:$0xff] }
 0x401   :  { %4533 = vst.msk [vmem:[%s11714_s6 + $0xa8] sm:$0xff] %vm155_vm0, %v4401_v60  ;;  %v2753_v5 = vmul.f32 %v12842_v37, %v12841_v9  ;;  %v10025_v25 = vpop.permute.xlu1 %3550  ;;  %4002 = vperm.xlu1 %5280, %v2852_v28   ;;  %v12844_v60 = vld [vmem:[#allocation65_spill] sm:$0xff]  ;;  %v3613_v9 = vmul.f32 %v5669_v15, %v12846_v39 }
 0x402   :  { %12843 = vst [vmem:[#allocation26_spill] sm:$0xff] %v10025_v25  ;;  %v3838_v14 = vpop.permute.xlu0 %3837  ;;  %v2724_v44 = vmul.f32 %v12845_v36, %v12844_v60  ;;  %v2491_v39 = vld [vmem:[%s11713_s5 + $0x2d8] sm:$0xff]  ;;  %v12852_v25 = vld [vmem:[#allocation263_spill] sm:$0xff] }
 0x403   :  { %v4403_v41 = vadd.f32 %v3838_v14, %v3611_v54  ;;  %4157 = vperm.xlu0 %5279, %v2883_v22   ;;  %v2885_v28 = vsub.f32 %v2489_v51, %v2753_v5  ;;  %v2460_v54 = vld [vmem:[%s11713_s5 + $0x1e0] sm:$0xff]  ;;  %v12851_v5 = vld [vmem:[#allocation264_spill] sm:$0xff]  ;;  %v5670_v15 = vld [vmem:[%s11708_s0 + $0xd8] sm:$0xff] }
 0x404   :  { %v12848_v22 = vld [vmem:[#allocation166_spill] sm:$0xff]  ;;  %v2856_v36 = vsub.f32 %v2460_v54, %v2724_v44  ;;  %v12853_v44 = vld [vmem:[#allocation179_spill] sm:$0xff] }
 0x405   :  { %4535 = vst.msk [vmem:[%s11714_s6 + $0xb8] sm:$0xff] %vm155_vm0, %v4403_v41  ;;  %v2755_v45 = vmul.f32 %v12848_v22, %v12847_v12  ;;  %v10045_v37 = vpop.permute.xlu1 %3560  ;;  %4012 = vperm.xlu1 %5280, %v2854_v40   ;;  %v12850_v41 = vld [vmem:[#allocation67_spill] sm:$0xff]  ;;  %v3615_v12 = vmul.f32 %v5670_v15, %v12852_v25  ;;  %v2464_v15 = vld [vmem:[%s11713_s5 + $0x200] sm:$0xff] }
 0x406   :  { %12849 = vst [vmem:[#allocation224_spill] sm:$0xff] %v10045_v37  ;;  %v3848_v14 = vpop.permute.xlu0 %3847  ;;  %v2726_v51 = vmul.f32 %v12851_v5, %v12850_v41  ;;  %v2493_v25 = vld [vmem:[%s11713_s5 + $0x2e8] sm:$0xff]  ;;  %v12856_v5 = vld [vmem:[#allocation168_spill] sm:$0xff] }
 0x407   :  { %v4405_v60 = vadd.f32 %v3848_v14, %v3613_v9  ;;  %4167 = vperm.xlu0 %5279, %v2885_v28   ;;  %v2887_v40 = vsub.f32 %v2491_v39, %v2755_v45  ;;  %v2462_v9 = vld [vmem:[%s11713_s5 + $0x1f0] sm:$0xff]  ;;  %v2757_v28 = vmul.f32 %v8784_v1, %v12853_v44  ;;  %v5671_v39 = vld [vmem:[%s11708_s0 + $0xe8] sm:$0xff]  ;;  %v2495_v44 = vld [vmem:[%s11713_s5 + $0x2f8] sm:$0xff] }
 0x408   :  { %v2858_v41 = vsub.f32 %v2462_v9, %v2726_v51  ;;  %v3617_v1 = vmul.f32 %v5671_v39, %v12856_v5  ;;  %v12857_v51 = vld [vmem:[#allocation98_spill] sm:$0xff]  ;;  %v12862_v5 = vld [vmem:[#allocation244_spill] sm:$0xff] }
 0x409   :  { %4537 = vst.msk [vmem:[%s11714_s6 + $0xc8] sm:$0xff] %vm155_vm0, %v4405_v60  ;;  %v10065_v54 = vpop.permute.xlu1 %3570  ;;  %4022 = vperm.xlu1 %5280, %v2856_v36   ;;  %v12855_v60 = vld [vmem:[#allocation69_spill] sm:$0xff]  ;;  %v2889_v36 = vsub.f32 %v2493_v25, %v2757_v28  ;;  %v12861_v28 = vld [vmem:[#allocation267_spill] sm:$0xff]  ;;  %v5672_v39 = vld [vmem:[%s11708_s0] sm:$0xff] }
 0x40a   :  { %12854 = vst [vmem:[#allocation55_spill] sm:$0xff] %v10065_v54  ;;  %v3858_v22 = vpop.permute.xlu0 %3857  ;;  %v2728_v45 = vmul.f32 %v8801_v24, %v12855_v60  ;;  %v12867_v54 = vld [vmem:[#allocation262_spill] sm:$0xff] }
 0x40b   :  { %v4407_v14 = vadd.f32 %v3858_v22, %v3615_v12  ;;  %4177 = vperm.xlu0 %5279, %v2887_v40   ;;  %v12858_v12 = vld [vmem:[#allocation265_spill] sm:$0xff] }
 0x40c   :  { %v2759_v40 = vmul.f32 %v12858_v12, %v12857_v51  ;;  %v2860_v60 = vsub.f32 %v2464_v15, %v2728_v45  ;;  %v3588_v51 = vmul.f32 %v5672_v39, %v12862_v5  ;;  %v12863_v12 = vld [vmem:[#allocation266_spill] sm:$0xff]  ;;  %v12865_v15 = vld [vmem:[#allocation268_spill] sm:$0xff]  ;;  %v2497_v39 = vld [vmem:[%s11713_s5 + $0x308] sm:$0xff] }
 0x40d   :  { %4539 = vst.msk [vmem:[%s11714_s6 + $0xd8] sm:$0xff] %vm155_vm0, %v4407_v14  ;;  %4032 = vperm.xlu1 %5280, %v2858_v41   ;;  %v10085_v24 = vpop.permute.xlu1 %3580  ;;  %v12860_v14 = vld [vmem:[#allocation71_spill] sm:$0xff]  ;;  %v5673_v41 = vld [vmem:[%s11708_s0 + $0xf8] sm:$0xff] }
 0x40e   :  { %12859 = vst [vmem:[#allocation70_spill] sm:$0xff] %v10085_v24  ;;  %v3868_v9 = vpop.permute.xlu0 %3867  ;;  %v2730_v25 = vmul.f32 %v12861_v28, %v12860_v14  ;;  %v3619_v24 = vmul.f32 %v5673_v41, %v12863_v12  ;;  %v2891_v45 = vsub.f32 %v2495_v44, %v2759_v40  ;;  %v5674_v44 = vld [vmem:[%s11708_s0 + $0x10] sm:$0xff] }
 0x40f   :  { %v4409_v22 = vadd.f32 %v3868_v9, %v3617_v1  ;;  %4187 = vperm.xlu0 %5279, %v2889_v36   ;;  %v2466_v1 = vld [vmem:[%s11713_s5 + $0x210] sm:$0xff]  ;;  %v12864_v36 = vld [vmem:[#allocation183_spill] sm:$0xff] }
 0x410   :  { %v2761_v9 = vmul.f32 %v12865_v15, %v12864_v36  ;;  %v2862_v12 = vsub.f32 %v2466_v1, %v2730_v25  ;;  %v3590_v36 = vmul.f32 %v5674_v44, %v12867_v54  ;;  %v12868_v15 = vld [vmem:[#allocation172_spill] sm:$0xff]  ;;  %v2468_v54 = vld [vmem:[%s11713_s5 + $0x220] sm:$0xff]  ;;  %v12870_v25 = vld [vmem:[#allocation269_spill] sm:$0xff] }
 0x411   :  { %4541 = vst.msk [vmem:[%s11714_s6 + $0xe8] sm:$0xff] %vm155_vm0, %v4409_v22  ;;  %4042 = vperm.xlu1 %5280, %v2860_v60   ;;  %v3723_v14 = vpop.permute.xlu1 %3722  ;;  %v12866_v22 = vld [vmem:[#allocation73_spill] sm:$0xff]  ;;  %v5675_v60 = vld [vmem:[%s11708_s0 + $0x108] sm:$0xff]  ;;  %v5676_v44 = vld [vmem:[%s11708_s0 + $0x20] sm:$0xff] }
 0x412   :  { %v3878_v28 = vpop.permute.xlu0 %3877  ;;  %v4380_v5 = vadd.f32 %v3723_v14, %v3588_v51  ;;  %v2732_v40 = vmul.f32 %v8858_v35, %v12866_v22  ;;  %v3621_v37 = vmul.f32 %v5675_v60, %v12868_v15  ;;  %v2893_v35 = vsub.f32 %v2497_v39, %v2761_v9  ;;  %v2499_v14 = vld [vmem:[%s11713_s5 + $0x318] sm:$0xff]  ;;  %v12872_v9 = vld [vmem:[#allocation271_spill] sm:$0xff]  ;;  %v12873_v60 = vld [vmem:[#allocation170_spill] sm:$0xff] }
 0x413   :  { %v4411_v41 = vadd.f32 %v3878_v28, %v3619_v24  ;;  %4197 = vperm.xlu0 %5279, %v2891_v45   ;;  %v12869_v24 = vld [vmem:[#allocation102_spill] sm:$0xff]  ;;  %v3592_v15 = vmul.f32 %v5676_v44, %v12873_v60  ;;  %v5678_v60 = vld [vmem:[%s11708_s0 + $0x30] sm:$0xff] }
 0x414   :  { %4512 = vst.msk [vmem:[%s11714_s6] sm:$0xff] %vm155_vm0, %v4380_v5  ;;  %v2763_v51 = vmul.f32 %v12870_v25, %v12869_v24  ;;  %v2864_v22 = vsub.f32 %v2468_v54, %v2732_v40  ;;  %v12874_v24 = vld [vmem:[#allocation270_spill] sm:$0xff]  ;;  %v2470_v40 = vld [vmem:[%s11713_s5 + $0x230] sm:$0xff] }
 0x415   :  { %4543 = vst.msk [vmem:[%s11714_s6 + $0xf8] sm:$0xff] %vm155_vm0, %v4411_v41  ;;  %4052 = vperm.xlu1 %5280, %v2862_v12   ;;  %v3733_v45 = vpop.permute.xlu1 %3732  ;;  %v12871_v41 = vld [vmem:[#allocation75_spill] sm:$0xff]  ;;  %v5677_v12 = vld [vmem:[%s11708_s0 + $0x118] sm:$0xff] }
 0x416   :  { %v3888_v1 = vpop.permute.xlu0 %3887  ;;  %v4382_v28 = vadd.f32 %v3733_v45, %v3590_v36  ;;  %v2734_v39 = vmul.f32 %v12872_v9, %v12871_v41  ;;  %v3623_v25 = vmul.f32 %v5677_v12, %v12874_v24  ;;  %v12875_v36 = vld [vmem:[#allocation104_spill] sm:$0xff]  ;;  %v12879_v12 = vld [vmem:[#allocation174_spill] sm:$0xff] }
 0x417   :  { %v4413_v5 = vadd.f32 %v3888_v1, %v3621_v37  ;;  %4207 = vperm.xlu0 %5279, %v2893_v35   ;;  %v2895_v37 = vsub.f32 %v2499_v14, %v2763_v51  ;;  %v12876_v35 = vld [vmem:[#allocation176_spill] sm:$0xff]  ;;  %v12878_v51 = vld [vmem:[#allocation273_spill] sm:$0xff]  ;;  %v3594_v24 = vmul.f32 %v5678_v60, %v12879_v12  ;;  %v12883_v60 = vld [vmem:[#allocation178_spill] sm:$0xff] }
 0x418   :  { %4514 = vst.msk [vmem:[%s11714_s6 + $0x10] sm:$0xff] %vm155_vm0, %v4382_v28  ;;  %v2765_v54 = vmul.f32 %v12876_v35, %v12875_v36  ;;  %v2501_v28 = vld [vmem:[%s11713_s5 + $0x328] sm:$0xff]  ;;  %v2866_v44 = vsub.f32 %v2470_v40, %v2734_v39  ;;  %v12880_v36 = vld [vmem:[#allocation272_spill] sm:$0xff]  ;;  %v12884_v12 = vld [vmem:[#allocation274_spill] sm:$0xff] }
 0x419   :  { %4545 = vst.msk [vmem:[%s11714_s6 + $0x108] sm:$0xff] %vm155_vm0, %v4413_v5  ;;  %4062 = vperm.xlu1 %5280, %v2864_v22   ;;  %v3743_v45 = vpop.permute.xlu1 %3742  ;;  %v12877_v5 = vld [vmem:[#allocation77_spill] sm:$0xff]  ;;  %v5679_v22 = vld [vmem:[%s11708_s0 + $0x128] sm:$0xff] }
 0x41a   :  { %v3898_v1 = vpop.permute.xlu0 %3897  ;;  %v4384_v41 = vadd.f32 %v3743_v45, %v3592_v15  ;;  %v2736_v14 = vmul.f32 %v12878_v51, %v12877_v5  ;;  %v3625_v35 = vmul.f32 %v5679_v22, %v12880_v36  ;;  %v2897_v39 = vsub.f32 %v2501_v28, %v2765_v54  ;;  %v2472_v15 = vld [vmem:[%s11713_s5 + $0x240] sm:$0xff]  ;;  %v12886_v36 = vld [vmem:[#allocation275_spill] sm:$0xff] }
 0x41b   :  { %v4415_v9 = vadd.f32 %v3898_v1, %v3623_v25  ;;  %4217 = vperm.xlu0 %5279, %v2895_v37   ;;  %v12881_v25 = vld [vmem:[#allocation106_spill] sm:$0xff]  ;;  %v2503_v1 = vld [vmem:[%s11713_s5 + $0x338] sm:$0xff] }
 0x41c   :  { %4516 = vst.msk [vmem:[%s11714_s6 + $0x20] sm:$0xff] %vm155_vm0, %v4384_v41  ;;  %v2767_v37 = vmul.f32 %v8924_v29, %v12881_v25  ;;  %v2868_v51 = vsub.f32 %v2472_v15, %v2736_v14  ;;  %v5680_v28 = vld [vmem:[%s11708_s0 + $0x40] sm:$0xff]  ;;  %v2474_v14 = vld [vmem:[%s11713_s5 + $0x250] sm:$0xff]  ;;  %v2505_v25 = vld [vmem:[%s11713_s5 + $0x348] sm:$0xff] }
 0x41d   :  { %4547 = vst.msk [vmem:[%s11714_s6 + $0x118] sm:$0xff] %vm155_vm0, %v4415_v9  ;;  %4072 = vperm.xlu1 %5280, %v2866_v44   ;;  %v3753_v40 = vpop.permute.xlu1 %3752  ;;  %v12882_v9 = vld [vmem:[#allocation79_spill] sm:$0xff]  ;;  %v3596_v29 = vmul.f32 %v5680_v28, %v12883_v60  ;;  %v5681_v44 = vld [vmem:[%s11708_s0 + $0x138] sm:$0xff]  ;;  %v12889_v60 = vld [vmem:[#allocation276_spill] sm:$0xff] }
 0x41e   :  { %v3908_v45 = vpop.permute.xlu0 %3907  ;;  %v4386_v41 = vadd.f32 %v3753_v40, %v3594_v24  ;;  %v2738_v54 = vmul.f32 %v8941_v23, %v12882_v9  ;;  %v3627_v22 = vmul.f32 %v5681_v44, %v12884_v12  ;;  %v2899_v23 = vsub.f32 %v2503_v1, %v2767_v37  ;;  %v12885_v24 = vld [vmem:[#allocation108_spill] sm:$0xff]  ;;  %v12891_v12 = vld [vmem:[#allocation277_spill] sm:$0xff] }
 0x41f   :  { %v4417_v5 = vadd.f32 %v3908_v45, %v3625_v35  ;;  %4227 = vperm.xlu0 %5279, %v2897_v39   ;;  %v2769_v35 = vmul.f32 %v12886_v36, %v12885_v24  ;;  %v5682_v1 = vld [vmem:[%s11708_s0 + $0x50] sm:$0xff]  ;;  %v2507_v24 = vld [vmem:[%s11713_s5 + $0x358] sm:$0xff] }
 0x420   :  { %4518 = vst.msk [vmem:[%s11714_s6 + $0x30] sm:$0xff] %vm155_vm0, %v4386_v41  ;;  %v2870_v41 = vsub.f32 %v2474_v14, %v2738_v54  ;;  %v12888_v9 = vld [vmem:[#allocation180_spill] sm:$0xff]  ;;  %v2476_v54 = vld [vmem:[%s11713_s5 + $0x260] sm:$0xff] }
 0x421   :  { %4549 = vst.msk [vmem:[%s11714_s6 + $0x128] sm:$0xff] %vm155_vm0, %v4417_v5  ;;  %4082 = vperm.xlu1 %5280, %v2868_v51   ;;  %v3763_v39 = vpop.permute.xlu1 %3762  ;;  %v12887_v5 = vld [vmem:[#allocation81_spill] sm:$0xff]  ;;  %v3598_v28 = vmul.f32 %v5682_v1, %v12888_v9  ;;  %v5683_v51 = vld [vmem:[%s11708_s0 + $0x148] sm:$0xff]  ;;  %v12895_v9 = vld [vmem:[#allocation278_spill] sm:$0xff] }
 0x422   :  { %v3918_v15 = vpop.permute.xlu0 %3917  ;;  %v4388_v40 = vadd.f32 %v3763_v39, %v3596_v29  ;;  %v2740_v37 = vmul.f32 %v8969_v21, %v12887_v5  ;;  %v3629_v44 = vmul.f32 %v5683_v51, %v12889_v60  ;;  %v2901_v21 = vsub.f32 %v2505_v25, %v2769_v35  ;;  %v12890_v29 = vld [vmem:[#allocation110_spill] sm:$0xff]  ;;  %v12893_v35 = vld [vmem:[#allocation279_spill] sm:$0xff]  ;;  %v12896_v60 = vld [vmem:[#allocation112_spill] sm:$0xff] }
 0x423   :  { %v4419_v45 = vadd.f32 %v3918_v15, %v3627_v22  ;;  %4237 = vperm.xlu0 %5279, %v2899_v23   ;;  %v2771_v22 = vmul.f32 %v12891_v12, %v12890_v29  ;;  %v12894_v5 = vld [vmem:[#allocation182_spill] sm:$0xff]  ;;  %v2509_v12 = vld [vmem:[%s11713_s5 + $0x368] sm:$0xff] }
 0x424   :  { %4520 = vst.msk [vmem:[%s11714_s6 + $0x40] sm:$0xff] %vm155_vm0, %v4388_v40  ;;  %v2872_v15 = vsub.f32 %v2476_v54, %v2740_v37  ;;  %v12892_v40 = vld [vmem:[#allocation83_spill] sm:$0xff] }
 0x425   :  { %4551 = vst.msk [vmem:[%s11714_s6 + $0x138] sm:$0xff] %vm155_vm0, %v4419_v45  ;;  %4092 = vperm.xlu1 %5280, %v2870_v41   ;;  %v3773_v23 = vpop.permute.xlu1 %3772  ;;  %v2742_v25 = vmul.f32 %v12893_v35, %v12892_v40  ;;  %v5684_v45 = vld [vmem:[%s11708_s0 + $0x60] sm:$0xff]  ;;  %v5685_v41 = vld [vmem:[%s11708_s0 + $0x158] sm:$0xff]  ;;  %v2903_v37 = vsub.f32 %v2507_v24, %v2771_v22  ;;  %v5686_v24 = vld [vmem:[%s11708_s0 + $0x70] sm:$0xff] }
 0x426   :  { %v3928_v14 = vpop.permute.xlu0 %3927  ;;  %v4390_v36 = vadd.f32 %v3773_v23, %v3598_v28  ;;  %v3600_v1 = vmul.f32 %v5684_v45, %v12894_v5  ;;  %v3631_v51 = vmul.f32 %v5685_v41, %v12895_v9  ;;  %v2478_v28 = vld [vmem:[%s11713_s5 + $0x270] sm:$0xff]  ;;  %v12900_v45 = vld [vmem:[#allocation281_spill] sm:$0xff] }
 0x427   :  { %v4421_v39 = vadd.f32 %v3928_v14, %v3629_v44  ;;  %4247 = vperm.xlu0 %5279, %v2901_v21   ;;  %v12897_v44 = vld [vmem:[#allocation280_spill] sm:$0xff] }
 0x428   :  { %4522 = vst.msk [vmem:[%s11714_s6 + $0x50] sm:$0xff] %vm155_vm0, %v4390_v36  ;;  %v2773_v21 = vmul.f32 %v12897_v44, %v12896_v60  ;;  %v2874_v36 = vsub.f32 %v2478_v28, %v2742_v25  ;;  %v12899_v40 = vld [vmem:[#allocation184_spill] sm:$0xff]  ;;  %v2480_v25 = vld [vmem:[%s11713_s5 + $0x280] sm:$0xff] }
 0x429   :  { %4553 = vst.msk [vmem:[%s11714_s6 + $0x148] sm:$0xff] %vm155_vm0, %v4421_v39  ;;  %4102 = vperm.xlu1 %5280, %v2872_v15   ;;  %v3783_v54 = vpop.permute.xlu1 %3782  ;;  %v12898_v39 = vld [vmem:[#allocation85_spill] sm:$0xff]  ;;  %v3602_v35 = vmul.f32 %v5686_v24, %v12899_v40  ;;  %v5687_v15 = vld [vmem:[%s11708_s0 + $0x168] sm:$0xff]  ;;  %v2482_v24 = vld [vmem:[%s11713_s5 + $0x290] sm:$0xff] }
 0x42a   :  { %v3938_v29 = vpop.permute.xlu0 %3937  ;;  %v4392_v23 = vadd.f32 %v3783_v54, %v3600_v1  ;;  %v2744_v22 = vmul.f32 %v9025_v61, %v12898_v39  ;;  %v3633_v5 = vmul.f32 %v5687_v15, %v12900_v45  ;;  %v2905_v61 = vsub.f32 %v2509_v12, %v2773_v21  ;;  %v12901_v1 = vld [vmem:[#allocation114_spill] sm:$0xff]  ;;  %v12902_v54 = vld [vmem:[#allocation87_spill] sm:$0xff] }
 0x42b   :  { %v4423_v14 = vadd.f32 %v3938_v29, %v3631_v51  ;;  %4257 = vperm.xlu0 %5279, %v2903_v37   ;;  %v2775_v41 = vmul.f32 %v9039_v58, %v12901_v1  ;;  %v2511_v37 = vld [vmem:[%s11713_s5 + $0x378] sm:$0xff]  ;;  %v12903_v21 = vld [vmem:[#allocation186_spill] sm:$0xff] }
 0x42c   :  { %4524 = vst.msk [vmem:[%s11714_s6 + $0x60] sm:$0xff] %vm155_vm0, %v4392_v23  ;;  %v2876_v44 = vsub.f32 %v2480_v25, %v2744_v22  ;;  %v2746_v29 = vmul.f32 %v12903_v21, %v12902_v54  ;;  %v5688_v12 = vld [vmem:[%s11708_s0 + $0x80] sm:$0xff] }
 0x42d   :  { %4555 = vst.msk [vmem:[%s11714_s6 + $0x158] sm:$0xff] %vm155_vm0, %v4423_v14  ;;  %4112 = vperm.xlu1 %5280, %v2874_v36   ;;  %v3793_v9 = vpop.permute.xlu1 %3792  ;;  %v12904_v23 = vld [vmem:[#allocation282_spill] sm:$0xff]  ;;  %v5689_v14 = vld [vmem:[%s11708_s0 + $0x178] sm:$0xff]  ;;  %v12905_v36 = vld [vmem:[#allocation283_spill] sm:$0xff]  ;;  %v2907_v22 = vsub.f32 %v2511_v37, %v2775_v41 }
 0x42e   :  { %v3948_v51 = vpop.permute.xlu0 %3947  ;;  %v4394_v28 = vadd.f32 %v3793_v9, %v3602_v35  ;;  %v3604_v58 = vmul.f32 %v5688_v12, %v12904_v23  ;;  %v3635_v39 = vmul.f32 %v5689_v14, %v12905_v36  ;;  %v12906_v40 = vld [vmem:[#allocation2_spill] sm:$0xff]  ;;  %v12907_v35 = vld [vmem:[#allocation284_spill] sm:$0xff]  ;;  %v2878_v9 = vsub.f32 %v2482_v24, %v2746_v29  ;;  %v12911_v12 = vld [vmem:[#allocation3_spill] sm:$0xff] }
 0x42f   :  { %v4425_v60 = vadd.f32 %v3948_v51, %v3633_v5  ;;  %4267 = vperm.xlu0 %5279, %v2905_v61   ;;  %v2777_v15 = vmul.f32 %v12907_v35, %v12906_v40  ;;  %v2513_v61 = vld [vmem:[%s11713_s5 + $0x388] sm:$0xff]  ;;  %v12908_v51 = vld [vmem:[#allocation89_spill] sm:$0xff]  ;;  %v5690_v37 = vld [vmem:[%s11708_s0 + $0x90] sm:$0xff]  ;;  %v2779_v23 = vmul.f32 %v9092_v62, %v12911_v12 }
 0x430   :  { %4526 = vst.msk [vmem:[%s11714_s6 + $0x70] sm:$0xff] %vm155_vm0, %v4394_v28  ;;  %v2748_v41 = vmul.f32 %v9078_v31, %v12908_v51  ;;  %v12909_v28 = vld [vmem:[#allocation285_spill] sm:$0xff]  ;;  %v12910_v54 = vld [vmem:[#allocation286_spill] sm:$0xff]  ;;  %v12912_v40 = vld [vmem:[#allocation91_spill] sm:$0xff] }
 0x431   :  { %4557 = vst.msk [vmem:[%s11714_s6 + $0x168] sm:$0xff] %vm155_vm0, %v4425_v60  ;;  %4122 = vperm.xlu1 %5280, %v2876_v44   ;;  %v3803_v45 = vpop.permute.xlu1 %3802  ;;  %v3606_v60 = vmul.f32 %v5690_v37, %v12909_v28  ;;  %v5691_v44 = vld [vmem:[%s11708_s0 + $0x188] sm:$0xff]  ;;  %v2909_v31 = vsub.f32 %v2513_v61, %v2777_v15  ;;  %v2484_v29 = vld [vmem:[%s11713_s5 + $0x2a0] sm:$0xff]  ;;  %v2515_v36 = vld [vmem:[%s11713_s5 + $0x398] sm:$0xff]  ;;  %v2750_v35 = vmul.f32 %v9102_v8, %v12912_v40 }
 0x432   :  { %v3958_v5 = vpop.permute.xlu0 %3957  ;;  %v4396_v25 = vadd.f32 %v3803_v45, %v3604_v58  ;;  %v3637_v21 = vmul.f32 %v5691_v44, %v12910_v54  ;;  %v2880_v24 = vsub.f32 %v2484_v29, %v2748_v41  ;;  %v5692_v15 = vld [vmem:[%s11708_s0 + $0xa0] sm:$0xff]  ;;  %v5693_v45 = vld [vmem:[%s11708_s0 + $0x198] sm:$0xff]  ;;  %v2911_v8 = vsub.f32 %v2515_v36, %v2779_v23  ;;  %v5694_v44 = vld [vmem:[%s11708_s0 + $0xb0] sm:$0xff] }
 0x433   :  { %v4427_v1 = vadd.f32 %v3958_v5, %v3635_v39  ;;  %4277 = vperm.xlu0 %5279, %v2907_v22   ;;  %v3608_v62 = vmul.f32 %v5692_v15, %v9097_v34  ;;  %v3639_v5 = vmul.f32 %v5693_v45, %v9100_v11  ;;  %v2486_v34 = vld [vmem:[%s11713_s5 + $0x2b0] sm:$0xff]  ;;  %v12913_v61 = vld [vmem:[#allocation117_spill] sm:$0xff]  ;;  %v12915_v54 = vld [vmem:[#allocation131_spill] sm:$0xff] }
 0x434   :  { %4528 = vst.msk [vmem:[%s11714_s6 + $0x80] sm:$0xff] %vm155_vm0, %v4396_v25  ;;  %v2781_v25 = vmul.f32 %v9115_v53, %v12913_v61  ;;  %v2882_v37 = vsub.f32 %v2486_v34, %v2750_v35  ;;  %v12914_v28 = vld [vmem:[#allocation93_spill] sm:$0xff]  ;;  %v3610_v53 = vmul.f32 %v5694_v44, %v12915_v54  ;;  %v2488_v12 = vld [vmem:[%s11713_s5 + $0x2c0] sm:$0xff]  ;;  %v12917_v23 = vld [vmem:[#allocation119_spill] sm:$0xff] }
 0x435   :  { %4559 = vst.msk [vmem:[%s11714_s6 + $0x178] sm:$0xff] %vm155_vm0, %v4427_v1  ;;  %4132 = vperm.xlu1 %5280, %v2878_v9   ;;  %v3813_v58 = vpop.permute.xlu1 %3812  ;;  %v2517_v9 = vld [vmem:[%s11713_s5 + $0x3a8] sm:$0xff]  ;;  %v12919_v40 = vld [vmem:[#allocation217_spill] sm:$0xff]  ;;  %v5696_v61 = vld [vmem:[%s11708_s0 + $0xc0] sm:$0xff] }
 0x436   :  { %v3968_v14 = vpop.permute.xlu0 %3967  ;;  %v4398_v39 = vadd.f32 %v3813_v58, %v3606_v60  ;;  %v2752_v60 = vmul.f32 %v9131_v38, %v12914_v28  ;;  %v2913_v38 = vsub.f32 %v2517_v9, %v2781_v25  ;;  %v2783_v58 = vmul.f32 %v9136_v26, %v12917_v23  ;;  %v12920_v45 = vld [vmem:[#allocation223_spill] sm:$0xff]  ;;  %v12924_v28 = vld [vmem:[#allocation133_spill] sm:$0xff]  ;;  %v12926_v23 = vld [vmem:[#allocation136_spill] sm:$0xff] }
 0x437   :  { %v4429_v22 = vadd.f32 %v3968_v14, %v3637_v21  ;;  %4287 = vperm.xlu0 %5279, %v2909_v31   ;;  %v5695_v21 = vld [vmem:[%s11708_s0 + $0x1a8] sm:$0xff]  ;;  %v12918_v14 = vld [vmem:[#allocation216_spill] sm:$0xff]  ;;  %v10402_v35 = vmul.f32 0.020408163, %v12919_v40  ;;  %v3612_v25 = vmul.f32 %v5696_v61, %v9141_v55  ;;  %v12928_v40 = vld [vmem:[#allocation289_spill] sm:$0xff] }
 0x438   :  { %4530 = vst.msk [vmem:[%s11714_s6 + $0x90] sm:$0xff] %vm155_vm0, %v4398_v39  ;;  %v12916_v31 = vld [vmem:[#allocation287_spill] sm:$0xff]  ;;  %v10396_v36 = vmul.f32 0.020408163, %v12918_v14  ;;  %v2490_v55 = vld [vmem:[%s11713_s5 + $0x2d0] sm:$0xff] }
 0x439   :  { %4561 = vst.msk [vmem:[%s11714_s6 + $0x188] sm:$0xff] %vm155_vm0, %v4429_v22  ;;  %4142 = vperm.xlu1 %5280, %v2880_v24   ;;  %v3823_v11 = vpop.permute.xlu1 %3822  ;;  %v3641_v29 = vmul.f32 %v5695_v21, %v12916_v31  ;;  %v2519_v24 = vld [vmem:[%s11713_s5 + $0x3b8] sm:$0xff]  ;;  %v12921_v26 = vld [vmem:[#allocation95_spill] sm:$0xff]  ;;  %v4717_v21 = vmul.f32 %v10402_v35, %v10402_v35 }
 0x43a   :  { %v3978_v1 = vpop.permute.xlu0 %3977  ;;  %v4400_v51 = vadd.f32 %v3823_v11, %v3608_v62  ;;  %v2754_v34 = vmul.f32 %v9151_v16, %v12921_v26  ;;  %v5697_v11 = vld [vmem:[%s11708_s0 + $0x1b8] sm:$0xff]  ;;  %v2915_v16 = vsub.f32 %v2519_v24, %v2783_v58  ;;  %v12925_v31 = vld [vmem:[#allocation135_spill] sm:$0xff]  ;;  %v4713_v58 = vmul.f32 0.020408163, %v12926_v23  ;;  %v5698_v24 = vld [vmem:[%s11708_s0 + $0xd0] sm:$0xff] }
 0x43b   :  { %v4431_v41 = vadd.f32 %v3978_v1, %v3639_v5  ;;  %4297 = vperm.xlu0 %5279, %v2911_v8   ;;  %v4710_v5 = vmul.f32 0.020408163, %v12920_v45  ;;  %v2884_v8 = vsub.f32 %v2488_v12, %v2752_v60  ;;  %v12922_v1 = vld [vmem:[#allocation288_spill] sm:$0xff]  ;;  %v10431_v60 = vmul.f32 0.020408163, %v12924_v28  ;;  %v12929_v45 = vld [vmem:[#allocation290_spill] sm:$0xff] }
 0x43c   :  { %4532 = vst.msk [vmem:[%s11714_s6 + $0xa0] sm:$0xff] %vm155_vm0, %v4400_v51  ;;  %v3643_v9 = vmul.f32 %v5697_v11, %v12922_v1  ;;  %v12923_v51 = vld [vmem:[#allocation121_spill] sm:$0xff]  ;;  %v2886_v14 = vsub.f32 %v2490_v55, %v2754_v34  ;;  %v12930_v26 = vld [vmem:[#allocation123_spill] sm:$0xff] }
 0x43d   :  { %4563 = vst.msk [vmem:[%s11714_s6 + $0x198] sm:$0xff] %vm155_vm0, %v4431_v41  ;;  %4152 = vperm.xlu1 %5280, %v2882_v37   ;;  %v3833_v39 = vpop.permute.xlu1 %3832  ;;  %v2785_v41 = vmul.f32 %v9158_v52, %v12923_v51  ;;  %v4716_v37 = vmul.f32 %v10396_v36, %v10396_v36  ;;  %v2787_v34 = vmul.f32 %v9180_v3, %v12930_v26 }
 0x43e   :  { %v3988_v22 = vpop.permute.xlu0 %3987  ;;  %v4402_v15 = vadd.f32 %v3833_v39, %v3610_v53  ;;  %v2521_v53 = vld [vmem:[%s11713_s5 + $0x3c8] sm:$0xff]  ;;  %v12927_v39 = vld [vmem:[#allocation97_spill] sm:$0xff]  ;;  %v4719_v61 = vmul.f32 %v10431_v60, %v10431_v60 }
 0x43f   :  { %v4433_v62 = vadd.f32 %v3988_v22, %v3641_v29  ;;  %4307 = vperm.xlu0 %5279, %v2913_v38   ;;  %v4711_v29 = vmul.f32 0.020408163, %v12925_v31  ;;  %v4722_v12 = vsub.f32 %v4710_v5, %v4716_v37  ;;  %v2756_v22 = vmul.f32 %v9173_v30, %v12927_v39  ;;  %v2492_v5 = vld [vmem:[%s11713_s5 + $0x2e0] sm:$0xff]  ;;  %v12932_v37 = vld [vmem:[#allocation99_spill] sm:$0xff] }
 0x440   :  { %4534 = vst.msk [vmem:[%s11714_s6 + $0xb0] sm:$0xff] %vm155_vm0, %v4402_v15  ;;  %v3614_v15 = vmul.f32 %v5698_v24, %v12928_v40  ;;  %v2917_v30 = vsub.f32 %v2521_v53, %v2785_v41  ;;  %v2758_v3 = vmul.f32 %v9195_v27, %v12932_v37  ;;  %v2525_v24 = vld [vmem:[%s11713_s5 + $0x3e8] sm:$0xff] }
 0x441   :  { %4565 = vst.msk [vmem:[%s11714_s6 + $0x1a8] sm:$0xff] %vm155_vm0, %v4433_v62  ;;  %4162 = vperm.xlu1 %5280, %v2884_v8   ;;  %v3843_v44 = vpop.permute.xlu1 %3842  ;;  %v5699_v62 = vld [vmem:[%s11708_s0 + $0x1c8] sm:$0xff]  ;;  %v4723_v55 = vsub.f32 %v4711_v29, %v4717_v21  ;;  %v4728_v28 = vmax.f32 %v4722_v12, 0.0  ;;  %v2888_v31 = vsub.f32 %v2492_v5, %v2756_v22  ;;  %v5701_v21 = vld [vmem:[%s11708_s0 + $0x1d8] sm:$0xff] }
 0x442   :  { %v3998_v54 = vpop.permute.xlu0 %3997  ;;  %v4404_v38 = vadd.f32 %v3843_v44, %v3612_v25  ;;  %v3645_v8 = vmul.f32 %v5699_v62, %v12929_v45  ;;  %v12931_v25 = vld [vmem:[#allocation134_spill] sm:$0xff]  ;;  %v4725_v44 = vsub.f32 %v4713_v58, %v4719_v61  ;;  %v12934_v29 = vld [vmem:[#allocation291_spill] sm:$0xff]  ;;  %v12935_v12 = vld [vmem:[#allocation125_spill] sm:$0xff] }
 0x443   :  { %v4435_v52 = vadd.f32 %v3998_v54, %v3643_v9  ;;  %4317 = vperm.xlu0 %5279, %v2915_v16   ;;  %v10466_v11 = vmul.f32 0.020408163, %v12931_v25  ;;  %v2523_v16 = vld [vmem:[%s11713_s5 + $0x3d8] sm:$0xff]  ;;  %v3647_v23 = vmul.f32 %v5701_v21, %v12934_v29  ;;  %v2789_v58 = vmul.f32 %v9202_v17, %v12935_v12  ;;  %v2496_v61 = vld [vmem:[%s11713_s5 + $0x300] sm:$0xff]  ;;  %v5702_v25 = vld [vmem:[%s11708_s0 + $0xf0] sm:$0xff] }
 0x444   :  { %4536 = vst.msk [vmem:[%s11714_s6 + $0xc0] sm:$0xff] %vm155_vm0, %v4404_v38  ;;  %v12933_v54 = vld [vmem:[#allocation137_spill] sm:$0xff]  ;;  %v5700_v38 = vld [vmem:[%s11708_s0 + $0xe0] sm:$0xff]  ;;  %v2919_v27 = vsub.f32 %v2523_v16, %v2787_v34  ;;  %v4729_v40 = vmax.f32 %v4723_v55, 0.0  ;;  %v4734_v5 = vadd.f32 1e-05, %v4728_v28 }
 0x445   :  { %4567 = vst.msk [vmem:[%s11714_s6 + $0x1b8] sm:$0xff] %vm155_vm0, %v4435_v52  ;;  %4172 = vperm.xlu1 %5280, %v2886_v14   ;;  %v3853_v1 = vpop.permute.xlu1 %3852  ;;  %v4715_v53 = vmul.f32 0.020408163, %v12933_v54  ;;  %v3616_v52 = vmul.f32 %v5700_v38, %v9185_v56  ;;  %v2494_v56 = vld [vmem:[%s11713_s5 + $0x2f0] sm:$0xff]  ;;  %v4721_v14 = vmul.f32 %v10466_v11, %v10466_v11  ;;  %v12936_v45 = vld [vmem:[#allocation101_spill] sm:$0xff]  ;;  %v4731_v26 = vmax.f32 %v4725_v44, 0.0 }
 0x446   :  { %v4008_v9 = vpop.permute.xlu0 %4007  ;;  %v4406_v51 = vadd.f32 %v3853_v1, %v3614_v15  ;;  %v2890_v34 = vsub.f32 %v2494_v56, %v2758_v3  ;;  %v12938_v1 = vld [vmem:[#allocation292_spill] sm:$0xff]  ;;  %v5703_v16 = vld [vmem:[%s11708_s0 + $0x1e8] sm:$0xff]  ;;  %v12939_v55 = vld [vmem:[#allocation293_spill] sm:$0xff]  ;;  %5545 = vrsqrt.f32 %v4734_v5 }
 0x447   :  { %v4437_v41 = vadd.f32 %v4008_v9, %v3645_v8  ;;  %4327 = vperm.xlu0 %5279, %v2917_v30   ;;  %v12937_v8 = vld [vmem:[#allocation294_spill] sm:$0xff]  ;;  %v4727_v17 = vsub.f32 %v4715_v53, %v4721_v14  ;;  %v3618_v9 = vmul.f32 %v5702_v25, %v12938_v1  ;;  %v12940_v37 = vld [vmem:[#allocation127_spill] sm:$0xff]  ;;  %v2527_v54 = vld [vmem:[%s11713_s5 + $0x3f8] sm:$0xff]  ;;  %v4735_v53 = vadd.f32 1e-05, %v4729_v40 }
 0x448   :  { %4538 = vst.msk [vmem:[%s11714_s6 + $0xd0] sm:$0xff] %vm155_vm0, %v4406_v51  ;;  %v2760_v30 = vmul.f32 %v12937_v8, %v12936_v45  ;;  %v3649_v51 = vmul.f32 %v5703_v16, %v12939_v55  ;;  %v2791_v3 = vmul.f32 %v9224_v6, %v12940_v37  ;;  %v4737_v21 = vadd.f32 1e-05, %v4731_v26  ;;  %v5704_v6 = vld [vmem:[%s11708_s0 + $0x100] sm:$0xff]  ;;  %v12943_v12 = vld [vmem:[#allocation295_spill] sm:$0xff]  ;;  %v5705_v14 = vld [vmem:[%s11708_s0 + $0x1f8] sm:$0xff] }
 0x449   :  { %4569 = vst.msk [vmem:[%s11714_s6 + $0x1c8] sm:$0xff] %vm155_vm0, %v4437_v41  ;;  %4182 = vperm.xlu1 %5280, %v2888_v31   ;;  %v3863_v39 = vpop.permute.xlu1 %3862  ;;  %v2921_v41 = vsub.f32 %v2525_v24, %v2789_v58  ;;  %v4733_v29 = vmax.f32 %v4727_v17, 0.0  ;;  %v3620_v58 = vmul.f32 %v5704_v6, %v12943_v12  ;;  %v2498_v40 = vld [vmem:[%s11713_s5 + $0x310] sm:$0xff]  ;;  %v2529_v5 = vld [vmem:[%s11713_s5 + $0x408] sm:$0xff]  ;;  %5547 = vrsqrt.f32 %v4735_v53  ;;  %v12952_v53 = vld [vmem:[#allocation138_spill] sm:$0xff] }
 0x44a   :  { %v4018_v22 = vpop.permute.xlu0 %4017  ;;  %v4408_v15 = vadd.f32 %v3863_v39, %v3616_v52  ;;  %v2892_v52 = vsub.f32 %v2496_v61, %v2760_v30  ;;  %v12944_v39 = vld [vmem:[#allocation296_spill] sm:$0xff]  ;;  %v2923_v24 = vsub.f32 %v2527_v54, %v2791_v3  ;;  %5549 = vrsqrt.f32 %v4737_v21  ;;  %v12948_v16 = vld [vmem:[#allocation299_spill] sm:$0xff]  ;;  %v2500_v3 = vld [vmem:[%s11713_s5 + $0x320] sm:$0xff] }
 0x44b   :  { %v4439_v62 = vadd.f32 %v4018_v22, %v3647_v23  ;;  %4337 = vperm.xlu0 %5279, %v2919_v27   ;;  %v12941_v23 = vld [vmem:[#allocation103_spill] sm:$0xff]  ;;  %v12942_v27 = vld [vmem:[#allocation297_spill] sm:$0xff]  ;;  %v3651_v22 = vmul.f32 %v5705_v14, %v12944_v39  ;;  %v12947_v25 = vld [vmem:[#allocation188_spill] sm:$0xff] }
 0x44c   :  { %4540 = vst.msk [vmem:[%s11714_s6 + $0xe0] sm:$0xff] %vm155_vm0, %v4408_v15  ;;  %v2762_v56 = vmul.f32 %v12942_v27, %v12941_v23  ;;  %v12945_v15 = vld [vmem:[#allocation129_spill] sm:$0xff]  ;;  %v2764_v1 = vmul.f32 %v9261_v10, %v12947_v25  ;;  %v12954_v6 = vld [vmem:[#allocation235_spill] sm:$0xff]  ;;  %v12956_v39 = vld [vmem:[#allocation302_spill] sm:$0xff] }
 0x44d   :  { %4571 = vst.msk [vmem:[%s11714_s6 + $0x1d8] sm:$0xff] %vm155_vm0, %v4439_v62  ;;  %4192 = vperm.xlu1 %5280, %v2890_v34   ;;  %v3873_v28 = vpop.permute.xlu1 %3872  ;;  %v12946_v62 = vld [vmem:[#allocation298_spill] sm:$0xff]  ;;  %v4739_v34 = vadd.f32 1e-05, %v4733_v29  ;;  %v2531_v21 = vld [vmem:[%s11713_s5 + $0x418] sm:$0xff]  ;;  %v12953_v29 = vld [vmem:[#allocation231_spill] sm:$0xff] }
 0x44e   :  { %v4028_v44 = vpop.permute.xlu0 %4027  ;;  %v4410_v31 = vadd.f32 %v3873_v28, %v3618_v9  ;;  %v2793_v45 = vmul.f32 %v12946_v62, %v12945_v15  ;;  %v2894_v61 = vsub.f32 %v2498_v40, %v2762_v56  ;;  %v5706_v9 = vld [vmem:[%s11708_s0 + $0x110] sm:$0xff]  ;;  %v12950_v28 = vld [vmem:[#allocation107_spill] sm:$0xff]  ;;  %v10582_v23 = vmul.f32 0.020408163, %v12953_v29  ;;  %v12955_v14 = vld [vmem:[#allocation105_spill] sm:$0xff] }
 0x44f   :  { %v4441_v38 = vadd.f32 %v4028_v44, %v3649_v51  ;;  %4347 = vperm.xlu0 %5279, %v2921_v41   ;;  %v3622_v55 = vmul.f32 %v5706_v9, %v12948_v16  ;;  %v5707_v51 = vld [vmem:[%s11708_s0 + $0x208] sm:$0xff]  ;;  %v12949_v41 = vld [vmem:[#allocation300_spill] sm:$0xff]  ;;  %v12951_v44 = vld [vmem:[#allocation301_spill] sm:$0xff]  ;;  %5551 = vrsqrt.f32 %v4739_v34  ;;  %v4920_v12 = vmul.f32 0.020408163, %v12954_v6 }
 0x450   :  { %4542 = vst.msk [vmem:[%s11714_s6 + $0xf0] sm:$0xff] %vm155_vm0, %v4410_v31  ;;  %v3653_v37 = vmul.f32 %v5707_v51, %v12949_v41  ;;  %v2925_v10 = vsub.f32 %v2529_v5, %v2793_v45  ;;  %v2795_v54 = vmul.f32 %v12951_v44, %v12950_v28  ;;  %v10576_v31 = vmul.f32 0.020408163, %v12952_v53  ;;  %v12957_v40 = vld [vmem:[#allocation8_spill] sm:$0xff]  ;;  %v5709_v62 = vld [vmem:[%s11708_s0 + $0x218] sm:$0xff]  ;;  %v4746_v25 = vld [vmem:[%s11712_s4 + $0x420] sm:$0xff] }
 0x451   :  { %4573 = vst.msk [vmem:[%s11714_s6 + $0x1e8] sm:$0xff] %vm155_vm0, %v4441_v38  ;;  %4202 = vperm.xlu1 %5280, %v2892_v52   ;;  %v3883_v8 = vpop.permute.xlu1 %3882  ;;  %v12958_v45 = vld [vmem:[#allocation196_spill] sm:$0xff]  ;;  %v12959_v9 = vld [vmem:[#allocation237_spill] sm:$0xff]  ;;  %v2504_v29 = vld [vmem:[%s11713_s5 + $0x340] sm:$0xff] }
 0x452   :  { %v4038_v30 = vpop.permute.xlu0 %4037  ;;  %v4412_v26 = vadd.f32 %v3883_v8, %v3620_v58  ;;  %v2896_v58 = vsub.f32 %v2500_v3, %v2764_v1  ;;  %v3655_v8 = vmul.f32 %v5709_v62, %v12958_v45  ;;  %v2502_v5 = vld [vmem:[%s11713_s5 + $0x330] sm:$0xff]  ;;  %v4928_v1 = vmul.f32 %v10582_v23, %v10582_v23 }
 0x453   :  { %v4443_v17 = vadd.f32 %v4038_v30, %v3651_v22  ;;  %4357 = vperm.xlu0 %5279, %v2923_v24   ;;  %v2766_v22 = vmul.f32 %v12956_v39, %v12955_v14  ;;  %v5708_v24 = vld [vmem:[%s11708_s0 + $0x120] sm:$0xff]  ;;  %v2927_v30 = vsub.f32 %v2531_v21, %v2795_v54  ;;  %v4922_v16 = vmul.f32 0.020408163, %v12959_v9  ;;  %v5710_v44 = vld [vmem:[%s11708_s0 + $0x130] sm:$0xff]  ;;  %v12961_v54 = vld [vmem:[#allocation7_spill] sm:$0xff] }
 0x454   :  { %4544 = vst.msk [vmem:[%s11714_s6 + $0x100] sm:$0xff] %vm155_vm0, %v4412_v26  ;;  %v3624_v15 = vmul.f32 %v5708_v24, %v12957_v40  ;;  %v5546_v26 = vpop.eup %5545  ;;  %v3626_v53 = vmul.f32 %v5710_v44, %v12961_v54  ;;  %v12964_v62 = vld [vmem:[#allocation124_spill] sm:$0xff]  ;;  %v12968_v54 = vld [vmem:[#allocation113_spill] sm:$0xff] }
 0x455   :  { %4575 = vst.msk [vmem:[%s11714_s6 + $0x1f8] sm:$0xff] %vm155_vm0, %v4443_v17  ;;  %4212 = vperm.xlu1 %5280, %v2894_v61   ;;  %v3893_v38 = vpop.permute.xlu1 %3892  ;;  %v4926_v17 = vmul.f32 %v10576_v31, %v10576_v31  ;;  %v5548_v28 = vpop.eup %5547  ;;  %v4934_v14 = vsub.f32 %v4922_v16, %v4928_v1  ;;  %v12967_v16 = vld [vmem:[#allocation145_spill] sm:$0xff] }
 0x456   :  { %v4048_v52 = vpop.permute.xlu0 %4047  ;;  %v4414_v27 = vadd.f32 %v3893_v38, %v3622_v55  ;;  %v5711_v38 = vld [vmem:[%s11708_s0 + $0x228] sm:$0xff] }
 0x457   :  { %v4445_v56 = vadd.f32 %v4048_v52, %v3653_v37  ;;  %4367 = vperm.xlu0 %5279, %v2925_v10   ;;  %v4932_v41 = vsub.f32 %v4920_v12, %v4926_v17  ;;  %v2898_v37 = vsub.f32 %v2502_v5, %v2766_v22  ;;  %v12960_v10 = vld [vmem:[#allocation109_spill] sm:$0xff]  ;;  %v12962_v52 = vld [vmem:[#allocation303_spill] sm:$0xff] }
 0x458   :  { %4546 = vst.msk [vmem:[%s11714_s6 + $0x110] sm:$0xff] %vm155_vm0, %v4414_v27  ;;  %v2768_v3 = vmul.f32 %v9306_v2, %v12960_v10  ;;  %v3657_v21 = vmul.f32 %v5711_v38, %v12962_v52  ;;  %v10632_v2 = vmul.f32 %v5546_v26, %v4746_v25  ;;  %v5550_v27 = vpop.eup %5549  ;;  %v4749_v12 = vld [vmem:[%s11712_s4 + $0x438] sm:$0xff]  ;;  %v2506_v25 = vld [vmem:[%s11713_s5 + $0x350] sm:$0xff]  ;;  %v4940_v10 = vmax.f32 %v4934_v14, 0.0  ;;  %v12969_v38 = vld [vmem:[#allocation154_spill] sm:$0xff] }
 0x459   :  { %4577 = vst.msk [vmem:[%s11714_s6 + $0x208] sm:$0xff] %vm155_vm0, %v4445_v56  ;;  %4222 = vperm.xlu1 %5280, %v2896_v58   ;;  %v3903_v34 = vpop.permute.xlu1 %3902  ;;  %v4747_v58 = vld [vmem:[%s11712_s4 + $0x428] sm:$0xff]  ;;  %v4938_v24 = vmax.f32 %v4932_v41, 0.0  ;;  %v5713_v26 = vld [vmem:[%s11708_s0 + $0x238] sm:$0xff]  ;;  %v5552_v9 = vpop.eup %5551  ;;  %v5131_v52 = vmul.f32 0.020408163, %v12969_v38 }
 0x45a   :  { %v4058_v61 = vpop.permute.xlu0 %4057  ;;  %v4416_v55 = vadd.f32 %v3903_v34, %v3624_v15  ;;  %v2900_v40 = vsub.f32 %v2504_v29, %v2768_v3  ;;  %v12963_v15 = vld [vmem:[#allocation111_spill] sm:$0xff]  ;;  %v12966_v17 = vld [vmem:[#allocation9_spill] sm:$0xff]  ;;  %v10665_v1 = vmul.f32 %v5548_v28, %v4747_v58  ;;  %v2508_v29 = vld [vmem:[%s11713_s5 + $0x360] sm:$0xff] }
 0x45b   :  { %v4447_v51 = vadd.f32 %v4058_v61, %v3655_v8  ;;  %4377 = vperm.xlu0 %5279, %v2927_v30   ;;  %v2770_v45 = vmul.f32 %v12964_v62, %v12963_v15  ;;  %v5712_v8 = vld [vmem:[%s11708_s0 + $0x140] sm:$0xff]  ;;  %v3659_v34 = vmul.f32 %v5713_v26, %v12966_v17  ;;  %v4761_v61 = vmul.f32 %v5550_v27, %v4749_v12  ;;  %v12970_v27 = vld [vmem:[#allocation115_spill] sm:$0xff]  ;;  %v12974_v62 = vld [vmem:[#allocation92_spill] sm:$0xff] }
 0x45c   :  { %4548 = vst.msk [vmem:[%s11714_s6 + $0x120] sm:$0xff] %vm155_vm0, %v4416_v55  ;;  %v12965_v30 = vld [vmem:[#allocation122_spill] sm:$0xff]  ;;  %v10668_v55 = vmul.f32 0.020408163, %v12967_v16  ;;  %v4944_v28 = vadd.f32 1e-05, %v4938_v24 }
 0x45d   :  { %4579 = vst.msk [vmem:[%s11714_s6 + $0x218] sm:$0xff] %vm155_vm0, %v4447_v51  ;;  %4232 = vperm.xlu1 %5280, %v2898_v37   ;;  %v3913_v56 = vpop.permute.xlu1 %3912  ;;  %v3628_v5 = vmul.f32 %v5712_v8, %v12965_v30  ;;  %v4751_v37 = vld [vmem:[%s11712_s4 + $0x448] sm:$0xff]  ;;  %v12972_v14 = vld [vmem:[#allocation206_spill] sm:$0xff]  ;;  %v12973_v24 = vld [vmem:[#allocation233_spill] sm:$0xff]  ;;  %v4767_v26 = vmul.f32 %v4761_v61, %v10431_v60  ;;  %v4946_v17 = vadd.f32 1e-05, %v4940_v10 }
 0x45e   :  { %v4068_v6 = vpop.permute.xlu0 %4067  ;;  %v4418_v39 = vadd.f32 %v3913_v56, %v3626_v53  ;;  %v2772_v53 = vmul.f32 %v9350_v42, %v12968_v54  ;;  %v2774_v56 = vmul.f32 %v9369_v33, %v12970_v27  ;;  %v12971_v12 = vld [vmem:[#allocation11_spill] sm:$0xff]  ;;  %v4763_v33 = vmul.f32 %v5552_v9, %v4751_v37  ;;  %v2510_v9 = vld [vmem:[%s11713_s5 + $0x370] sm:$0xff]  ;;  %v4755_v16 = vld [vmem:[%s11713_s5 + $0x438] sm:$0xff] }
 0x45f   :  { %v4449_v22 = vadd.f32 %v4068_v6, %v3657_v21  ;;  %4778 = vperm.xlu0 %5279, %v10632_v2   ;;  %v2902_v21 = vsub.f32 %v2506_v25, %v2770_v45  ;;  %v5714_v6 = vld [vmem:[%s11708_s0 + $0x150] sm:$0xff]  ;;  %v5715_v42 = vld [vmem:[%s11708_s0 + $0x248] sm:$0xff]  ;;  %v5137_v15 = vmul.f32 %v10668_v55, %v10668_v55  ;;  %v10705_v45 = vmul.f32 0.020408163, %v12974_v62  ;;  %v12977_v54 = vld [vmem:[#allocation13_spill] sm:$0xff] }
 0x460   :  { %4550 = vst.msk [vmem:[%s11714_s6 + $0x130] sm:$0xff] %vm155_vm0, %v4418_v39  ;;  %v3630_v58 = vmul.f32 %v5714_v6, %v12971_v12  ;;  %v3661_v39 = vmul.f32 %v5715_v42, %v12972_v14  ;;  %v2904_v25 = vsub.f32 %v2508_v29, %v2772_v53  ;;  %5553 = vrsqrt.f32 %v4944_v28  ;;  %v12978_v38 = vld [vmem:[#allocation116_spill] sm:$0xff] }
 0x461   :  { %4581 = vst.msk [vmem:[%s11714_s6 + $0x228] sm:$0xff] %vm155_vm0, %v4449_v22  ;;  %4242 = vperm.xlu1 %5280, %v2900_v40   ;;  %v3923_v51 = vpop.permute.xlu1 %3922  ;;  %v4765_v22 = vmul.f32 %v10665_v1, %v10402_v35  ;;  %v10700_v40 = vmul.f32 0.020408163, %v12973_v24  ;;  %v5143_v37 = vsub.f32 %v5131_v52, %v5137_v15  ;;  %v2906_v6 = vsub.f32 %v2510_v9, %v2774_v56  ;;  %v12980_v15 = vld [vmem:[#allocation162_spill] sm:$0xff]  ;;  %v5718_v56 = vld [vmem:[%s11708_s0 + $0x170] sm:$0xff] }
 0x462   :  { %v4078_v41 = vpop.permute.xlu0 %4077  ;;  %v4420_v3 = vadd.f32 %v3923_v51, %v3628_v5  ;;  %v4753_v5 = vld [vmem:[%s11713_s5 + $0x428] sm:$0xff]  ;;  %v12975_v51 = vld [vmem:[#allocation241_spill] sm:$0xff]  ;;  %v4773_v12 = vsub.f32 %v4755_v16, %v4767_v26  ;;  %5555 = vrsqrt.f32 %v4946_v17  ;;  %v5135_v62 = vmul.f32 0.020408163, %v12980_v15 }
 0x463   :  { %v4451_v44 = vadd.f32 %v4078_v41, %v3659_v34  ;;  %4793 = vperm.xlu0 %5279, %v4761_v61   ;;  %v10718_v41 = vmul.f32 0.020408163, %v12975_v51  ;;  %v5716_v61 = vld [vmem:[%s11708_s0 + $0x160] sm:$0xff]  ;;  %v4771_v28 = vsub.f32 %v4753_v5, %v4765_v22  ;;  %v4930_v52 = vmul.f32 %v10700_v40, %v10700_v40  ;;  %v12982_v5 = vld [vmem:[#allocation128_spill] sm:$0xff]  ;;  %v5719_v17 = vld [vmem:[%s11708_s0 + $0x268] sm:$0xff] }
 0x464   :  { %4552 = vst.msk [vmem:[%s11714_s6 + $0x140] sm:$0xff] %vm155_vm0, %v4420_v3  ;;  %v12976_v3 = vld [vmem:[#allocation158_spill] sm:$0xff]  ;;  %v3632_v10 = vmul.f32 %v5716_v61, %v9360_v18  ;;  %v2776_v18 = vmul.f32 %v9390_v59, %v12978_v38  ;;  %v5149_v22 = vmax.f32 %v5143_v37, 0.0  ;;  %v3634_v26 = vmul.f32 %v5718_v56, %v12982_v5  ;;  %v4757_v37 = vld [vmem:[%s11713_s5 + $0x448] sm:$0xff] }
 0x465   :  { %4583 = vst.msk [vmem:[%s11714_s6 + $0x238] sm:$0xff] %vm155_vm0, %v4451_v44  ;;  %4252 = vperm.xlu1 %5280, %v2902_v21   ;;  %v3933_v8 = vpop.permute.xlu1 %3932  ;;  %v5133_v60 = vmul.f32 0.020408163, %v12976_v3  ;;  %v5717_v44 = vld [vmem:[%s11708_s0 + $0x258] sm:$0xff]  ;;  %v5139_v21 = vmul.f32 %v10705_v45, %v10705_v45  ;;  %v5141_v59 = vmul.f32 %v10718_v41, %v10718_v41  ;;  %v4769_v9 = vmul.f32 %v4763_v33, %v10466_v11  ;;  %v12984_v3 = vld [vmem:[#allocation4_spill] sm:$0xff]  ;;  %v12990_v56 = vld [vmem:[#allocation118_spill] sm:$0xff] }
 0x466   :  { %v4088_v30 = vpop.permute.xlu0 %4087  ;;  %v4422_v35 = vadd.f32 %v3933_v8, %v3630_v58  ;;  %v3663_v53 = vmul.f32 %v5717_v44, %v12977_v54  ;;  %v12979_v58 = vld [vmem:[#allocation239_spill] sm:$0xff]  ;;  %v12981_v8 = vld [vmem:[#allocation144_spill] sm:$0xff]  ;;  %v2780_v5 = vmul.f32 %v9432_v57, %v12990_v56 }
 0x467   :  { %v4453_v34 = vadd.f32 %v4088_v30, %v3661_v39  ;;  %4803 = vperm.xlu0 %5279, %v4763_v33   ;;  %v4924_v42 = vmul.f32 0.020408163, %v12979_v58  ;;  %v5145_v24 = vsub.f32 %v5133_v60, %v5139_v21  ;;  %v10748_v30 = vmul.f32 0.020408163, %v12981_v8  ;;  %v12985_v60 = vld [vmem:[#allocation190_spill] sm:$0xff]  ;;  %v12986_v44 = vld [vmem:[#allocation152_spill] sm:$0xff] }
 0x468   :  { %4554 = vst.msk [vmem:[%s11714_s6 + $0x150] sm:$0xff] %vm155_vm0, %v4422_v35  ;;  %v12983_v35 = vld [vmem:[#allocation15_spill] sm:$0xff]  ;;  %v2778_v61 = vmul.f32 %v12985_v60, %v12984_v3  ;;  %v5130_v54 = vmul.f32 0.020408163, %v12986_v44  ;;  %v2514_v11 = vld [vmem:[%s11713_s5 + $0x390] sm:$0xff]  ;;  %v5147_v21 = vsub.f32 %v5135_v62, %v5141_v59  ;;  %v12989_v59 = vld [vmem:[#allocation146_spill] sm:$0xff] }
 0x469   :  { %4585 = vst.msk [vmem:[%s11714_s6 + $0x248] sm:$0xff] %vm155_vm0, %v4453_v34  ;;  %4262 = vperm.xlu1 %5280, %v2904_v25   ;;  %v3943_v29 = vpop.permute.xlu1 %3942  ;;  %v3665_v34 = vmul.f32 %v5719_v17, %v12983_v35  ;;  %v2512_v25 = vld [vmem:[%s11713_s5 + $0x380] sm:$0xff]  ;;  %v5155_v33 = vadd.f32 1e-05, %v5149_v22  ;;  %v5151_v38 = vmax.f32 %v5145_v24, 0.0  ;;  %v4956_v8 = vld [vmem:[%s11712_s4 + $0x450] sm:$0xff] }
 0x46a   :  { %v4098_v27 = vpop.permute.xlu0 %4097  ;;  %v4424_v14 = vadd.f32 %v3943_v29, %v3632_v10  ;;  %v4936_v10 = vsub.f32 %v4924_v42, %v4930_v52  ;;  %v2908_v29 = vsub.f32 %v2512_v25, %v2776_v18  ;;  %v5720_v52 = vld [vmem:[%s11708_s0 + $0x180] sm:$0xff]  ;;  %v12988_v42 = vld [vmem:[#allocation17_spill] sm:$0xff]  ;;  %v4775_v18 = vsub.f32 %v4757_v37, %v4769_v9  ;;  %v12991_v9 = vld [vmem:[#allocation156_spill] sm:$0xff] }
 0x46b   :  { %v4455_v39 = vadd.f32 %v4098_v27, %v3663_v53  ;;  %4819 = vperm.xlu0 %5279, %v4771_v28   ;;  %v5136_v27 = vmul.f32 %v10748_v30, %v10748_v30  ;;  %v10798_v22 = vmul.f32 0.020408163, %v12989_v59  ;;  %v2910_v62 = vsub.f32 %v2514_v11, %v2778_v61  ;;  %v2516_v25 = vld [vmem:[%s11713_s5 + $0x3a0] sm:$0xff]  ;;  %v5722_v60 = vld [vmem:[%s11708_s0 + $0x190] sm:$0xff]  ;;  %v12992_v57 = vld [vmem:[#allocation19_spill] sm:$0xff] }
 0x46c   :  { %4556 = vst.msk [vmem:[%s11714_s6 + $0x160] sm:$0xff] %vm155_vm0, %v4424_v14  ;;  %5557 = vrsqrt.f32 %v5155_v33  ;;  %v5153_v37 = vmax.f32 %v5147_v21, 0.0  ;;  %v3638_v61 = vmul.f32 %v5722_v60, %v12992_v57  ;;  %v12993_v44 = vld [vmem:[#allocation191_spill] sm:$0xff]  ;;  %v12994_v11 = vld [vmem:[#allocation150_spill] sm:$0xff] }
 0x46d   :  { %4587 = vst.msk [vmem:[%s11714_s6 + $0x258] sm:$0xff] %vm155_vm0, %v4455_v39  ;;  %4272 = vperm.xlu1 %5280, %v2906_v6   ;;  %v3953_v16 = vpop.permute.xlu1 %3952  ;;  %v12987_v6 = vld [vmem:[#allocation130_spill] sm:$0xff]  ;;  %v5554_v39 = vpop.eup %5553  ;;  %v5142_v17 = vsub.f32 %v5130_v54, %v5136_v27  ;;  %v10828_v33 = vmul.f32 0.020408163, %v12994_v11 }
 0x46e   :  { %v4108_v51 = vpop.permute.xlu0 %4107  ;;  %v4426_v53 = vadd.f32 %v3953_v16, %v3634_v26  ;;  %v3636_v58 = vmul.f32 %v5720_v52, %v12987_v6  ;;  %v4942_v26 = vmax.f32 %v4936_v10, 0.0  ;;  %v5132_v16 = vmul.f32 0.020408163, %v12991_v9  ;;  %v5556_v3 = vpop.eup %5555  ;;  %v5723_v10 = vld [vmem:[%s11708_s0 + $0x288] sm:$0xff]  ;;  %v4958_v27 = vld [vmem:[%s11712_s4 + $0x460] sm:$0xff]  ;;  %v12995_v52 = vld [vmem:[#allocation120_spill] sm:$0xff] }
 0x46f   :  { %v4457_v28 = vadd.f32 %v4108_v51, %v3665_v34  ;;  %4829 = vperm.xlu0 %5279, %v4773_v12   ;;  %v5721_v12 = vld [vmem:[%s11708_s0 + $0x278] sm:$0xff]  ;;  %v5157_v51 = vadd.f32 1e-05, %v5151_v38  ;;  %v3669_v54 = vmul.f32 %v5723_v10, %v12993_v44  ;;  %v2782_v6 = vmul.f32 %v9449_v50, %v12995_v52  ;;  %v5726_v44 = vld [vmem:[%s11708_s0 + $0x1b0] sm:$0xff] }
 0x470   :  { %v3667_v14 = vmul.f32 %v5721_v12, %v12988_v42  ;;  %4558 = vst.msk [vmem:[%s11714_s6 + $0x170] sm:$0xff] %vm155_vm0, %v4426_v53  ;;  %v4968_v53 = vmul.f32 %v5554_v39, %v4956_v8  ;;  %v5148_v12 = vmax.f32 %v5142_v17, 0.0  ;;  %v12996_v39 = vld [vmem:[#allocation160_spill] sm:$0xff]  ;;  %v5725_v50 = vld [vmem:[%s11708_s0 + $0x298] sm:$0xff]  ;;  %v12998_v17 = vld [vmem:[#allocation219_spill] sm:$0xff] }
 0x471   :  { %4589 = vst.msk [vmem:[%s11714_s6 + $0x268] sm:$0xff] %vm155_vm0, %v4457_v28  ;;  %4282 = vperm.xlu1 %5280, %v2908_v29   ;;  %v3963_v24 = vpop.permute.xlu1 %3962  ;;  %v5138_v28 = vmul.f32 %v10798_v22, %v10798_v22  ;;  %v2912_v29 = vsub.f32 %v2516_v25, %v2780_v5  ;;  %5559 = vrsqrt.f32 %v5157_v51  ;;  %v5134_v59 = vmul.f32 0.020408163, %v12996_v39  ;;  %v12997_v8 = vld [vmem:[#allocation21_spill] sm:$0xff] }
 0x472   :  { %v4118_v15 = vpop.permute.xlu0 %4117  ;;  %v4428_v35 = vadd.f32 %v3963_v24, %v3636_v58  ;;  %v4948_v58 = vadd.f32 1e-05, %v4942_v26  ;;  %v5159_v24 = vadd.f32 1e-05, %v5153_v37  ;;  %v3671_v56 = vmul.f32 %v5725_v50, %v12997_v8  ;;  %v12999_v51 = vld [vmem:[#allocation201_spill] sm:$0xff]  ;;  %v5728_v50 = vld [vmem:[%s11708_s0 + $0x1c0] sm:$0xff] }
 0x473   :  { %v4459_v34 = vadd.f32 %v4118_v15, %v3667_v14  ;;  %4839 = vperm.xlu0 %5279, %v4775_v18   ;;  %v5144_v18 = vsub.f32 %v5132_v16, %v5138_v28  ;;  %v5724_v15 = vld [vmem:[%s11708_s0 + $0x1a0] sm:$0xff]  ;;  %v10852_v5 = vmul.f32 %v5556_v3, %v4958_v27  ;;  %v4974_v26 = vmul.f32 %v4968_v53, %v10576_v31  ;;  %v4962_v16 = vld [vmem:[%s11713_s5 + $0x450] sm:$0xff] }
 0x474   :  { %4560 = vst.msk [vmem:[%s11714_s6 + $0x180] sm:$0xff] %vm155_vm0, %v4428_v35  ;;  %v10859_v35 = vmul.f32 0.020408163, %v12998_v17  ;;  %v2784_v37 = vmul.f32 %v9464_v4, %v12999_v51  ;;  %5561 = vrsqrt.f32 %v4948_v58  ;;  %v5154_v3 = vadd.f32 1e-05, %v5148_v12  ;;  %v5727_v4 = vld [vmem:[%s11708_s0 + $0x2a8] sm:$0xff] }
 0x475   :  { %4591 = vst.msk [vmem:[%s11714_s6 + $0x278] sm:$0xff] %vm155_vm0, %v4459_v34  ;;  %4292 = vperm.xlu1 %5280, %v2910_v62   ;;  %v3973_v38 = vpop.permute.xlu1 %3972  ;;  %v3640_v62 = vmul.f32 %v5724_v15, %v9441_v43  ;;  %v2518_v43 = vld [vmem:[%s11713_s5 + $0x3b0] sm:$0xff]  ;;  %v5140_v34 = vmul.f32 %v10828_v33, %v10828_v33  ;;  %v5150_v57 = vmax.f32 %v5144_v18, 0.0  ;;  %5563 = vrsqrt.f32 %v5159_v24  ;;  %v5167_v58 = vld [vmem:[%s11712_s4 + $0x488] sm:$0xff]  ;;  %v13002_v12 = vld [vmem:[#allocation225_spill] sm:$0xff] }
 0x476   :  { %v4128_v21 = vpop.permute.xlu0 %4127  ;;  %v4430_v42 = vadd.f32 %v3973_v38, %v3638_v61  ;;  %v2914_v10 = vsub.f32 %v2518_v43, %v2782_v6  ;;  %v4980_v11 = vsub.f32 %v4962_v16, %v4974_v26  ;;  %v5558_v38 = vpop.eup %5557  ;;  %5565 = vrsqrt.f32 %v5154_v3  ;;  %v13003_v15 = vld [vmem:[#allocation204_spill] sm:$0xff]  ;;  %v13004_v43 = vld [vmem:[#allocation23_spill] sm:$0xff]  ;;  %v5169_v16 = vld [vmem:[%s11712_s4 + $0x498] sm:$0xff] }
 0x477   :  { %v4461_v14 = vadd.f32 %v4128_v21, %v3669_v54  ;;  %4988 = vperm.xlu0 %5279, %v4968_v53   ;;  %v5146_v61 = vsub.f32 %v5134_v59, %v5140_v34  ;;  %v3642_v54 = vmul.f32 %v5726_v44, %v9456_v19  ;;  %v13000_v53 = vld [vmem:[#allocation192_spill] sm:$0xff]  ;;  %v2520_v19 = vld [vmem:[%s11713_s5 + $0x3c0] sm:$0xff]  ;;  %v4718_v21 = vmul.f32 %v10859_v35, %v10859_v35 }
 0x478   :  { %4562 = vst.msk [vmem:[%s11714_s6 + $0x190] sm:$0xff] %vm155_vm0, %v4430_v42  ;;  %v3673_v28 = vmul.f32 %v5727_v4, %v13000_v53  ;;  %v4712_v42 = vmul.f32 0.020408163, %v13002_v12  ;;  %v5156_v39 = vadd.f32 1e-05, %v5150_v57  ;;  %v2916_v24 = vsub.f32 %v2520_v19, %v2784_v37  ;;  %v13005_v37 = vld [vmem:[#allocation227_spill] sm:$0xff] }
 0x479   :  { %4593 = vst.msk [vmem:[%s11714_s6 + $0x288] sm:$0xff] %vm155_vm0, %v4461_v14  ;;  %4302 = vperm.xlu1 %5280, %v2912_v29   ;;  %v3983_v25 = vpop.permute.xlu1 %3982  ;;  %v13001_v29 = vld [vmem:[#allocation221_spill] sm:$0xff]  ;;  %v5152_v59 = vmax.f32 %v5146_v61, 0.0  ;;  %v3644_v8 = vmul.f32 %v5728_v50, %v9471_v48  ;;  %v2522_v48 = vld [vmem:[%s11713_s5 + $0x3d0] sm:$0xff]  ;;  %v4714_v3 = vmul.f32 0.020408163, %v13005_v37 }
 0x47a   :  { %v4138_v9 = vpop.permute.xlu0 %4137  ;;  %v4432_v60 = vadd.f32 %v3983_v25, %v3640_v62  ;;  %v10891_v27 = vmul.f32 0.020408163, %v13001_v29  ;;  %v2786_v62 = vmul.f32 %v9479_v49, %v13003_v15  ;;  %v10915_v49 = vmul.f32 %v5558_v38, %v5167_v58  ;;  %v13007_v44 = vld [vmem:[#allocation194_spill] sm:$0xff]  ;;  %v5730_v53 = vld [vmem:[%s11708_s0 + $0x1d0] sm:$0xff]  ;;  %v5731_v19 = vld [vmem:[%s11708_s0 + $0x2c8] sm:$0xff] }
 0x47b   :  { %v4463_v31 = vadd.f32 %v4138_v9, %v3671_v56  ;;  %4998 = vperm.xlu0 %5279, %v10852_v5   ;;  %v5729_v56 = vld [vmem:[%s11708_s0 + $0x2b8] sm:$0xff]  ;;  %v5560_v17 = vpop.eup %5559  ;;  %v4724_v51 = vsub.f32 %v4712_v42, %v4718_v21  ;;  %5567 = vrsqrt.f32 %v5156_v39  ;;  %v5158_v57 = vadd.f32 1e-05, %v5152_v59  ;;  %v5171_v42 = vld [vmem:[%s11712_s4 + $0x4a8] sm:$0xff] }
 0x47c   :  { %4564 = vst.msk [vmem:[%s11714_s6 + $0x1a0] sm:$0xff] %vm155_vm0, %v4432_v60  ;;  %v3675_v26 = vmul.f32 %v5729_v56, %v13004_v43  ;;  %v4720_v34 = vmul.f32 %v10891_v27, %v10891_v27  ;;  %v2918_v61 = vsub.f32 %v2522_v48, %v2786_v62  ;;  %v13009_v38 = vld [vmem:[#allocation25_spill] sm:$0xff]  ;;  %v10945_v29 = vmul.f32 %v5560_v17, %v5169_v16  ;;  %v13010_v62 = vld [vmem:[#allocation187_spill] sm:$0xff] }
 0x47d   :  { %4595 = vst.msk [vmem:[%s11714_s6 + $0x298] sm:$0xff] %vm155_vm0, %v4463_v31  ;;  %4312 = vperm.xlu1 %5280, %v2914_v10   ;;  %v3993_v52 = vpop.permute.xlu1 %3992  ;;  %v13006_v10 = vld [vmem:[#allocation126_spill] sm:$0xff]  ;;  %v3677_v21 = vmul.f32 %v5731_v19, %v13009_v38  ;;  %5569 = vrsqrt.f32 %v5158_v57  ;;  %v13011_v50 = vld [vmem:[#allocation29_spill] sm:$0xff]  ;;  %v4976_v56 = vmul.f32 %v10852_v5, %v10582_v23  ;;  %v13012_v48 = vld [vmem:[#allocation27_spill] sm:$0xff] }
 0x47e   :  { %v4148_v6 = vpop.permute.xlu0 %4147  ;;  %v4434_v14 = vadd.f32 %v3993_v52, %v3642_v54  ;;  %v2788_v54 = vmul.f32 %v13007_v44, %v13006_v10  ;;  %v5562_v4 = vpop.eup %5561  ;;  %v2524_v52 = vld [vmem:[%s11713_s5 + $0x3e0] sm:$0xff]  ;;  %v4726_v39 = vsub.f32 %v4714_v3, %v4720_v34  ;;  %v5733_v34 = vld [vmem:[%s11708_s0 + $0x2d8] sm:$0xff]  ;;  %v2526_v5 = vld [vmem:[%s11713_s5 + $0x3f0] sm:$0xff] }
 0x47f   :  { %v4465_v18 = vadd.f32 %v4148_v6, %v3673_v28  ;;  %5024 = vperm.xlu0 %5279, %v4980_v11   ;;  %v13008_v28 = vld [vmem:[#allocation193_spill] sm:$0xff]  ;;  %v5564_v6 = vpop.eup %5563 }
 0x480   :  { %4566 = vst.msk [vmem:[%s11714_s6 + $0x1b0] sm:$0xff] %vm155_vm0, %v4434_v14  ;;  %v3646_v11 = vmul.f32 %v5730_v53, %v13008_v28  ;;  %v4960_v14 = vld [vmem:[%s11712_s4 + $0x470] sm:$0xff]  ;;  %v2920_v15 = vsub.f32 %v2524_v52, %v2788_v54  ;;  %v5566_v43 = vpop.eup %5565  ;;  %v10977_v23 = vmul.f32 %v5564_v6, %v5171_v42  ;;  %v4732_v57 = vmax.f32 %v4726_v39, 0.0  ;;  %v13014_v54 = vld [vmem:[#allocation189_spill] sm:$0xff]  ;;  %v13017_v52 = vld [vmem:[#allocation31_spill] sm:$0xff] }
 0x481   :  { %4597 = vst.msk [vmem:[%s11714_s6 + $0x2a8] sm:$0xff] %vm155_vm0, %v4465_v18  ;;  %4322 = vperm.xlu1 %5280, %v2916_v24   ;;  %v4003_v25 = vpop.permute.xlu1 %4002  ;;  %v4730_v18 = vmax.f32 %v4724_v51, 0.0  ;;  %v10982_v16 = vmul.f32 %v5562_v4, %v4960_v14  ;;  %v5166_v51 = vld [vmem:[%s11712_s4 + $0x480] sm:$0xff]  ;;  %v13015_v4 = vld [vmem:[#allocation199_spill] sm:$0xff]  ;;  %v13016_v19 = vld [vmem:[#allocation197_spill] sm:$0xff] }
 0x482   :  { %v4158_v9 = vpop.permute.xlu0 %4157  ;;  %v4436_v60 = vadd.f32 %v4003_v25, %v3644_v8  ;;  %v2790_v8 = vmul.f32 %v13011_v50, %v13010_v62  ;;  %v13013_v25 = vld [vmem:[#allocation195_spill] sm:$0xff]  ;;  %v2792_v53 = vmul.f32 %v13015_v4, %v13014_v54  ;;  %v10993_v28 = vmul.f32 %v5566_v43, %v5166_v51  ;;  %v5168_v62 = vld [vmem:[%s11712_s4 + $0x490] sm:$0xff] }
 0x483   :  { %v4467_v31 = vadd.f32 %v4158_v9, %v3675_v26  ;;  %5203 = vperm.xlu0 %5279, %v10915_v49   ;;  %v5732_v26 = vld [vmem:[%s11708_s0 + $0x1e0] sm:$0xff]  ;;  %v3679_v9 = vmul.f32 %v5733_v34, %v13013_v25  ;;  %v4978_v42 = vmul.f32 %v10982_v16, %v10700_v40  ;;  %v4738_v50 = vadd.f32 1e-05, %v4732_v57  ;;  %v13019_v43 = vld [vmem:[#allocation132_spill] sm:$0xff]  ;;  %v13021_v25 = vld [vmem:[#allocation33_spill] sm:$0xff] }
 0x484   :  { %4568 = vst.msk [vmem:[%s11714_s6 + $0x1c0] sm:$0xff] %vm155_vm0, %v4436_v60  ;;  %v3648_v17 = vmul.f32 %v5732_v26, %v13012_v48  ;;  %v4964_v60 = vld [vmem:[%s11713_s5 + $0x460] sm:$0xff]  ;;  %v2922_v44 = vsub.f32 %v2526_v5, %v2790_v8  ;;  %v13020_v26 = vld [vmem:[#allocation304_spill] sm:$0xff]  ;;  %v5737_v5 = vld [vmem:[%s11708_s0 + $0x2f8] sm:$0xff] }
 0x485   :  { %4599 = vst.msk [vmem:[%s11714_s6 + $0x2b8] sm:$0xff] %vm155_vm0, %v4467_v31  ;;  %4332 = vperm.xlu1 %5280, %v2918_v61   ;;  %v4013_v58 = vpop.permute.xlu1 %4012  ;;  %v4736_v31 = vadd.f32 1e-05, %v4730_v18  ;;  %v5568_v14 = vpop.eup %5567  ;;  %v13018_v18 = vld [vmem:[#allocation229_spill] sm:$0xff]  ;;  %v2794_v48 = vmul.f32 %v13020_v26, %v13019_v43  ;;  %v5736_v34 = vld [vmem:[%s11708_s0 + $0x200] sm:$0xff]  ;;  %v13022_v51 = vld [vmem:[#allocation200_spill] sm:$0xff] }
 0x486   :  { %v4168_v12 = vpop.permute.xlu0 %4167  ;;  %v4438_v59 = vadd.f32 %v4013_v58, %v3646_v11  ;;  %v5734_v11 = vld [vmem:[%s11708_s0 + $0x1f0] sm:$0xff]  ;;  %v4982_v58 = vsub.f32 %v4964_v60, %v4976_v56  ;;  %v11017_v39 = vmul.f32 0.020408163, %v13018_v18  ;;  %v5172_v60 = vld [vmem:[%s11713_s5 + $0x480] sm:$0xff]  ;;  %v13026_v18 = vld [vmem:[#allocation185_spill] sm:$0xff] }
 0x487   :  { %v4469_v24 = vadd.f32 %v4168_v12, %v3677_v21  ;;  %5213 = vperm.xlu0 %5279, %v10945_v29   ;;  %v3650_v38 = vmul.f32 %v5734_v11, %v13016_v19  ;;  %v5735_v21 = vld [vmem:[%s11708_s0 + $0x2e8] sm:$0xff]  ;;  %v2528_v12 = vld [vmem:[%s11713_s5 + $0x400] sm:$0xff]  ;;  %5571 = vrsqrt.f32 %v4736_v31  ;;  %v11051_v31 = vmul.f32 %v5568_v14, %v5168_v62  ;;  %v5570_v57 = vpop.eup %5569 }
 0x488   :  { %4570 = vst.msk [vmem:[%s11714_s6 + $0x1d0] sm:$0xff] %vm155_vm0, %v4438_v59  ;;  %v3681_v6 = vmul.f32 %v5735_v21, %v13017_v52  ;;  %v2924_v40 = vsub.f32 %v2528_v12, %v2792_v53  ;;  %v5170_v53 = vld [vmem:[%s11712_s4 + $0x4a0] sm:$0xff]  ;;  %5573 = vrsqrt.f32 %v4738_v50  ;;  %v5739_v14 = vld [vmem:[%s11708_s0 + $0x308] sm:$0xff] }
 0x489   :  { %4601 = vst.msk [vmem:[%s11714_s6 + $0x2c8] sm:$0xff] %vm155_vm0, %v4469_v24  ;;  %4342 = vperm.xlu1 %5280, %v2920_v15   ;;  %v4023_v37 = vpop.permute.xlu1 %4022  ;;  %v4966_v15 = vld [vmem:[%s11713_s5 + $0x470] sm:$0xff]  ;;  %v13025_v12 = vld [vmem:[#allocation6_spill] sm:$0xff] }
 0x48a   :  { %v4178_v3 = vpop.permute.xlu0 %4177  ;;  %v4440_v61 = vadd.f32 %v4023_v37, %v3648_v17  ;;  %v5184_v17 = vmul.f32 %v10993_v28, %v10748_v30  ;;  %v3683_v37 = vmul.f32 %v5737_v5, %v13022_v51  ;;  %v4984_v30 = vsub.f32 %v4966_v15, %v4978_v42  ;;  %v5741_v5 = vld [vmem:[%s11708_s0 + $0x318] sm:$0xff]  ;;  %v13029_v51 = vld [vmem:[#allocation203_spill] sm:$0xff] }
 0x48b   :  { %v4471_v10 = vadd.f32 %v4178_v3, %v3679_v9  ;;  %5223 = vperm.xlu0 %5279, %v10977_v23   ;;  %v3652_v9 = vmul.f32 %v5736_v34, %v13021_v25  ;;  %v2530_v3 = vld [vmem:[%s11713_s5 + $0x410] sm:$0xff]  ;;  %v11080_v15 = vmul.f32 %v5570_v57, %v5170_v53  ;;  %v13028_v25 = vld [vmem:[#allocation35_spill] sm:$0xff] }
 0x48c   :  { %4572 = vst.msk [vmem:[%s11714_s6 + $0x1e0] sm:$0xff] %vm155_vm0, %v4440_v61  ;;  %v4927_v61 = vmul.f32 %v11017_v39, %v11017_v39  ;;  %v2926_v52 = vsub.f32 %v2530_v3, %v2794_v48  ;;  %v4748_v3 = vld [vmem:[%s11712_s4 + $0x430] sm:$0xff] }
 0x48d   :  { %4603 = vst.msk [vmem:[%s11714_s6 + $0x2d8] sm:$0xff] %vm155_vm0, %v4471_v10  ;;  %4352 = vperm.xlu1 %5280, %v2922_v44   ;;  %v4033_v59 = vpop.permute.xlu1 %4032  ;;  %v13023_v10 = vld [vmem:[#allocation141_spill] sm:$0xff] }
 0x48e   :  { %v4188_v24 = vpop.permute.xlu0 %4187  ;;  %v4442_v8 = vadd.f32 %v4033_v59, %v3650_v38  ;;  %v4921_v44 = vmul.f32 0.020408163, %v13023_v10  ;;  %v13024_v38 = vld [vmem:[#allocation139_spill] sm:$0xff]  ;;  %v3685_v59 = vmul.f32 %v5739_v14, %v13026_v18  ;;  %v4750_v18 = vld [vmem:[%s11712_s4 + $0x440] sm:$0xff] }
 0x48f   :  { %v4473_v56 = vadd.f32 %v4188_v24, %v3681_v6  ;;  %5034 = vperm.xlu0 %5279, %v4982_v58   ;;  %v11060_v21 = vmul.f32 0.020408163, %v13024_v38  ;;  %v5190_v6 = vsub.f32 %v5172_v60, %v5184_v17  ;;  %v5738_v58 = vld [vmem:[%s11708_s0 + $0x210] sm:$0xff]  ;;  %v5186_v24 = vmul.f32 %v11051_v31, %v10798_v22  ;;  %v5740_v22 = vld [vmem:[%s11708_s0 + $0x220] sm:$0xff] }
 0x490   :  { %4574 = vst.msk [vmem:[%s11714_s6 + $0x1f0] sm:$0xff] %vm155_vm0, %v4442_v8  ;;  %v3654_v42 = vmul.f32 %v5738_v58, %v13025_v12  ;;  %v4933_v62 = vsub.f32 %v4921_v44, %v4927_v61  ;;  %v5188_v60 = vmul.f32 %v11080_v15, %v10828_v33  ;;  %v5176_v44 = vld [vmem:[%s11713_s5 + $0x4a0] sm:$0xff]  ;;  %v13030_v38 = vld [vmem:[#allocation140_spill] sm:$0xff]  ;;  %v5743_v58 = vld [vmem:[%s11708_s0 + $0x328] sm:$0xff] }
 0x491   :  { %4605 = vst.msk [vmem:[%s11714_s6 + $0x2e8] sm:$0xff] %vm155_vm0, %v4473_v56  ;;  %4362 = vperm.xlu1 %5280, %v2924_v40   ;;  %v4043_v54 = vpop.permute.xlu1 %4042  ;;  %v5174_v56 = vld [vmem:[%s11713_s5 + $0x490] sm:$0xff]  ;;  %v13027_v40 = vld [vmem:[#allocation142_spill] sm:$0xff]  ;;  %v4929_v17 = vmul.f32 %v11060_v21, %v11060_v21  ;;  %v5572_v34 = vpop.eup %5571 }
 0x492   :  { %v4198_v4 = vpop.permute.xlu0 %4197  ;;  %v4444_v11 = vadd.f32 %v4043_v54, %v3652_v9  ;;  %v4923_v43 = vmul.f32 0.020408163, %v13027_v40  ;;  %v3656_v9 = vmul.f32 %v5740_v22, %v13028_v25  ;;  %v4939_v57 = vmax.f32 %v4933_v62, 0.0  ;;  %v5742_v33 = vld [vmem:[%s11708_s0 + $0x230] sm:$0xff]  ;;  %v13032_v12 = vld [vmem:[#allocation198_spill] sm:$0xff]  ;;  %v13034_v22 = vld [vmem:[#allocation37_spill] sm:$0xff] }
 0x493   :  { %v4475_v19 = vadd.f32 %v4198_v4, %v3683_v37  ;;  %5044 = vperm.xlu0 %5279, %v4984_v30   ;;  %v3687_v37 = vmul.f32 %v5741_v5, %v13029_v51  ;;  %v5192_v30 = vsub.f32 %v5174_v56, %v5186_v24  ;;  %v5194_v14 = vsub.f32 %v5176_v44, %v5188_v60  ;;  %v13035_v5 = vld [vmem:[#allocation205_spill] sm:$0xff]  ;;  %v5746_v44 = vld [vmem:[%s11708_s0 + $0x250] sm:$0xff] }
 0x494   :  { %4576 = vst.msk [vmem:[%s11714_s6 + $0x200] sm:$0xff] %vm155_vm0, %v4444_v11  ;;  %v4935_v54 = vsub.f32 %v4923_v43, %v4929_v17  ;;  %v4760_v11 = vmul.f32 %v5572_v34, %v4748_v3  ;;  %v5744_v34 = vld [vmem:[%s11708_s0 + $0x240] sm:$0xff] }
 0x495   :  { %4607 = vst.msk [vmem:[%s11714_s6 + $0x2f8] sm:$0xff] %vm155_vm0, %v4475_v19  ;;  %v4053_v50 = vpop.permute.xlu1 %4052  ;;  %4372 = vperm.xlu1 %5280, %v2926_v52   ;;  %v5574_v19 = vpop.eup %5573  ;;  %v11114_v52 = vmul.f32 0.020408163, %v13030_v38  ;;  %v3660_v25 = vmul.f32 %v5744_v34, %v13034_v22  ;;  %v5750_v34 = vld [vmem:[%s11708_s0 + $0x270] sm:$0xff] }
 0x496   :  { %v4208_v8 = vpop.permute.xlu0 %4207  ;;  %v4446_v26 = vadd.f32 %v4053_v50, %v3654_v42  ;;  %v3689_v42 = vmul.f32 %v5743_v58, %v13032_v12  ;;  %v4941_v50 = vmax.f32 %v4935_v54, 0.0  ;;  %v13036_v54 = vld [vmem:[#allocation10_spill] sm:$0xff]  ;;  %v13040_v22 = vld [vmem:[#allocation12_spill] sm:$0xff] }
 0x497   :  { %v4477_v48 = vadd.f32 %v4208_v8, %v3685_v59  ;;  %5234 = vperm.xlu0 %5279, %v5190_v6   ;;  %v13031_v6 = vld [vmem:[#allocation5_spill] sm:$0xff]  ;;  %v4945_v59 = vadd.f32 1e-05, %v4939_v57  ;;  %v13033_v8 = vld [vmem:[#allocation143_spill] sm:$0xff]  ;;  %v4931_v17 = vmul.f32 %v11114_v52, %v11114_v52 }
 0x498   :  { %4578 = vst.msk [vmem:[%s11714_s6 + $0x210] sm:$0xff] %vm155_vm0, %v4446_v26  ;;  %v4925_v56 = vmul.f32 0.020408163, %v13033_v8  ;;  %v4762_v26 = vmul.f32 %v5574_v19, %v4750_v18  ;;  %v13037_v19 = vld [vmem:[#allocation202_spill] sm:$0xff]  ;;  %v13038_v18 = vld [vmem:[#allocation39_spill] sm:$0xff] }
 0x499   :  { %4609 = vst.msk [vmem:[%s11714_s6 + $0x308] sm:$0xff] %vm155_vm0, %v4477_v48  ;;  %v4063_v61 = vpop.permute.xlu1 %4062  ;;  %4783 = vperm.xlu1 %5280, %v10665_v1   ;;  %v3658_v1 = vmul.f32 %v5742_v33, %v13031_v6  ;;  %v4764_v48 = vmul.f32 %v10632_v2, %v10396_v36  ;;  %v4752_v36 = vld [vmem:[%s11713_s5 + $0x420] sm:$0xff]  ;;  %5575 = vrsqrt.f32 %v4945_v59 }
 0x49a   :  { %v4218_v10 = vpop.permute.xlu0 %4217  ;;  %v4448_v4 = vadd.f32 %v4063_v61, %v3656_v9  ;;  %v5745_v9 = vld [vmem:[%s11708_s0 + $0x338] sm:$0xff]  ;;  %v4937_v3 = vsub.f32 %v4925_v56, %v4931_v17 }
 0x49b   :  { %v4479_v53 = vadd.f32 %v4218_v10, %v3687_v37  ;;  %5244 = vperm.xlu0 %5279, %v5192_v30   ;;  %v3691_v51 = vmul.f32 %v5745_v9, %v13035_v5  ;;  %v4947_v30 = vadd.f32 1e-05, %v4941_v50  ;;  %v4770_v61 = vsub.f32 %v4752_v36, %v4764_v48  ;;  %v5751_v9 = vld [vmem:[%s11708_s0 + $0x368] sm:$0xff]  ;;  %v4957_v36 = vld [vmem:[%s11712_s4 + $0x458] sm:$0xff] }
 0x49c   :  { %4580 = vst.msk [vmem:[%s11714_s6 + $0x220] sm:$0xff] %vm155_vm0, %v4448_v4  ;;  %v4766_v10 = vmul.f32 %v4760_v11, %v10859_v35  ;;  %v3662_v4 = vmul.f32 %v5746_v44, %v13036_v54  ;;  %v4754_v35 = vld [vmem:[%s11713_s5 + $0x430] sm:$0xff]  ;;  %v4943_v6 = vmax.f32 %v4937_v3, 0.0  ;;  %v13041_v5 = vld [vmem:[#allocation207_spill] sm:$0xff]  ;;  %v5753_v54 = vld [vmem:[%s11708_s0 + $0x378] sm:$0xff] }
 0x49d   :  { %4611 = vst.msk [vmem:[%s11714_s6 + $0x318] sm:$0xff] %vm155_vm0, %v4479_v53  ;;  %v4073_v24 = vpop.permute.xlu1 %4072  ;;  %4788 = vperm.xlu1 %5280, %v4760_v11   ;;  %v5747_v53 = vld [vmem:[%s11708_s0 + $0x348] sm:$0xff]  ;;  %5577 = vrsqrt.f32 %v4947_v30 }
 0x49e   :  { %v4228_v62 = vpop.permute.xlu0 %4227  ;;  %v4450_v40 = vadd.f32 %v4073_v24, %v3658_v1  ;;  %v3693_v38 = vmul.f32 %v5747_v53, %v13037_v19  ;;  %v4772_v12 = vsub.f32 %v4754_v35, %v4766_v10  ;;  %v5749_v24 = vld [vmem:[%s11708_s0 + $0x358] sm:$0xff]  ;;  %v4959_v19 = vld [vmem:[%s11712_s4 + $0x468] sm:$0xff] }
 0x49f   :  { %v4481_v43 = vadd.f32 %v4228_v62, %v3689_v42  ;;  %5254 = vperm.xlu0 %5279, %v5194_v14   ;;  %v4768_v42 = vmul.f32 %v4762_v26, %v10891_v27  ;;  %v5748_v14 = vld [vmem:[%s11708_s0 + $0x260] sm:$0xff]  ;;  %v13039_v62 = vld [vmem:[#allocation208_spill] sm:$0xff]  ;;  %v13042_v10 = vld [vmem:[#allocation41_spill] sm:$0xff] }
 0x4a0   :  { %4582 = vst.msk [vmem:[%s11714_s6 + $0x230] sm:$0xff] %vm155_vm0, %v4450_v40  ;;  %v3664_v59 = vmul.f32 %v5748_v14, %v13038_v18  ;;  %v3695_v50 = vmul.f32 %v5749_v24, %v13039_v62  ;;  %v4756_v27 = vld [vmem:[%s11713_s5 + $0x440] sm:$0xff]  ;;  %v4949_v40 = vadd.f32 1e-05, %v4943_v6 }
 0x4a1   :  { %4613 = vst.msk [vmem:[%s11714_s6 + $0x328] sm:$0xff] %vm155_vm0, %v4481_v43  ;;  %v4083_v2 = vpop.permute.xlu1 %4082  ;;  %4798 = vperm.xlu1 %5280, %v4762_v26   ;;  %v4774_v17 = vsub.f32 %v4756_v27, %v4768_v42  ;;  %v5755_v42 = vld [vmem:[%s11708_s0 + $0x388] sm:$0xff]  ;;  %v13045_v14 = vld [vmem:[#allocation210_spill] sm:$0xff] }
 0x4a2   :  { %v4238_v37 = vpop.permute.xlu0 %4237  ;;  %v4452_v60 = vadd.f32 %v4083_v2, %v3660_v25  ;;  %v3666_v25 = vmul.f32 %v5750_v34, %v13040_v22  ;;  %5579 = vrsqrt.f32 %v4949_v40  ;;  %v3701_v18 = vmul.f32 %v5755_v42, %v13045_v14  ;;  %v5763_v14 = vld [vmem:[%s11708_s0 + $0x3c8] sm:$0xff] }
 0x4a3   :  { %v4483_v57 = vadd.f32 %v4238_v37, %v3691_v51  ;;  %v5576_v48 = vpop.eup %5575  ;;  %v3697_v51 = vmul.f32 %v5751_v9, %v13041_v5 }
 0x4a4   :  { %4584 = vst.msk [vmem:[%s11714_s6 + $0x240] sm:$0xff] %vm155_vm0, %v4452_v60  ;;  %v11218_v60 = vmul.f32 %v5576_v48, %v4957_v36  ;;  %v13048_v36 = vld [vmem:[#allocation211_spill] sm:$0xff] }
 0x4a5   :  { %4615 = vst.msk [vmem:[%s11714_s6 + $0x338] sm:$0xff] %vm155_vm0, %v4483_v57  ;;  %v4093_v11 = vpop.permute.xlu1 %4092  ;;  %4814 = vperm.xlu1 %5280, %v4770_v61   ;;  %v5752_v61 = vld [vmem:[%s11708_s0 + $0x280] sm:$0xff] }
 0x4a6   :  { %v4248_v33 = vpop.permute.xlu0 %4247  ;;  %v4454_v1 = vadd.f32 %v4093_v11, %v3662_v4  ;;  %v3668_v44 = vmul.f32 %v5752_v61, %v13042_v10  ;;  %v13043_v4 = vld [vmem:[#allocation209_spill] sm:$0xff] }
 0x4a7   :  { %v4485_v58 = vadd.f32 %v4248_v33, %v3693_v38  ;;  %v5578_v57 = vpop.eup %5577  ;;  %v3699_v53 = vmul.f32 %v5753_v54, %v13043_v4  ;;  %v13050_v54 = vld [vmem:[#allocation212_spill] sm:$0xff] }
 0x4a8   :  { %4586 = vst.msk [vmem:[%s11714_s6 + $0x250] sm:$0xff] %vm155_vm0, %v4454_v1  ;;  %v11240_v6 = vmul.f32 %v5578_v57, %v4959_v19  ;;  %v5754_v1 = vld [vmem:[%s11708_s0 + $0x290] sm:$0xff]  ;;  %v13051_v19 = vld [vmem:[#allocation18_spill] sm:$0xff] }
 0x4a9   :  { %4617 = vst.msk [vmem:[%s11714_s6 + $0x348] sm:$0xff] %vm155_vm0, %v4485_v58  ;;  %v4103_v8 = vpop.permute.xlu1 %4102  ;;  %4824 = vperm.xlu1 %5280, %v4772_v12   ;;  %v13044_v58 = vld [vmem:[#allocation14_spill] sm:$0xff] }
 0x4aa   :  { %v4258_v56 = vpop.permute.xlu0 %4257  ;;  %v4456_v43 = vadd.f32 %v4103_v8, %v3664_v59  ;;  %v3670_v12 = vmul.f32 %v5754_v1, %v13044_v58  ;;  %v5756_v8 = vld [vmem:[%s11708_s0 + $0x2a0] sm:$0xff]  ;;  %v5762_v58 = vld [vmem:[%s11708_s0 + $0x2d0] sm:$0xff] }
 0x4ab   :  { %v4487_v26 = vadd.f32 %v4258_v56, %v3695_v50  ;;  %v13046_v56 = vld [vmem:[#allocation43_spill] sm:$0xff] }
 0x4ac   :  { %4588 = vst.msk [vmem:[%s11714_s6 + $0x260] sm:$0xff] %vm155_vm0, %v4456_v43  ;;  %v5580_v27 = vpop.eup %5579  ;;  %v3672_v40 = vmul.f32 %v5756_v8, %v13046_v56  ;;  %v5757_v43 = vld [vmem:[%s11708_s0 + $0x398] sm:$0xff]  ;;  %v5764_v8 = vld [vmem:[%s11708_s0 + $0x2e0] sm:$0xff]  ;;  %v13054_v56 = vld [vmem:[#allocation215_spill] sm:$0xff] }
 0x4ad   :  { %4619 = vst.msk [vmem:[%s11714_s6 + $0x358] sm:$0xff] %vm155_vm0, %v4487_v26  ;;  %v4113_v2 = vpop.permute.xlu1 %4112  ;;  %4834 = vperm.xlu1 %5280, %v4774_v17   ;;  %v13047_v26 = vld [vmem:[#allocation16_spill] sm:$0xff]  ;;  %v4961_v17 = vld [vmem:[%s11712_s4 + $0x478] sm:$0xff] }
 0x4ae   :  { %v4268_v37 = vpop.permute.xlu0 %4267  ;;  %v4458_v30 = vadd.f32 %v4113_v2, %v3666_v25  ;;  %v3703_v48 = vmul.f32 %v5757_v43, %v13047_v26  ;;  %v4973_v5 = vmul.f32 %v5580_v27, %v4961_v17  ;;  %v4975_v27 = vmul.f32 %v11218_v60, %v11017_v39  ;;  %v5765_v43 = vld [vmem:[%s11708_s0 + $0x3d8] sm:$0xff]  ;;  %v13055_v26 = vld [vmem:[#allocation20_spill] sm:$0xff] }
 0x4af   :  { %v4489_v3 = vadd.f32 %v4268_v37, %v3697_v51  ;;  %v5758_v51 = vld [vmem:[%s11708_s0 + $0x2b0] sm:$0xff]  ;;  %v5759_v37 = vld [vmem:[%s11708_s0 + $0x3a8] sm:$0xff]  ;;  %v4963_v39 = vld [vmem:[%s11713_s5 + $0x458] sm:$0xff] }
 0x4b0   :  { %4590 = vst.msk [vmem:[%s11714_s6 + $0x270] sm:$0xff] %vm155_vm0, %v4458_v30  ;;  %v3674_v2 = vmul.f32 %v5758_v51, %v13048_v36  ;;  %v13049_v30 = vld [vmem:[#allocation45_spill] sm:$0xff]  ;;  %v13056_v51 = vld [vmem:[#allocation218_spill] sm:$0xff] }
 0x4b1   :  { %4621 = vst.msk [vmem:[%s11714_s6 + $0x368] sm:$0xff] %vm155_vm0, %v4489_v3  ;;  %v4123_v38 = vpop.permute.xlu1 %4122  ;;  %4993 = vperm.xlu1 %5280, %v11218_v60   ;;  %v3705_v3 = vmul.f32 %v5759_v37, %v13049_v30  ;;  %v13057_v37 = vld [vmem:[#allocation49_spill] sm:$0xff] }
 0x4b2   :  { %v4278_v35 = vpop.permute.xlu0 %4277  ;;  %v4460_v11 = vadd.f32 %v4123_v38, %v3668_v44  ;;  %v5760_v44 = vld [vmem:[%s11708_s0 + $0x2c0] sm:$0xff] }
 0x4b3   :  { %v4491_v33 = vadd.f32 %v4278_v35, %v3699_v53  ;;  %v3676_v4 = vmul.f32 %v5760_v44, %v13050_v54  ;;  %v5761_v53 = vld [vmem:[%s11708_s0 + $0x3b8] sm:$0xff]  ;;  %v13058_v44 = vld [vmem:[#allocation64_spill] sm:$0xff] }
 0x4b4   :  { %4592 = vst.msk [vmem:[%s11714_s6 + $0x280] sm:$0xff] %vm155_vm0, %v4460_v11  ;;  %v3707_v38 = vmul.f32 %v5761_v53, %v13051_v19  ;;  %v13059_v53 = vld [vmem:[#allocation22_spill] sm:$0xff] }
 0x4b5   :  { %4623 = vst.msk [vmem:[%s11714_s6 + $0x378] sm:$0xff] %vm155_vm0, %v4491_v33  ;;  %v4133_v59 = vpop.permute.xlu1 %4132  ;;  %5003 = vperm.xlu1 %5280, %v11240_v6  }
 0x4b6   :  { %v4288_v24 = vpop.permute.xlu0 %4287  ;;  %v4462_v62 = vadd.f32 %v4133_v59, %v3670_v12  ;;  %v13052_v12 = vld [vmem:[#allocation213_spill] sm:$0xff] }
 0x4b7   :  { %v4493_v50 = vadd.f32 %v4288_v24, %v3701_v18  ;;  %v3678_v42 = vmul.f32 %v5762_v58, %v13052_v12  ;;  %v13053_v18 = vld [vmem:[#allocation47_spill] sm:$0xff]  ;;  %v5770_v58 = vld [vmem:[%s11708_s0 + $0x310] sm:$0xff] }
 0x4b8   :  { %4594 = vst.msk [vmem:[%s11714_s6 + $0x290] sm:$0xff] %vm155_vm0, %v4462_v62  ;;  %v3709_v59 = vmul.f32 %v5763_v14, %v13053_v18  ;;  %v13060_v12 = vld [vmem:[#allocation220_spill] sm:$0xff]  ;;  %v5771_v14 = vld [vmem:[%s11708_s0 + $0x408] sm:$0xff] }
 0x4b9   :  { %4625 = vst.msk [vmem:[%s11714_s6 + $0x388] sm:$0xff] %vm155_vm0, %v4493_v50  ;;  %v4143_v34 = vpop.permute.xlu1 %4142  ;;  %5008 = vperm.xlu1 %5280, %v10982_v16   ;;  %v13061_v18 = vld [vmem:[#allocation51_spill] sm:$0xff] }
 0x4ba   :  { %v4298_v22 = vpop.permute.xlu0 %4297  ;;  %v4464_v25 = vadd.f32 %v4143_v34, %v3672_v40  ;;  %v3680_v40 = vmul.f32 %v5764_v8, %v13054_v56  ;;  %v5772_v8 = vld [vmem:[%s11708_s0 + $0x320] sm:$0xff] }
 0x4bb   :  { %v4495_v9 = vadd.f32 %v4298_v22, %v3703_v48  ;;  %v3711_v48 = vmul.f32 %v5765_v43, %v13055_v26  ;;  %v4981_v22 = vsub.f32 %v4963_v39, %v4975_v27  ;;  %v5187_v27 = vmul.f32 %v10945_v29, %v10705_v45  ;;  %v13062_v56 = vld [vmem:[#allocation66_spill] sm:$0xff]  ;;  %v5773_v43 = vld [vmem:[%s11708_s0 + $0x418] sm:$0xff]  ;;  %v13063_v26 = vld [vmem:[#allocation24_spill] sm:$0xff] }
 0x4bc   :  { %4596 = vst.msk [vmem:[%s11714_s6 + $0x2a0] sm:$0xff] %vm155_vm0, %v4464_v25  ;;  %v4977_v25 = vmul.f32 %v11240_v6, %v11060_v21  ;;  %v4965_v21 = vld [vmem:[%s11713_s5 + $0x468] sm:$0xff]  ;;  %v5175_v45 = vld [vmem:[%s11713_s5 + $0x498] sm:$0xff] }
 0x4bd   :  { %4627 = vst.msk [vmem:[%s11714_s6 + $0x398] sm:$0xff] %vm155_vm0, %v4495_v9  ;;  %v4153_v16 = vpop.permute.xlu1 %4152  ;;  %5013 = vperm.xlu1 %5280, %v4973_v5   ;;  %v5766_v9 = vld [vmem:[%s11708_s0 + $0x2f0] sm:$0xff] }
 0x4be   :  { %v4308_v57 = vpop.permute.xlu0 %4307  ;;  %v4466_v61 = vadd.f32 %v4153_v16, %v3674_v2  ;;  %v3682_v36 = vmul.f32 %v5766_v9, %v13056_v51  ;;  %v5767_v2 = vld [vmem:[%s11708_s0 + $0x3e8] sm:$0xff] }
 0x4bf   :  { %v4497_v10 = vadd.f32 %v4308_v57, %v3705_v3  ;;  %v3713_v30 = vmul.f32 %v5767_v2, %v13057_v37  ;;  %v4983_v57 = vsub.f32 %v4965_v21, %v4977_v25 }
 0x4c0   :  { %4598 = vst.msk [vmem:[%s11714_s6 + $0x2b0] sm:$0xff] %vm155_vm0, %v4466_v61  ;;  %v4979_v61 = vmul.f32 %v4973_v5, %v11114_v52  ;;  %v4967_v52 = vld [vmem:[%s11713_s5 + $0x478] sm:$0xff] }
 0x4c1   :  { %4629 = vst.msk [vmem:[%s11714_s6 + $0x3a8] sm:$0xff] %vm155_vm0, %v4497_v10  ;;  %v4163_v35 = vpop.permute.xlu1 %4162  ;;  %5198 = vperm.xlu1 %5280, %v10993_v28   ;;  %v5768_v10 = vld [vmem:[%s11708_s0 + $0x300] sm:$0xff] }
 0x4c2   :  { %v4318_v11 = vpop.permute.xlu0 %4317  ;;  %v4468_v33 = vadd.f32 %v4163_v35, %v3676_v4  ;;  %v3684_v54 = vmul.f32 %v5768_v10, %v13058_v44  ;;  %v5769_v4 = vld [vmem:[%s11708_s0 + $0x3f8] sm:$0xff] }
 0x4c3   :  { %v4499_v1 = vadd.f32 %v4318_v11, %v3707_v38  ;;  %v3715_v19 = vmul.f32 %v5769_v4, %v13059_v53  ;;  %v13064_v4 = vld [vmem:[#allocation151_spill] sm:$0xff] }
 0x4c4   :  { %4600 = vst.msk [vmem:[%s11714_s6 + $0x2c0] sm:$0xff] %vm155_vm0, %v4468_v33  ;;  %v4985_v33 = vsub.f32 %v4967_v52, %v4979_v61 }
 0x4c5   :  { %4631 = vst.msk [vmem:[%s11714_s6 + $0x3b8] sm:$0xff] %vm155_vm0, %v4499_v1  ;;  %v4173_v28 = vpop.permute.xlu1 %4172  ;;  %5208 = vperm.xlu1 %5280, %v11051_v31   ;;  %v5185_v1 = vmul.f32 %v10915_v49, %v10668_v55  ;;  %v5173_v55 = vld [vmem:[%s11713_s5 + $0x488] sm:$0xff] }
 0x4c6   :  { %v4328_v24 = vpop.permute.xlu0 %4327  ;;  %v4470_v62 = vadd.f32 %v4173_v28, %v3678_v42  ;;  %v3686_v42 = vmul.f32 %v5770_v58, %v13060_v12 }
 0x4c7   :  { %v4501_v50 = vadd.f32 %v4328_v24, %v3709_v59  ;;  %v3717_v59 = vmul.f32 %v5771_v14, %v13061_v18 }
 0x4c8   :  { %4602 = vst.msk [vmem:[%s11714_s6 + $0x2d0] sm:$0xff] %vm155_vm0, %v4470_v62 }
 0x4c9   :  { %4633 = vst.msk [vmem:[%s11714_s6 + $0x3c8] sm:$0xff] %vm155_vm0, %v4501_v50  ;;  %v4183_v31 = vpop.permute.xlu1 %4182  ;;  %5218 = vperm.xlu1 %5280, %v11080_v15   ;;  %v5191_v50 = vsub.f32 %v5173_v55, %v5185_v1  ;;  %v5781_v1 = vld [vmem:[%s11709_s1 + $0x28] sm:$0xff] }
 0x4ca   :  { %v4338_v60 = vpop.permute.xlu0 %4337  ;;  %v4472_v17 = vadd.f32 %v4183_v31, %v3680_v40  ;;  %v3688_v40 = vmul.f32 %v5772_v8, %v13062_v56 }
 0x4cb   :  { %v4503_v34 = vadd.f32 %v4338_v60, %v3711_v48  ;;  %v3719_v48 = vmul.f32 %v5773_v43, %v13063_v26  ;;  %v5785_v26 = vld [vmem:[%s11710_s2] sm:$0xff] }
 0x4cc   :  { %4604 = vst.msk [vmem:[%s11714_s6 + $0x2e0] sm:$0xff] %vm155_vm0, %v4472_v17  ;;  %v5193_v17 = vsub.f32 %v5175_v45, %v5187_v27 }
 0x4cd   :  { %4635 = vst.msk [vmem:[%s11714_s6 + $0x3d8] sm:$0xff] %vm155_vm0, %v4503_v34  ;;  %v4193_v15 = vpop.permute.xlu1 %4192  ;;  %5029 = vperm.xlu1 %5280, %v4981_v22   ;;  %v5189_v34 = vmul.f32 %v10977_v23, %v10718_v41  ;;  %v5774_v22 = vld [vmem:[%s11708_s0 + $0x330] sm:$0xff]  ;;  %v5177_v41 = vld [vmem:[%s11713_s5 + $0x4a8] sm:$0xff] }
 0x4ce   :  { %v4348_v6 = vpop.permute.xlu0 %4347  ;;  %v4474_v3 = vadd.f32 %v4193_v15, %v3682_v36  ;;  %v3690_v25 = vmul.f32 %v5774_v22, %v9805_v46  ;;  %v5775_v36 = vld [vmem:[%s11708_s0 + $0x340] sm:$0xff]  ;;  %v5776_v15 = vld [vmem:[%s11708_s0 + $0x350] sm:$0xff] }
 0x4cf   :  { %v4505_v16 = vadd.f32 %v4348_v6, %v3713_v30  ;;  %v5195_v46 = vsub.f32 %v5177_v41, %v5189_v34  ;;  %v3692_v2 = vmul.f32 %v5775_v36, %v9825_v47  ;;  %v3694_v6 = vmul.f32 %v5776_v15, %v9845_v63  ;;  %v5787_v22 = vld [vmem:[%s11708_s0 + $0x3d0] sm:$0xff]  ;;  %v13067_v36 = vld [vmem:[#allocation26_spill] sm:$0xff] }
 0x4d0   :  { %4606 = vst.msk [vmem:[%s11714_s6 + $0x2f0] sm:$0xff] %vm155_vm0, %v4474_v3  ;;  %v5789_v15 = vld [vmem:[%s11708_s0 + $0x3f0] sm:$0xff] }
 0x4d1   :  { %4637 = vst.msk [vmem:[%s11714_s6 + $0x3e8] sm:$0xff] %vm155_vm0, %v4505_v16  ;;  %v4203_v5 = vpop.permute.xlu1 %4202  ;;  %5039 = vperm.xlu1 %5280, %v4983_v57   ;;  %v5777_v57 = vld [vmem:[%s11708_s0 + $0x360] sm:$0xff] }
 0x4d2   :  { %v4358_v38 = vpop.permute.xlu0 %4357  ;;  %v4476_v35 = vadd.f32 %v4203_v5, %v3684_v54  ;;  %v3696_v61 = vmul.f32 %v5777_v57, %v9865_v0  ;;  %v5778_v54 = vld [vmem:[%s11708_s0 + $0x370] sm:$0xff] }
 0x4d3   :  { %v4507_v11 = vadd.f32 %v4358_v38, %v3715_v19  ;;  %v3698_v53 = vmul.f32 %v5778_v54, %v13064_v4  ;;  %v5779_v19 = vld [vmem:[%s11709_s1 + $0x18] sm:$0xff]  ;;  %v5791_v54 = vld [vmem:[%s11708_s0 + $0x400] sm:$0xff]  ;;  %v13069_v4 = vld [vmem:[#allocation55_spill] sm:$0xff] }
 0x4d4   :  { %4608 = vst.msk [vmem:[%s11714_s6 + $0x300] sm:$0xff] %vm155_vm0, %v4476_v35 }
 0x4d5   :  { %4639 = vst.msk [vmem:[%s11714_s6 + $0x3f8] sm:$0xff] %vm155_vm0, %v4507_v11  ;;  %v4213_v49 = vpop.permute.xlu1 %4212  ;;  %5049 = vperm.xlu1 %5280, %v4985_v33   ;;  %v5780_v11 = vld [vmem:[%s11708_s0 + $0x380] sm:$0xff] }
 0x4d6   :  { %v4368_v28 = vpop.permute.xlu0 %4367  ;;  %v4478_v24 = vadd.f32 %v4213_v49, %v3686_v42  ;;  %v3700_v33 = vmul.f32 %v5780_v11, %v9905_v13  ;;  %v5782_v13 = vld [vmem:[%s11708_s0 + $0x390] sm:$0xff] }
 0x4d7   :  { %v4509_v62 = vadd.f32 %v4368_v28, %v3717_v59  ;;  %v13065_v59 = vld [vmem:[#allocation53_spill] sm:$0xff] }
 0x4d8   :  { %4610 = vst.msk [vmem:[%s11714_s6 + $0x310] sm:$0xff] %vm155_vm0, %v4478_v24  ;;  %v3702_v55 = vmul.f32 %v5782_v13, %v13065_v59 }
 0x4d9   :  { %4641 = vst.msk [vmem:[%s11714_s6 + $0x408] sm:$0xff] %vm155_vm0, %v4509_v62  ;;  %v4223_v29 = vpop.permute.xlu1 %4222  ;;  %5239 = vperm.xlu1 %5280, %v5191_v50   ;;  %v5783_v62 = vld [vmem:[%s11708_s0 + $0x3a0] sm:$0xff] }
 0x4da   :  { %v4378_v39 = vpop.permute.xlu0 %4377  ;;  %v4480_v31 = vadd.f32 %v4223_v29, %v3688_v40  ;;  %v3704_v50 = vmul.f32 %v5783_v62, %v9945_v20  ;;  %v5784_v40 = vld [vmem:[%s11708_s0 + $0x3b0] sm:$0xff]  ;;  %v5796_v62 = vld [vmem:[%s11709_s1 + $0x20] sm:$0xff] }
 0x4db   :  { %v4511_v60 = vadd.f32 %v4378_v39, %v3719_v48  ;;  %v3706_v43 = vmul.f32 %v5784_v40, %v9965_v7 }
 0x4dc   :  { %4612 = vst.msk [vmem:[%s11714_s6 + $0x320] sm:$0xff] %vm155_vm0, %v4480_v31  ;;  %v5786_v31 = vld [vmem:[%s11708_s0 + $0x3c0] sm:$0xff] }
 0x4dd   :  { %4643 = vst.msk [vmem:[%s11714_s6 + $0x418] sm:$0xff] %vm155_vm0, %v4511_v60  ;;  %v4233_v23 = vpop.permute.xlu1 %4232  ;;  %5249 = vperm.xlu1 %5280, %v5193_v17   ;;  %v3708_v7 = vmul.f32 %v5786_v31, %v9985_v32  ;;  %v5798_v31 = vld [vmem:[%s11711_s3] sm:$0xff] }
 0x4de   :  { %v11451_v9 = vpop.permute.xlu0 %4778  ;;  %v4482_v51 = vadd.f32 %v4233_v23, %v3690_v25  ;;  %v13066_v25 = vld [vmem:[#allocation222_spill] sm:$0xff] }
 0x4df   :  { %v3710_v32 = vmul.f32 %v5787_v22, %v13066_v25  ;;  %v5799_v25 = vld [vmem:[%s11711_s3 + $0x10] sm:$0xff] }
 0x4e0   :  { %4614 = vst.msk [vmem:[%s11714_s6 + $0x330] sm:$0xff] %vm155_vm0, %v4482_v51 }
 0x4e1   :  { %v4243_v37 = vpop.permute.xlu1 %4242  ;;  %5259 = vperm.xlu1 %5280, %v5195_v46   ;;  %v5788_v46 = vld [vmem:[%s11708_s0 + $0x3e0] sm:$0xff] }
 0x4e2   :  { %v4794_v30 = vpop.permute.xlu0 %4793  ;;  %v4484_v21 = vadd.f32 %v4243_v37, %v3692_v2  ;;  %v3712_v2 = vmul.f32 %v5788_v46, %v13067_v36  ;;  %v5800_v46 = vld [vmem:[%s11711_s3 + $0x20] sm:$0xff] }
 0x4e3   :  { %v4809_v0 = vmul.f32 %v5779_v19, %v4794_v30 }
 0x4e4   :  { %4616 = vst.msk [vmem:[%s11714_s6 + $0x340] sm:$0xff] %vm155_vm0, %v4484_v21 }
 0x4e5   :  { %v4253_v47 = vpop.permute.xlu1 %4252 }
 0x4e6   :  { %v4804_v3 = vpop.permute.xlu0 %4803  ;;  %v4486_v16 = vadd.f32 %v4253_v47, %v3694_v6  ;;  %v13068_v6 = vld [vmem:[#allocation224_spill] sm:$0xff] }
 0x4e7   :  { %v4811_v58 = vmul.f32 %v5781_v1, %v4804_v3  ;;  %v3714_v47 = vmul.f32 %v5789_v15, %v13068_v6  ;;  %v5790_v3 = vld [vmem:[%s11710_s2 + $0x10] sm:$0xff]  ;;  %v5793_v1 = vld [vmem:[%s11709_s1 + $0x8] sm:$0xff] }
 0x4e8   :  { %4618 = vst.msk [vmem:[%s11714_s6 + $0x350] sm:$0xff] %vm155_vm0, %v4486_v16 }
 0x4e9   :  { %v4263_v63 = vpop.permute.xlu1 %4262 }
 0x4ea   :  { %v11477_v10 = vpop.permute.xlu0 %4819  ;;  %v4488_v44 = vadd.f32 %v4263_v63, %v3696_v61 }
 0x4ec   :  { %4620 = vst.msk [vmem:[%s11714_s6 + $0x360] sm:$0xff] %vm155_vm0, %v4488_v44 }
 0x4ed   :  { %v4273_v52 = vpop.permute.xlu1 %4272 }
 0x4ee   :  { %v4830_v5 = vpop.permute.xlu0 %4829  ;;  %v4490_v38 = vadd.f32 %v4273_v52, %v3698_v53  ;;  %v3716_v53 = vmul.f32 %v5791_v54, %v13069_v4  ;;  %v5792_v52 = vld [vmem:[%s11708_s0 + $0x410] sm:$0xff] }
 0x4ef   :  { %v4845_v35 = vadd.f32 %v4830_v5, %v4809_v0  ;;  %v13070_v5 = vld [vmem:[#allocation70_spill] sm:$0xff] }
 0x4f0   :  { %4622 = vst.msk [vmem:[%s11714_s6 + $0x370] sm:$0xff] %vm155_vm0, %v4490_v38  ;;  %v3718_v38 = vmul.f32 %v5792_v52, %v13070_v5  ;;  %v5805_v5 = vld [vmem:[%s11711_s3 + $0x18] sm:$0xff] }
 0x4f1   :  { %4851 = vst.msk [vmem:[%s11714_s6 + $0x438] sm:$0xff] %vm155_vm0, %v4845_v35  ;;  %v4283_v12 = vpop.permute.xlu1 %4282 }
 0x4f2   :  { %v4840_v42 = vpop.permute.xlu0 %4839  ;;  %v4492_v14 = vadd.f32 %v4283_v12, %v3700_v33 }
 0x4f3   :  { %v4847_v18 = vadd.f32 %v4840_v42, %v4811_v58 }
 0x4f4   :  { %4624 = vst.msk [vmem:[%s11714_s6 + $0x380] sm:$0xff] %vm155_vm0, %v4492_v14 }
 0x4f5   :  { %4853 = vst.msk [vmem:[%s11714_s6 + $0x448] sm:$0xff] %vm155_vm0, %v4847_v18  ;;  %v4293_v49 = vpop.permute.xlu1 %4292  ;;  %v5794_v18 = vld [vmem:[%s11709_s1] sm:$0xff] }
 0x4f6   :  { %v4989_v28 = vpop.permute.xlu0 %4988  ;;  %v4494_v24 = vadd.f32 %v4293_v49, %v3702_v55  ;;  %v4806_v13 = vmul.f32 %v5794_v18, %v11451_v9  ;;  %v5795_v49 = vld [vmem:[%s11709_s1 + $0x10] sm:$0xff] }
 0x4f7   :  { %v5016_v48 = vmul.f32 %v5785_v26, %v4989_v28  ;;  %v5797_v26 = vld [vmem:[%s11710_s2 + $0x20] sm:$0xff] }
 0x4f8   :  { %4626 = vst.msk [vmem:[%s11714_s6 + $0x390] sm:$0xff] %vm155_vm0, %v4494_v24 }
 0x4f9   :  { %v4303_v27 = vpop.permute.xlu1 %4302 }
 0x4fa   :  { %v4999_v8 = vpop.permute.xlu0 %4998  ;;  %v4496_v56 = vadd.f32 %v4303_v27, %v3704_v50 }
 0x4fb   :  { %v5018_v16 = vmul.f32 %v5790_v3, %v4999_v8  ;;  %v5802_v3 = vld [vmem:[%s11710_s2 + $0x18] sm:$0xff] }
 0x4fc   :  { %4628 = vst.msk [vmem:[%s11714_s6 + $0x3a0] sm:$0xff] %vm155_vm0, %v4496_v56 }
 0x4fd   :  { %v4313_v20 = vpop.permute.xlu1 %4312 }
 0x4fe   :  { %v5025_v45 = vpop.permute.xlu0 %5024  ;;  %v4498_v29 = vadd.f32 %v4313_v20, %v3706_v43 }
 0x4ff   :  { %v5052_v39 = vadd.f32 %v5025_v45, %v5016_v48 }
 0x500   :  { %4630 = vst.msk [vmem:[%s11714_s6 + $0x3b0] sm:$0xff] %vm155_vm0, %v4498_v29 }
 0x501   :  { %5058 = vst.msk [vmem:[%s11714_s6 + $0x450] sm:$0xff] %vm155_vm0, %v5052_v39  ;;  %v4323_v60 = vpop.permute.xlu1 %4322 }
 0x502   :  { %v11548_v17 = vpop.permute.xlu0 %5203  ;;  %v4500_v34 = vadd.f32 %v4323_v60, %v3708_v7 }
 0x504   :  { %4632 = vst.msk [vmem:[%s11714_s6 + $0x3c0] sm:$0xff] %vm155_vm0, %v4500_v34 }
 0x505   :  { %v4333_v41 = vpop.permute.xlu1 %4332 }
 0x506   :  { %v11558_v23 = vpop.permute.xlu0 %5213  ;;  %v4502_v51 = vadd.f32 %v4333_v41, %v3710_v32 }
 0x508   :  { %4634 = vst.msk [vmem:[%s11714_s6 + $0x3d0] sm:$0xff] %vm155_vm0, %v4502_v51 }
 0x509   :  { %v4343_v37 = vpop.permute.xlu1 %4342 }
 0x50a   :  { %v11568_v30 = vpop.permute.xlu0 %5223  ;;  %v4504_v21 = vadd.f32 %v4343_v37, %v3712_v2  ;;  %v5801_v37 = vld [vmem:[%s11710_s2 + $0x8] sm:$0xff] }
 0x50c   :  { %4636 = vst.msk [vmem:[%s11714_s6 + $0x3e0] sm:$0xff] %vm155_vm0, %v4504_v21 }
 0x50d   :  { %v4353_v57 = vpop.permute.xlu1 %4352 }
 0x50e   :  { %v5035_v61 = vpop.permute.xlu0 %5034  ;;  %v4506_v63 = vadd.f32 %v4353_v57, %v3714_v47 }
 0x50f   :  { %v5054_v44 = vadd.f32 %v5035_v61, %v5018_v16 }
 0x510   :  { %4638 = vst.msk [vmem:[%s11714_s6 + $0x3f0] sm:$0xff] %vm155_vm0, %v4506_v63  ;;  %v5803_v63 = vld [vmem:[%s11710_s2 + $0x28] sm:$0xff] }
 0x511   :  { %5060 = vst.msk [vmem:[%s11714_s6 + $0x460] sm:$0xff] %vm155_vm0, %v5054_v44  ;;  %v4363_v19 = vpop.permute.xlu1 %4362 }
 0x512   :  { %v4508_v0 = vadd.f32 %v4363_v19, %v3716_v53  ;;  %v5045_v40 = vpop.permute.xlu0 %5044  ;;  %v5804_v53 = vld [vmem:[%s11711_s3 + $0x8] sm:$0xff] }
 0x513   :  { %v5227_v19 = vmul.f32 %v5804_v53, %v11548_v17 }
 0x514   :  { %4640 = vst.msk [vmem:[%s11714_s6 + $0x400] sm:$0xff] %vm155_vm0, %v4508_v0 }
 0x515   :  { %v4373_v35 = vpop.permute.xlu1 %4372 }
 0x516   :  { %v4510_v11 = vadd.f32 %v4373_v35, %v3718_v38  ;;  %v5235_v29 = vpop.permute.xlu0 %5234  ;;  %v5229_v38 = vmul.f32 %v5805_v5, %v11558_v23 }
 0x518   :  { %4642 = vst.msk [vmem:[%s11714_s6 + $0x410] sm:$0xff] %vm155_vm0, %v4510_v11  ;;  %v5806_v11 = vld [vmem:[%s11711_s3 + $0x28] sm:$0xff] }
 0x519   :  { %v4784_v33 = vpop.permute.xlu1 %4783 }
 0x51a   :  { %v4807_v58 = vmul.f32 %v5793_v1, %v4784_v33  ;;  %v5245_v34 = vpop.permute.xlu0 %5244  ;;  %v5231_v33 = vmul.f32 %v5806_v11, %v11568_v30 }
 0x51c   :  { %v4843_v12 = vadd.f32 %v11477_v10, %v4807_v58 }
 0x51d   :  { %v4789_v42 = vpop.permute.xlu1 %4788 }
 0x51e   :  { %4849 = vst.msk [vmem:[%s11714_s6 + $0x428] sm:$0xff] %vm155_vm0, %v4843_v12  ;;  %v4808_v10 = vmul.f32 %v5795_v49, %v4789_v42  ;;  %v5255_v2 = vpop.permute.xlu0 %5254 }
 0x521   :  { %v4799_v14 = vpop.permute.xlu1 %4798 }
 0x522   :  { %v4810_v50 = vmul.f32 %v5796_v62, %v4799_v14 }
 0x525   :  { %v4815_v59 = vpop.permute.xlu1 %4814 }
 0x526   :  { %v4842_v55 = vadd.f32 %v4815_v59, %v4806_v13 }
 0x528   :  { %4848 = vst.msk [vmem:[%s11714_s6 + $0x420] sm:$0xff] %vm155_vm0, %v4842_v55 }
 0x529   :  { %v4825_v28 = vpop.permute.xlu1 %4824 }
 0x52a   :  { %v4844_v24 = vadd.f32 %v4825_v28, %v4808_v10 }
 0x52c   :  { %4850 = vst.msk [vmem:[%s11714_s6 + $0x430] sm:$0xff] %vm155_vm0, %v4844_v24 }
 0x52d   :  { %v4835_v9 = vpop.permute.xlu1 %4834 }
 0x52e   :  { %v4846_v27 = vadd.f32 %v4835_v9, %v4810_v50 }
 0x530   :  { %4852 = vst.msk [vmem:[%s11714_s6 + $0x440] sm:$0xff] %vm155_vm0, %v4846_v27 }
 0x531   :  { %v4994_v8 = vpop.permute.xlu1 %4993 }
 0x532   :  { %v5017_v21 = vmul.f32 %v5801_v37, %v4994_v8 }
 0x535   :  { %v5004_v56 = vpop.permute.xlu1 %5003 }
 0x536   :  { %v5019_v16 = vmul.f32 %v5802_v3, %v5004_v56 }
 0x539   :  { %v5009_v43 = vpop.permute.xlu1 %5008 }
 0x53a   :  { %v5020_v48 = vmul.f32 %v5797_v26, %v5009_v43 }
 0x53c   :  { %v5056_v20 = vadd.f32 %v5045_v40, %v5020_v48 }
 0x53d   :  { %v5014_v45 = vpop.permute.xlu1 %5013 }
 0x53e   :  { %5062 = vst.msk [vmem:[%s11714_s6 + $0x470] sm:$0xff] %vm155_vm0, %v5056_v20  ;;  %v5021_v44 = vmul.f32 %v5803_v63, %v5014_v45 }
 0x541   :  { %v5199_v39 = vpop.permute.xlu1 %5198 }
 0x542   :  { %v5226_v7 = vmul.f32 %v5798_v31, %v5199_v39 }
 0x544   :  { %v5262_v60 = vadd.f32 %v5235_v29, %v5226_v7 }
 0x545   :  { %v5209_v22 = vpop.permute.xlu1 %5208 }
 0x546   :  { %5268 = vst.msk [vmem:[%s11714_s6 + $0x480] sm:$0xff] %vm155_vm0, %v5262_v60  ;;  %v5228_v32 = vmul.f32 %v5799_v25, %v5209_v22 }
 0x548   :  { %v5264_v41 = vadd.f32 %v5245_v34, %v5228_v32 }
 0x549   :  { %v5219_v51 = vpop.permute.xlu1 %5218 }
 0x54a   :  { %5270 = vst.msk [vmem:[%s11714_s6 + $0x490] sm:$0xff] %vm155_vm0, %v5264_v41  ;;  %v5230_v36 = vmul.f32 %v5800_v46, %v5219_v51 }
 0x54c   :  { %v5266_v15 = vadd.f32 %v5255_v2, %v5230_v36 }
 0x54d   :  { %v5030_v6 = vpop.permute.xlu1 %5029 }
 0x54e   :  { %5272 = vst.msk [vmem:[%s11714_s6 + $0x4a0] sm:$0xff] %vm155_vm0, %v5266_v15  ;;  %v5053_v47 = vadd.f32 %v5030_v6, %v5017_v21 }
 0x550   :  { %5059 = vst.msk [vmem:[%s11714_s6 + $0x458] sm:$0xff] %vm155_vm0, %v5053_v47 }
 0x551   :  { %v5040_v57 = vpop.permute.xlu1 %5039 }
 0x552   :  { %v5055_v61 = vadd.f32 %v5040_v57, %v5019_v16 }
 0x554   :  { %5061 = vst.msk [vmem:[%s11714_s6 + $0x468] sm:$0xff] %vm155_vm0, %v5055_v61 }
 0x555   :  { %v5050_v54 = vpop.permute.xlu1 %5049 }
 0x556   :  { %v5057_v4 = vadd.f32 %v5050_v54, %v5021_v44 }
 0x558   :  { %5063 = vst.msk [vmem:[%s11714_s6 + $0x478] sm:$0xff] %vm155_vm0, %v5057_v4 }
 0x559   :  { %v5240_v0 = vpop.permute.xlu1 %5239 }
 0x55a   :  { %v5263_v52 = vadd.f32 %v5240_v0, %v5227_v19 }
 0x55c   :  { %5269 = vst.msk [vmem:[%s11714_s6 + $0x488] sm:$0xff] %vm155_vm0, %v5263_v52 }
 0x55d   :  { %v5250_v35 = vpop.permute.xlu1 %5249 }
 0x55e   :  { %v5265_v17 = vadd.f32 %v5250_v35, %v5229_v38 }
 0x560   :  { %5271 = vst.msk [vmem:[%s11714_s6 + $0x498] sm:$0xff] %vm155_vm0, %v5265_v17 }
 0x561   :  { %v5260_v1 = vpop.permute.xlu1 %5259 }
 0x562   :  { %v5267_v23 = vadd.f32 %v5260_v1, %v5231_v33 }
 0x564   :  { %5273 = vst.msk [vmem:[%s11714_s6 + $0x4a8] sm:$0xff] %vm155_vm0, %v5267_v23 }

</bundles_post_ra>
